<compile_context>
chip_gen: v6e
topology: v6e:2x2x1
jax: 0.10.0
libtpu: 0.0.40
codegen_flags: <defaults>
</compile_context>

<pallas_src>
import jax
import jax.numpy as jnp
from jax import lax
from jax.experimental import pallas as pl
from jax.experimental.pallas import tpu as pltpu

INPUT = 156    # LSTM input_size and fc2 out_features (num_nodes)
HIDDEN = 256   # LSTM hidden_size
FC1 = 64       # fc1 out_features (logical)
FC1_PAD = 128  # fc1 out_features padded to a full lane group (exact, zeros)


def _make_kernel(B, T):
    def kernel(x_ref, wih_ref, b_ref,                      # auto-DMA'd VMEM inputs
               whh_hbm, fc1w_hbm, fc1b_hbm, fc2w_hbm, fc2b_hbm,  # raw HBM refs
               out_ref,
               gx_ref, whh_vmem, fc1w_vmem, fc1b_vmem, fc2w_vmem, fc2b_vmem,
               dma_sem):
        # ---- kick off weight DMAs so they overlap the input projection ----
        cp_whh = pltpu.make_async_copy(whh_hbm, whh_vmem, dma_sem.at[0])
        cp_fc1w = pltpu.make_async_copy(fc1w_hbm, fc1w_vmem, dma_sem.at[1])
        cp_fc1b = pltpu.make_async_copy(fc1b_hbm, fc1b_vmem, dma_sem.at[2])
        cp_fc2w = pltpu.make_async_copy(fc2w_hbm, fc2w_vmem, dma_sem.at[3])
        cp_fc2b = pltpu.make_async_copy(fc2b_hbm, fc2b_vmem, dma_sem.at[4])
        cp_whh.start()
        cp_fc1w.start()
        cp_fc1b.start()
        cp_fc2w.start()
        cp_fc2b.start()

        # ---- hoisted input projection: one (T*B, I) @ (I, 4H) MXU pass ----
        # Bias broadcast folded in here once (not re-broadcast per timestep).
        gx = (jnp.dot(x_ref[...], wih_ref[...],
                      preferred_element_type=jnp.float32)
              + b_ref[...])                                     # (T*B, 4H)

        # Park per-timestep pre-activations in scratch: bounds the live range
        # of the 64 KB gx value and gives tile-clean (B, 4H) reads per step.
        for t in range(T):
            gx_ref[t] = gx[t * B:(t + 1) * B, :]

        h = jnp.zeros((B, HIDDEN), jnp.float32)
        c = jnp.zeros((B, HIDDEN), jnp.float32)

        # W_hh must be resident before the first recurrent matmul.
        cp_whh.wait()

        # ---- fully-unrolled recurrence (T is small and static) ----
        # Only h @ W_hh sits on the serial dependency chain.  Kept at default
        # f32 dot precision: the bf16-operand variant risks breaking the 1e-4
        # tolerance (see header comment).
        for t in range(T):
            gates = gx_ref[t] + jnp.dot(
                h, whh_vmem[...], preferred_element_type=jnp.float32)
            # PyTorch gate order: i, f, g, o — fuse sigmoid over contiguous i|f.
            if_act = jax.nn.sigmoid(gates[:, :2 * HIDDEN])
            i_g = if_act[:, :HIDDEN]
            f_g = if_act[:, HIDDEN:]
            g_g = jnp.tanh(gates[:, 2 * HIDDEN:3 * HIDDEN])
            o_g = jax.nn.sigmoid(gates[:, 3 * HIDDEN:])
            c = f_g * c + i_g * g_g
            h = o_g * jnp.tanh(c)

        # ---- MLP head on the last hidden state ----
        cp_fc1w.wait()
        cp_fc1b.wait()
        cp_fc2w.wait()
        cp_fc2b.wait()
        z1 = jnp.maximum(
            jnp.dot(h, fc1w_vmem[...], preferred_element_type=jnp.float32)
            + fc1b_vmem[...], 0.0)                               # (B, FC1_PAD)
        z2 = (jnp.dot(z1, fc2w_vmem[...], preferred_element_type=jnp.float32)
              + fc2b_vmem[...])                                  # (B, INPUT)
        out_ref[...] = jnp.tanh(z2)

    return kernel


def model_forward(x, params):
    """x: (B, T, INPUT) float32 -> (B, INPUT) float32."""
    w_ih, w_hh, b, fc1w, fc1b, fc2w, fc2b = params
    B, T, I = x.shape
    # Time-major then flatten so timestep t occupies rows [t*B, (t+1)*B) and
    # the kernel can do the input projection for all timesteps in one matmul.
    x_tm = jnp.transpose(x, (1, 0, 2)).reshape(T * B, I)

    # Exact zero-padding of the fc1/fc2 pair so z1 is a full 128-lane vreg.
    fc1w_p = jnp.pad(fc1w, ((0, 0), (0, FC1_PAD - FC1)))
    fc1b_p = jnp.pad(fc1b, ((0, 0), (0, FC1_PAD - FC1)))
    fc2w_p = jnp.pad(fc2w, ((0, FC1_PAD - FC1), (0, 0)))

    vmem = pl.BlockSpec(memory_space=pltpu.MemorySpace.VMEM)
    hbm = pl.BlockSpec(memory_space=pl.ANY)   # raw ref, manual DMA in-kernel

    # TODO(synk): for a steady-state inference loop with fixed weights, hoist
    # the weight DMA across calls (cross-call prefetch / larger batches) so
    # the ~1.8 MB reload is amortized.
    return pl.pallas_call(
        _make_kernel(B, T),
        out_shape=jax.ShapeDtypeStruct((B, INPUT), jnp.float32),
        # No grid: single invocation; x / W_ih / b are whole-array auto-DMA'd
        # VMEM blocks, everything else is manually copied so it overlaps with
        # the gx projection.
        in_specs=[vmem, vmem, vmem, hbm, hbm, hbm, hbm, hbm],
        out_specs=vmem,
        scratch_shapes=[
            pltpu.VMEM((T, B, 4 * HIDDEN), jnp.float32),   # gx per-timestep
            pltpu.VMEM((HIDDEN, 4 * HIDDEN), jnp.float32), # W_hh
            pltpu.VMEM((HIDDEN, FC1_PAD), jnp.float32),    # fc1 weight (padded)
            pltpu.VMEM((1, FC1_PAD), jnp.float32),         # fc1 bias (padded)
            pltpu.VMEM((FC1_PAD, INPUT), jnp.float32),     # fc2 weight (padded K)
            pltpu.VMEM((1, INPUT), jnp.float32),           # fc2 bias
            pltpu.SemaphoreType.DMA((5,)),
        ],
    )(x_tm, w_ih, b, w_hh, fc1w_p, fc1b_p, fc2w_p, fc2b)


def ref_forward(x, params):
    """Pure-JAX reference of the PyTorch Model.forward."""
    w_ih, w_hh, b, fc1w, fc1b, fc2w, fc2b = params
    B, T, I = x.shape

    def step(carry, x_t):
        h, c = carry
        gates = x_t @ w_ih + h @ w_hh + b
        i_g = jax.nn.sigmoid(gates[:, 0 * HIDDEN:1 * HIDDEN])
        f_g = jax.nn.sigmoid(gates[:, 1 * HIDDEN:2 * HIDDEN])
        g_g = jnp.tanh(gates[:, 2 * HIDDEN:3 * HIDDEN])
        o_g = jax.nn.sigmoid(gates[:, 3 * HIDDEN:4 * HIDDEN])
        c = f_g * c + i_g * g_g
        h = o_g * jnp.tanh(c)
        return (h, c), None

    h0 = jnp.zeros((B, HIDDEN), jnp.float32)
    c0 = jnp.zeros((B, HIDDEN), jnp.float32)
    (h, _), _ = lax.scan(step, (h0, c0), jnp.transpose(x, (1, 0, 2)))
    z = jnp.maximum(h @ fc1w + fc1b, 0.0)
    return jnp.tanh(z @ fc2w + fc2b)


def init_params(key):
    """Deterministic param init mirroring the PyTorch module's shapes."""
    ks = jax.random.split(key, 8)
    s_lstm = 1.0 / jnp.sqrt(HIDDEN)
    s_fc1 = 1.0 / jnp.sqrt(HIDDEN)
    s_fc2 = 1.0 / jnp.sqrt(FC1)
    # PyTorch stores weight_ih_l0 as (4H, I); we keep the transposed (I, 4H).
    w_ih = jax.random.uniform(ks[0], (INPUT, 4 * HIDDEN), jnp.float32, -s_lstm, s_lstm)
    w_hh = jax.random.uniform(ks[1], (HIDDEN, 4 * HIDDEN), jnp.float32, -s_lstm, s_lstm)
    b_ih = jax.random.uniform(ks[2], (1, 4 * HIDDEN), jnp.float32, -s_lstm, s_lstm)
    b_hh = jax.random.uniform(ks[3], (1, 4 * HIDDEN), jnp.float32, -s_lstm, s_lstm)
    b = b_ih + b_hh
    fc1w = jax.random.uniform(ks[4], (HIDDEN, FC1), jnp.float32, -s_fc1, s_fc1)
    fc1b = jax.random.uniform(ks[5], (1, FC1), jnp.float32, -s_fc1, s_fc1)
    fc2w = jax.random.uniform(ks[6], (FC1, INPUT), jnp.float32, -s_fc2, s_fc2)
    fc2b = jax.random.uniform(ks[7], (1, INPUT), jnp.float32, -s_fc2, s_fc2)
    return (w_ih, w_hh, b, fc1w, fc1b, fc2w, fc2b)


if __name__ == "__main__":
    key = jax.random.PRNGKey(0)
    k_x, k_p = jax.random.split(key)

    B, T = 2, 8
    x = jax.random.normal(k_x, (B, T, INPUT), jnp.float32)
    params = init_params(k_p)

    out = jax.block_until_ready(model_forward(x, params))
    ref = ref_forward(x, params)

    assert out.shape == (B, INPUT)
    assert jnp.allclose(out, ref, atol=1e-4, rtol=1e-4), "mismatch vs reference"

    print("KERNEL_OK")
</pallas_src>

<mosaic_0001>
module attributes {stable_mosaic.version = 11 : i64} {
  func.func @kernel(%arg0: memref<16x156xf32, #tpu.memory_space<vmem>>, %arg1: memref<156x1024xf32, #tpu.memory_space<vmem>>, %arg2: memref<1x1024xf32, #tpu.memory_space<vmem>>, %arg3: memref<256x1024xf32, #tpu.memory_space<any>>, %arg4: memref<256x128xf32, #tpu.memory_space<any>>, %arg5: memref<1x128xf32, #tpu.memory_space<any>>, %arg6: memref<128x156xf32, #tpu.memory_space<any>>, %arg7: memref<1x156xf32, #tpu.memory_space<any>>, %arg8: memref<2x156xf32, #tpu.memory_space<vmem>>, %arg9: memref<8x2x1024xf32, #tpu.memory_space<vmem>>, %arg10: memref<256x1024xf32, #tpu.memory_space<vmem>>, %arg11: memref<256x128xf32, #tpu.memory_space<vmem>>, %arg12: memref<1x128xf32, #tpu.memory_space<vmem>>, %arg13: memref<128x156xf32, #tpu.memory_space<vmem>>, %arg14: memref<1x156xf32, #tpu.memory_space<vmem>>, %arg15: memref<5x!tpu.dma_semaphore, #tpu.memory_space<semaphore_mem>>) attributes {dimension_semantics = [], scalar_prefetch = 0 : i64, scratch_operands = 7 : i64, tpu.core_type = #tpu.core_type<tc>} {
    %c0_i32 = arith.constant 0 : i32
    %0 = tpu.memref_slice %arg15[%c0_i32] : memref<5x!tpu.dma_semaphore, #tpu.memory_space<semaphore_mem>> -> memref<1x!tpu.dma_semaphore, #tpu.memory_space<semaphore_mem>>
    %1 = tpu.memref_squeeze %0 : memref<1x!tpu.dma_semaphore, #tpu.memory_space<semaphore_mem>> -> memref<!tpu.dma_semaphore, #tpu.memory_space<semaphore_mem>>
    tpu.enqueue_dma source(%arg3 : memref<256x1024xf32, #tpu.memory_space<any>>) target(%arg10 : memref<256x1024xf32, #tpu.memory_space<vmem>>) target_semaphore(%1 : memref<!tpu.dma_semaphore, #tpu.memory_space<semaphore_mem>>)
    %c1_i32 = arith.constant 1 : i32
    %2 = tpu.memref_slice %arg15[%c1_i32] : memref<5x!tpu.dma_semaphore, #tpu.memory_space<semaphore_mem>> -> memref<1x!tpu.dma_semaphore, #tpu.memory_space<semaphore_mem>>
    %3 = tpu.memref_squeeze %2 : memref<1x!tpu.dma_semaphore, #tpu.memory_space<semaphore_mem>> -> memref<!tpu.dma_semaphore, #tpu.memory_space<semaphore_mem>>
    tpu.enqueue_dma source(%arg4 : memref<256x128xf32, #tpu.memory_space<any>>) target(%arg11 : memref<256x128xf32, #tpu.memory_space<vmem>>) target_semaphore(%3 : memref<!tpu.dma_semaphore, #tpu.memory_space<semaphore_mem>>)
    %c2_i32 = arith.constant 2 : i32
    %4 = tpu.memref_slice %arg15[%c2_i32] : memref<5x!tpu.dma_semaphore, #tpu.memory_space<semaphore_mem>> -> memref<1x!tpu.dma_semaphore, #tpu.memory_space<semaphore_mem>>
    %5 = tpu.memref_squeeze %4 : memref<1x!tpu.dma_semaphore, #tpu.memory_space<semaphore_mem>> -> memref<!tpu.dma_semaphore, #tpu.memory_space<semaphore_mem>>
    tpu.enqueue_dma source(%arg5 : memref<1x128xf32, #tpu.memory_space<any>>) target(%arg12 : memref<1x128xf32, #tpu.memory_space<vmem>>) target_semaphore(%5 : memref<!tpu.dma_semaphore, #tpu.memory_space<semaphore_mem>>)
    %c3_i32 = arith.constant 3 : i32
    %6 = tpu.memref_slice %arg15[%c3_i32] : memref<5x!tpu.dma_semaphore, #tpu.memory_space<semaphore_mem>> -> memref<1x!tpu.dma_semaphore, #tpu.memory_space<semaphore_mem>>
    %7 = tpu.memref_squeeze %6 : memref<1x!tpu.dma_semaphore, #tpu.memory_space<semaphore_mem>> -> memref<!tpu.dma_semaphore, #tpu.memory_space<semaphore_mem>>
    tpu.enqueue_dma source(%arg6 : memref<128x156xf32, #tpu.memory_space<any>>) target(%arg13 : memref<128x156xf32, #tpu.memory_space<vmem>>) target_semaphore(%7 : memref<!tpu.dma_semaphore, #tpu.memory_space<semaphore_mem>>)
    %c4_i32 = arith.constant 4 : i32
    %8 = tpu.memref_slice %arg15[%c4_i32] : memref<5x!tpu.dma_semaphore, #tpu.memory_space<semaphore_mem>> -> memref<1x!tpu.dma_semaphore, #tpu.memory_space<semaphore_mem>>
    %9 = tpu.memref_squeeze %8 : memref<1x!tpu.dma_semaphore, #tpu.memory_space<semaphore_mem>> -> memref<!tpu.dma_semaphore, #tpu.memory_space<semaphore_mem>>
    tpu.enqueue_dma source(%arg7 : memref<1x156xf32, #tpu.memory_space<any>>) target(%arg14 : memref<1x156xf32, #tpu.memory_space<vmem>>) target_semaphore(%9 : memref<!tpu.dma_semaphore, #tpu.memory_space<semaphore_mem>>)
    %c0 = arith.constant 0 : index
    %c0_0 = arith.constant 0 : index
    %10 = vector.load %arg0[%c0, %c0_0] : memref<16x156xf32, #tpu.memory_space<vmem>>, vector<16x156xf32>
    %c0_1 = arith.constant 0 : index
    %c0_2 = arith.constant 0 : index
    %11 = vector.load %arg1[%c0_1, %c0_2] : memref<156x1024xf32, #tpu.memory_space<vmem>>, vector<156x1024xf32>
    %cst = arith.constant dense<0.000000e+00> : vector<16x1024xf32>
    %12 = tpu.matmul %10, %11, %cst {dimension_numbers = #tpu.dot_dimension_numbers<[1], [0], [0], [1], [0, 0, 1, 1], [], []>} : vector<16x156xf32>, vector<156x1024xf32>, vector<16x1024xf32> -> vector<16x1024xf32>
    %c0_3 = arith.constant 0 : index
    %c0_4 = arith.constant 0 : index
    %13 = vector.load %arg2[%c0_3, %c0_4] : memref<1x1024xf32, #tpu.memory_space<vmem>>, vector<1x1024xf32>
    %14 = vector.broadcast %13 : vector<1x1024xf32> to vector<16x1024xf32>
    %15 = arith.addf %12, %14 : vector<16x1024xf32>
    %16 = vector.extract_strided_slice %15 {offsets = [0, 0], sizes = [2, 1024], strides = [1, 1]} : vector<16x1024xf32> to vector<2x1024xf32>
    %c0_5 = arith.constant 0 : index
    %c0_6 = arith.constant 0 : index
    %c0_7 = arith.constant 0 : index
    %17 = vector.load %arg9[%c0_5, %c0_6, %c0_7] : memref<8x2x1024xf32, #tpu.memory_space<vmem>>, vector<1x2x1024xf32>
    %18 = vector.shape_cast %17 : vector<1x2x1024xf32> to vector<2x1024xf32>
    %19 = vector.shape_cast %16 : vector<2x1024xf32> to vector<1x2x1024xf32>
    tpu.vector_store %arg9[%c0_5, %c0_6, %c0_7], %19 {strides = array<i32>} : memref<8x2x1024xf32, #tpu.memory_space<vmem>>, vector<1x2x1024xf32>,
    %20 = vector.extract_strided_slice %15 {offsets = [2, 0], sizes = [2, 1024], strides = [1, 1]} : vector<16x1024xf32> to vector<2x1024xf32>
    %c1 = arith.constant 1 : index
    %c0_8 = arith.constant 0 : index
    %c0_9 = arith.constant 0 : index
    %21 = vector.load %arg9[%c1, %c0_8, %c0_9] : memref<8x2x1024xf32, #tpu.memory_space<vmem>>, vector<1x2x1024xf32>
    %22 = vector.shape_cast %21 : vector<1x2x1024xf32> to vector<2x1024xf32>
    %23 = vector.shape_cast %20 : vector<2x1024xf32> to vector<1x2x1024xf32>
    tpu.vector_store %arg9[%c1, %c0_8, %c0_9], %23 {strides = array<i32>} : memref<8x2x1024xf32, #tpu.memory_space<vmem>>, vector<1x2x1024xf32>,
    %24 = vector.extract_strided_slice %15 {offsets = [4, 0], sizes = [2, 1024], strides = [1, 1]} : vector<16x1024xf32> to vector<2x1024xf32>
    %c2 = arith.constant 2 : index
    %c0_10 = arith.constant 0 : index
    %c0_11 = arith.constant 0 : index
    %25 = vector.load %arg9[%c2, %c0_10, %c0_11] : memref<8x2x1024xf32, #tpu.memory_space<vmem>>, vector<1x2x1024xf32>
    %26 = vector.shape_cast %25 : vector<1x2x1024xf32> to vector<2x1024xf32>
    %27 = vector.shape_cast %24 : vector<2x1024xf32> to vector<1x2x1024xf32>
    tpu.vector_store %arg9[%c2, %c0_10, %c0_11], %27 {strides = array<i32>} : memref<8x2x1024xf32, #tpu.memory_space<vmem>>, vector<1x2x1024xf32>,
    %28 = vector.extract_strided_slice %15 {offsets = [6, 0], sizes = [2, 1024], strides = [1, 1]} : vector<16x1024xf32> to vector<2x1024xf32>
    %c3 = arith.constant 3 : index
    %c0_12 = arith.constant 0 : index
    %c0_13 = arith.constant 0 : index
    %29 = vector.load %arg9[%c3, %c0_12, %c0_13] : memref<8x2x1024xf32, #tpu.memory_space<vmem>>, vector<1x2x1024xf32>
    %30 = vector.shape_cast %29 : vector<1x2x1024xf32> to vector<2x1024xf32>
    %31 = vector.shape_cast %28 : vector<2x1024xf32> to vector<1x2x1024xf32>
    tpu.vector_store %arg9[%c3, %c0_12, %c0_13], %31 {strides = array<i32>} : memref<8x2x1024xf32, #tpu.memory_space<vmem>>, vector<1x2x1024xf32>,
    %32 = vector.extract_strided_slice %15 {offsets = [8, 0], sizes = [2, 1024], strides = [1, 1]} : vector<16x1024xf32> to vector<2x1024xf32>
    %c4 = arith.constant 4 : index
    %c0_14 = arith.constant 0 : index
    %c0_15 = arith.constant 0 : index
    %33 = vector.load %arg9[%c4, %c0_14, %c0_15] : memref<8x2x1024xf32, #tpu.memory_space<vmem>>, vector<1x2x1024xf32>
    %34 = vector.shape_cast %33 : vector<1x2x1024xf32> to vector<2x1024xf32>
    %35 = vector.shape_cast %32 : vector<2x1024xf32> to vector<1x2x1024xf32>
    tpu.vector_store %arg9[%c4, %c0_14, %c0_15], %35 {strides = array<i32>} : memref<8x2x1024xf32, #tpu.memory_space<vmem>>, vector<1x2x1024xf32>,
    %36 = vector.extract_strided_slice %15 {offsets = [10, 0], sizes = [2, 1024], strides = [1, 1]} : vector<16x1024xf32> to vector<2x1024xf32>
    %c5 = arith.constant 5 : index
    %c0_16 = arith.constant 0 : index
    %c0_17 = arith.constant 0 : index
    %37 = vector.load %arg9[%c5, %c0_16, %c0_17] : memref<8x2x1024xf32, #tpu.memory_space<vmem>>, vector<1x2x1024xf32>
    %38 = vector.shape_cast %37 : vector<1x2x1024xf32> to vector<2x1024xf32>
    %39 = vector.shape_cast %36 : vector<2x1024xf32> to vector<1x2x1024xf32>
    tpu.vector_store %arg9[%c5, %c0_16, %c0_17], %39 {strides = array<i32>} : memref<8x2x1024xf32, #tpu.memory_space<vmem>>, vector<1x2x1024xf32>,
    %40 = vector.extract_strided_slice %15 {offsets = [12, 0], sizes = [2, 1024], strides = [1, 1]} : vector<16x1024xf32> to vector<2x1024xf32>
    %c6 = arith.constant 6 : index
    %c0_18 = arith.constant 0 : index
    %c0_19 = arith.constant 0 : index
    %41 = vector.load %arg9[%c6, %c0_18, %c0_19] : memref<8x2x1024xf32, #tpu.memory_space<vmem>>, vector<1x2x1024xf32>
    %42 = vector.shape_cast %41 : vector<1x2x1024xf32> to vector<2x1024xf32>
    %43 = vector.shape_cast %40 : vector<2x1024xf32> to vector<1x2x1024xf32>
    tpu.vector_store %arg9[%c6, %c0_18, %c0_19], %43 {strides = array<i32>} : memref<8x2x1024xf32, #tpu.memory_space<vmem>>, vector<1x2x1024xf32>,
    %44 = vector.extract_strided_slice %15 {offsets = [14, 0], sizes = [2, 1024], strides = [1, 1]} : vector<16x1024xf32> to vector<2x1024xf32>
    %c7 = arith.constant 7 : index
    %c0_20 = arith.constant 0 : index
    %c0_21 = arith.constant 0 : index
    %45 = vector.load %arg9[%c7, %c0_20, %c0_21] : memref<8x2x1024xf32, #tpu.memory_space<vmem>>, vector<1x2x1024xf32>
    %46 = vector.shape_cast %45 : vector<1x2x1024xf32> to vector<2x1024xf32>
    %47 = vector.shape_cast %44 : vector<2x1024xf32> to vector<1x2x1024xf32>
    tpu.vector_store %arg9[%c7, %c0_20, %c0_21], %47 {strides = array<i32>} : memref<8x2x1024xf32, #tpu.memory_space<vmem>>, vector<1x2x1024xf32>,
    %cst_22 = arith.constant 0.000000e+00 : f32
    %48 = vector.broadcast %cst_22 : f32 to vector<2x256xf32>
    %cst_23 = arith.constant 0.000000e+00 : f32
    %49 = vector.broadcast %cst_23 : f32 to vector<2x256xf32>
    %c0_i32_24 = arith.constant 0 : i32
    %50 = tpu.memref_slice %arg15[%c0_i32_24] : memref<5x!tpu.dma_semaphore, #tpu.memory_space<semaphore_mem>> -> memref<1x!tpu.dma_semaphore, #tpu.memory_space<semaphore_mem>>
    %51 = tpu.memref_squeeze %50 : memref<1x!tpu.dma_semaphore, #tpu.memory_space<semaphore_mem>> -> memref<!tpu.dma_semaphore, #tpu.memory_space<semaphore_mem>>
    tpu.wait_dma2 semaphore(%51 : memref<!tpu.dma_semaphore, #tpu.memory_space<semaphore_mem>>) src(%arg3 : memref<256x1024xf32, #tpu.memory_space<any>>) dst(%arg10 : memref<256x1024xf32, #tpu.memory_space<vmem>>)
    %c0_25 = arith.constant 0 : index
    %c0_26 = arith.constant 0 : index
    %c0_27 = arith.constant 0 : index
    %52 = vector.load %arg9[%c0_25, %c0_26, %c0_27] : memref<8x2x1024xf32, #tpu.memory_space<vmem>>, vector<1x2x1024xf32>
    %53 = vector.shape_cast %52 : vector<1x2x1024xf32> to vector<2x1024xf32>
    %c0_28 = arith.constant 0 : index
    %c0_29 = arith.constant 0 : index
    %54 = vector.load %arg10[%c0_28, %c0_29] : memref<256x1024xf32, #tpu.memory_space<vmem>>, vector<256x1024xf32>
    %cst_30 = arith.constant dense<0.000000e+00> : vector<2x1024xf32>
    %55 = tpu.matmul %48, %54, %cst_30 {dimension_numbers = #tpu.dot_dimension_numbers<[1], [0], [0], [1], [0, 0, 1, 1], [], []>} : vector<2x256xf32>, vector<256x1024xf32>, vector<2x1024xf32> -> vector<2x1024xf32>
    %56 = arith.addf %53, %55 : vector<2x1024xf32>
    %57 = vector.extract_strided_slice %56 {offsets = [0, 0], sizes = [2, 512], strides = [1, 1]} : vector<2x1024xf32> to vector<2x512xf32>
    %58 = arith.negf %57 : vector<2x512xf32>
    %59 = math.exp %58 : vector<2x512xf32>
    %cst_31 = arith.constant 1.000000e+00 : f32
    %60 = vector.broadcast %cst_31 : f32 to vector<2x512xf32>
    %61 = arith.addf %60, %59 : vector<2x512xf32>
    %62 = arith.divf %60, %61 : vector<2x512xf32>
    %63 = vector.extract_strided_slice %62 {offsets = [0, 0], sizes = [2, 256], strides = [1, 1]} : vector<2x512xf32> to vector<2x256xf32>
    %64 = vector.extract_strided_slice %62 {offsets = [0, 256], sizes = [2, 256], strides = [1, 1]} : vector<2x512xf32> to vector<2x256xf32>
    %65 = vector.extract_strided_slice %56 {offsets = [0, 512], sizes = [2, 256], strides = [1, 1]} : vector<2x1024xf32> to vector<2x256xf32>
    %66 = math.tanh %65 : vector<2x256xf32>
    %67 = vector.extract_strided_slice %56 {offsets = [0, 768], sizes = [2, 256], strides = [1, 1]} : vector<2x1024xf32> to vector<2x256xf32>
    %68 = arith.negf %67 : vector<2x256xf32>
    %69 = math.exp %68 : vector<2x256xf32>
    %cst_32 = arith.constant 1.000000e+00 : f32
    %70 = vector.broadcast %cst_32 : f32 to vector<2x256xf32>
    %71 = arith.addf %70, %69 : vector<2x256xf32>
    %72 = arith.divf %70, %71 : vector<2x256xf32>
    %73 = arith.mulf %64, %49 : vector<2x256xf32>
    %74 = arith.mulf %63, %66 : vector<2x256xf32>
    %75 = arith.addf %73, %74 : vector<2x256xf32>
    %76 = math.tanh %75 : vector<2x256xf32>
    %77 = arith.mulf %72, %76 : vector<2x256xf32>
    %c1_33 = arith.constant 1 : index
    %c0_34 = arith.constant 0 : index
    %c0_35 = arith.constant 0 : index
    %78 = vector.load %arg9[%c1_33, %c0_34, %c0_35] : memref<8x2x1024xf32, #tpu.memory_space<vmem>>, vector<1x2x1024xf32>
    %79 = vector.shape_cast %78 : vector<1x2x1024xf32> to vector<2x1024xf32>
    %c0_36 = arith.constant 0 : index
    %c0_37 = arith.constant 0 : index
    %80 = vector.load %arg10[%c0_36, %c0_37] : memref<256x1024xf32, #tpu.memory_space<vmem>>, vector<256x1024xf32>
    %cst_38 = arith.constant dense<0.000000e+00> : vector<2x1024xf32>
    %81 = tpu.matmul %77, %80, %cst_38 {dimension_numbers = #tpu.dot_dimension_numbers<[1], [0], [0], [1], [0, 0, 1, 1], [], []>} : vector<2x256xf32>, vector<256x1024xf32>, vector<2x1024xf32> -> vector<2x1024xf32>
    %82 = arith.addf %79, %81 : vector<2x1024xf32>
    %83 = vector.extract_strided_slice %82 {offsets = [0, 0], sizes = [2, 512], strides = [1, 1]} : vector<2x1024xf32> to vector<2x512xf32>
    %84 = arith.negf %83 : vector<2x512xf32>
    %85 = math.exp %84 : vector<2x512xf32>
    %cst_39 = arith.constant 1.000000e+00 : f32
    %86 = vector.broadcast %cst_39 : f32 to vector<2x512xf32>
    %87 = arith.addf %86, %85 : vector<2x512xf32>
    %88 = arith.divf %86, %87 : vector<2x512xf32>
    %89 = vector.extract_strided_slice %88 {offsets = [0, 0], sizes = [2, 256], strides = [1, 1]} : vector<2x512xf32> to vector<2x256xf32>
    %90 = vector.extract_strided_slice %88 {offsets = [0, 256], sizes = [2, 256], strides = [1, 1]} : vector<2x512xf32> to vector<2x256xf32>
    %91 = vector.extract_strided_slice %82 {offsets = [0, 512], sizes = [2, 256], strides = [1, 1]} : vector<2x1024xf32> to vector<2x256xf32>
    %92 = math.tanh %91 : vector<2x256xf32>
    %93 = vector.extract_strided_slice %82 {offsets = [0, 768], sizes = [2, 256], strides = [1, 1]} : vector<2x1024xf32> to vector<2x256xf32>
    %94 = arith.negf %93 : vector<2x256xf32>
    %95 = math.exp %94 : vector<2x256xf32>
    %cst_40 = arith.constant 1.000000e+00 : f32
    %96 = vector.broadcast %cst_40 : f32 to vector<2x256xf32>
    %97 = arith.addf %96, %95 : vector<2x256xf32>
    %98 = arith.divf %96, %97 : vector<2x256xf32>
    %99 = arith.mulf %90, %75 : vector<2x256xf32>
    %100 = arith.mulf %89, %92 : vector<2x256xf32>
    %101 = arith.addf %99, %100 : vector<2x256xf32>
    %102 = math.tanh %101 : vector<2x256xf32>
    %103 = arith.mulf %98, %102 : vector<2x256xf32>
    %c2_41 = arith.constant 2 : index
    %c0_42 = arith.constant 0 : index
    %c0_43 = arith.constant 0 : index
    %104 = vector.load %arg9[%c2_41, %c0_42, %c0_43] : memref<8x2x1024xf32, #tpu.memory_space<vmem>>, vector<1x2x1024xf32>
    %105 = vector.shape_cast %104 : vector<1x2x1024xf32> to vector<2x1024xf32>
    %c0_44 = arith.constant 0 : index
    %c0_45 = arith.constant 0 : index
    %106 = vector.load %arg10[%c0_44, %c0_45] : memref<256x1024xf32, #tpu.memory_space<vmem>>, vector<256x1024xf32>
    %cst_46 = arith.constant dense<0.000000e+00> : vector<2x1024xf32>
    %107 = tpu.matmul %103, %106, %cst_46 {dimension_numbers = #tpu.dot_dimension_numbers<[1], [0], [0], [1], [0, 0, 1, 1], [], []>} : vector<2x256xf32>, vector<256x1024xf32>, vector<2x1024xf32> -> vector<2x1024xf32>
    %108 = arith.addf %105, %107 : vector<2x1024xf32>
    %109 = vector.extract_strided_slice %108 {offsets = [0, 0], sizes = [2, 512], strides = [1, 1]} : vector<2x1024xf32> to vector<2x512xf32>
    %110 = arith.negf %109 : vector<2x512xf32>
    %111 = math.exp %110 : vector<2x512xf32>
    %cst_47 = arith.constant 1.000000e+00 : f32
    %112 = vector.broadcast %cst_47 : f32 to vector<2x512xf32>
    %113 = arith.addf %112, %111 : vector<2x512xf32>
    %114 = arith.divf %112, %113 : vector<2x512xf32>
    %115 = vector.extract_strided_slice %114 {offsets = [0, 0], sizes = [2, 256], strides = [1, 1]} : vector<2x512xf32> to vector<2x256xf32>
    %116 = vector.extract_strided_slice %114 {offsets = [0, 256], sizes = [2, 256], strides = [1, 1]} : vector<2x512xf32> to vector<2x256xf32>
    %117 = vector.extract_strided_slice %108 {offsets = [0, 512], sizes = [2, 256], strides = [1, 1]} : vector<2x1024xf32> to vector<2x256xf32>
    %118 = math.tanh %117 : vector<2x256xf32>
    %119 = vector.extract_strided_slice %108 {offsets = [0, 768], sizes = [2, 256], strides = [1, 1]} : vector<2x1024xf32> to vector<2x256xf32>
    %120 = arith.negf %119 : vector<2x256xf32>
    %121 = math.exp %120 : vector<2x256xf32>
    %cst_48 = arith.constant 1.000000e+00 : f32
    %122 = vector.broadcast %cst_48 : f32 to vector<2x256xf32>
    %123 = arith.addf %122, %121 : vector<2x256xf32>
    %124 = arith.divf %122, %123 : vector<2x256xf32>
    %125 = arith.mulf %116, %101 : vector<2x256xf32>
    %126 = arith.mulf %115, %118 : vector<2x256xf32>
    %127 = arith.addf %125, %126 : vector<2x256xf32>
    %128 = math.tanh %127 : vector<2x256xf32>
    %129 = arith.mulf %124, %128 : vector<2x256xf32>
    %c3_49 = arith.constant 3 : index
    %c0_50 = arith.constant 0 : index
    %c0_51 = arith.constant 0 : index
    %130 = vector.load %arg9[%c3_49, %c0_50, %c0_51] : memref<8x2x1024xf32, #tpu.memory_space<vmem>>, vector<1x2x1024xf32>
    %131 = vector.shape_cast %130 : vector<1x2x1024xf32> to vector<2x1024xf32>
    %c0_52 = arith.constant 0 : index
    %c0_53 = arith.constant 0 : index
    %132 = vector.load %arg10[%c0_52, %c0_53] : memref<256x1024xf32, #tpu.memory_space<vmem>>, vector<256x1024xf32>
    %cst_54 = arith.constant dense<0.000000e+00> : vector<2x1024xf32>
    %133 = tpu.matmul %129, %132, %cst_54 {dimension_numbers = #tpu.dot_dimension_numbers<[1], [0], [0], [1], [0, 0, 1, 1], [], []>} : vector<2x256xf32>, vector<256x1024xf32>, vector<2x1024xf32> -> vector<2x1024xf32>
    %134 = arith.addf %131, %133 : vector<2x1024xf32>
    %135 = vector.extract_strided_slice %134 {offsets = [0, 0], sizes = [2, 512], strides = [1, 1]} : vector<2x1024xf32> to vector<2x512xf32>
    %136 = arith.negf %135 : vector<2x512xf32>
    %137 = math.exp %136 : vector<2x512xf32>
    %cst_55 = arith.constant 1.000000e+00 : f32
    %138 = vector.broadcast %cst_55 : f32 to vector<2x512xf32>
    %139 = arith.addf %138, %137 : vector<2x512xf32>
    %140 = arith.divf %138, %139 : vector<2x512xf32>
    %141 = vector.extract_strided_slice %140 {offsets = [0, 0], sizes = [2, 256], strides = [1, 1]} : vector<2x512xf32> to vector<2x256xf32>
    %142 = vector.extract_strided_slice %140 {offsets = [0, 256], sizes = [2, 256], strides = [1, 1]} : vector<2x512xf32> to vector<2x256xf32>
    %143 = vector.extract_strided_slice %134 {offsets = [0, 512], sizes = [2, 256], strides = [1, 1]} : vector<2x1024xf32> to vector<2x256xf32>
    %144 = math.tanh %143 : vector<2x256xf32>
    %145 = vector.extract_strided_slice %134 {offsets = [0, 768], sizes = [2, 256], strides = [1, 1]} : vector<2x1024xf32> to vector<2x256xf32>
    %146 = arith.negf %145 : vector<2x256xf32>
    %147 = math.exp %146 : vector<2x256xf32>
    %cst_56 = arith.constant 1.000000e+00 : f32
    %148 = vector.broadcast %cst_56 : f32 to vector<2x256xf32>
    %149 = arith.addf %148, %147 : vector<2x256xf32>
    %150 = arith.divf %148, %149 : vector<2x256xf32>
    %151 = arith.mulf %142, %127 : vector<2x256xf32>
    %152 = arith.mulf %141, %144 : vector<2x256xf32>
    %153 = arith.addf %151, %152 : vector<2x256xf32>
    %154 = math.tanh %153 : vector<2x256xf32>
    %155 = arith.mulf %150, %154 : vector<2x256xf32>
    %c4_57 = arith.constant 4 : index
    %c0_58 = arith.constant 0 : index
    %c0_59 = arith.constant 0 : index
    %156 = vector.load %arg9[%c4_57, %c0_58, %c0_59] : memref<8x2x1024xf32, #tpu.memory_space<vmem>>, vector<1x2x1024xf32>
    %157 = vector.shape_cast %156 : vector<1x2x1024xf32> to vector<2x1024xf32>
    %c0_60 = arith.constant 0 : index
    %c0_61 = arith.constant 0 : index
    %158 = vector.load %arg10[%c0_60, %c0_61] : memref<256x1024xf32, #tpu.memory_space<vmem>>, vector<256x1024xf32>
    %cst_62 = arith.constant dense<0.000000e+00> : vector<2x1024xf32>
    %159 = tpu.matmul %155, %158, %cst_62 {dimension_numbers = #tpu.dot_dimension_numbers<[1], [0], [0], [1], [0, 0, 1, 1], [], []>} : vector<2x256xf32>, vector<256x1024xf32>, vector<2x1024xf32> -> vector<2x1024xf32>
    %160 = arith.addf %157, %159 : vector<2x1024xf32>
    %161 = vector.extract_strided_slice %160 {offsets = [0, 0], sizes = [2, 512], strides = [1, 1]} : vector<2x1024xf32> to vector<2x512xf32>
    %162 = arith.negf %161 : vector<2x512xf32>
    %163 = math.exp %162 : vector<2x512xf32>
    %cst_63 = arith.constant 1.000000e+00 : f32
    %164 = vector.broadcast %cst_63 : f32 to vector<2x512xf32>
    %165 = arith.addf %164, %163 : vector<2x512xf32>
    %166 = arith.divf %164, %165 : vector<2x512xf32>
    %167 = vector.extract_strided_slice %166 {offsets = [0, 0], sizes = [2, 256], strides = [1, 1]} : vector<2x512xf32> to vector<2x256xf32>
    %168 = vector.extract_strided_slice %166 {offsets = [0, 256], sizes = [2, 256], strides = [1, 1]} : vector<2x512xf32> to vector<2x256xf32>
    %169 = vector.extract_strided_slice %160 {offsets = [0, 512], sizes = [2, 256], strides = [1, 1]} : vector<2x1024xf32> to vector<2x256xf32>
    %170 = math.tanh %169 : vector<2x256xf32>
    %171 = vector.extract_strided_slice %160 {offsets = [0, 768], sizes = [2, 256], strides = [1, 1]} : vector<2x1024xf32> to vector<2x256xf32>
    %172 = arith.negf %171 : vector<2x256xf32>
    %173 = math.exp %172 : vector<2x256xf32>
    %cst_64 = arith.constant 1.000000e+00 : f32
    %174 = vector.broadcast %cst_64 : f32 to vector<2x256xf32>
    %175 = arith.addf %174, %173 : vector<2x256xf32>
    %176 = arith.divf %174, %175 : vector<2x256xf32>
    %177 = arith.mulf %168, %153 : vector<2x256xf32>
    %178 = arith.mulf %167, %170 : vector<2x256xf32>
    %179 = arith.addf %177, %178 : vector<2x256xf32>
    %180 = math.tanh %179 : vector<2x256xf32>
    %181 = arith.mulf %176, %180 : vector<2x256xf32>
    %c5_65 = arith.constant 5 : index
    %c0_66 = arith.constant 0 : index
    %c0_67 = arith.constant 0 : index
    %182 = vector.load %arg9[%c5_65, %c0_66, %c0_67] : memref<8x2x1024xf32, #tpu.memory_space<vmem>>, vector<1x2x1024xf32>
    %183 = vector.shape_cast %182 : vector<1x2x1024xf32> to vector<2x1024xf32>
    %c0_68 = arith.constant 0 : index
    %c0_69 = arith.constant 0 : index
    %184 = vector.load %arg10[%c0_68, %c0_69] : memref<256x1024xf32, #tpu.memory_space<vmem>>, vector<256x1024xf32>
    %cst_70 = arith.constant dense<0.000000e+00> : vector<2x1024xf32>
    %185 = tpu.matmul %181, %184, %cst_70 {dimension_numbers = #tpu.dot_dimension_numbers<[1], [0], [0], [1], [0, 0, 1, 1], [], []>} : vector<2x256xf32>, vector<256x1024xf32>, vector<2x1024xf32> -> vector<2x1024xf32>
    %186 = arith.addf %183, %185 : vector<2x1024xf32>
    %187 = vector.extract_strided_slice %186 {offsets = [0, 0], sizes = [2, 512], strides = [1, 1]} : vector<2x1024xf32> to vector<2x512xf32>
    %188 = arith.negf %187 : vector<2x512xf32>
    %189 = math.exp %188 : vector<2x512xf32>
    %cst_71 = arith.constant 1.000000e+00 : f32
    %190 = vector.broadcast %cst_71 : f32 to vector<2x512xf32>
    %191 = arith.addf %190, %189 : vector<2x512xf32>
    %192 = arith.divf %190, %191 : vector<2x512xf32>
    %193 = vector.extract_strided_slice %192 {offsets = [0, 0], sizes = [2, 256], strides = [1, 1]} : vector<2x512xf32> to vector<2x256xf32>
    %194 = vector.extract_strided_slice %192 {offsets = [0, 256], sizes = [2, 256], strides = [1, 1]} : vector<2x512xf32> to vector<2x256xf32>
    %195 = vector.extract_strided_slice %186 {offsets = [0, 512], sizes = [2, 256], strides = [1, 1]} : vector<2x1024xf32> to vector<2x256xf32>
    %196 = math.tanh %195 : vector<2x256xf32>
    %197 = vector.extract_strided_slice %186 {offsets = [0, 768], sizes = [2, 256], strides = [1, 1]} : vector<2x1024xf32> to vector<2x256xf32>
    %198 = arith.negf %197 : vector<2x256xf32>
    %199 = math.exp %198 : vector<2x256xf32>
    %cst_72 = arith.constant 1.000000e+00 : f32
    %200 = vector.broadcast %cst_72 : f32 to vector<2x256xf32>
    %201 = arith.addf %200, %199 : vector<2x256xf32>
    %202 = arith.divf %200, %201 : vector<2x256xf32>
    %203 = arith.mulf %194, %179 : vector<2x256xf32>
    %204 = arith.mulf %193, %196 : vector<2x256xf32>
    %205 = arith.addf %203, %204 : vector<2x256xf32>
    %206 = math.tanh %205 : vector<2x256xf32>
    %207 = arith.mulf %202, %206 : vector<2x256xf32>
    %c6_73 = arith.constant 6 : index
    %c0_74 = arith.constant 0 : index
    %c0_75 = arith.constant 0 : index
    %208 = vector.load %arg9[%c6_73, %c0_74, %c0_75] : memref<8x2x1024xf32, #tpu.memory_space<vmem>>, vector<1x2x1024xf32>
    %209 = vector.shape_cast %208 : vector<1x2x1024xf32> to vector<2x1024xf32>
    %c0_76 = arith.constant 0 : index
    %c0_77 = arith.constant 0 : index
    %210 = vector.load %arg10[%c0_76, %c0_77] : memref<256x1024xf32, #tpu.memory_space<vmem>>, vector<256x1024xf32>
    %cst_78 = arith.constant dense<0.000000e+00> : vector<2x1024xf32>
    %211 = tpu.matmul %207, %210, %cst_78 {dimension_numbers = #tpu.dot_dimension_numbers<[1], [0], [0], [1], [0, 0, 1, 1], [], []>} : vector<2x256xf32>, vector<256x1024xf32>, vector<2x1024xf32> -> vector<2x1024xf32>
    %212 = arith.addf %209, %211 : vector<2x1024xf32>
    %213 = vector.extract_strided_slice %212 {offsets = [0, 0], sizes = [2, 512], strides = [1, 1]} : vector<2x1024xf32> to vector<2x512xf32>
    %214 = arith.negf %213 : vector<2x512xf32>
    %215 = math.exp %214 : vector<2x512xf32>
    %cst_79 = arith.constant 1.000000e+00 : f32
    %216 = vector.broadcast %cst_79 : f32 to vector<2x512xf32>
    %217 = arith.addf %216, %215 : vector<2x512xf32>
    %218 = arith.divf %216, %217 : vector<2x512xf32>
    %219 = vector.extract_strided_slice %218 {offsets = [0, 0], sizes = [2, 256], strides = [1, 1]} : vector<2x512xf32> to vector<2x256xf32>
    %220 = vector.extract_strided_slice %218 {offsets = [0, 256], sizes = [2, 256], strides = [1, 1]} : vector<2x512xf32> to vector<2x256xf32>
    %221 = vector.extract_strided_slice %212 {offsets = [0, 512], sizes = [2, 256], strides = [1, 1]} : vector<2x1024xf32> to vector<2x256xf32>
    %222 = math.tanh %221 : vector<2x256xf32>
    %223 = vector.extract_strided_slice %212 {offsets = [0, 768], sizes = [2, 256], strides = [1, 1]} : vector<2x1024xf32> to vector<2x256xf32>
    %224 = arith.negf %223 : vector<2x256xf32>
    %225 = math.exp %224 : vector<2x256xf32>
    %cst_80 = arith.constant 1.000000e+00 : f32
    %226 = vector.broadcast %cst_80 : f32 to vector<2x256xf32>
    %227 = arith.addf %226, %225 : vector<2x256xf32>
    %228 = arith.divf %226, %227 : vector<2x256xf32>
    %229 = arith.mulf %220, %205 : vector<2x256xf32>
    %230 = arith.mulf %219, %222 : vector<2x256xf32>
    %231 = arith.addf %229, %230 : vector<2x256xf32>
    %232 = math.tanh %231 : vector<2x256xf32>
    %233 = arith.mulf %228, %232 : vector<2x256xf32>
    %c7_81 = arith.constant 7 : index
    %c0_82 = arith.constant 0 : index
    %c0_83 = arith.constant 0 : index
    %234 = vector.load %arg9[%c7_81, %c0_82, %c0_83] : memref<8x2x1024xf32, #tpu.memory_space<vmem>>, vector<1x2x1024xf32>
    %235 = vector.shape_cast %234 : vector<1x2x1024xf32> to vector<2x1024xf32>
    %c0_84 = arith.constant 0 : index
    %c0_85 = arith.constant 0 : index
    %236 = vector.load %arg10[%c0_84, %c0_85] : memref<256x1024xf32, #tpu.memory_space<vmem>>, vector<256x1024xf32>
    %cst_86 = arith.constant dense<0.000000e+00> : vector<2x1024xf32>
    %237 = tpu.matmul %233, %236, %cst_86 {dimension_numbers = #tpu.dot_dimension_numbers<[1], [0], [0], [1], [0, 0, 1, 1], [], []>} : vector<2x256xf32>, vector<256x1024xf32>, vector<2x1024xf32> -> vector<2x1024xf32>
    %238 = arith.addf %235, %237 : vector<2x1024xf32>
    %239 = vector.extract_strided_slice %238 {offsets = [0, 0], sizes = [2, 512], strides = [1, 1]} : vector<2x1024xf32> to vector<2x512xf32>
    %240 = arith.negf %239 : vector<2x512xf32>
    %241 = math.exp %240 : vector<2x512xf32>
    %cst_87 = arith.constant 1.000000e+00 : f32
    %242 = vector.broadcast %cst_87 : f32 to vector<2x512xf32>
    %243 = arith.addf %242, %241 : vector<2x512xf32>
    %244 = arith.divf %242, %243 : vector<2x512xf32>
    %245 = vector.extract_strided_slice %244 {offsets = [0, 0], sizes = [2, 256], strides = [1, 1]} : vector<2x512xf32> to vector<2x256xf32>
    %246 = vector.extract_strided_slice %244 {offsets = [0, 256], sizes = [2, 256], strides = [1, 1]} : vector<2x512xf32> to vector<2x256xf32>
    %247 = vector.extract_strided_slice %238 {offsets = [0, 512], sizes = [2, 256], strides = [1, 1]} : vector<2x1024xf32> to vector<2x256xf32>
    %248 = math.tanh %247 : vector<2x256xf32>
    %249 = vector.extract_strided_slice %238 {offsets = [0, 768], sizes = [2, 256], strides = [1, 1]} : vector<2x1024xf32> to vector<2x256xf32>
    %250 = arith.negf %249 : vector<2x256xf32>
    %251 = math.exp %250 : vector<2x256xf32>
    %cst_88 = arith.constant 1.000000e+00 : f32
    %252 = vector.broadcast %cst_88 : f32 to vector<2x256xf32>
    %253 = arith.addf %252, %251 : vector<2x256xf32>
    %254 = arith.divf %252, %253 : vector<2x256xf32>
    %255 = arith.mulf %246, %231 : vector<2x256xf32>
    %256 = arith.mulf %245, %248 : vector<2x256xf32>
    %257 = arith.addf %255, %256 : vector<2x256xf32>
    %258 = math.tanh %257 : vector<2x256xf32>
    %259 = arith.mulf %254, %258 : vector<2x256xf32>
    %c1_i32_89 = arith.constant 1 : i32
    %260 = tpu.memref_slice %arg15[%c1_i32_89] : memref<5x!tpu.dma_semaphore, #tpu.memory_space<semaphore_mem>> -> memref<1x!tpu.dma_semaphore, #tpu.memory_space<semaphore_mem>>
    %261 = tpu.memref_squeeze %260 : memref<1x!tpu.dma_semaphore, #tpu.memory_space<semaphore_mem>> -> memref<!tpu.dma_semaphore, #tpu.memory_space<semaphore_mem>>
    tpu.wait_dma2 semaphore(%261 : memref<!tpu.dma_semaphore, #tpu.memory_space<semaphore_mem>>) src(%arg4 : memref<256x128xf32, #tpu.memory_space<any>>) dst(%arg11 : memref<256x128xf32, #tpu.memory_space<vmem>>)
    %c2_i32_90 = arith.constant 2 : i32
    %262 = tpu.memref_slice %arg15[%c2_i32_90] : memref<5x!tpu.dma_semaphore, #tpu.memory_space<semaphore_mem>> -> memref<1x!tpu.dma_semaphore, #tpu.memory_space<semaphore_mem>>
    %263 = tpu.memref_squeeze %262 : memref<1x!tpu.dma_semaphore, #tpu.memory_space<semaphore_mem>> -> memref<!tpu.dma_semaphore, #tpu.memory_space<semaphore_mem>>
    tpu.wait_dma2 semaphore(%263 : memref<!tpu.dma_semaphore, #tpu.memory_space<semaphore_mem>>) src(%arg5 : memref<1x128xf32, #tpu.memory_space<any>>) dst(%arg12 : memref<1x128xf32, #tpu.memory_space<vmem>>)
    %c3_i32_91 = arith.constant 3 : i32
    %264 = tpu.memref_slice %arg15[%c3_i32_91] : memref<5x!tpu.dma_semaphore, #tpu.memory_space<semaphore_mem>> -> memref<1x!tpu.dma_semaphore, #tpu.memory_space<semaphore_mem>>
    %265 = tpu.memref_squeeze %264 : memref<1x!tpu.dma_semaphore, #tpu.memory_space<semaphore_mem>> -> memref<!tpu.dma_semaphore, #tpu.memory_space<semaphore_mem>>
    tpu.wait_dma2 semaphore(%265 : memref<!tpu.dma_semaphore, #tpu.memory_space<semaphore_mem>>) src(%arg6 : memref<128x156xf32, #tpu.memory_space<any>>) dst(%arg13 : memref<128x156xf32, #tpu.memory_space<vmem>>)
    %c4_i32_92 = arith.constant 4 : i32
    %266 = tpu.memref_slice %arg15[%c4_i32_92] : memref<5x!tpu.dma_semaphore, #tpu.memory_space<semaphore_mem>> -> memref<1x!tpu.dma_semaphore, #tpu.memory_space<semaphore_mem>>
    %267 = tpu.memref_squeeze %266 : memref<1x!tpu.dma_semaphore, #tpu.memory_space<semaphore_mem>> -> memref<!tpu.dma_semaphore, #tpu.memory_space<semaphore_mem>>
    tpu.wait_dma2 semaphore(%267 : memref<!tpu.dma_semaphore, #tpu.memory_space<semaphore_mem>>) src(%arg7 : memref<1x156xf32, #tpu.memory_space<any>>) dst(%arg14 : memref<1x156xf32, #tpu.memory_space<vmem>>)
    %c0_93 = arith.constant 0 : index
    %c0_94 = arith.constant 0 : index
    %268 = vector.load %arg11[%c0_93, %c0_94] : memref<256x128xf32, #tpu.memory_space<vmem>>, vector<256x128xf32>
    %cst_95 = arith.constant dense<0.000000e+00> : vector<2x128xf32>
    %269 = tpu.matmul %259, %268, %cst_95 {dimension_numbers = #tpu.dot_dimension_numbers<[1], [0], [0], [1], [0, 0, 1, 1], [], []>} : vector<2x256xf32>, vector<256x128xf32>, vector<2x128xf32> -> vector<2x128xf32>
    %c0_96 = arith.constant 0 : index
    %c0_97 = arith.constant 0 : index
    %270 = vector.load %arg12[%c0_96, %c0_97] : memref<1x128xf32, #tpu.memory_space<vmem>>, vector<1x128xf32>
    %271 = vector.broadcast %270 : vector<1x128xf32> to vector<2x128xf32>
    %272 = arith.addf %269, %271 : vector<2x128xf32>
    %cst_98 = arith.constant 0.000000e+00 : f32
    %273 = vector.broadcast %cst_98 : f32 to vector<2x128xf32>
    %274 = arith.maximumf %272, %273 : vector<2x128xf32>
    %c0_99 = arith.constant 0 : index
    %c0_100 = arith.constant 0 : index
    %275 = vector.load %arg13[%c0_99, %c0_100] : memref<128x156xf32, #tpu.memory_space<vmem>>, vector<128x156xf32>
    %cst_101 = arith.constant dense<0.000000e+00> : vector<2x156xf32>
    %276 = tpu.matmul %274, %275, %cst_101 {dimension_numbers = #tpu.dot_dimension_numbers<[1], [0], [0], [1], [0, 0, 1, 1], [], []>} : vector<2x128xf32>, vector<128x156xf32>, vector<2x156xf32> -> vector<2x156xf32>
    %c0_102 = arith.constant 0 : index
    %c0_103 = arith.constant 0 : index
    %277 = vector.load %arg14[%c0_102, %c0_103] : memref<1x156xf32, #tpu.memory_space<vmem>>, vector<1x156xf32>
    %278 = vector.broadcast %277 : vector<1x156xf32> to vector<2x156xf32>
    %279 = arith.addf %276, %278 : vector<2x156xf32>
    %280 = math.tanh %279 : vector<2x156xf32>
    %c0_104 = arith.constant 0 : index
    %c0_105 = arith.constant 0 : index
    %281 = vector.load %arg8[%c0_104, %c0_105] : memref<2x156xf32, #tpu.memory_space<vmem>>, vector<2x156xf32>
    tpu.vector_store %arg8[%c0_104, %c0_105], %280 {strides = array<i32>} : memref<2x156xf32, #tpu.memory_space<vmem>>, vector<2x156xf32>,
    return
  }
}

</mosaic_0001>

<bundles_post_ra>
// kernel: tpu_custom_call.1
= control target key start
LH: loop header
LB: loop body
LE: loop exit
PB: predicated region body
PF: predicated region fallthrough
CT: control target
= control target key end

     0   :  { %13 = vsyncpa [#allocation10], 0  ;;  %s10496_s0 = inlined_call_operand.vmem [shape: f32[16,156], index: 0, kind: input, shape index: {}]   ;;  %s10497_s1 = inlined_call_operand.hbm [shape: f32[156,1024], index: 1, kind: input, shape index: {}]   ;;  %s10498_s2 = inlined_call_operand.vmem [shape: f32[1,1024], index: 2, kind: input, shape index: {}]   ;;  %s10499_s3 = inlined_call_operand.hbm [shape: f32[256,1024], index: 3, kind: input, shape index: {}]   ;;  %s10500_s4 = inlined_call_operand.vmem [shape: f32[256,128], index: 4, kind: input, shape index: {}]   ;;  %s10501_s5 = inlined_call_operand.vmem [shape: f32[1,128], index: 5, kind: input, shape index: {}]   ;;  %s10502_s6 = inlined_call_operand.vmem [shape: f32[128,156], index: 6, kind: input, shape index: {}]   ;;  %s10503_s7 = inlined_call_operand.vmem [shape: f32[1,156], index: 7, kind: input, shape index: {}]   ;;  %s10504_s8 = inlined_call_operand.hbm [shape: f32[2,156], index: 8, kind: output, shape index: {}]  }
   0x1   :  { %14 = vsyncpa [#allocation11], 0  ;;  %s5666_s27 = smov [#allocation9]  }
   0x2   :  { %s22_s28 = sshll.u32 %s5666_s27, 4  ;;  %s23_s28 = int_to_ptr.vmem [resolvable:$true] %s22_s28 }
   0x3   :  { %s5600_s29 = scalar_lea.vmem %s23_s28, 20480  ;;  %p5605_p1 = scmp.lt.s32.totalorder %s23_s28, %s23_s28 }
   0x4   :  { %p5601_p0 = scmp.ne.s32.totalorder %s23_s28, %s5600_s29  ;;  %p5606_p2 = scmp.lt.s32.totalorder %s5600_s29, %s5600_s29 }
   0x6   :  { %p5607_p3 = por %p5606_p2, %p5605_p1 }
   0x8   :  { %p5608_p4 = pnand %p5607_p3, %p5601_p0 }
   0xa   :  { %5611 = shalt.err (!%p5608_p4)
}
   0xb   :  { %s5667_s30 = smov 1024   ;;  %s5668_s9 = smov 64  }
   0xc   :  { %28 = dma.hbm_to_vmem [thread:$0]  %s10497_s1, 20480, %s23_s28, [#allocation10], %s5667_s30, %s5667_s30, %s5668_s9  }
   0xd   :  { %5652 = dma.done.wait [#allocation10], 20480  }
   0xe   :  { %5653 = vsyncadd [#allocation10], 4294946816  ;;  %s5669_s12 = smov [#allocation3]  }
   0xf   :  { %s41_s13 = sshll.u32 %s5669_s12, 4  ;;  %s42_s13 = int_to_ptr.vmem [resolvable:$true] %s41_s13 }
  0x10   :  { %s5620_s14 = scalar_lea.vmem %s42_s13, 32768  ;;  %p5625_p6 = scmp.lt.s32.totalorder %s42_s13, %s42_s13 }
  0x11   :  { %p5621_p5 = scmp.ne.s32.totalorder %s42_s13, %s5620_s14  ;;  %p5626_p7 = scmp.lt.s32.totalorder %s5620_s14, %s5620_s14 }
  0x13   :  { %p5627_p8 = por %p5626_p7, %p5625_p6 }
  0x15   :  { %p5628_p9 = pnand %p5627_p8, %p5621_p5 }
  0x17   :  { %5631 = shalt.err (!%p5628_p9)  }
  0x18   :  { %44 = dma.hbm_to_vmem [thread:$0]  %s10499_s3, 32768, %s42_s13, [#allocation8]  ;;  %v5727_v0 = vld [vmem:[%s10500_s4] sm:$0xff]  ;;  %v5732_v1 = vld [vmem:[%s10500_s4 + $0x8] sm:$0xff]  ;;  %v5737_v2 = vld [vmem:[%s10500_s4 + $0x10] sm:$0xff] }
  0x19   :  { %11319 = vst [vmem:[#allocation28_spill] sm:$0xff] %v5727_v0  ;;  %11320 = vst [vmem:[#allocation29_spill] sm:$0xff] %v5732_v1  ;;  %v5742_v3 = vld [vmem:[%s10500_s4 + $0x18] sm:$0xff]  ;;  %v5747_v4 = vld [vmem:[%s10500_s4 + $0x20] sm:$0xff] }
  0x1a   :  { %11321 = vst [vmem:[#allocation30_spill] sm:$0xff] %v5737_v2  ;;  %11322 = vst [vmem:[#allocation31_spill] sm:$0xff] %v5742_v3  ;;  %v5752_v5 = vld [vmem:[%s10500_s4 + $0x28] sm:$0xff]  ;;  %v5757_v6 = vld [vmem:[%s10500_s4 + $0x30] sm:$0xff] }
  0x1b   :  { %11323 = vst [vmem:[#allocation32_spill] sm:$0xff] %v5747_v4  ;;  %11324 = vst [vmem:[#allocation33_spill] sm:$0xff] %v5752_v5  ;;  %v5762_v7 = vld [vmem:[%s10500_s4 + $0x38] sm:$0xff]  ;;  %v5767_v8 = vld [vmem:[%s10500_s4 + $0x40] sm:$0xff] }
  0x1c   :  { %11325 = vst [vmem:[#allocation34_spill] sm:$0xff] %v5757_v6  ;;  %11326 = vst [vmem:[#allocation35_spill] sm:$0xff] %v5762_v7  ;;  %v5772_v9 = vld [vmem:[%s10500_s4 + $0x48] sm:$0xff]  ;;  %v5777_v10 = vld [vmem:[%s10500_s4 + $0x50] sm:$0xff] }
  0x1d   :  { %11327 = vst [vmem:[#allocation36_spill] sm:$0xff] %v5767_v8  ;;  %11328 = vst [vmem:[#allocation37_spill] sm:$0xff] %v5772_v9  ;;  %v5782_v11 = vld [vmem:[%s10500_s4 + $0x58] sm:$0xff]  ;;  %v5787_v12 = vld [vmem:[%s10500_s4 + $0x60] sm:$0xff] }
  0x1e   :  { %11329 = vst [vmem:[#allocation38_spill] sm:$0xff] %v5777_v10  ;;  %11330 = vst [vmem:[#allocation39_spill] sm:$0xff] %v5782_v11  ;;  %v5792_v13 = vld [vmem:[%s10500_s4 + $0x68] sm:$0xff]  ;;  %v5797_v14 = vld [vmem:[%s10500_s4 + $0x70] sm:$0xff] }
  0x1f   :  { %11331 = vst [vmem:[#allocation40_spill] sm:$0xff] %v5787_v12  ;;  %11332 = vst [vmem:[#allocation41_spill] sm:$0xff] %v5792_v13  ;;  %v5802_v15 = vld [vmem:[%s10500_s4 + $0x78] sm:$0xff]  ;;  %v5807_v16 = vld [vmem:[%s10500_s4 + $0x80] sm:$0xff] }
  0x20   :  { %11333 = vst [vmem:[#allocation42_spill] sm:$0xff] %v5797_v14  ;;  %11334 = vst [vmem:[#allocation43_spill] sm:$0xff] %v5802_v15  ;;  %v5812_v17 = vld [vmem:[%s10500_s4 + $0x88] sm:$0xff]  ;;  %v5817_v18 = vld [vmem:[%s10500_s4 + $0x90] sm:$0xff] }
  0x21   :  { %11335 = vst [vmem:[#allocation44_spill] sm:$0xff] %v5807_v16  ;;  %11336 = vst [vmem:[#allocation45_spill] sm:$0xff] %v5812_v17  ;;  %v5822_v19 = vld [vmem:[%s10500_s4 + $0x98] sm:$0xff]  ;;  %v5827_v20 = vld [vmem:[%s10500_s4 + $0xa0] sm:$0xff] }
  0x22   :  { %11337 = vst [vmem:[#allocation46_spill] sm:$0xff] %v5817_v18  ;;  %11338 = vst [vmem:[#allocation47_spill] sm:$0xff] %v5822_v19  ;;  %v5832_v21 = vld [vmem:[%s10500_s4 + $0xa8] sm:$0xff]  ;;  %v5837_v22 = vld [vmem:[%s10500_s4 + $0xb0] sm:$0xff] }
  0x23   :  { %11339 = vst [vmem:[#allocation48_spill] sm:$0xff] %v5827_v20  ;;  %11340 = vst [vmem:[#allocation49_spill] sm:$0xff] %v5832_v21  ;;  %v5842_v23 = vld [vmem:[%s10500_s4 + $0xb8] sm:$0xff]  ;;  %v5847_v24 = vld [vmem:[%s10500_s4 + $0xc0] sm:$0xff] }
  0x24   :  { %11341 = vst [vmem:[#allocation50_spill] sm:$0xff] %v5837_v22  ;;  %11342 = vst [vmem:[#allocation51_spill] sm:$0xff] %v5842_v23  ;;  %v5852_v25 = vld [vmem:[%s10500_s4 + $0xc8] sm:$0xff]  ;;  %v5857_v26 = vld [vmem:[%s10500_s4 + $0xd0] sm:$0xff] }
  0x25   :  { %11343 = vst [vmem:[#allocation52_spill] sm:$0xff] %v5847_v24  ;;  %11344 = vst [vmem:[#allocation53_spill] sm:$0xff] %v5852_v25  ;;  %v5862_v27 = vld [vmem:[%s10500_s4 + $0xd8] sm:$0xff]  ;;  %v5867_v28 = vld [vmem:[%s10500_s4 + $0xe0] sm:$0xff] }
  0x26   :  { %11345 = vst [vmem:[#allocation54_spill] sm:$0xff] %v5857_v26  ;;  %11346 = vst [vmem:[#allocation55_spill] sm:$0xff] %v5862_v27  ;;  %v5872_v29 = vld [vmem:[%s10500_s4 + $0xe8] sm:$0xff]  ;;  %v5877_v30 = vld [vmem:[%s10500_s4 + $0xf0] sm:$0xff] }
  0x27   :  { %11347 = vst [vmem:[#allocation56_spill] sm:$0xff] %v5867_v28  ;;  %11348 = vst [vmem:[#allocation57_spill] sm:$0xff] %v5872_v29  ;;  %v5882_v31 = vld [vmem:[%s10500_s4 + $0xf8] sm:$0xff] }
  0x28   :  { %11349 = vst [vmem:[#allocation58_spill] sm:$0xff] %v5877_v30  ;;  %11350 = vst [vmem:[#allocation59_spill] sm:$0xff] %v5882_v31 }
  0x29   :  { %150 = vsyncadd [#allocation8 + $0x1], 4096  ;;  %v170_v32 = vld [vmem:[%s10501_s5] sm:$0x1] }
  0x2a   :  { %171 = vst [vmem:[#allocation5] sm:$0x1] %v170_v32 }
  0x2b   :  { %197 = vsyncadd [#allocation8 + $0x2], 16  ;;  %v5890_v33 = vld [vmem:[%s10502_s6] sm:$0xff]  ;;  %v5895_v34 = vld [vmem:[%s10502_s6 + $0x8] sm:$0xff] }
  0x2c   :  { %11351 = vst [vmem:[#allocation60_spill] sm:$0xff] %v5890_v33  ;;  %11352 = vst [vmem:[#allocation61_spill] sm:$0xff] %v5895_v34  ;;  %v5900_v35 = vld [vmem:[%s10502_s6 + $0x10] sm:$0xff]  ;;  %v5905_v36 = vld [vmem:[%s10502_s6 + $0x18] sm:$0xff] }
  0x2d   :  { %11353 = vst [vmem:[#allocation62_spill] sm:$0xff] %v5900_v35  ;;  %11354 = vst [vmem:[#allocation63_spill] sm:$0xff] %v5905_v36  ;;  %v5910_v37 = vld [vmem:[%s10502_s6 + $0x20] sm:$0xff]  ;;  %v5915_v38 = vld [vmem:[%s10502_s6 + $0x28] sm:$0xff] }
  0x2e   :  { %11355 = vst [vmem:[#allocation64_spill] sm:$0xff] %v5910_v37  ;;  %11356 = vst [vmem:[#allocation65_spill] sm:$0xff] %v5915_v38  ;;  %v5920_v39 = vld [vmem:[%s10502_s6 + $0x30] sm:$0xff]  ;;  %v5925_v40 = vld [vmem:[%s10502_s6 + $0x38] sm:$0xff] }
  0x2f   :  { %11357 = vst [vmem:[#allocation66_spill] sm:$0xff] %v5920_v39  ;;  %11358 = vst [vmem:[#allocation67_spill] sm:$0xff] %v5925_v40  ;;  %v5930_v41 = vld [vmem:[%s10502_s6 + $0x40] sm:$0xff]  ;;  %v5935_v42 = vld [vmem:[%s10502_s6 + $0x48] sm:$0xff] }
  0x30   :  { %11359 = vst [vmem:[#allocation68_spill] sm:$0xff] %v5930_v41  ;;  %11360 = vst [vmem:[#allocation69_spill] sm:$0xff] %v5935_v42  ;;  %v5940_v43 = vld [vmem:[%s10502_s6 + $0x50] sm:$0xff]  ;;  %v5945_v44 = vld [vmem:[%s10502_s6 + $0x58] sm:$0xff] }
  0x31   :  { %11361 = vst [vmem:[#allocation70_spill] sm:$0xff] %v5940_v43  ;;  %11362 = vst [vmem:[#allocation71_spill] sm:$0xff] %v5945_v44  ;;  %v5950_v45 = vld [vmem:[%s10502_s6 + $0x60] sm:$0xff]  ;;  %v5955_v46 = vld [vmem:[%s10502_s6 + $0x68] sm:$0xff] }
  0x32   :  { %11363 = vst [vmem:[#allocation72_spill] sm:$0xff] %v5950_v45  ;;  %11364 = vst [vmem:[#allocation73_spill] sm:$0xff] %v5955_v46  ;;  %v5960_v47 = vld [vmem:[%s10502_s6 + $0x70] sm:$0xff]  ;;  %v5965_v48 = vld [vmem:[%s10502_s6 + $0x78] sm:$0xff] }
  0x33   :  { %11365 = vst [vmem:[#allocation74_spill] sm:$0xff] %v5960_v47  ;;  %11366 = vst [vmem:[#allocation75_spill] sm:$0xff] %v5965_v48  ;;  %v5970_v49 = vld [vmem:[%s10502_s6 + $0x80] sm:$0xff]  ;;  %v5975_v50 = vld [vmem:[%s10502_s6 + $0x88] sm:$0xff] }
  0x34   :  { %11367 = vst [vmem:[#allocation76_spill] sm:$0xff] %v5970_v49  ;;  %11368 = vst [vmem:[#allocation77_spill] sm:$0xff] %v5975_v50  ;;  %v5980_v51 = vld [vmem:[%s10502_s6 + $0x90] sm:$0xff]  ;;  %v5985_v52 = vld [vmem:[%s10502_s6 + $0x98] sm:$0xff] }
  0x35   :  { %11369 = vst [vmem:[#allocation78_spill] sm:$0xff] %v5980_v51  ;;  %11370 = vst [vmem:[#allocation79_spill] sm:$0xff] %v5985_v52  ;;  %v5990_v53 = vld [vmem:[%s10502_s6 + $0xa0] sm:$0xff]  ;;  %v5995_v54 = vld [vmem:[%s10502_s6 + $0xa8] sm:$0xff] }
  0x36   :  { %11371 = vst [vmem:[#allocation80_spill] sm:$0xff] %v5990_v53  ;;  %11372 = vst [vmem:[#allocation81_spill] sm:$0xff] %v5995_v54  ;;  %v6000_v55 = vld [vmem:[%s10502_s6 + $0xb0] sm:$0xff]  ;;  %v6005_v56 = vld [vmem:[%s10502_s6 + $0xb8] sm:$0xff] }
  0x37   :  { %11373 = vst [vmem:[#allocation82_spill] sm:$0xff] %v6000_v55  ;;  %11374 = vst [vmem:[#allocation83_spill] sm:$0xff] %v6005_v56  ;;  %v6010_v57 = vld [vmem:[%s10502_s6 + $0xc0] sm:$0xff]  ;;  %v6015_v58 = vld [vmem:[%s10502_s6 + $0xc8] sm:$0xff] }
  0x38   :  { %11375 = vst [vmem:[#allocation84_spill] sm:$0xff] %v6010_v57  ;;  %11376 = vst [vmem:[#allocation85_spill] sm:$0xff] %v6015_v58  ;;  %v6020_v59 = vld [vmem:[%s10502_s6 + $0xd0] sm:$0xff]  ;;  %v6025_v60 = vld [vmem:[%s10502_s6 + $0xd8] sm:$0xff] }
  0x39   :  { %11377 = vst [vmem:[#allocation86_spill] sm:$0xff] %v6020_v59  ;;  %11378 = vst [vmem:[#allocation87_spill] sm:$0xff] %v6025_v60  ;;  %v6030_v61 = vld [vmem:[%s10502_s6 + $0xe0] sm:$0xff]  ;;  %v6035_v62 = vld [vmem:[%s10502_s6 + $0xe8] sm:$0xff] }
  0x3a   :  { %11379 = vst [vmem:[#allocation88_spill] sm:$0xff] %v6030_v61  ;;  %11380 = vst [vmem:[#allocation89_spill] sm:$0xff] %v6035_v62  ;;  %v6040_v63 = vld [vmem:[%s10502_s6 + $0xf0] sm:$0xff]  ;;  %v6045_v32 = vld [vmem:[%s10502_s6 + $0xf8] sm:$0xff] }
  0x3b   :  { %11381 = vst [vmem:[#allocation90_spill] sm:$0xff] %v6040_v63  ;;  %11382 = vst [vmem:[#allocation91_spill] sm:$0xff] %v6045_v32 }
  0x3c   :  { %303 = vsyncadd [#allocation8 + $0x3], 4096  ;;  %v323_v33 = vld [vmem:[%s10503_s7] sm:$0x3] }
  0x3d   :  { %324 = vst [vmem:[#allocation7] sm:$0x3] %v323_v33 }
  0x3e   :  { %350 = vsyncadd [#allocation8 + $0x4], 32  ;;  %v476_v34 = vld [vmem:[#allocation9 + $0x3c8] sm:$0xff]  ;;  %v478_v0 = vld [vmem:[#allocation9 + $0x3d8] sm:$0xff]  ;;  %vm564_vm0 = vcmask 1043456   ;;  %vm557_vm1 = vcmask 228352  }
  0x3f   :  { %589 = vmatprep.subr.mxu0 %v476_v34  ;;  %666 = vmatprep.subr.mxu1 %v478_v0  ;;  %v475_v35 = vld [vmem:[#allocation9 + $0x3c0] sm:$0xff]  ;;  %v477_v16 = vld [vmem:[#allocation9 + $0x3d0] sm:$0xff]  ;;  %v468_v36 = vld [vmem:[#allocation9 + $0x388] sm:$0xff] }
  0x40   :  { %590 = vmatpush1.msra.mxu0 %v475_v35  ;;  %667 = vmatpush1.msra.mxu1 %v477_v16  ;;  %v470_v1 = vld [vmem:[#allocation9 + $0x398] sm:$0xff]  ;;  %v467_v37 = vld [vmem:[#allocation9 + $0x380] sm:$0xff]  ;;  %v469_v17 = vld [vmem:[#allocation9 + $0x390] sm:$0xff] }
  0x41   :  { %591 = vmatprep.subr.mxu0 %v468_v36  ;;  %668 = vmatprep.subr.mxu1 %v470_v1  ;;  %v460_v38 = vld [vmem:[#allocation9 + $0x348] sm:$0xff]  ;;  %v462_v2 = vld [vmem:[#allocation9 + $0x358] sm:$0xff]  ;;  %v459_v39 = vld [vmem:[#allocation9 + $0x340] sm:$0xff] }
  0x42   :  { %592 = vmatpush1.msra.mxu0 %v467_v37  ;;  %669 = vmatpush1.msra.mxu1 %v469_v17  ;;  %v461_v33 = vld [vmem:[#allocation9 + $0x350] sm:$0xff]  ;;  %v452_v18 = vld [vmem:[#allocation9 + $0x308] sm:$0xff]  ;;  %v454_v40 = vld [vmem:[#allocation9 + $0x318] sm:$0xff] }
  0x43   :  { %593 = vmatprep.subr.mxu0 %v460_v38  ;;  %670 = vmatprep.subr.mxu1 %v462_v2  ;;  %v451_v0 = vld [vmem:[#allocation9 + $0x300] sm:$0xff]  ;;  %v453_v34 = vld [vmem:[#allocation9 + $0x310] sm:$0xff]  ;;  %v444_v16 = vld [vmem:[#allocation9 + $0x2c8] sm:$0xff] }
  0x44   :  { %594 = vmatpush1.msra.mxu0 %v459_v39  ;;  %671 = vmatpush1.msra.mxu1 %v461_v33  ;;  %v446_v35 = vld [vmem:[#allocation9 + $0x2d8] sm:$0xff]  ;;  %v443_v36 = vld [vmem:[#allocation9 + $0x2c0] sm:$0xff]  ;;  %v445_v1 = vld [vmem:[#allocation9 + $0x2d0] sm:$0xff] }
  0x45   :  { %595 = vmatprep.subr.mxu0 %v452_v18  ;;  %672 = vmatprep.subr.mxu1 %v454_v40  ;;  %v436_v3 = vld [vmem:[#allocation9 + $0x288] sm:$0xff]  ;;  %v438_v37 = vld [vmem:[#allocation9 + $0x298] sm:$0xff]  ;;  %v435_v17 = vld [vmem:[#allocation9 + $0x280] sm:$0xff] }
  0x46   :  { %596 = vmatpush1.msra.mxu0 %v451_v0  ;;  %673 = vmatpush1.msra.mxu1 %v453_v34  ;;  %v437_v41 = vld [vmem:[#allocation9 + $0x290] sm:$0xff]  ;;  %v428_v2 = vld [vmem:[#allocation9 + $0x248] sm:$0xff]  ;;  %v430_v38 = vld [vmem:[#allocation9 + $0x258] sm:$0xff] }
  0x47   :  { %597 = vmatprep.subr.mxu0 %v444_v16  ;;  %674 = vmatprep.subr.mxu1 %v446_v35  ;;  %v427_v39 = vld [vmem:[#allocation9 + $0x240] sm:$0xff]  ;;  %v429_v33 = vld [vmem:[#allocation9 + $0x250] sm:$0xff]  ;;  %v420_v18 = vld [vmem:[#allocation9 + $0x208] sm:$0xff] }
  0x48   :  { %598 = vmatpush1.msra.mxu0 %v443_v36  ;;  %675 = vmatpush1.msra.mxu1 %v445_v1  ;;  %v422_v40 = vld [vmem:[#allocation9 + $0x218] sm:$0xff]  ;;  %v419_v0 = vld [vmem:[#allocation9 + $0x200] sm:$0xff]  ;;  %v421_v34 = vld [vmem:[#allocation9 + $0x210] sm:$0xff] }
  0x49   :  { %599 = vmatprep.subr.mxu0 %v436_v3  ;;  %676 = vmatprep.subr.mxu1 %v438_v37  ;;  %v412_v16 = vld [vmem:[#allocation9 + $0x1c8] sm:$0xff]  ;;  %v414_v35 = vld [vmem:[#allocation9 + $0x1d8] sm:$0xff]  ;;  %v411_v36 = vld [vmem:[#allocation9 + $0x1c0] sm:$0xff] }
  0x4a   :  { %600 = vmatpush1.msra.mxu0 %v435_v17  ;;  %677 = vmatpush1.msra.mxu1 %v437_v41  ;;  %v413_v1 = vld [vmem:[#allocation9 + $0x1d0] sm:$0xff]  ;;  %v404_v3 = vld [vmem:[#allocation9 + $0x188] sm:$0xff]  ;;  %v406_v37 = vld [vmem:[#allocation9 + $0x198] sm:$0xff] }
  0x4b   :  { %601 = vmatprep.subr.mxu0 %v428_v2  ;;  %678 = vmatprep.subr.mxu1 %v430_v38  ;;  %v403_v41 = vld [vmem:[#allocation9 + $0x180] sm:$0xff]  ;;  %v405_v17 = vld [vmem:[#allocation9 + $0x190] sm:$0xff]  ;;  %v396_v2 = vld [vmem:[#allocation9 + $0x148] sm:$0xff] }
  0x4c   :  { %602 = vmatpush1.msra.mxu0 %v427_v39  ;;  %679 = vmatpush1.msra.mxu1 %v429_v33  ;;  %v398_v38 = vld [vmem:[#allocation9 + $0x158] sm:$0xff]  ;;  %v395_v39 = vld [vmem:[#allocation9 + $0x140] sm:$0xff]  ;;  %v397_v33 = vld [vmem:[#allocation9 + $0x150] sm:$0xff] }
  0x4d   :  { %603 = vmatprep.subr.mxu0 %v420_v18  ;;  %680 = vmatprep.subr.mxu1 %v422_v40  ;;  %v388_v18 = vld [vmem:[#allocation9 + $0x108] sm:$0xff]  ;;  %v390_v40 = vld [vmem:[#allocation9 + $0x118] sm:$0xff]  ;;  %v455_v19 = vld [vmem:[#allocation9 + $0x320] sm:$0xff] }
  0x4e   :  { %604 = vmatpush1.msra.mxu0 %v419_v0  ;;  %681 = vmatpush1.msra.mxu1 %v421_v34  ;;  %v387_v0 = vld [vmem:[#allocation9 + $0x100] sm:$0xff]  ;;  %v389_v34 = vld [vmem:[#allocation9 + $0x110] sm:$0xff] }
  0x4f   :  { %605 = vmatprep.subr.mxu0 %v412_v16  ;;  %682 = vmatprep.subr.mxu1 %v414_v35  ;;  %v380_v16 = vld [vmem:[#allocation9 + $0xc8] sm:$0xff]  ;;  %v382_v35 = vld [vmem:[#allocation9 + $0xd8] sm:$0xff]  ;;  %v457_v42 = vld [vmem:[#allocation9 + $0x330] sm:$0xff] }
  0x50   :  { %606 = vmatpush1.msra.mxu0 %v411_v36  ;;  %683 = vmatpush1.msra.mxu1 %v413_v1  ;;  %v379_v36 = vld [vmem:[#allocation9 + $0xc0] sm:$0xff]  ;;  %v381_v1 = vld [vmem:[#allocation9 + $0xd0] sm:$0xff] }
  0x51   :  { %607 = vmatprep.subr.mxu0 %v404_v3  ;;  %684 = vmatprep.subr.mxu1 %v406_v37  ;;  %v372_v3 = vld [vmem:[#allocation9 + $0x88] sm:$0xff]  ;;  %v374_v37 = vld [vmem:[#allocation9 + $0x98] sm:$0xff] }
  0x52   :  { %608 = vmatpush1.msra.mxu0 %v403_v41  ;;  %685 = vmatpush1.msra.mxu1 %v405_v17  ;;  %v371_v41 = vld [vmem:[#allocation9 + $0x80] sm:$0xff]  ;;  %v373_v17 = vld [vmem:[#allocation9 + $0x90] sm:$0xff] }
  0x53   :  { %609 = vmatprep.subr.mxu0 %v396_v2  ;;  %686 = vmatprep.subr.mxu1 %v398_v38  ;;  %v364_v2 = vld [vmem:[#allocation9 + $0x48] sm:$0xff]  ;;  %v366_v38 = vld [vmem:[#allocation9 + $0x58] sm:$0xff] }
  0x54   :  { %610 = vmatpush1.msra.mxu0 %v395_v39  ;;  %687 = vmatpush1.msra.mxu1 %v397_v33  ;;  %v363_v39 = vld [vmem:[#allocation9 + $0x40] sm:$0xff]  ;;  %v365_v33 = vld [vmem:[#allocation9 + $0x50] sm:$0xff] }
  0x55   :  { %611 = vmatprep.subr.mxu0 %v388_v18  ;;  %688 = vmatprep.subr.mxu1 %v390_v40  ;;  %v356_v18 = vld [vmem:[#allocation9 + $0x8] sm:$0xff]  ;;  %v358_v40 = vld [vmem:[#allocation9 + $0x18] sm:$0xff] }
  0x56   :  { %612 = vmatpush1.msra.mxu0 %v387_v0  ;;  %689 = vmatpush1.msra.mxu1 %v389_v34  ;;  %v355_v0 = vld [vmem:[#allocation9] sm:$0xff]  ;;  %v357_v34 = vld [vmem:[#allocation9 + $0x10] sm:$0xff] }
  0x57   :  { %613 = vmatprep.subr.mxu0 %v380_v16  ;;  %690 = vmatprep.subr.mxu1 %v382_v35  ;;  %v508_v16 = vld [vmem:[#allocation9 + $0x4c8] sm:$0xf]  ;;  %v510_v35 = vld [vmem:[#allocation9 + $0x4d8] sm:$0xf] }
  0x58   :  { %614 = vmatpush1.msra.mxu0 %v379_v36  ;;  %691 = vmatpush1.msra.mxu1 %v381_v1  ;;  %v507_v36 = vld [vmem:[#allocation9 + $0x4c0] sm:$0xf]  ;;  %v509_v1 = vld [vmem:[#allocation9 + $0x4d0] sm:$0xf] }
  0x59   :  { %615 = vmatprep.subr.mxu0 %v372_v3  ;;  %692 = vmatprep.subr.mxu1 %v374_v37  ;;  %v500_v3 = vld [vmem:[#allocation9 + $0x488] sm:$0xff]  ;;  %v502_v37 = vld [vmem:[#allocation9 + $0x498] sm:$0xff] }
  0x5a   :  { %616 = vmatpush1.msra.mxu0 %v371_v41  ;;  %693 = vmatpush1.msra.mxu1 %v373_v17  ;;  %v499_v41 = vld [vmem:[#allocation9 + $0x480] sm:$0xff]  ;;  %v501_v17 = vld [vmem:[#allocation9 + $0x490] sm:$0xff] }
  0x5b   :  { %617 = vmatprep.subr.mxu0 %v364_v2  ;;  %694 = vmatprep.subr.mxu1 %v366_v38  ;;  %v492_v2 = vld [vmem:[#allocation9 + $0x448] sm:$0xff]  ;;  %v494_v38 = vld [vmem:[#allocation9 + $0x458] sm:$0xff] }
  0x5c   :  { %618 = vmatpush1.msra.mxu0 %v363_v39  ;;  %695 = vmatpush1.msra.mxu1 %v365_v33  ;;  %v491_v39 = vld [vmem:[#allocation9 + $0x440] sm:$0xff]  ;;  %v493_v33 = vld [vmem:[#allocation9 + $0x450] sm:$0xff] }
  0x5d   :  { %619 = vmatprep.subr.mxu0 %v356_v18  ;;  %696 = vmatprep.subr.mxu1 %v358_v40  ;;  %v484_v18 = vld [vmem:[#allocation9 + $0x408] sm:$0xff]  ;;  %v486_v40 = vld [vmem:[#allocation9 + $0x418] sm:$0xff] }
  0x5e   :  { %620 = vmatpush1.msra.mxu0 %v355_v0  ;;  %697 = vmatpush1.msra.mxu1 %v357_v34  ;;  %v483_v0 = vld [vmem:[#allocation9 + $0x400] sm:$0xff] }
  0x5f   :  { %4632 = vmatprep.subr.msk.mxu0 %vm564_vm0, %v508_v16  ;;  %4636 = vmatprep.subr.msk.mxu1 %vm564_vm0, %v510_v35  ;;  %v6057_v34 = vld [vmem:[%s10496_s0 + $0x8] sm:$0xff]  ;;  %v485_v16 = vld [vmem:[#allocation9 + $0x410] sm:$0xff]  ;;  %v6062_v35 = vld [vmem:[%s10496_s0] sm:$0xff] }
  0x60   :  { %4633 = vmatpush2.msk.msra.mxu0 %vm564_vm0, %v507_v36  ;;  %4637 = vmatpush2.msk.msra.mxu1 %vm564_vm0, %v509_v1  ;;  %v480_v36 = vld [vmem:[#allocation9 + $0x3e8] sm:$0xff]  ;;  %v482_v1 = vld [vmem:[#allocation9 + $0x3f8] sm:$0xff] }
  0x61   :  { %647 = vmatprep.subr.mxu0 %v500_v3  ;;  %724 = vmatprep.subr.mxu1 %v502_v37  ;;  %v479_v3 = vld [vmem:[#allocation9 + $0x3e0] sm:$0xff]  ;;  %v481_v37 = vld [vmem:[#allocation9 + $0x3f0] sm:$0xff] }
  0x62   :  { %648 = vmatpush2.msra.mxu0 %v499_v41  ;;  %725 = vmatpush2.msra.mxu1 %v501_v17  ;;  %v472_v41 = vld [vmem:[#allocation9 + $0x3a8] sm:$0xff]  ;;  %v474_v17 = vld [vmem:[#allocation9 + $0x3b8] sm:$0xff] }
  0x63   :  { %649 = vmatprep.subr.mxu0 %v492_v2  ;;  %726 = vmatprep.subr.mxu1 %v494_v38  ;;  %v471_v2 = vld [vmem:[#allocation9 + $0x3a0] sm:$0xff]  ;;  %v473_v38 = vld [vmem:[#allocation9 + $0x3b0] sm:$0xff] }
  0x64   :  { %650 = vmatpush2.msra.mxu0 %v491_v39  ;;  %727 = vmatpush2.msra.mxu1 %v493_v33  ;;  %v464_v39 = vld [vmem:[#allocation9 + $0x368] sm:$0xff]  ;;  %v466_v33 = vld [vmem:[#allocation9 + $0x378] sm:$0xff] }
  0x65   :  { %651 = vmatprep.subr.mxu0 %v484_v18  ;;  %728 = vmatprep.subr.mxu1 %v486_v40  ;;  %v463_v18 = vld [vmem:[#allocation9 + $0x360] sm:$0xff]  ;;  %v465_v40 = vld [vmem:[#allocation9 + $0x370] sm:$0xff] }
  0x66   :  { %652 = vmatpush2.msra.mxu0 %v483_v0  ;;  %4634 = vmatprep.mubr.msk.f32.mxu0 %vm557_vm1, %v6057_v34  ;;  %v456_v0 = vld [vmem:[#allocation9 + $0x328] sm:$0xff] }
  0x67   :  { %729 = vmatpush2.msra.mxu1 %v485_v16  ;;  %4638 = vmatprep.mubr.msk.f32.mxu1 %vm557_vm1, %v6057_v34  ;;  %v458_v16 = vld [vmem:[#allocation9 + $0x338] sm:$0xff] }
  0x68   :  { %654 = vmatmul.mubr.f32.vlgmr.msra.gmra.mxu0 %v6062_v35  ;;  %731 = vmatmul.mubr.f32.vlgmr.msra.gmra.mxu1 %v6062_v35 }
  0x69   :  { %743 = vmatprep.subr.mxu0 %v480_v36  ;;  %820 = vmatprep.subr.mxu1 %v482_v1  ;;  %v448_v36 = vld [vmem:[#allocation9 + $0x2e8] sm:$0xff]  ;;  %v450_v1 = vld [vmem:[#allocation9 + $0x2f8] sm:$0xff] }
  0x6a   :  { %744 = vmatpush1.msra.mxu0 %v479_v3  ;;  %821 = vmatpush1.msra.mxu1 %v481_v37  ;;  %v447_v3 = vld [vmem:[#allocation9 + $0x2e0] sm:$0xff]  ;;  %v449_v37 = vld [vmem:[#allocation9 + $0x2f0] sm:$0xff] }
  0x6b   :  { %745 = vmatprep.subr.mxu0 %v472_v41  ;;  %822 = vmatprep.subr.mxu1 %v474_v17  ;;  %v440_v41 = vld [vmem:[#allocation9 + $0x2a8] sm:$0xff]  ;;  %v442_v17 = vld [vmem:[#allocation9 + $0x2b8] sm:$0xff] }
  0x6c   :  { %746 = vmatpush1.msra.mxu0 %v471_v2  ;;  %823 = vmatpush1.msra.mxu1 %v473_v38  ;;  %v439_v2 = vld [vmem:[#allocation9 + $0x2a0] sm:$0xff]  ;;  %v441_v38 = vld [vmem:[#allocation9 + $0x2b0] sm:$0xff] }
  0x6d   :  { %747 = vmatprep.subr.mxu0 %v464_v39  ;;  %824 = vmatprep.subr.mxu1 %v466_v33  ;;  %v432_v39 = vld [vmem:[#allocation9 + $0x268] sm:$0xff]  ;;  %v434_v33 = vld [vmem:[#allocation9 + $0x278] sm:$0xff] }
  0x6e   :  { %748 = vmatpush1.msra.mxu0 %v463_v18  ;;  %825 = vmatpush1.msra.mxu1 %v465_v40  ;;  %v431_v18 = vld [vmem:[#allocation9 + $0x260] sm:$0xff]  ;;  %v433_v40 = vld [vmem:[#allocation9 + $0x270] sm:$0xff] }
  0x6f   :  { %749 = vmatprep.subr.mxu0 %v456_v0  ;;  %826 = vmatprep.subr.mxu1 %v458_v16  ;;  %v424_v0 = vld [vmem:[#allocation9 + $0x228] sm:$0xff]  ;;  %v426_v16 = vld [vmem:[#allocation9 + $0x238] sm:$0xff] }
  0x70   :  { %750 = vmatpush1.msra.mxu0 %v455_v19  ;;  %827 = vmatpush1.msra.mxu1 %v457_v42  ;;  %v423_v19 = vld [vmem:[#allocation9 + $0x220] sm:$0xff]  ;;  %v425_v42 = vld [vmem:[#allocation9 + $0x230] sm:$0xff] }
  0x71   :  { %751 = vmatprep.subr.mxu0 %v448_v36  ;;  %828 = vmatprep.subr.mxu1 %v450_v1  ;;  %v416_v36 = vld [vmem:[#allocation9 + $0x1e8] sm:$0xff]  ;;  %v418_v1 = vld [vmem:[#allocation9 + $0x1f8] sm:$0xff] }
  0x72   :  { %752 = vmatpush1.msra.mxu0 %v447_v3  ;;  %829 = vmatpush1.msra.mxu1 %v449_v37  ;;  %v415_v3 = vld [vmem:[#allocation9 + $0x1e0] sm:$0xff]  ;;  %v417_v37 = vld [vmem:[#allocation9 + $0x1f0] sm:$0xff] }
  0x73   :  { %753 = vmatprep.subr.mxu0 %v440_v41  ;;  %830 = vmatprep.subr.mxu1 %v442_v17  ;;  %v408_v41 = vld [vmem:[#allocation9 + $0x1a8] sm:$0xff]  ;;  %v410_v17 = vld [vmem:[#allocation9 + $0x1b8] sm:$0xff] }
  0x74   :  { %754 = vmatpush1.msra.mxu0 %v439_v2  ;;  %831 = vmatpush1.msra.mxu1 %v441_v38  ;;  %v407_v2 = vld [vmem:[#allocation9 + $0x1a0] sm:$0xff]  ;;  %v409_v38 = vld [vmem:[#allocation9 + $0x1b0] sm:$0xff] }
  0x75   :  { %755 = vmatprep.subr.mxu0 %v432_v39  ;;  %832 = vmatprep.subr.mxu1 %v434_v33  ;;  %v400_v39 = vld [vmem:[#allocation9 + $0x168] sm:$0xff]  ;;  %v402_v33 = vld [vmem:[#allocation9 + $0x178] sm:$0xff] }
  0x76   :  { %756 = vmatpush1.msra.mxu0 %v431_v18  ;;  %833 = vmatpush1.msra.mxu1 %v433_v40  ;;  %v399_v18 = vld [vmem:[#allocation9 + $0x160] sm:$0xff]  ;;  %v401_v40 = vld [vmem:[#allocation9 + $0x170] sm:$0xff] }
  0x77   :  { %757 = vmatprep.subr.mxu0 %v424_v0  ;;  %834 = vmatprep.subr.mxu1 %v426_v16  ;;  %v392_v0 = vld [vmem:[#allocation9 + $0x128] sm:$0xff]  ;;  %v394_v16 = vld [vmem:[#allocation9 + $0x138] sm:$0xff] }
  0x78   :  { %758 = vmatpush1.msra.mxu0 %v423_v19  ;;  %835 = vmatpush1.msra.mxu1 %v425_v42  ;;  %v391_v19 = vld [vmem:[#allocation9 + $0x120] sm:$0xff]  ;;  %v393_v42 = vld [vmem:[#allocation9 + $0x130] sm:$0xff] }
  0x79   :  { %759 = vmatprep.subr.mxu0 %v416_v36  ;;  %836 = vmatprep.subr.mxu1 %v418_v1  ;;  %v384_v36 = vld [vmem:[#allocation9 + $0xe8] sm:$0xff]  ;;  %v386_v1 = vld [vmem:[#allocation9 + $0xf8] sm:$0xff] }
  0x7a   :  { %760 = vmatpush1.msra.mxu0 %v415_v3  ;;  %837 = vmatpush1.msra.mxu1 %v417_v37  ;;  %v383_v3 = vld [vmem:[#allocation9 + $0xe0] sm:$0xff]  ;;  %v385_v37 = vld [vmem:[#allocation9 + $0xf0] sm:$0xff] }
  0x7b   :  { %761 = vmatprep.subr.mxu0 %v408_v41  ;;  %838 = vmatprep.subr.mxu1 %v410_v17  ;;  %v376_v41 = vld [vmem:[#allocation9 + $0xa8] sm:$0xff]  ;;  %v378_v17 = vld [vmem:[#allocation9 + $0xb8] sm:$0xff] }
  0x7c   :  { %762 = vmatpush1.msra.mxu0 %v407_v2  ;;  %839 = vmatpush1.msra.mxu1 %v409_v38  ;;  %v375_v2 = vld [vmem:[#allocation9 + $0xa0] sm:$0xff]  ;;  %v377_v38 = vld [vmem:[#allocation9 + $0xb0] sm:$0xff] }
  0x7d   :  { %763 = vmatprep.subr.mxu0 %v400_v39  ;;  %840 = vmatprep.subr.mxu1 %v402_v33  ;;  %v368_v39 = vld [vmem:[#allocation9 + $0x68] sm:$0xff]  ;;  %v370_v33 = vld [vmem:[#allocation9 + $0x78] sm:$0xff] }
  0x7e   :  { %764 = vmatpush1.msra.mxu0 %v399_v18  ;;  %841 = vmatpush1.msra.mxu1 %v401_v40  ;;  %v367_v18 = vld [vmem:[#allocation9 + $0x60] sm:$0xff]  ;;  %v369_v40 = vld [vmem:[#allocation9 + $0x70] sm:$0xff] }
  0x7f   :  { %765 = vmatprep.subr.mxu0 %v392_v0  ;;  %842 = vmatprep.subr.mxu1 %v394_v16  ;;  %v360_v0 = vld [vmem:[#allocation9 + $0x28] sm:$0xff]  ;;  %v362_v16 = vld [vmem:[#allocation9 + $0x38] sm:$0xff] }
  0x80   :  { %766 = vmatpush1.msra.mxu0 %v391_v19  ;;  %843 = vmatpush1.msra.mxu1 %v393_v42  ;;  %v359_v19 = vld [vmem:[#allocation9 + $0x20] sm:$0xff]  ;;  %v361_v42 = vld [vmem:[#allocation9 + $0x30] sm:$0xff] }
  0x81   :  { %767 = vmatprep.subr.mxu0 %v384_v36  ;;  %844 = vmatprep.subr.mxu1 %v386_v1  ;;  %v512_v36 = vld [vmem:[#allocation9 + $0x4e8] sm:$0xf]  ;;  %v514_v1 = vld [vmem:[#allocation9 + $0x4f8] sm:$0xf] }
  0x82   :  { %768 = vmatpush1.msra.mxu0 %v383_v3  ;;  %845 = vmatpush1.msra.mxu1 %v385_v37  ;;  %v354_v3 = vld [vmem:[%s10496_s0 + $0x18] sm:$0xff]  ;;  %v511_v37 = vld [vmem:[#allocation9 + $0x4e0] sm:$0xf] }
  0x83   :  { %769 = vmatprep.subr.mxu0 %v376_v41  ;;  %846 = vmatprep.subr.mxu1 %v378_v17  ;;  %v513_v41 = vld [vmem:[#allocation9 + $0x4f0] sm:$0xf] }
  0x84   :  { %770 = vmatpush1.msra.mxu0 %v375_v2  ;;  %847 = vmatpush1.msra.mxu1 %v377_v38  ;;  %v353_v17 = vld [vmem:[%s10496_s0 + $0x10] sm:$0xff]  ;;  %v506_v38 = vld [vmem:[#allocation9 + $0x4b8] sm:$0xff] }
  0x85   :  { %771 = vmatprep.subr.mxu0 %v368_v39  ;;  %848 = vmatprep.subr.mxu1 %v370_v33  ;;  %v504_v2 = vld [vmem:[#allocation9 + $0x4a8] sm:$0xff]  ;;  %v503_v39 = vld [vmem:[#allocation9 + $0x4a0] sm:$0xff]  ;;  %v505_v33 = vld [vmem:[#allocation9 + $0x4b0] sm:$0xff] }
  0x86   :  { %772 = vmatpush1.msra.mxu0 %v367_v18  ;;  %849 = vmatpush1.msra.mxu1 %v369_v40  ;;  %v496_v18 = vld [vmem:[#allocation9 + $0x468] sm:$0xff]  ;;  %v498_v40 = vld [vmem:[#allocation9 + $0x478] sm:$0xff] }
  0x87   :  { %773 = vmatprep.subr.mxu0 %v360_v0  ;;  %850 = vmatprep.subr.mxu1 %v362_v16  ;;  %v495_v0 = vld [vmem:[#allocation9 + $0x460] sm:$0xff]  ;;  %v497_v16 = vld [vmem:[#allocation9 + $0x470] sm:$0xff] }
  0x88   :  { %774 = vmatpush1.msra.mxu0 %v359_v19  ;;  %851 = vmatpush1.msra.mxu1 %v361_v42  ;;  %v488_v19 = vld [vmem:[#allocation9 + $0x428] sm:$0xff]  ;;  %v490_v42 = vld [vmem:[#allocation9 + $0x438] sm:$0xff] }
  0x89   :  { %4640 = vmatprep.subr.msk.mxu0 %vm564_vm0, %v512_v36  ;;  %4644 = vmatprep.subr.msk.mxu1 %vm564_vm0, %v514_v1  ;;  %v487_v36 = vld [vmem:[#allocation9 + $0x420] sm:$0xff]  ;;  %v489_v1 = vld [vmem:[#allocation9 + $0x430] sm:$0xff] }
  0x8a   :  { %4635 = vmatprep.mubr.msk.f32.mxu0 %vm557_vm1, %v354_v3  ;;  %4639 = vmatprep.mubr.msk.f32.mxu1 %vm557_vm1, %v354_v3 }
  0x8b   :  { %4641 = vmatpush2.msk.msra.mxu0 %vm564_vm0, %v511_v37  ;;  %4645 = vmatpush2.msk.msra.mxu1 %vm564_vm0, %v513_v41  ;;  %v517_v37 = vlaneseq }
  0x8c   :  { %660 = vmatmul.mubr.f32.gmra.mxu0 %v353_v17  ;;  %737 = vmatmul.mubr.f32.gmra.mxu1 %v353_v17 }
  0x8d   :  { %801 = vmatprep.subr.mxu0 %v504_v2  ;;  %878 = vmatprep.subr.mxu1 %v506_v38  ;;  %v6090_v41 = vshrl.u32 %v517_v37, 7 }
  0x8e   :  { %802 = vmatpush2.msra.mxu0 %v503_v39  ;;  %879 = vmatpush2.msra.mxu1 %v505_v33  ;;  %v5670_v39 = vmov 1983009808  }
  0x8f   :  { %803 = vmatprep.subr.mxu0 %v496_v18  ;;  %880 = vmatprep.subr.mxu1 %v498_v40  ;;  %11383 = vst [vmem:[#allocation92_spill] sm:$0xff] %v6090_v41  ;;  %v10505_v2 = vsub.s32 0, %v6090_v41  ;;  %v527_v38 = vsub.s32 2, %v6090_v41  ;;  %v908_v33 = vunpack.c.l.s4 %v5670_v39  ;;  %v531_v18 = vsub.s32 3, %v6090_v41 }
  0x90   :  { %804 = vmatpush2.msra.mxu0 %v495_v0  ;;  %881 = vmatpush2.msra.mxu1 %v497_v16 }
  0x91   :  { %805 = vmatprep.subr.mxu0 %v488_v19  ;;  %882 = vmatprep.subr.mxu1 %v490_v42  ;;  %v909_v40 = vunpack.c.0.s8 %v908_v33 }
  0x92   :  { %806 = vmatpush2.msra.mxu0 %v487_v36  ;;  %4642 = vmatprep.mubr.msk.f32.mxu0 %vm557_vm1, %v6057_v34 }
  0x93   :  { %883 = vmatpush2.msra.mxu1 %v489_v1  ;;  %4646 = vmatprep.mubr.msk.f32.mxu1 %vm557_vm1, %v6057_v34  ;;  %v515_v34 = vld [vmem:[%s10498_s2] sm:$0xff]  ;;  %v6104_v39 = vsub.s32 %v909_v40, %v6090_v41  ;;  %v539_v40 = vsub.s32 5, %v6090_v41 }
  0x94   :  { %808 = vmatmul.mubr.f32.vlgmr.msra.gmra.mxu0 %v6062_v35  ;;  %885 = vmatmul.mubr.f32.vlgmr.msra.gmra.mxu1 %v6062_v35  ;;  %v10506_v35 = vsub.s32 1, %v6090_v41  ;;  %v532_v16 = vrot.slane %v515_v34, %v531_v18 }
  0x95   :  { %4643 = vmatprep.mubr.msk.f32.mxu0 %vm557_vm1, %v354_v3  ;;  %4647 = vmatprep.mubr.msk.f32.mxu1 %vm557_vm1, %v354_v3  ;;  %v520_v3 = vrot.slane %v515_v34, %v10505_v2  ;;  %11384 = vst [vmem:[#allocation93_spill] sm:$0xff] %v6104_v39 }
  0x96   :  { %v524_v0 = vrot.slane %v515_v34, %v10506_v35  ;;  %v543_v35 = vsub.s32 6, %v6090_v41 }
  0x98   :  { %814 = vmatmul.mubr.f32.gmra.mxu0 %v353_v17  ;;  %891 = vmatmul.mubr.f32.gmra.mxu1 %v353_v17  ;;  %v528_v17 = vrot.slane %v515_v34, %v527_v38  ;;  %v544_v22 = vrot.slane %v515_v34, %v543_v35 }
 0x128   :  { %v655_v19 = vpop.f32.mrf.mxu0  ;;  %v732_v42 = vpop.f32.mrf.mxu1 }
 0x129   :  { %v656_v36 = vadd.f32 %v655_v19, %v520_v3  ;;  %v733_v1 = vadd.f32 %v732_v42, %v528_v17 }
 0x12a   :  { %v657_v37 = vpop.f32.mrf.mxu0  ;;  %v734_v4 = vpop.f32.mrf.mxu1 }
 0x12b   :  { %v658_v43 = vadd.f32 %v657_v37, %v524_v0  ;;  %v735_v20 = vadd.f32 %v734_v4, %v532_v16  ;;  %v547_v4 = vsub.s32 7, %v6090_v41 }
 0x12d   :  { %v905_v44 = vcombine.low %v656_v36, %v658_v43  ;;  %v950_v5 = vcombine.high %v656_v36, %v658_v43  ;;  %v906_v2 = vcombine.low %v733_v1, %v735_v20  ;;  %v951_v38 = vcombine.high %v733_v1, %v735_v20 }
 0x12f   :  { %v6107_v33 = vrot.slane %v905_v44, %v6104_v39  ;;  %v6110_v18 = vrot.slane %v950_v5, %v6104_v39  ;;  %v6113_v19 = vrot.slane %v906_v2, %v6104_v39  ;;  %v6116_v42 = vrot.slane %v951_v38, %v6104_v39 }
 0x130   :  { %v535_v38 = vsub.s32 4, %v6090_v41 }
 0x131   :  { %11385 = vst [vmem:[#allocation94_spill] sm:$0xff] %v6107_v33  ;;  %11386 = vst [vmem:[#allocation95_spill] sm:$0xff] %v6110_v18 }
 0x132   :  { %11387 = vst [vmem:[#allocation96_spill] sm:$0xff] %v6113_v19  ;;  %11388 = vst [vmem:[#allocation97_spill] sm:$0xff] %v6116_v42  ;;  %v536_v47 = vrot.slane %v515_v34, %v535_v38 }
 0x14c   :  { %v661_v5 = vpop.f32.mrf.mxu0  ;;  %v738_v44 = vpop.f32.mrf.mxu1 }
 0x14d   :  { %v662_v36 = vadd.f32 %v661_v5, %v520_v3  ;;  %v739_v2 = vadd.f32 %v738_v44, %v528_v17  ;;  %v540_v3 = vrot.slane %v515_v34, %v539_v40  ;;  %v548_v17 = vrot.slane %v515_v34, %v547_v4 }
 0x14e   :  { %v663_v1 = vpop.f32.mrf.mxu0  ;;  %v740_v37 = vpop.f32.mrf.mxu1 }
 0x14f   :  { %v664_v45 = vadd.f32 %v663_v1, %v524_v0  ;;  %v741_v21 = vadd.f32 %v740_v37, %v532_v16 }
 0x151   :  { %v1004_v20 = vcombine.low %v662_v36, %v664_v45  ;;  %v1050_v46 = vcombine.high %v662_v36, %v664_v45  ;;  %v1005_v6 = vcombine.low %v739_v2, %v741_v21  ;;  %v1051_v43 = vcombine.high %v739_v2, %v741_v21 }
 0x153   :  { %v6131_v5 = vrot.slane %v1004_v20, %v6104_v39  ;;  %v6134_v44 = vrot.slane %v1050_v46, %v6104_v39  ;;  %v6137_v48 = vrot.slane %v1005_v6, %v6104_v39  ;;  %v6140_v0 = vrot.slane %v1051_v43, %v6104_v39 }
 0x154   :  { %v809_v16 = vpop.f32.mrf.mxu0  ;;  %v886_v45 = vpop.f32.mrf.mxu1 }
 0x155   :  { %11389 = vst [vmem:[#allocation98_spill] sm:$0xff] %v6131_v5  ;;  %11390 = vst [vmem:[#allocation99_spill] sm:$0xff] %v6134_v44  ;;  %v810_v4 = vadd.f32 %v809_v16, %v536_v47  ;;  %v887_v20 = vadd.f32 %v886_v45, %v544_v22 }
 0x156   :  { %11391 = vst [vmem:[#allocation100_spill] sm:$0xff] %v6137_v48  ;;  %11392 = vst [vmem:[#allocation101_spill] sm:$0xff] %v6140_v0  ;;  %v811_v40 = vpop.f32.mrf.mxu0  ;;  %v888_v6 = vpop.f32.mrf.mxu1 }
 0x157   :  { %v812_v43 = vadd.f32 %v811_v40, %v540_v3  ;;  %v889_v36 = vadd.f32 %v888_v6, %v548_v17 }
 0x158   :  { %v815_v2 = vpop.f32.mrf.mxu0  ;;  %v892_v1 = vpop.f32.mrf.mxu1 }
 0x159   :  { %v922_v37 = vcombine.low %v810_v4, %v812_v43  ;;  %v967_v38 = vcombine.high %v810_v4, %v812_v43  ;;  %v923_v21 = vcombine.low %v887_v20, %v889_v36  ;;  %v968_v41 = vcombine.high %v887_v20, %v889_v36 }
 0x15a   :  { %v817_v7 = vpop.f32.mrf.mxu0  ;;  %v894_v34 = vpop.f32.mrf.mxu1  ;;  %v816_v45 = vadd.f32 %v815_v2, %v536_v47  ;;  %v893_v40 = vadd.f32 %v892_v1, %v544_v22 }
 0x15b   :  { %v6151_v49 = vrot.slane %v922_v37, %v6104_v39  ;;  %v6154_v35 = vrot.slane %v967_v38, %v6104_v39  ;;  %v6157_v46 = vrot.slane %v923_v21, %v6104_v39  ;;  %v6160_v16 = vrot.slane %v968_v41, %v6104_v39 }
 0x15c   :  { %v818_v6 = vadd.f32 %v817_v7, %v540_v3  ;;  %v895_v4 = vadd.f32 %v894_v34, %v548_v17 }
 0x15d   :  { %11393 = vst [vmem:[#allocation102_spill] sm:$0xff] %v6151_v49  ;;  %11394 = vst [vmem:[#allocation103_spill] sm:$0xff] %v6154_v35 }
 0x15e   :  { %11395 = vst [vmem:[#allocation104_spill] sm:$0xff] %v6157_v46  ;;  %11396 = vst [vmem:[#allocation105_spill] sm:$0xff] %v6160_v16  ;;  %v1021_v37 = vcombine.low %v816_v45, %v818_v6  ;;  %v1067_v38 = vcombine.high %v816_v45, %v818_v6  ;;  %v1022_v41 = vcombine.low %v893_v40, %v895_v4 }
 0x15f   :  { %v1068_v23 = vcombine.high %v893_v40, %v895_v4 }
 0x160   :  { %v6171_v22 = vrot.slane %v1021_v37, %v6104_v39  ;;  %v6174_v7 = vrot.slane %v1067_v38, %v6104_v39  ;;  %v6177_v47 = vrot.slane %v1022_v41, %v6104_v39 }
 0x161   :  { %v6180_v3 = vrot.slane %v1068_v23, %v6104_v39 }
 0x162   :  { %11397 = vst [vmem:[#allocation106_spill] sm:$0xff] %v6171_v22  ;;  %11398 = vst [vmem:[#allocation107_spill] sm:$0xff] %v6174_v7 }
 0x163   :  { %11399 = vst [vmem:[#allocation108_spill] sm:$0xff] %v6177_v47  ;;  %11400 = vst [vmem:[#allocation109_spill] sm:$0xff] %v6180_v3 }
 0x164   :  { %5654 = dma.done.wait [#allocation8], 32768 }
 0x165   :  { %5655 = vsyncadd [#allocation8], 4294934528  ;;  %v10509_v45 = vmov 0.0   ;;  %v1223_v23 = vld [vmem:[#allocation3 + $0x3c8] sm:$0xff]  ;;  %v1225_v40 = vld [vmem:[#allocation3 + $0x3d8] sm:$0xff] }
 0x166   :  { %1422 = vmatprep.mubr.f32.mxu0 %v10509_v45  ;;  %1493 = vmatprep.mubr.f32.mxu1 %v10509_v45  ;;  %v1222_v6 = vld [vmem:[#allocation3 + $0x3c0] sm:$0xff]  ;;  %v1224_v4 = vld [vmem:[#allocation3 + $0x3d0] sm:$0xff]  ;;  %v1215_v37 = vld [vmem:[#allocation3 + $0x388] sm:$0xff] }
 0x167   :  { %1358 = vmatprep.subr.mxu0 %v1223_v23  ;;  %1429 = vmatprep.subr.mxu1 %v1225_v40  ;;  %v1217_v38 = vld [vmem:[#allocation3 + $0x398] sm:$0xff]  ;;  %v1214_v41 = vld [vmem:[#allocation3 + $0x380] sm:$0xff]  ;;  %v1216_v2 = vld [vmem:[#allocation3 + $0x390] sm:$0xff] }
 0x168   :  { %1359 = vmatpush1.msra.mxu0 %v1222_v6  ;;  %1430 = vmatpush1.msra.mxu1 %v1224_v4  ;;  %v1207_v1 = vld [vmem:[#allocation3 + $0x348] sm:$0xff]  ;;  %v1209_v34 = vld [vmem:[#allocation3 + $0x358] sm:$0xff]  ;;  %v1206_v17 = vld [vmem:[#allocation3 + $0x340] sm:$0xff] }
 0x169   :  { %1360 = vmatprep.subr.mxu0 %v1215_v37  ;;  %1431 = vmatprep.subr.mxu1 %v1217_v38  ;;  %v1208_v21 = vld [vmem:[#allocation3 + $0x350] sm:$0xff]  ;;  %v6192_v36 = vld [vmem:[#allocation3 + $0x308] sm:$0xff]  ;;  %v6194_v43 = vld [vmem:[#allocation3 + $0x318] sm:$0xff] }
 0x16a   :  { %1361 = vmatpush1.msra.mxu0 %v1214_v41  ;;  %1432 = vmatpush1.msra.mxu1 %v1216_v2  ;;  %v6196_v23 = vld [vmem:[#allocation3 + $0x300] sm:$0xff]  ;;  %v6198_v40 = vld [vmem:[#allocation3 + $0x310] sm:$0xff]  ;;  %v6200_v6 = vld [vmem:[#allocation3 + $0x2c8] sm:$0xff] }
 0x16b   :  { %1362 = vmatprep.subr.mxu0 %v1207_v1  ;;  %1433 = vmatprep.subr.mxu1 %v1209_v34  ;;  %v6202_v4 = vld [vmem:[#allocation3 + $0x2d8] sm:$0xff]  ;;  %v6206_v2 = vld [vmem:[#allocation3 + $0x2c0] sm:$0xff]  ;;  %v6208_v37 = vld [vmem:[#allocation3 + $0x2d0] sm:$0xff] }
 0x16c   :  { %1363 = vmatpush1.msra.mxu0 %v1206_v17  ;;  %1434 = vmatpush1.msra.mxu1 %v1208_v21  ;;  %v6212_v34 = vld [vmem:[#allocation3 + $0x288] sm:$0xff]  ;;  %v6214_v17 = vld [vmem:[#allocation3 + $0x298] sm:$0xff]  ;;  %v6218_v21 = vld [vmem:[#allocation3 + $0x280] sm:$0xff] }
 0x16d   :  { %1364 = vmatprep.subr.mxu0 %v6192_v36  ;;  %1435 = vmatprep.subr.mxu1 %v6194_v43  ;;  %v6220_v1 = vld [vmem:[#allocation3 + $0x290] sm:$0xff]  ;;  %v6224_v38 = vld [vmem:[#allocation3 + $0x248] sm:$0xff]  ;;  %v6226_v41 = vld [vmem:[#allocation3 + $0x258] sm:$0xff] }
 0x16e   :  { %1365 = vmatpush1.msra.mxu0 %v6196_v23  ;;  %1436 = vmatpush1.msra.mxu1 %v6198_v40  ;;  %v6230_v20 = vld [vmem:[#allocation3 + $0x240] sm:$0xff]  ;;  %v6232_v45 = vld [vmem:[#allocation3 + $0x250] sm:$0xff]  ;;  %v6236_v50 = vld [vmem:[#allocation3 + $0x208] sm:$0xff] }
 0x16f   :  { %1366 = vmatprep.subr.mxu0 %v6200_v6  ;;  %1437 = vmatprep.subr.mxu1 %v6202_v4  ;;  %v6238_v8 = vld [vmem:[#allocation3 + $0x218] sm:$0xff]  ;;  %v6242_v51 = vld [vmem:[#allocation3 + $0x200] sm:$0xff]  ;;  %v6244_v24 = vld [vmem:[#allocation3 + $0x210] sm:$0xff] }
 0x170   :  { %1367 = vmatpush1.msra.mxu0 %v6206_v2  ;;  %1438 = vmatpush1.msra.mxu1 %v6208_v37  ;;  %v6248_v52 = vld [vmem:[#allocation3 + $0x1c8] sm:$0xff]  ;;  %v6250_v9 = vld [vmem:[#allocation3 + $0x1d8] sm:$0xff]  ;;  %v6254_v53 = vld [vmem:[#allocation3 + $0x1c0] sm:$0xff] }
 0x171   :  { %1368 = vmatprep.subr.mxu0 %v6212_v34  ;;  %1439 = vmatprep.subr.mxu1 %v6214_v17  ;;  %v6256_v25 = vld [vmem:[#allocation3 + $0x1d0] sm:$0xff]  ;;  %v6260_v54 = vld [vmem:[#allocation3 + $0x188] sm:$0xff]  ;;  %v6262_v10 = vld [vmem:[#allocation3 + $0x198] sm:$0xff] }
 0x172   :  { %1369 = vmatpush1.msra.mxu0 %v6218_v21  ;;  %1440 = vmatpush1.msra.mxu1 %v6220_v1  ;;  %v6266_v55 = vld [vmem:[#allocation3 + $0x180] sm:$0xff]  ;;  %v6268_v26 = vld [vmem:[#allocation3 + $0x190] sm:$0xff]  ;;  %v6272_v56 = vld [vmem:[#allocation3 + $0x148] sm:$0xff] }
 0x173   :  { %1370 = vmatprep.subr.mxu0 %v6224_v38  ;;  %1441 = vmatprep.subr.mxu1 %v6226_v41  ;;  %v6274_v11 = vld [vmem:[#allocation3 + $0x158] sm:$0xff]  ;;  %v6278_v57 = vld [vmem:[#allocation3 + $0x140] sm:$0xff]  ;;  %v6280_v27 = vld [vmem:[#allocation3 + $0x150] sm:$0xff] }
 0x174   :  { %1371 = vmatpush1.msra.mxu0 %v6230_v20  ;;  %1442 = vmatpush1.msra.mxu1 %v6232_v45  ;;  %v6284_v58 = vld [vmem:[#allocation3 + $0x108] sm:$0xff]  ;;  %v6286_v12 = vld [vmem:[#allocation3 + $0x118] sm:$0xff]  ;;  %v6290_v59 = vld [vmem:[#allocation3 + $0x100] sm:$0xff] }
 0x175   :  { %1372 = vmatprep.subr.mxu0 %v6236_v50  ;;  %1443 = vmatprep.subr.mxu1 %v6238_v8  ;;  %v6292_v28 = vld [vmem:[#allocation3 + $0x110] sm:$0xff]  ;;  %v6296_v60 = vld [vmem:[#allocation3 + $0xc8] sm:$0xff]  ;;  %v6298_v13 = vld [vmem:[#allocation3 + $0xd8] sm:$0xff] }
 0x176   :  { %1373 = vmatpush1.msra.mxu0 %v6242_v51  ;;  %1444 = vmatpush1.msra.mxu1 %v6244_v24  ;;  %v6302_v29 = vld [vmem:[#allocation3 + $0xc0] sm:$0xff]  ;;  %v6304_v61 = vld [vmem:[#allocation3 + $0xd0] sm:$0xff]  ;;  %v6308_v14 = vld [vmem:[#allocation3 + $0x88] sm:$0xff] }
 0x177   :  { %1374 = vmatprep.subr.mxu0 %v6248_v52  ;;  %1445 = vmatprep.subr.mxu1 %v6250_v9  ;;  %v6310_v62 = vld [vmem:[#allocation3 + $0x98] sm:$0xff]  ;;  %v6314_v30 = vld [vmem:[#allocation3 + $0x80] sm:$0xff]  ;;  %v6316_v63 = vld [vmem:[#allocation3 + $0x90] sm:$0xff] }
 0x178   :  { %1375 = vmatpush1.msra.mxu0 %v6254_v53  ;;  %1446 = vmatpush1.msra.mxu1 %v6256_v25  ;;  %v6320_v15 = vld [vmem:[#allocation3 + $0x48] sm:$0xff]  ;;  %v6322_v32 = vld [vmem:[#allocation3 + $0x58] sm:$0xff]  ;;  %v6326_v31 = vld [vmem:[#allocation3 + $0x40] sm:$0xff] }
 0x179   :  { %1376 = vmatprep.subr.mxu0 %v6260_v54  ;;  %1447 = vmatprep.subr.mxu1 %v6262_v10  ;;  %v6328_v3 = vld [vmem:[#allocation3 + $0x50] sm:$0xff]  ;;  %v6332_v7 = vld [vmem:[#allocation3 + $0x8] sm:$0xff]  ;;  %v6334_v0 = vld [vmem:[#allocation3 + $0x18] sm:$0xff] }
 0x17a   :  { %1377 = vmatpush1.msra.mxu0 %v6266_v55  ;;  %1448 = vmatpush1.msra.mxu1 %v6268_v26  ;;  %v6338_v44 = vld [vmem:[#allocation3] sm:$0xff]  ;;  %v6340_v47 = vld [vmem:[#allocation3 + $0x10] sm:$0xff]  ;;  %v6344_v22 = vld [vmem:[#allocation3 + $0x7c8] sm:$0xff] }
 0x17b   :  { %1378 = vmatprep.subr.mxu0 %v6272_v56  ;;  %1449 = vmatprep.subr.mxu1 %v6274_v11  ;;  %11401 = vst [vmem:[#allocation110_spill] sm:$0xff] %v6344_v22  ;;  %v6346_v48 = vld [vmem:[#allocation3 + $0x7d8] sm:$0xff]  ;;  %v6350_v5 = vld [vmem:[#allocation3 + $0x7c0] sm:$0xff]  ;;  %v6352_v16 = vld [vmem:[#allocation3 + $0x7d0] sm:$0xff] }
 0x17c   :  { %1379 = vmatpush1.msra.mxu0 %v6278_v57  ;;  %1450 = vmatpush1.msra.mxu1 %v6280_v27  ;;  %11402 = vst [vmem:[#allocation111_spill] sm:$0xff] %v6346_v48  ;;  %11403 = vst [vmem:[#allocation112_spill] sm:$0xff] %v6350_v5  ;;  %v6356_v35 = vld [vmem:[#allocation3 + $0x788] sm:$0xff]  ;;  %v6358_v42 = vld [vmem:[#allocation3 + $0x798] sm:$0xff] }
 0x17d   :  { %1380 = vmatprep.subr.mxu0 %v6284_v58  ;;  %1451 = vmatprep.subr.mxu1 %v6286_v12  ;;  %11404 = vst [vmem:[#allocation113_spill] sm:$0xff] %v6352_v16  ;;  %11405 = vst [vmem:[#allocation114_spill] sm:$0xff] %v6356_v35  ;;  %v6362_v18 = vld [vmem:[#allocation3 + $0x780] sm:$0xff]  ;;  %v6364_v46 = vld [vmem:[#allocation3 + $0x790] sm:$0xff] }
 0x17e   :  { %1381 = vmatpush1.msra.mxu0 %v6290_v59  ;;  %1452 = vmatpush1.msra.mxu1 %v6292_v28  ;;  %11406 = vst [vmem:[#allocation115_spill] sm:$0xff] %v6358_v42  ;;  %11407 = vst [vmem:[#allocation116_spill] sm:$0xff] %v6362_v18  ;;  %v6368_v49 = vld [vmem:[#allocation3 + $0x748] sm:$0xff]  ;;  %v6370_v19 = vld [vmem:[#allocation3 + $0x758] sm:$0xff] }
 0x17f   :  { %1382 = vmatprep.subr.mxu0 %v6296_v60  ;;  %1453 = vmatprep.subr.mxu1 %v6298_v13  ;;  %11408 = vst [vmem:[#allocation117_spill] sm:$0xff] %v6364_v46  ;;  %11409 = vst [vmem:[#allocation118_spill] sm:$0xff] %v6368_v49  ;;  %v6374_v33 = vld [vmem:[#allocation3 + $0x740] sm:$0xff]  ;;  %v6376_v39 = vld [vmem:[#allocation3 + $0x750] sm:$0xff] }
 0x180   :  { %1383 = vmatpush1.msra.mxu0 %v6302_v29  ;;  %1454 = vmatpush1.msra.mxu1 %v6304_v61  ;;  %11410 = vst [vmem:[#allocation119_spill] sm:$0xff] %v6370_v19  ;;  %11411 = vst [vmem:[#allocation120_spill] sm:$0xff] %v6374_v33 }
 0x181   :  { %1384 = vmatprep.subr.mxu0 %v6308_v14  ;;  %1455 = vmatprep.subr.mxu1 %v6310_v62  ;;  %11412 = vst [vmem:[#allocation121_spill] sm:$0xff] %v6376_v39 }
 0x182   :  { %1385 = vmatpush1.msra.mxu0 %v6314_v30  ;;  %1456 = vmatpush1.msra.mxu1 %v6316_v63 }
 0x183   :  { %1386 = vmatprep.subr.mxu0 %v6320_v15  ;;  %1457 = vmatprep.subr.mxu1 %v6322_v32 }
 0x184   :  { %1387 = vmatpush1.msra.mxu0 %v6326_v31  ;;  %1458 = vmatpush1.msra.mxu1 %v6328_v3 }
 0x185   :  { %1388 = vmatprep.subr.mxu0 %v6332_v7  ;;  %1459 = vmatprep.subr.mxu1 %v6334_v0 }
 0x186   :  { %1389 = vmatpush1.msra.mxu0 %v6338_v44  ;;  %1460 = vmatpush1.msra.mxu1 %v6340_v47 }
 0x187   :  { %1390 = vmatprep.subr.mxu0 %v6344_v22  ;;  %1461 = vmatprep.subr.mxu1 %v6346_v48  ;;  %v6380_v48 = vld [vmem:[#allocation3 + $0x708] sm:$0xff]  ;;  %v6568_v22 = vld [vmem:[#allocation3 + $0x360] sm:$0xff] }
 0x188   :  { %1391 = vmatpush2.msra.mxu0 %v6350_v5  ;;  %1462 = vmatpush2.msra.mxu1 %v6352_v16  ;;  %11413 = vst [vmem:[#allocation122_spill] sm:$0xff] %v6380_v48  ;;  %v6382_v5 = vld [vmem:[#allocation3 + $0x718] sm:$0xff]  ;;  %v6386_v16 = vld [vmem:[#allocation3 + $0x700] sm:$0xff]  ;;  %11476 = vst [vmem:[#allocation184_spill] sm:$0xff] %v6568_v22 }
 0x189   :  { %1392 = vmatprep.subr.mxu0 %v6356_v35  ;;  %1463 = vmatprep.subr.mxu1 %v6358_v42  ;;  %11414 = vst [vmem:[#allocation123_spill] sm:$0xff] %v6382_v5  ;;  %11415 = vst [vmem:[#allocation124_spill] sm:$0xff] %v6386_v16  ;;  %v6388_v35 = vld [vmem:[#allocation3 + $0x710] sm:$0xff]  ;;  %v6392_v42 = vld [vmem:[#allocation3 + $0x6c8] sm:$0xff] }
 0x18a   :  { %1393 = vmatpush2.msra.mxu0 %v6362_v18  ;;  %1464 = vmatpush2.msra.mxu1 %v6364_v46  ;;  %11416 = vst [vmem:[#allocation125_spill] sm:$0xff] %v6388_v35  ;;  %11417 = vst [vmem:[#allocation126_spill] sm:$0xff] %v6392_v42  ;;  %v6394_v18 = vld [vmem:[#allocation3 + $0x6d8] sm:$0xff]  ;;  %v6398_v46 = vld [vmem:[#allocation3 + $0x6c0] sm:$0xff] }
 0x18b   :  { %1394 = vmatprep.subr.mxu0 %v6368_v49  ;;  %1465 = vmatprep.subr.mxu1 %v6370_v19  ;;  %11418 = vst [vmem:[#allocation127_spill] sm:$0xff] %v6394_v18  ;;  %11419 = vst [vmem:[#allocation128_spill] sm:$0xff] %v6398_v46  ;;  %v6400_v49 = vld [vmem:[#allocation3 + $0x6d0] sm:$0xff]  ;;  %v6404_v19 = vld [vmem:[#allocation3 + $0x688] sm:$0xff] }
 0x18c   :  { %1395 = vmatpush2.msra.mxu0 %v6374_v33  ;;  %1466 = vmatpush2.msra.mxu1 %v6376_v39  ;;  %11420 = vst [vmem:[#allocation129_spill] sm:$0xff] %v6400_v49  ;;  %11421 = vst [vmem:[#allocation130_spill] sm:$0xff] %v6404_v19  ;;  %v6406_v33 = vld [vmem:[#allocation3 + $0x698] sm:$0xff]  ;;  %v6410_v39 = vld [vmem:[#allocation3 + $0x680] sm:$0xff] }
 0x18d   :  { %1396 = vmatprep.subr.mxu0 %v6380_v48  ;;  %1467 = vmatprep.subr.mxu1 %v6382_v5  ;;  %11422 = vst [vmem:[#allocation131_spill] sm:$0xff] %v6406_v33  ;;  %11423 = vst [vmem:[#allocation132_spill] sm:$0xff] %v6410_v39  ;;  %v6412_v48 = vld [vmem:[#allocation3 + $0x690] sm:$0xff]  ;;  %v6416_v5 = vld [vmem:[#allocation3 + $0x648] sm:$0xff] }
 0x18e   :  { %1397 = vmatpush2.msra.mxu0 %v6386_v16  ;;  %1468 = vmatpush2.msra.mxu1 %v6388_v35  ;;  %11424 = vst [vmem:[#allocation133_spill] sm:$0xff] %v6412_v48  ;;  %11425 = vst [vmem:[#allocation134_spill] sm:$0xff] %v6416_v5  ;;  %v6418_v16 = vld [vmem:[#allocation3 + $0x658] sm:$0xff]  ;;  %v6422_v35 = vld [vmem:[#allocation3 + $0x640] sm:$0xff] }
 0x18f   :  { %1398 = vmatprep.subr.mxu0 %v6392_v42  ;;  %1469 = vmatprep.subr.mxu1 %v6394_v18  ;;  %11426 = vst [vmem:[#allocation135_spill] sm:$0xff] %v6418_v16  ;;  %11427 = vst [vmem:[#allocation136_spill] sm:$0xff] %v6422_v35  ;;  %v6424_v42 = vld [vmem:[#allocation3 + $0x650] sm:$0xff]  ;;  %v6428_v18 = vld [vmem:[#allocation3 + $0x608] sm:$0xff] }
 0x190   :  { %1399 = vmatpush2.msra.mxu0 %v6398_v46  ;;  %1470 = vmatpush2.msra.mxu1 %v6400_v49  ;;  %11428 = vst [vmem:[#allocation137_spill] sm:$0xff] %v6424_v42  ;;  %11429 = vst [vmem:[#allocation138_spill] sm:$0xff] %v6428_v18  ;;  %v6430_v46 = vld [vmem:[#allocation3 + $0x618] sm:$0xff]  ;;  %v6434_v49 = vld [vmem:[#allocation3 + $0x600] sm:$0xff] }
 0x191   :  { %1400 = vmatprep.subr.mxu0 %v6404_v19  ;;  %1471 = vmatprep.subr.mxu1 %v6406_v33  ;;  %11430 = vst [vmem:[#allocation139_spill] sm:$0xff] %v6430_v46  ;;  %11431 = vst [vmem:[#allocation140_spill] sm:$0xff] %v6434_v49  ;;  %v6436_v19 = vld [vmem:[#allocation3 + $0x610] sm:$0xff]  ;;  %v6440_v33 = vld [vmem:[#allocation3 + $0x5c8] sm:$0xff] }
 0x192   :  { %1401 = vmatpush2.msra.mxu0 %v6410_v39  ;;  %1472 = vmatpush2.msra.mxu1 %v6412_v48  ;;  %11432 = vst [vmem:[#allocation141_spill] sm:$0xff] %v6436_v19  ;;  %11433 = vst [vmem:[#allocation142_spill] sm:$0xff] %v6440_v33  ;;  %v6442_v39 = vld [vmem:[#allocation3 + $0x5d8] sm:$0xff]  ;;  %v6446_v48 = vld [vmem:[#allocation3 + $0x5c0] sm:$0xff] }
 0x193   :  { %1402 = vmatprep.subr.mxu0 %v6416_v5  ;;  %1473 = vmatprep.subr.mxu1 %v6418_v16  ;;  %11434 = vst [vmem:[#allocation143_spill] sm:$0xff] %v6442_v39  ;;  %11435 = vst [vmem:[#allocation144_spill] sm:$0xff] %v6446_v48  ;;  %v6448_v5 = vld [vmem:[#allocation3 + $0x5d0] sm:$0xff]  ;;  %v6452_v16 = vld [vmem:[#allocation3 + $0x588] sm:$0xff] }
 0x194   :  { %1403 = vmatpush2.msra.mxu0 %v6422_v35  ;;  %1474 = vmatpush2.msra.mxu1 %v6424_v42  ;;  %11436 = vst [vmem:[#allocation145_spill] sm:$0xff] %v6448_v5  ;;  %11437 = vst [vmem:[#allocation146_spill] sm:$0xff] %v6452_v16  ;;  %v6454_v35 = vld [vmem:[#allocation3 + $0x598] sm:$0xff]  ;;  %v6458_v42 = vld [vmem:[#allocation3 + $0x580] sm:$0xff] }
 0x195   :  { %1404 = vmatprep.subr.mxu0 %v6428_v18  ;;  %1475 = vmatprep.subr.mxu1 %v6430_v46  ;;  %11438 = vst [vmem:[#allocation147_spill] sm:$0xff] %v6454_v35  ;;  %11439 = vst [vmem:[#allocation148_spill] sm:$0xff] %v6458_v42  ;;  %v6460_v18 = vld [vmem:[#allocation3 + $0x590] sm:$0xff]  ;;  %v6464_v46 = vld [vmem:[#allocation3 + $0x548] sm:$0xff] }
 0x196   :  { %1405 = vmatpush2.msra.mxu0 %v6434_v49  ;;  %1476 = vmatpush2.msra.mxu1 %v6436_v19  ;;  %11440 = vst [vmem:[#allocation149_spill] sm:$0xff] %v6460_v18  ;;  %11441 = vst [vmem:[#allocation150_spill] sm:$0xff] %v6464_v46  ;;  %v6466_v49 = vld [vmem:[#allocation3 + $0x558] sm:$0xff]  ;;  %v6470_v19 = vld [vmem:[#allocation3 + $0x540] sm:$0xff] }
 0x197   :  { %1406 = vmatprep.subr.mxu0 %v6440_v33  ;;  %1477 = vmatprep.subr.mxu1 %v6442_v39  ;;  %11442 = vst [vmem:[#allocation151_spill] sm:$0xff] %v6466_v49  ;;  %11443 = vst [vmem:[#allocation152_spill] sm:$0xff] %v6470_v19  ;;  %v6472_v33 = vld [vmem:[#allocation3 + $0x550] sm:$0xff]  ;;  %v6476_v39 = vld [vmem:[#allocation3 + $0x508] sm:$0xff] }
 0x198   :  { %1407 = vmatpush2.msra.mxu0 %v6446_v48  ;;  %1478 = vmatpush2.msra.mxu1 %v6448_v5  ;;  %11444 = vst [vmem:[#allocation153_spill] sm:$0xff] %v6472_v33  ;;  %11445 = vst [vmem:[#allocation154_spill] sm:$0xff] %v6476_v39  ;;  %v6478_v48 = vld [vmem:[#allocation3 + $0x518] sm:$0xff]  ;;  %v6482_v5 = vld [vmem:[#allocation3 + $0x500] sm:$0xff] }
 0x199   :  { %1408 = vmatprep.subr.mxu0 %v6452_v16  ;;  %1479 = vmatprep.subr.mxu1 %v6454_v35  ;;  %11446 = vst [vmem:[#allocation155_spill] sm:$0xff] %v6478_v48  ;;  %11447 = vst [vmem:[#allocation156_spill] sm:$0xff] %v6482_v5  ;;  %v6484_v16 = vld [vmem:[#allocation3 + $0x510] sm:$0xff]  ;;  %v6488_v35 = vld [vmem:[#allocation3 + $0x4c8] sm:$0xff] }
 0x19a   :  { %1409 = vmatpush2.msra.mxu0 %v6458_v42  ;;  %1480 = vmatpush2.msra.mxu1 %v6460_v18  ;;  %11448 = vst [vmem:[#allocation157_spill] sm:$0xff] %v6484_v16  ;;  %11449 = vst [vmem:[#allocation158_spill] sm:$0xff] %v6488_v35  ;;  %v6490_v42 = vld [vmem:[#allocation3 + $0x4d8] sm:$0xff]  ;;  %v6494_v18 = vld [vmem:[#allocation3 + $0x4c0] sm:$0xff] }
 0x19b   :  { %1410 = vmatprep.subr.mxu0 %v6464_v46  ;;  %1481 = vmatprep.subr.mxu1 %v6466_v49  ;;  %11450 = vst [vmem:[#allocation159_spill] sm:$0xff] %v6490_v42  ;;  %11451 = vst [vmem:[#allocation160_spill] sm:$0xff] %v6494_v18  ;;  %v6496_v46 = vld [vmem:[#allocation3 + $0x4d0] sm:$0xff]  ;;  %v6500_v49 = vld [vmem:[#allocation3 + $0x488] sm:$0xff] }
 0x19c   :  { %1411 = vmatpush2.msra.mxu0 %v6470_v19  ;;  %1482 = vmatpush2.msra.mxu1 %v6472_v33  ;;  %11452 = vst [vmem:[#allocation161_spill] sm:$0xff] %v6496_v46  ;;  %11453 = vst [vmem:[#allocation162_spill] sm:$0xff] %v6500_v49  ;;  %v6502_v19 = vld [vmem:[#allocation3 + $0x498] sm:$0xff]  ;;  %v6506_v33 = vld [vmem:[#allocation3 + $0x480] sm:$0xff] }
 0x19d   :  { %1412 = vmatprep.subr.mxu0 %v6476_v39  ;;  %1483 = vmatprep.subr.mxu1 %v6478_v48  ;;  %11454 = vst [vmem:[#allocation163_spill] sm:$0xff] %v6502_v19  ;;  %11455 = vst [vmem:[#allocation164_spill] sm:$0xff] %v6506_v33  ;;  %v6508_v39 = vld [vmem:[#allocation3 + $0x490] sm:$0xff]  ;;  %v6512_v48 = vld [vmem:[#allocation3 + $0x448] sm:$0xff] }
 0x19e   :  { %1413 = vmatpush2.msra.mxu0 %v6482_v5  ;;  %1484 = vmatpush2.msra.mxu1 %v6484_v16  ;;  %11456 = vst [vmem:[#allocation165_spill] sm:$0xff] %v6508_v39  ;;  %11457 = vst [vmem:[#allocation166_spill] sm:$0xff] %v6512_v48  ;;  %v6514_v5 = vld [vmem:[#allocation3 + $0x458] sm:$0xff]  ;;  %v6518_v16 = vld [vmem:[#allocation3 + $0x440] sm:$0xff] }
 0x19f   :  { %1414 = vmatprep.subr.mxu0 %v6488_v35  ;;  %1485 = vmatprep.subr.mxu1 %v6490_v42  ;;  %11458 = vst [vmem:[#allocation167_spill] sm:$0xff] %v6514_v5  ;;  %11459 = vst [vmem:[#allocation168_spill] sm:$0xff] %v6518_v16  ;;  %v6520_v35 = vld [vmem:[#allocation3 + $0x450] sm:$0xff]  ;;  %v6524_v42 = vld [vmem:[#allocation3 + $0x408] sm:$0xff] }
 0x1a0   :  { %1415 = vmatpush2.msra.mxu0 %v6494_v18  ;;  %1486 = vmatpush2.msra.mxu1 %v6496_v46  ;;  %11460 = vst [vmem:[#allocation169_spill] sm:$0xff] %v6520_v35  ;;  %11461 = vst [vmem:[#allocation170_spill] sm:$0xff] %v6524_v42  ;;  %v6526_v18 = vld [vmem:[#allocation3 + $0x418] sm:$0xff]  ;;  %v6530_v46 = vld [vmem:[#allocation3 + $0x400] sm:$0xff] }
 0x1a1   :  { %1416 = vmatprep.subr.mxu0 %v6500_v49  ;;  %1487 = vmatprep.subr.mxu1 %v6502_v19  ;;  %11462 = vst [vmem:[#allocation171_spill] sm:$0xff] %v6526_v18  ;;  %11463 = vst [vmem:[#allocation172_spill] sm:$0xff] %v6530_v46  ;;  %v6532_v49 = vld [vmem:[#allocation3 + $0x410] sm:$0xff]  ;;  %v11469_v19 = vmov 0.0  }
 0x1a2   :  { %1417 = vmatpush2.msra.mxu0 %v6506_v33  ;;  %1488 = vmatpush2.msra.mxu1 %v6508_v39  ;;  %11464 = vst [vmem:[#allocation173_spill] sm:$0xff] %v6532_v49  ;;  %v6538_v39 = vld [vmem:[#allocation3 + $0x3e8] sm:$0xff]  ;;  %v6540_v33 = vld [vmem:[#allocation3 + $0x3f8] sm:$0xff] }
 0x1a3   :  { %1418 = vmatprep.subr.mxu0 %v6512_v48  ;;  %1489 = vmatprep.subr.mxu1 %v6514_v5  ;;  %11465 = vst [vmem:[#allocation174_spill] sm:$0xff] %v6538_v39  ;;  %11466 = vst [vmem:[#allocation175_spill] sm:$0xff] %v6540_v33  ;;  %v6544_v5 = vld [vmem:[#allocation3 + $0x3e0] sm:$0xff]  ;;  %v6546_v48 = vld [vmem:[#allocation3 + $0x3f0] sm:$0xff] }
 0x1a4   :  { %1419 = vmatpush2.msra.mxu0 %v6518_v16  ;;  %1490 = vmatpush2.msra.mxu1 %v6520_v35  ;;  %11467 = vst [vmem:[#allocation176_spill] sm:$0xff] %v6544_v5  ;;  %11468 = vst [vmem:[#allocation177_spill] sm:$0xff] %v6546_v48  ;;  %v6550_v35 = vld [vmem:[#allocation3 + $0x3a8] sm:$0xff]  ;;  %v6564_v16 = vld [vmem:[#allocation3 + $0x378] sm:$0xff] }
 0x1a5   :  { %1420 = vmatprep.subr.mxu0 %v6524_v42  ;;  %1491 = vmatprep.subr.mxu1 %v6526_v18  ;;  %11470 = vst [vmem:[#allocation178_spill] sm:$0xff] %v6550_v35  ;;  %v6552_v42 = vld [vmem:[#allocation3 + $0x3b8] sm:$0xff]  ;;  %v6556_v18 = vld [vmem:[#allocation3 + $0x3a0] sm:$0xff]  ;;  %11475 = vst [vmem:[#allocation183_spill] sm:$0xff] %v6564_v16 }
 0x1a6   :  { %1421 = vmatpush2.msra.mxu0 %v6530_v46  ;;  %1492 = vmatpush2.msra.mxu1 %v6532_v49  ;;  %11471 = vst [vmem:[#allocation179_spill] sm:$0xff] %v6552_v42  ;;  %11472 = vst [vmem:[#allocation180_spill] sm:$0xff] %v6556_v18  ;;  %v6558_v46 = vld [vmem:[#allocation3 + $0x3b0] sm:$0xff]  ;;  %v6562_v49 = vld [vmem:[#allocation3 + $0x368] sm:$0xff] }
 0x1a7   :  { %1423 = vmatmul.mubr.f32.vlgmr.msra.gmra.mxu0 %v11469_v19  ;;  %1494 = vmatmul.mubr.f32.vlgmr.msra.gmra.mxu1 %v11469_v19  ;;  %11473 = vst [vmem:[#allocation181_spill] sm:$0xff] %v6558_v46  ;;  %11474 = vst [vmem:[#allocation182_spill] sm:$0xff] %v6562_v49 }
 0x1a8   :  { %1500 = vmatprep.subr.mxu0 %v6538_v39  ;;  %1571 = vmatprep.subr.mxu1 %v6540_v33  ;;  %v6570_v39 = vld [vmem:[#allocation3 + $0x370] sm:$0xff]  ;;  %v6574_v33 = vld [vmem:[#allocation3 + $0x328] sm:$0xff] }
 0x1a9   :  { %1501 = vmatpush1.msra.mxu0 %v6544_v5  ;;  %1572 = vmatpush1.msra.mxu1 %v6546_v48  ;;  %11477 = vst [vmem:[#allocation185_spill] sm:$0xff] %v6570_v39  ;;  %11478 = vst [vmem:[#allocation186_spill] sm:$0xff] %v6574_v33  ;;  %v6576_v5 = vld [vmem:[#allocation3 + $0x338] sm:$0xff]  ;;  %v6580_v48 = vld [vmem:[#allocation3 + $0x320] sm:$0xff] }
 0x1aa   :  { %1502 = vmatprep.subr.mxu0 %v6550_v35  ;;  %1573 = vmatprep.subr.mxu1 %v6552_v42  ;;  %11479 = vst [vmem:[#allocation187_spill] sm:$0xff] %v6576_v5  ;;  %11480 = vst [vmem:[#allocation188_spill] sm:$0xff] %v6580_v48  ;;  %v6582_v35 = vld [vmem:[#allocation3 + $0x330] sm:$0xff]  ;;  %v6586_v42 = vld [vmem:[#allocation3 + $0x2e8] sm:$0xff] }
 0x1ab   :  { %1503 = vmatpush1.msra.mxu0 %v6556_v18  ;;  %1574 = vmatpush1.msra.mxu1 %v6558_v46  ;;  %11481 = vst [vmem:[#allocation189_spill] sm:$0xff] %v6582_v35  ;;  %11482 = vst [vmem:[#allocation190_spill] sm:$0xff] %v6586_v42  ;;  %v6588_v18 = vld [vmem:[#allocation3 + $0x2f8] sm:$0xff]  ;;  %v6592_v46 = vld [vmem:[#allocation3 + $0x2e0] sm:$0xff] }
 0x1ac   :  { %1504 = vmatprep.subr.mxu0 %v6562_v49  ;;  %1575 = vmatprep.subr.mxu1 %v6564_v16  ;;  %11483 = vst [vmem:[#allocation191_spill] sm:$0xff] %v6588_v18  ;;  %11484 = vst [vmem:[#allocation192_spill] sm:$0xff] %v6592_v46  ;;  %v6594_v49 = vld [vmem:[#allocation3 + $0x2f0] sm:$0xff]  ;;  %v6598_v16 = vld [vmem:[#allocation3 + $0x2a8] sm:$0xff] }
 0x1ad   :  { %1505 = vmatpush1.msra.mxu0 %v6568_v22  ;;  %1576 = vmatpush1.msra.mxu1 %v6570_v39  ;;  %11485 = vst [vmem:[#allocation193_spill] sm:$0xff] %v6594_v49  ;;  %11486 = vst [vmem:[#allocation194_spill] sm:$0xff] %v6598_v16  ;;  %v6600_v22 = vld [vmem:[#allocation3 + $0x2b8] sm:$0xff]  ;;  %v6604_v39 = vld [vmem:[#allocation3 + $0x2a0] sm:$0xff] }
 0x1ae   :  { %1506 = vmatprep.subr.mxu0 %v6574_v33  ;;  %1577 = vmatprep.subr.mxu1 %v6576_v5  ;;  %11487 = vst [vmem:[#allocation195_spill] sm:$0xff] %v6600_v22  ;;  %11488 = vst [vmem:[#allocation196_spill] sm:$0xff] %v6604_v39  ;;  %v6606_v33 = vld [vmem:[#allocation3 + $0x2b0] sm:$0xff]  ;;  %v6610_v5 = vld [vmem:[#allocation3 + $0x268] sm:$0xff] }
 0x1af   :  { %1507 = vmatpush1.msra.mxu0 %v6580_v48  ;;  %1578 = vmatpush1.msra.mxu1 %v6582_v35  ;;  %11489 = vst [vmem:[#allocation197_spill] sm:$0xff] %v6606_v33  ;;  %11490 = vst [vmem:[#allocation198_spill] sm:$0xff] %v6610_v5  ;;  %v6612_v48 = vld [vmem:[#allocation3 + $0x278] sm:$0xff]  ;;  %v6616_v35 = vld [vmem:[#allocation3 + $0x260] sm:$0xff] }
 0x1b0   :  { %1508 = vmatprep.subr.mxu0 %v6586_v42  ;;  %1579 = vmatprep.subr.mxu1 %v6588_v18  ;;  %11491 = vst [vmem:[#allocation199_spill] sm:$0xff] %v6612_v48  ;;  %11492 = vst [vmem:[#allocation200_spill] sm:$0xff] %v6616_v35  ;;  %v6618_v42 = vld [vmem:[#allocation3 + $0x270] sm:$0xff]  ;;  %v6622_v18 = vld [vmem:[#allocation3 + $0x228] sm:$0xff] }
 0x1b1   :  { %1509 = vmatpush1.msra.mxu0 %v6592_v46  ;;  %1580 = vmatpush1.msra.mxu1 %v6594_v49  ;;  %11493 = vst [vmem:[#allocation201_spill] sm:$0xff] %v6618_v42  ;;  %11494 = vst [vmem:[#allocation202_spill] sm:$0xff] %v6622_v18  ;;  %v6624_v46 = vld [vmem:[#allocation3 + $0x238] sm:$0xff]  ;;  %v6628_v49 = vld [vmem:[#allocation3 + $0x220] sm:$0xff] }
 0x1b2   :  { %1510 = vmatprep.subr.mxu0 %v6598_v16  ;;  %1581 = vmatprep.subr.mxu1 %v6600_v22  ;;  %11495 = vst [vmem:[#allocation203_spill] sm:$0xff] %v6624_v46  ;;  %11496 = vst [vmem:[#allocation204_spill] sm:$0xff] %v6628_v49  ;;  %v6630_v16 = vld [vmem:[#allocation3 + $0x230] sm:$0xff]  ;;  %v6634_v22 = vld [vmem:[#allocation3 + $0x1e8] sm:$0xff] }
 0x1b3   :  { %1511 = vmatpush1.msra.mxu0 %v6604_v39  ;;  %1582 = vmatpush1.msra.mxu1 %v6606_v33  ;;  %11497 = vst [vmem:[#allocation205_spill] sm:$0xff] %v6630_v16  ;;  %11498 = vst [vmem:[#allocation206_spill] sm:$0xff] %v6634_v22  ;;  %v6636_v39 = vld [vmem:[#allocation3 + $0x1f8] sm:$0xff]  ;;  %v6640_v33 = vld [vmem:[#allocation3 + $0x1e0] sm:$0xff] }
 0x1b4   :  { %1512 = vmatprep.subr.mxu0 %v6610_v5  ;;  %1583 = vmatprep.subr.mxu1 %v6612_v48  ;;  %11499 = vst [vmem:[#allocation207_spill] sm:$0xff] %v6636_v39  ;;  %11500 = vst [vmem:[#allocation208_spill] sm:$0xff] %v6640_v33  ;;  %v6642_v5 = vld [vmem:[#allocation3 + $0x1f0] sm:$0xff]  ;;  %v6646_v48 = vld [vmem:[#allocation3 + $0x1a8] sm:$0xff] }
 0x1b5   :  { %1513 = vmatpush1.msra.mxu0 %v6616_v35  ;;  %1584 = vmatpush1.msra.mxu1 %v6618_v42  ;;  %11501 = vst [vmem:[#allocation209_spill] sm:$0xff] %v6642_v5  ;;  %11502 = vst [vmem:[#allocation210_spill] sm:$0xff] %v6646_v48  ;;  %v6648_v35 = vld [vmem:[#allocation3 + $0x1b8] sm:$0xff]  ;;  %v6652_v42 = vld [vmem:[#allocation3 + $0x1a0] sm:$0xff] }
 0x1b6   :  { %1514 = vmatprep.subr.mxu0 %v6622_v18  ;;  %1585 = vmatprep.subr.mxu1 %v6624_v46  ;;  %11503 = vst [vmem:[#allocation211_spill] sm:$0xff] %v6648_v35  ;;  %11504 = vst [vmem:[#allocation212_spill] sm:$0xff] %v6652_v42  ;;  %v6654_v18 = vld [vmem:[#allocation3 + $0x1b0] sm:$0xff]  ;;  %v6658_v46 = vld [vmem:[#allocation3 + $0x168] sm:$0xff] }
 0x1b7   :  { %1515 = vmatpush1.msra.mxu0 %v6628_v49  ;;  %1586 = vmatpush1.msra.mxu1 %v6630_v16  ;;  %11505 = vst [vmem:[#allocation213_spill] sm:$0xff] %v6654_v18  ;;  %11506 = vst [vmem:[#allocation214_spill] sm:$0xff] %v6658_v46  ;;  %v6660_v49 = vld [vmem:[#allocation3 + $0x178] sm:$0xff]  ;;  %v6664_v16 = vld [vmem:[#allocation3 + $0x160] sm:$0xff] }
 0x1b8   :  { %1516 = vmatprep.subr.mxu0 %v6634_v22  ;;  %1587 = vmatprep.subr.mxu1 %v6636_v39  ;;  %11507 = vst [vmem:[#allocation215_spill] sm:$0xff] %v6660_v49  ;;  %11508 = vst [vmem:[#allocation216_spill] sm:$0xff] %v6664_v16  ;;  %v6666_v22 = vld [vmem:[#allocation3 + $0x170] sm:$0xff]  ;;  %v6670_v39 = vld [vmem:[#allocation3 + $0x128] sm:$0xff] }
 0x1b9   :  { %1517 = vmatpush1.msra.mxu0 %v6640_v33  ;;  %1588 = vmatpush1.msra.mxu1 %v6642_v5  ;;  %11509 = vst [vmem:[#allocation217_spill] sm:$0xff] %v6666_v22  ;;  %11510 = vst [vmem:[#allocation218_spill] sm:$0xff] %v6670_v39  ;;  %v6672_v33 = vld [vmem:[#allocation3 + $0x138] sm:$0xff]  ;;  %v6676_v5 = vld [vmem:[#allocation3 + $0x120] sm:$0xff] }
 0x1ba   :  { %1518 = vmatprep.subr.mxu0 %v6646_v48  ;;  %1589 = vmatprep.subr.mxu1 %v6648_v35  ;;  %11511 = vst [vmem:[#allocation219_spill] sm:$0xff] %v6672_v33  ;;  %11512 = vst [vmem:[#allocation220_spill] sm:$0xff] %v6676_v5  ;;  %v6678_v48 = vld [vmem:[#allocation3 + $0x130] sm:$0xff]  ;;  %v6682_v35 = vld [vmem:[#allocation3 + $0xe8] sm:$0xff] }
 0x1bb   :  { %1519 = vmatpush1.msra.mxu0 %v6652_v42  ;;  %1590 = vmatpush1.msra.mxu1 %v6654_v18  ;;  %11513 = vst [vmem:[#allocation221_spill] sm:$0xff] %v6678_v48  ;;  %11514 = vst [vmem:[#allocation222_spill] sm:$0xff] %v6682_v35  ;;  %v6684_v42 = vld [vmem:[#allocation3 + $0xf8] sm:$0xff]  ;;  %v6688_v18 = vld [vmem:[#allocation3 + $0xe0] sm:$0xff] }
 0x1bc   :  { %1520 = vmatprep.subr.mxu0 %v6658_v46  ;;  %1591 = vmatprep.subr.mxu1 %v6660_v49  ;;  %11515 = vst [vmem:[#allocation223_spill] sm:$0xff] %v6684_v42  ;;  %11516 = vst [vmem:[#allocation224_spill] sm:$0xff] %v6688_v18  ;;  %v6690_v46 = vld [vmem:[#allocation3 + $0xf0] sm:$0xff]  ;;  %v6694_v49 = vld [vmem:[#allocation3 + $0xa8] sm:$0xff] }
 0x1bd   :  { %1521 = vmatpush1.msra.mxu0 %v6664_v16  ;;  %1592 = vmatpush1.msra.mxu1 %v6666_v22  ;;  %11517 = vst [vmem:[#allocation225_spill] sm:$0xff] %v6690_v46  ;;  %11518 = vst [vmem:[#allocation226_spill] sm:$0xff] %v6694_v49  ;;  %v6696_v16 = vld [vmem:[#allocation3 + $0xb8] sm:$0xff]  ;;  %v6700_v22 = vld [vmem:[#allocation3 + $0xa0] sm:$0xff] }
 0x1be   :  { %1522 = vmatprep.subr.mxu0 %v6670_v39  ;;  %1593 = vmatprep.subr.mxu1 %v6672_v33  ;;  %11519 = vst [vmem:[#allocation227_spill] sm:$0xff] %v6696_v16  ;;  %11520 = vst [vmem:[#allocation228_spill] sm:$0xff] %v6700_v22  ;;  %v6702_v39 = vld [vmem:[#allocation3 + $0xb0] sm:$0xff]  ;;  %v6706_v33 = vld [vmem:[#allocation3 + $0x68] sm:$0xff] }
 0x1bf   :  { %1523 = vmatpush1.msra.mxu0 %v6676_v5  ;;  %1594 = vmatpush1.msra.mxu1 %v6678_v48  ;;  %11521 = vst [vmem:[#allocation229_spill] sm:$0xff] %v6702_v39  ;;  %11522 = vst [vmem:[#allocation230_spill] sm:$0xff] %v6706_v33  ;;  %v6708_v5 = vld [vmem:[#allocation3 + $0x78] sm:$0xff]  ;;  %v6712_v48 = vld [vmem:[#allocation3 + $0x60] sm:$0xff] }
 0x1c0   :  { %1524 = vmatprep.subr.mxu0 %v6682_v35  ;;  %1595 = vmatprep.subr.mxu1 %v6684_v42  ;;  %11523 = vst [vmem:[#allocation231_spill] sm:$0xff] %v6708_v5  ;;  %11524 = vst [vmem:[#allocation232_spill] sm:$0xff] %v6712_v48  ;;  %v6714_v35 = vld [vmem:[#allocation3 + $0x70] sm:$0xff]  ;;  %v6718_v42 = vld [vmem:[#allocation3 + $0x28] sm:$0xff] }
 0x1c1   :  { %1525 = vmatpush1.msra.mxu0 %v6688_v18  ;;  %1596 = vmatpush1.msra.mxu1 %v6690_v46  ;;  %11525 = vst [vmem:[#allocation233_spill] sm:$0xff] %v6714_v35  ;;  %11526 = vst [vmem:[#allocation234_spill] sm:$0xff] %v6718_v42  ;;  %v6720_v18 = vld [vmem:[#allocation3 + $0x38] sm:$0xff]  ;;  %v6724_v46 = vld [vmem:[#allocation3 + $0x20] sm:$0xff] }
 0x1c2   :  { %1526 = vmatprep.subr.mxu0 %v6694_v49  ;;  %1597 = vmatprep.subr.mxu1 %v6696_v16  ;;  %11527 = vst [vmem:[#allocation235_spill] sm:$0xff] %v6720_v18  ;;  %11528 = vst [vmem:[#allocation236_spill] sm:$0xff] %v6724_v46  ;;  %v6726_v49 = vld [vmem:[#allocation3 + $0x30] sm:$0xff]  ;;  %v6730_v16 = vld [vmem:[#allocation3 + $0x7e8] sm:$0xff] }
 0x1c3   :  { %1527 = vmatpush1.msra.mxu0 %v6700_v22  ;;  %1598 = vmatpush1.msra.mxu1 %v6702_v39  ;;  %11529 = vst [vmem:[#allocation237_spill] sm:$0xff] %v6726_v49  ;;  %11530 = vst [vmem:[#allocation238_spill] sm:$0xff] %v6730_v16  ;;  %v6732_v22 = vld [vmem:[#allocation3 + $0x7f8] sm:$0xff]  ;;  %v6736_v39 = vld [vmem:[#allocation3 + $0x7e0] sm:$0xff] }
 0x1c4   :  { %1528 = vmatprep.subr.mxu0 %v6706_v33  ;;  %1599 = vmatprep.subr.mxu1 %v6708_v5  ;;  %11531 = vst [vmem:[#allocation239_spill] sm:$0xff] %v6732_v22  ;;  %11532 = vst [vmem:[#allocation240_spill] sm:$0xff] %v6736_v39  ;;  %v6738_v33 = vld [vmem:[#allocation3 + $0x7f0] sm:$0xff]  ;;  %v6742_v5 = vld [vmem:[#allocation3 + $0x7a8] sm:$0xff] }
 0x1c5   :  { %1529 = vmatpush1.msra.mxu0 %v6712_v48  ;;  %1600 = vmatpush1.msra.mxu1 %v6714_v35  ;;  %11533 = vst [vmem:[#allocation241_spill] sm:$0xff] %v6738_v33  ;;  %11534 = vst [vmem:[#allocation242_spill] sm:$0xff] %v6742_v5  ;;  %v6744_v48 = vld [vmem:[#allocation3 + $0x7b8] sm:$0xff]  ;;  %v6748_v35 = vld [vmem:[#allocation3 + $0x7a0] sm:$0xff] }
 0x1c6   :  { %1530 = vmatprep.subr.mxu0 %v6718_v42  ;;  %1601 = vmatprep.subr.mxu1 %v6720_v18  ;;  %11535 = vst [vmem:[#allocation243_spill] sm:$0xff] %v6744_v48  ;;  %11536 = vst [vmem:[#allocation244_spill] sm:$0xff] %v6748_v35  ;;  %v6750_v42 = vld [vmem:[#allocation3 + $0x7b0] sm:$0xff]  ;;  %v6754_v18 = vld [vmem:[#allocation3 + $0x768] sm:$0xff] }
 0x1c7   :  { %1531 = vmatpush1.msra.mxu0 %v6724_v46  ;;  %1602 = vmatpush1.msra.mxu1 %v6726_v49  ;;  %11537 = vst [vmem:[#allocation245_spill] sm:$0xff] %v6750_v42  ;;  %11538 = vst [vmem:[#allocation246_spill] sm:$0xff] %v6754_v18  ;;  %v6756_v46 = vld [vmem:[#allocation3 + $0x778] sm:$0xff]  ;;  %v6760_v49 = vld [vmem:[#allocation3 + $0x760] sm:$0xff] }
 0x1c8   :  { %1532 = vmatprep.subr.mxu0 %v6730_v16  ;;  %1603 = vmatprep.subr.mxu1 %v6732_v22  ;;  %11539 = vst [vmem:[#allocation247_spill] sm:$0xff] %v6756_v46  ;;  %11540 = vst [vmem:[#allocation248_spill] sm:$0xff] %v6760_v49  ;;  %v6762_v16 = vld [vmem:[#allocation3 + $0x770] sm:$0xff]  ;;  %v6766_v22 = vld [vmem:[#allocation3 + $0x728] sm:$0xff] }
 0x1c9   :  { %1533 = vmatpush2.msra.mxu0 %v6736_v39  ;;  %1604 = vmatpush2.msra.mxu1 %v6738_v33  ;;  %11541 = vst [vmem:[#allocation249_spill] sm:$0xff] %v6762_v16  ;;  %11542 = vst [vmem:[#allocation250_spill] sm:$0xff] %v6766_v22  ;;  %v6768_v39 = vld [vmem:[#allocation3 + $0x738] sm:$0xff]  ;;  %v6772_v33 = vld [vmem:[#allocation3 + $0x720] sm:$0xff] }
 0x1ca   :  { %1534 = vmatprep.subr.mxu0 %v6742_v5  ;;  %1605 = vmatprep.subr.mxu1 %v6744_v48  ;;  %11543 = vst [vmem:[#allocation251_spill] sm:$0xff] %v6768_v39  ;;  %11544 = vst [vmem:[#allocation252_spill] sm:$0xff] %v6772_v33  ;;  %v6774_v5 = vld [vmem:[#allocation3 + $0x730] sm:$0xff]  ;;  %v6778_v48 = vld [vmem:[#allocation3 + $0x6e8] sm:$0xff] }
 0x1cb   :  { %1535 = vmatpush2.msra.mxu0 %v6748_v35  ;;  %1606 = vmatpush2.msra.mxu1 %v6750_v42  ;;  %11545 = vst [vmem:[#allocation253_spill] sm:$0xff] %v6774_v5  ;;  %11546 = vst [vmem:[#allocation254_spill] sm:$0xff] %v6778_v48  ;;  %v6780_v35 = vld [vmem:[#allocation3 + $0x6f8] sm:$0xff]  ;;  %v6784_v42 = vld [vmem:[#allocation3 + $0x6e0] sm:$0xff] }
 0x1cc   :  { %1536 = vmatprep.subr.mxu0 %v6754_v18  ;;  %1607 = vmatprep.subr.mxu1 %v6756_v46  ;;  %11547 = vst [vmem:[#allocation255_spill] sm:$0xff] %v6780_v35  ;;  %11548 = vst [vmem:[#allocation256_spill] sm:$0xff] %v6784_v42  ;;  %v6786_v18 = vld [vmem:[#allocation3 + $0x6f0] sm:$0xff]  ;;  %v6790_v46 = vld [vmem:[#allocation3 + $0x6a8] sm:$0xff] }
 0x1cd   :  { %1537 = vmatpush2.msra.mxu0 %v6760_v49  ;;  %1608 = vmatpush2.msra.mxu1 %v6762_v16  ;;  %11549 = vst [vmem:[#allocation257_spill] sm:$0xff] %v6786_v18  ;;  %11550 = vst [vmem:[#allocation258_spill] sm:$0xff] %v6790_v46  ;;  %v6792_v49 = vld [vmem:[#allocation3 + $0x6b8] sm:$0xff]  ;;  %v6796_v16 = vld [vmem:[#allocation3 + $0x6a0] sm:$0xff] }
 0x1ce   :  { %1538 = vmatprep.subr.mxu0 %v6766_v22  ;;  %1609 = vmatprep.subr.mxu1 %v6768_v39  ;;  %11551 = vst [vmem:[#allocation259_spill] sm:$0xff] %v6792_v49  ;;  %11552 = vst [vmem:[#allocation260_spill] sm:$0xff] %v6796_v16  ;;  %v6798_v22 = vld [vmem:[#allocation3 + $0x6b0] sm:$0xff]  ;;  %v6802_v39 = vld [vmem:[#allocation3 + $0x668] sm:$0xff] }
 0x1cf   :  { %1539 = vmatpush2.msra.mxu0 %v6772_v33  ;;  %1610 = vmatpush2.msra.mxu1 %v6774_v5  ;;  %11553 = vst [vmem:[#allocation261_spill] sm:$0xff] %v6798_v22  ;;  %11554 = vst [vmem:[#allocation262_spill] sm:$0xff] %v6802_v39  ;;  %v6804_v33 = vld [vmem:[#allocation3 + $0x678] sm:$0xff]  ;;  %v6808_v5 = vld [vmem:[#allocation3 + $0x660] sm:$0xff] }
 0x1d0   :  { %1540 = vmatprep.subr.mxu0 %v6778_v48  ;;  %1611 = vmatprep.subr.mxu1 %v6780_v35  ;;  %11555 = vst [vmem:[#allocation263_spill] sm:$0xff] %v6804_v33  ;;  %11556 = vst [vmem:[#allocation264_spill] sm:$0xff] %v6808_v5  ;;  %v6810_v48 = vld [vmem:[#allocation3 + $0x670] sm:$0xff]  ;;  %v6814_v35 = vld [vmem:[#allocation3 + $0x628] sm:$0xff] }
 0x1d1   :  { %1541 = vmatpush2.msra.mxu0 %v6784_v42  ;;  %1612 = vmatpush2.msra.mxu1 %v6786_v18  ;;  %11557 = vst [vmem:[#allocation265_spill] sm:$0xff] %v6810_v48  ;;  %11558 = vst [vmem:[#allocation266_spill] sm:$0xff] %v6814_v35  ;;  %v6816_v42 = vld [vmem:[#allocation3 + $0x638] sm:$0xff]  ;;  %v6820_v18 = vld [vmem:[#allocation3 + $0x620] sm:$0xff] }
 0x1d2   :  { %1542 = vmatprep.subr.mxu0 %v6790_v46  ;;  %1613 = vmatprep.subr.mxu1 %v6792_v49  ;;  %11559 = vst [vmem:[#allocation267_spill] sm:$0xff] %v6816_v42  ;;  %11560 = vst [vmem:[#allocation268_spill] sm:$0xff] %v6820_v18  ;;  %v6822_v46 = vld [vmem:[#allocation3 + $0x630] sm:$0xff]  ;;  %v6826_v49 = vld [vmem:[#allocation3 + $0x5e8] sm:$0xff] }
 0x1d3   :  { %1543 = vmatpush2.msra.mxu0 %v6796_v16  ;;  %1614 = vmatpush2.msra.mxu1 %v6798_v22  ;;  %11561 = vst [vmem:[#allocation269_spill] sm:$0xff] %v6822_v46  ;;  %11562 = vst [vmem:[#allocation270_spill] sm:$0xff] %v6826_v49  ;;  %v6828_v16 = vld [vmem:[#allocation3 + $0x5f8] sm:$0xff]  ;;  %v6832_v22 = vld [vmem:[#allocation3 + $0x5e0] sm:$0xff] }
 0x1d4   :  { %1544 = vmatprep.subr.mxu0 %v6802_v39  ;;  %1615 = vmatprep.subr.mxu1 %v6804_v33  ;;  %11563 = vst [vmem:[#allocation271_spill] sm:$0xff] %v6828_v16  ;;  %11564 = vst [vmem:[#allocation272_spill] sm:$0xff] %v6832_v22  ;;  %v6834_v39 = vld [vmem:[#allocation3 + $0x5f0] sm:$0xff]  ;;  %v6838_v33 = vld [vmem:[#allocation3 + $0x5a8] sm:$0xff] }
 0x1d5   :  { %1545 = vmatpush2.msra.mxu0 %v6808_v5  ;;  %1616 = vmatpush2.msra.mxu1 %v6810_v48  ;;  %11565 = vst [vmem:[#allocation273_spill] sm:$0xff] %v6834_v39  ;;  %11566 = vst [vmem:[#allocation274_spill] sm:$0xff] %v6838_v33  ;;  %v6840_v5 = vld [vmem:[#allocation3 + $0x5b8] sm:$0xff]  ;;  %v6844_v48 = vld [vmem:[#allocation3 + $0x5a0] sm:$0xff] }
 0x1d6   :  { %1546 = vmatprep.subr.mxu0 %v6814_v35  ;;  %1617 = vmatprep.subr.mxu1 %v6816_v42  ;;  %11567 = vst [vmem:[#allocation275_spill] sm:$0xff] %v6840_v5  ;;  %11568 = vst [vmem:[#allocation276_spill] sm:$0xff] %v6844_v48  ;;  %v6846_v35 = vld [vmem:[#allocation3 + $0x5b0] sm:$0xff]  ;;  %v6850_v42 = vld [vmem:[#allocation3 + $0x568] sm:$0xff] }
 0x1d7   :  { %1547 = vmatpush2.msra.mxu0 %v6820_v18  ;;  %1618 = vmatpush2.msra.mxu1 %v6822_v46  ;;  %11569 = vst [vmem:[#allocation277_spill] sm:$0xff] %v6846_v35  ;;  %11570 = vst [vmem:[#allocation278_spill] sm:$0xff] %v6850_v42  ;;  %v6852_v18 = vld [vmem:[#allocation3 + $0x578] sm:$0xff]  ;;  %v6856_v46 = vld [vmem:[#allocation3 + $0x560] sm:$0xff] }
 0x1d8   :  { %1548 = vmatprep.subr.mxu0 %v6826_v49  ;;  %1619 = vmatprep.subr.mxu1 %v6828_v16  ;;  %11571 = vst [vmem:[#allocation279_spill] sm:$0xff] %v6852_v18  ;;  %11572 = vst [vmem:[#allocation280_spill] sm:$0xff] %v6856_v46  ;;  %v6858_v49 = vld [vmem:[#allocation3 + $0x570] sm:$0xff]  ;;  %v6862_v16 = vld [vmem:[#allocation3 + $0x528] sm:$0xff] }
 0x1d9   :  { %1549 = vmatpush2.msra.mxu0 %v6832_v22  ;;  %1620 = vmatpush2.msra.mxu1 %v6834_v39  ;;  %11573 = vst [vmem:[#allocation281_spill] sm:$0xff] %v6858_v49  ;;  %11574 = vst [vmem:[#allocation282_spill] sm:$0xff] %v6862_v16  ;;  %v6864_v22 = vld [vmem:[#allocation3 + $0x538] sm:$0xff]  ;;  %v6868_v39 = vld [vmem:[#allocation3 + $0x520] sm:$0xff] }
 0x1da   :  { %1550 = vmatprep.subr.mxu0 %v6838_v33  ;;  %1621 = vmatprep.subr.mxu1 %v6840_v5  ;;  %11575 = vst [vmem:[#allocation283_spill] sm:$0xff] %v6864_v22  ;;  %11576 = vst [vmem:[#allocation284_spill] sm:$0xff] %v6868_v39  ;;  %v6870_v33 = vld [vmem:[#allocation3 + $0x530] sm:$0xff]  ;;  %v6874_v5 = vld [vmem:[#allocation3 + $0x4e8] sm:$0xff] }
 0x1db   :  { %1551 = vmatpush2.msra.mxu0 %v6844_v48  ;;  %1622 = vmatpush2.msra.mxu1 %v6846_v35  ;;  %11577 = vst [vmem:[#allocation285_spill] sm:$0xff] %v6870_v33  ;;  %11578 = vst [vmem:[#allocation286_spill] sm:$0xff] %v6874_v5  ;;  %v6876_v48 = vld [vmem:[#allocation3 + $0x4f8] sm:$0xff]  ;;  %v6880_v35 = vld [vmem:[#allocation3 + $0x4e0] sm:$0xff] }
 0x1dc   :  { %1552 = vmatprep.subr.mxu0 %v6850_v42  ;;  %1623 = vmatprep.subr.mxu1 %v6852_v18  ;;  %11579 = vst [vmem:[#allocation287_spill] sm:$0xff] %v6876_v48  ;;  %11580 = vst [vmem:[#allocation288_spill] sm:$0xff] %v6880_v35  ;;  %v6882_v42 = vld [vmem:[#allocation3 + $0x4f0] sm:$0xff]  ;;  %v6886_v18 = vld [vmem:[#allocation3 + $0x4a8] sm:$0xff] }
 0x1dd   :  { %1553 = vmatpush2.msra.mxu0 %v6856_v46  ;;  %1624 = vmatpush2.msra.mxu1 %v6858_v49  ;;  %11581 = vst [vmem:[#allocation289_spill] sm:$0xff] %v6882_v42  ;;  %v6888_v46 = vld [vmem:[#allocation3 + $0x4b8] sm:$0xff]  ;;  %v6892_v49 = vld [vmem:[#allocation3 + $0x4a0] sm:$0xff] }
 0x1de   :  { %1554 = vmatprep.subr.mxu0 %v6862_v16  ;;  %1625 = vmatprep.subr.mxu1 %v6864_v22  ;;  %11582 = vst [vmem:[#allocation290_spill] sm:$0xff] %v6888_v46  ;;  %v6894_v16 = vld [vmem:[#allocation3 + $0x4b0] sm:$0xff]  ;;  %v6898_v22 = vld [vmem:[#allocation3 + $0x468] sm:$0xff] }
 0x1df   :  { %1555 = vmatpush2.msra.mxu0 %v6868_v39  ;;  %1626 = vmatpush2.msra.mxu1 %v6870_v33  ;;  %v6900_v39 = vld [vmem:[#allocation3 + $0x478] sm:$0xff]  ;;  %v6904_v33 = vld [vmem:[#allocation3 + $0x460] sm:$0xff] }
 0x1e0   :  { %1556 = vmatprep.subr.mxu0 %v6874_v5  ;;  %1627 = vmatprep.subr.mxu1 %v6876_v48  ;;  %11583 = vst [vmem:[#allocation291_spill] sm:$0xff] %v6904_v33  ;;  %v6906_v5 = vld [vmem:[#allocation3 + $0x470] sm:$0xff]  ;;  %v6910_v48 = vld [vmem:[#allocation3 + $0x428] sm:$0xff] }
 0x1e1   :  { %1557 = vmatpush2.msra.mxu0 %v6880_v35  ;;  %1628 = vmatpush2.msra.mxu1 %v6882_v42  ;;  %11584 = vst [vmem:[#allocation292_spill] sm:$0xff] %v6906_v5  ;;  %v6912_v35 = vld [vmem:[#allocation3 + $0x438] sm:$0xff]  ;;  %v6916_v42 = vld [vmem:[#allocation3 + $0x420] sm:$0xff] }
 0x1e2   :  { %1558 = vmatprep.subr.mxu0 %v6886_v18  ;;  %1629 = vmatprep.subr.mxu1 %v6888_v46  ;;  %11585 = vst [vmem:[#allocation293_spill] sm:$0xff] %v6912_v35  ;;  %11586 = vst [vmem:[#allocation294_spill] sm:$0xff] %v6916_v42  ;;  %v6920_v46 = vld [vmem:[#allocation3 + $0x430] sm:$0xff] }
 0x1e3   :  { %1559 = vmatpush2.msra.mxu0 %v6892_v49  ;;  %1630 = vmatpush2.msra.mxu1 %v6894_v16  ;;  %11587 = vst [vmem:[#allocation295_spill] sm:$0xff] %v6920_v46 }
 0x1e4   :  { %1560 = vmatprep.subr.mxu0 %v6898_v22  ;;  %1631 = vmatprep.subr.mxu1 %v6900_v39 }
 0x1e5   :  { %1561 = vmatpush2.msra.mxu0 %v6904_v33  ;;  %1632 = vmatpush2.msra.mxu1 %v6906_v5  ;;  %v6930_v33 = vld [vmem:[#allocation3 + $0x3c8] sm:$0xff]  ;;  %v6933_v5 = vld [vmem:[#allocation3 + $0x3d8] sm:$0xff] }
 0x1e6   :  { %1562 = vmatprep.subr.mxu0 %v6910_v48  ;;  %1633 = vmatprep.subr.mxu1 %v6912_v35  ;;  %11588 = vst [vmem:[#allocation296_spill] sm:$0xff] %v6930_v33  ;;  %11589 = vst [vmem:[#allocation297_spill] sm:$0xff] %v6933_v5  ;;  %v6936_v35 = vld [vmem:[#allocation3 + $0x3c0] sm:$0xff] }
 0x1e7   :  { %1563 = vmatpush2.msra.mxu0 %v6916_v42  ;;  %1564 = vmatprep.mubr.f32.mxu0 %v11469_v19  ;;  %11590 = vst [vmem:[#allocation298_spill] sm:$0xff] %v6936_v35  ;;  %v6939_v42 = vld [vmem:[#allocation3 + $0x3d0] sm:$0xff] }
 0x1e8   :  { %1634 = vmatpush2.msra.mxu1 %v6920_v46  ;;  %1635 = vmatprep.mubr.f32.mxu1 %v11469_v19  ;;  %11591 = vst [vmem:[#allocation299_spill] sm:$0xff] %v6939_v42  ;;  %v6942_v46 = vld [vmem:[#allocation3 + $0x388] sm:$0xff] }
 0x1e9   :  { %1565 = vmatmul.mubr.f32.vlgmr.msra.gmra.mxu0 %v11469_v19  ;;  %1636 = vmatmul.mubr.f32.vlgmr.msra.gmra.mxu1 %v11469_v19  ;;  %11592 = vst [vmem:[#allocation300_spill] sm:$0xff] %v6942_v46  ;;  %v6945_v19 = vld [vmem:[#allocation3 + $0x398] sm:$0xff] }
 0x1ea   :  { %1725 = vmatprep.subr.mxu0 %v6930_v33  ;;  %1796 = vmatprep.subr.mxu1 %v6933_v5  ;;  %11593 = vst [vmem:[#allocation301_spill] sm:$0xff] %v6945_v19  ;;  %v6948_v33 = vld [vmem:[#allocation3 + $0x380] sm:$0xff]  ;;  %v6951_v5 = vld [vmem:[#allocation3 + $0x390] sm:$0xff] }
 0x1eb   :  { %1726 = vmatpush1.msra.mxu0 %v6936_v35  ;;  %1797 = vmatpush1.msra.mxu1 %v6939_v42  ;;  %v6954_v35 = vld [vmem:[#allocation3 + $0x348] sm:$0xff]  ;;  %v6957_v42 = vld [vmem:[#allocation3 + $0x358] sm:$0xff] }
 0x1ec   :  { %1727 = vmatprep.subr.mxu0 %v6942_v46  ;;  %1798 = vmatprep.subr.mxu1 %v6945_v19  ;;  %v6960_v46 = vld [vmem:[#allocation3 + $0x340] sm:$0xff]  ;;  %v6963_v19 = vld [vmem:[#allocation3 + $0x350] sm:$0xff] }
 0x1ed   :  { %1728 = vmatpush1.msra.mxu0 %v6948_v33  ;;  %1799 = vmatpush1.msra.mxu1 %v6951_v5 }
 0x1ee   :  { %1729 = vmatprep.subr.mxu0 %v6954_v35  ;;  %1800 = vmatprep.subr.mxu1 %v6957_v42 }
 0x1ef   :  { %1730 = vmatpush1.msra.mxu0 %v6960_v46  ;;  %1801 = vmatpush1.msra.mxu1 %v6963_v19 }
 0x1f0   :  { %1731 = vmatprep.subr.mxu0 %v6192_v36  ;;  %1802 = vmatprep.subr.mxu1 %v6194_v43  ;;  %v11628_v43 = vld [vmem:[#allocation144_spill] sm:$0xff]  ;;  %v11629_v36 = vld [vmem:[#allocation145_spill] sm:$0xff] }
 0x1f1   :  { %1732 = vmatpush1.msra.mxu0 %v6196_v23  ;;  %1803 = vmatpush1.msra.mxu1 %v6198_v40  ;;  %v11634_v23 = vld [vmem:[#allocation150_spill] sm:$0xff]  ;;  %v11635_v40 = vld [vmem:[#allocation151_spill] sm:$0xff] }
 0x1f2   :  { %1733 = vmatprep.subr.mxu0 %v6200_v6  ;;  %1804 = vmatprep.subr.mxu1 %v6202_v4  ;;  %v11636_v6 = vld [vmem:[#allocation152_spill] sm:$0xff]  ;;  %v11637_v4 = vld [vmem:[#allocation153_spill] sm:$0xff] }
 0x1f3   :  { %1734 = vmatpush1.msra.mxu0 %v6206_v2  ;;  %1805 = vmatpush1.msra.mxu1 %v6208_v37  ;;  %v11638_v2 = vld [vmem:[#allocation154_spill] sm:$0xff]  ;;  %v11639_v37 = vld [vmem:[#allocation155_spill] sm:$0xff] }
 0x1f4   :  { %1735 = vmatprep.subr.mxu0 %v6212_v34  ;;  %1806 = vmatprep.subr.mxu1 %v6214_v17  ;;  %v11640_v34 = vld [vmem:[#allocation156_spill] sm:$0xff]  ;;  %v11641_v17 = vld [vmem:[#allocation157_spill] sm:$0xff] }
 0x1f5   :  { %1736 = vmatpush1.msra.mxu0 %v6218_v21  ;;  %1807 = vmatpush1.msra.mxu1 %v6220_v1  ;;  %v11642_v21 = vld [vmem:[#allocation158_spill] sm:$0xff]  ;;  %v11643_v1 = vld [vmem:[#allocation159_spill] sm:$0xff] }
 0x1f6   :  { %1737 = vmatprep.subr.mxu0 %v6224_v38  ;;  %1808 = vmatprep.subr.mxu1 %v6226_v41  ;;  %v11644_v38 = vld [vmem:[#allocation160_spill] sm:$0xff]  ;;  %v11645_v41 = vld [vmem:[#allocation161_spill] sm:$0xff] }
 0x1f7   :  { %1738 = vmatpush1.msra.mxu0 %v6230_v20  ;;  %1809 = vmatpush1.msra.mxu1 %v6232_v45  ;;  %v11627_v20 = vld [vmem:[#allocation143_spill] sm:$0xff]  ;;  %v11633_v45 = vld [vmem:[#allocation149_spill] sm:$0xff] }
 0x1f8   :  { %1739 = vmatprep.subr.mxu0 %v6236_v50  ;;  %1810 = vmatprep.subr.mxu1 %v6238_v8  ;;  %v11594_v8 = vld [vmem:[#allocation110_spill] sm:$0xff] }
 0x1f9   :  { %1740 = vmatpush1.msra.mxu0 %v6242_v51  ;;  %1811 = vmatpush1.msra.mxu1 %v6244_v24  ;;  %v11602_v24 = vld [vmem:[#allocation118_spill] sm:$0xff]  ;;  %v11611_v51 = vld [vmem:[#allocation127_spill] sm:$0xff] }
 0x1fa   :  { %1741 = vmatprep.subr.mxu0 %v6248_v52  ;;  %1812 = vmatprep.subr.mxu1 %v6250_v9  ;;  %v11595_v9 = vld [vmem:[#allocation111_spill] sm:$0xff]  ;;  %v11610_v50 = vld [vmem:[#allocation126_spill] sm:$0xff]  ;;  %v11612_v52 = vld [vmem:[#allocation128_spill] sm:$0xff] }
 0x1fb   :  { %1742 = vmatpush1.msra.mxu0 %v6254_v53  ;;  %1813 = vmatpush1.msra.mxu1 %v6256_v25  ;;  %v11603_v25 = vld [vmem:[#allocation119_spill] sm:$0xff]  ;;  %v11613_v53 = vld [vmem:[#allocation129_spill] sm:$0xff] }
 0x1fc   :  { %1743 = vmatprep.subr.mxu0 %v6260_v54  ;;  %1814 = vmatprep.subr.mxu1 %v6262_v10  ;;  %v11596_v10 = vld [vmem:[#allocation112_spill] sm:$0xff]  ;;  %v11614_v54 = vld [vmem:[#allocation130_spill] sm:$0xff] }
 0x1fd   :  { %1744 = vmatpush1.msra.mxu0 %v6266_v55  ;;  %1815 = vmatpush1.msra.mxu1 %v6268_v26  ;;  %v11604_v26 = vld [vmem:[#allocation120_spill] sm:$0xff]  ;;  %v11615_v55 = vld [vmem:[#allocation131_spill] sm:$0xff] }
 0x1fe   :  { %1745 = vmatprep.subr.mxu0 %v6272_v56  ;;  %1816 = vmatprep.subr.mxu1 %v6274_v11  ;;  %v11597_v11 = vld [vmem:[#allocation113_spill] sm:$0xff]  ;;  %v11616_v56 = vld [vmem:[#allocation132_spill] sm:$0xff] }
 0x1ff   :  { %1746 = vmatpush1.msra.mxu0 %v6278_v57  ;;  %1817 = vmatpush1.msra.mxu1 %v6280_v27  ;;  %v11605_v27 = vld [vmem:[#allocation121_spill] sm:$0xff] }
 0x200   :  { %1747 = vmatprep.subr.mxu0 %v6284_v58  ;;  %1818 = vmatprep.subr.mxu1 %v6286_v12  ;;  %v11598_v12 = vld [vmem:[#allocation114_spill] sm:$0xff]  ;;  %v11617_v57 = vld [vmem:[#allocation133_spill] sm:$0xff] }
 0x201   :  { %1748 = vmatpush1.msra.mxu0 %v6290_v59  ;;  %1819 = vmatpush1.msra.mxu1 %v6292_v28  ;;  %v11606_v28 = vld [vmem:[#allocation122_spill] sm:$0xff]  ;;  %v11619_v59 = vld [vmem:[#allocation135_spill] sm:$0xff] }
 0x202   :  { %1749 = vmatprep.subr.mxu0 %v6296_v60  ;;  %1820 = vmatprep.subr.mxu1 %v6298_v13  ;;  %v11599_v13 = vld [vmem:[#allocation115_spill] sm:$0xff]  ;;  %v11618_v58 = vld [vmem:[#allocation134_spill] sm:$0xff]  ;;  %v11620_v60 = vld [vmem:[#allocation136_spill] sm:$0xff] }
 0x203   :  { %1750 = vmatpush1.msra.mxu0 %v6302_v29  ;;  %1821 = vmatpush1.msra.mxu1 %v6304_v61  ;;  %v11607_v29 = vld [vmem:[#allocation123_spill] sm:$0xff]  ;;  %v11621_v61 = vld [vmem:[#allocation137_spill] sm:$0xff] }
 0x204   :  { %1751 = vmatprep.subr.mxu0 %v6308_v14  ;;  %1822 = vmatprep.subr.mxu1 %v6310_v62  ;;  %v11600_v14 = vld [vmem:[#allocation116_spill] sm:$0xff]  ;;  %v11622_v62 = vld [vmem:[#allocation138_spill] sm:$0xff] }
 0x205   :  { %1752 = vmatpush1.msra.mxu0 %v6314_v30  ;;  %1823 = vmatpush1.msra.mxu1 %v6316_v63  ;;  %v11608_v30 = vld [vmem:[#allocation124_spill] sm:$0xff]  ;;  %v11623_v63 = vld [vmem:[#allocation139_spill] sm:$0xff] }
 0x206   :  { %1753 = vmatprep.subr.mxu0 %v6320_v15  ;;  %1824 = vmatprep.subr.mxu1 %v6322_v32  ;;  %v11601_v15 = vld [vmem:[#allocation117_spill] sm:$0xff]  ;;  %v11624_v32 = vld [vmem:[#allocation140_spill] sm:$0xff] }
 0x207   :  { %1754 = vmatpush1.msra.mxu0 %v6326_v31  ;;  %1825 = vmatpush1.msra.mxu1 %v6328_v3  ;;  %v11609_v31 = vld [vmem:[#allocation125_spill] sm:$0xff]  ;;  %v11632_v3 = vld [vmem:[#allocation148_spill] sm:$0xff] }
 0x208   :  { %1755 = vmatprep.subr.mxu0 %v6332_v7  ;;  %1826 = vmatprep.subr.mxu1 %v6334_v0  ;;  %v11626_v0 = vld [vmem:[#allocation142_spill] sm:$0xff] }
 0x209   :  { %1756 = vmatpush1.msra.mxu0 %v6338_v44  ;;  %1827 = vmatpush1.msra.mxu1 %v6340_v47  ;;  %v11625_v44 = vld [vmem:[#allocation141_spill] sm:$0xff]  ;;  %v11630_v7 = vld [vmem:[#allocation146_spill] sm:$0xff]  ;;  %v11631_v47 = vld [vmem:[#allocation147_spill] sm:$0xff] }
 0x20a   :  { %1757 = vmatprep.subr.mxu0 %v11594_v8  ;;  %1828 = vmatprep.subr.mxu1 %v11595_v9  ;;  %v11646_v8 = vld [vmem:[#allocation162_spill] sm:$0xff]  ;;  %v11647_v9 = vld [vmem:[#allocation163_spill] sm:$0xff] }
 0x20b   :  { %1758 = vmatpush2.msra.mxu0 %v11596_v10  ;;  %1829 = vmatpush2.msra.mxu1 %v11597_v11  ;;  %v11648_v10 = vld [vmem:[#allocation164_spill] sm:$0xff]  ;;  %v11649_v11 = vld [vmem:[#allocation165_spill] sm:$0xff] }
 0x20c   :  { %1759 = vmatprep.subr.mxu0 %v11598_v12  ;;  %1830 = vmatprep.subr.mxu1 %v11599_v13  ;;  %v11650_v12 = vld [vmem:[#allocation166_spill] sm:$0xff]  ;;  %v11651_v13 = vld [vmem:[#allocation167_spill] sm:$0xff] }
 0x20d   :  { %1760 = vmatpush2.msra.mxu0 %v11600_v14  ;;  %1831 = vmatpush2.msra.mxu1 %v11601_v15  ;;  %v11652_v14 = vld [vmem:[#allocation168_spill] sm:$0xff]  ;;  %v11653_v15 = vld [vmem:[#allocation169_spill] sm:$0xff] }
 0x20e   :  { %1761 = vmatprep.subr.mxu0 %v11602_v24  ;;  %1832 = vmatprep.subr.mxu1 %v11603_v25  ;;  %v11654_v24 = vld [vmem:[#allocation170_spill] sm:$0xff]  ;;  %v11655_v25 = vld [vmem:[#allocation171_spill] sm:$0xff] }
 0x20f   :  { %1762 = vmatpush2.msra.mxu0 %v11604_v26  ;;  %1833 = vmatpush2.msra.mxu1 %v11605_v27  ;;  %v11656_v26 = vld [vmem:[#allocation172_spill] sm:$0xff]  ;;  %v11657_v27 = vld [vmem:[#allocation173_spill] sm:$0xff] }
 0x210   :  { %1763 = vmatprep.subr.mxu0 %v11606_v28  ;;  %1834 = vmatprep.subr.mxu1 %v11607_v29  ;;  %v11658_v28 = vld [vmem:[#allocation174_spill] sm:$0xff]  ;;  %v11659_v29 = vld [vmem:[#allocation175_spill] sm:$0xff] }
 0x211   :  { %1764 = vmatpush2.msra.mxu0 %v11608_v30  ;;  %1835 = vmatpush2.msra.mxu1 %v11609_v31 }
 0x212   :  { %1765 = vmatprep.subr.mxu0 %v11610_v50  ;;  %1836 = vmatprep.subr.mxu1 %v11611_v51 }
 0x213   :  { %1766 = vmatpush2.msra.mxu0 %v11612_v52  ;;  %1837 = vmatpush2.msra.mxu1 %v11613_v53 }
 0x214   :  { %1767 = vmatprep.subr.mxu0 %v11614_v54  ;;  %1838 = vmatprep.subr.mxu1 %v11615_v55  ;;  %v11660_v54 = vld [vmem:[#allocation93_spill] sm:$0xff] }
 0x215   :  { %1768 = vmatpush2.msra.mxu0 %v11616_v56  ;;  %1839 = vmatpush2.msra.mxu1 %v11617_v57 }
 0x216   :  { %1769 = vmatprep.subr.mxu0 %v11618_v58  ;;  %1840 = vmatprep.subr.mxu1 %v11619_v59  ;;  %v11661_v58 = vld [vmem:[#allocation94_spill] sm:$0xff]  ;;  %v11662_v59 = vld [vmem:[#allocation96_spill] sm:$0xff] }
 0x217   :  { %1770 = vmatpush2.msra.mxu0 %v11620_v60  ;;  %1841 = vmatpush2.msra.mxu1 %v11621_v61  ;;  %v11663_v60 = vcombine.low %v11661_v58, %v11662_v59 }
 0x218   :  { %1771 = vmatprep.subr.mxu0 %v11622_v62  ;;  %1842 = vmatprep.subr.mxu1 %v11623_v63 }
 0x219   :  { %1772 = vmatpush2.msra.mxu0 %v11624_v32  ;;  %1843 = vmatpush2.msra.mxu1 %v11625_v44 }
 0x21a   :  { %1773 = vmatprep.subr.mxu0 %v11626_v0  ;;  %1844 = vmatprep.subr.mxu1 %v11627_v20 }
 0x21b   :  { %1774 = vmatpush2.msra.mxu0 %v11628_v43  ;;  %1845 = vmatpush2.msra.mxu1 %v11629_v36 }
 0x21c   :  { %1775 = vmatprep.subr.mxu0 %v11630_v7  ;;  %1846 = vmatprep.subr.mxu1 %v11631_v47 }
 0x21d   :  { %1776 = vmatpush2.msra.mxu0 %v11632_v3  ;;  %1847 = vmatpush2.msra.mxu1 %v11633_v45 }
 0x21e   :  { %1777 = vmatprep.subr.mxu0 %v11634_v23  ;;  %1848 = vmatprep.subr.mxu1 %v11635_v40  ;;  %v11664_v23 = vld [vmem:[#allocation102_spill] sm:$0xff]  ;;  %v11665_v40 = vld [vmem:[#allocation104_spill] sm:$0xff] }
 0x21f   :  { %1778 = vmatpush2.msra.mxu0 %v11636_v6  ;;  %1849 = vmatpush2.msra.mxu1 %v11637_v4  ;;  %v11666_v6 = vcombine.low %v11664_v23, %v11665_v40 }
 0x220   :  { %1779 = vmatprep.subr.mxu0 %v11638_v2  ;;  %1850 = vmatprep.subr.mxu1 %v11639_v37 }
 0x221   :  { %1780 = vmatpush2.msra.mxu0 %v11640_v34  ;;  %1851 = vmatpush2.msra.mxu1 %v11641_v17 }
 0x222   :  { %1781 = vmatprep.subr.mxu0 %v11642_v21  ;;  %1852 = vmatprep.subr.mxu1 %v11643_v1 }
 0x223   :  { %1782 = vmatpush2.msra.mxu0 %v11644_v38  ;;  %1853 = vmatpush2.msra.mxu1 %v11645_v41 }
 0x224   :  { %1783 = vmatprep.subr.mxu0 %v11646_v8  ;;  %1854 = vmatprep.subr.mxu1 %v11647_v9 }
 0x225   :  { %1784 = vmatpush2.msra.mxu0 %v11648_v10  ;;  %1855 = vmatpush2.msra.mxu1 %v11649_v11 }
 0x226   :  { %1785 = vmatprep.subr.mxu0 %v11650_v12  ;;  %1856 = vmatprep.subr.mxu1 %v11651_v13 }
 0x227   :  { %1786 = vmatpush2.msra.mxu0 %v11652_v14  ;;  %1857 = vmatpush2.msra.mxu1 %v11653_v15  ;;  %v11667_v15 = vld [vmem:[#allocation176_spill] sm:$0xff] }
 0x228   :  { %1787 = vmatprep.subr.mxu0 %v11654_v24  ;;  %1858 = vmatprep.subr.mxu1 %v11655_v25  ;;  %v11668_v24 = vld [vmem:[#allocation177_spill] sm:$0xff]  ;;  %v11669_v25 = vld [vmem:[#allocation178_spill] sm:$0xff] }
 0x229   :  { %1788 = vmatpush2.msra.mxu0 %v11656_v26  ;;  %1859 = vmatpush2.msra.mxu1 %v11657_v27  ;;  %v11670_v26 = vld [vmem:[#allocation179_spill] sm:$0xff]  ;;  %v11671_v27 = vld [vmem:[#allocation180_spill] sm:$0xff] }
 0x22a   :  { %1867 = vmatprep.subr.mxu0 %v11658_v28  ;;  %1938 = vmatprep.subr.mxu1 %v11659_v29  ;;  %v11672_v28 = vld [vmem:[#allocation181_spill] sm:$0xff]  ;;  %v11673_v29 = vld [vmem:[#allocation182_spill] sm:$0xff] }
 0x267   :  { %v1424_v30 = vpop.f32.mrf.mxu0  ;;  %v1495_v31 = vpop.f32.mrf.mxu1 }
 0x269   :  { %v1426_v50 = vpop.f32.mrf.mxu0  ;;  %v1497_v51 = vpop.f32.mrf.mxu1 }
 0x26a   :  { %v1650_v52 = vcombine.low %v1424_v30, %v1426_v50  ;;  %v1651_v53 = vcombine.low %v1495_v31, %v1497_v51  ;;  %v11674_v30 = vld [vmem:[#allocation183_spill] sm:$0xff]  ;;  %v11675_v31 = vld [vmem:[#allocation184_spill] sm:$0xff]  ;;  %v11676_v50 = vld [vmem:[#allocation185_spill] sm:$0xff] }
 0x26b   :  { %v11677_v51 = vld [vmem:[#allocation186_spill] sm:$0xff] }
 0x26c   :  { %v1658_v55 = vrot.slane %v1650_v52, %v11660_v54  ;;  %v1665_v56 = vrot.slane %v1651_v53, %v11660_v54  ;;  %v11678_v52 = vld [vmem:[#allocation187_spill] sm:$0xff]  ;;  %v11679_v53 = vld [vmem:[#allocation188_spill] sm:$0xff] }
 0x26e   :  { %v1666_v57 = vcombine.low %v1658_v55, %v1665_v56  ;;  %v11680_v55 = vld [vmem:[#allocation189_spill] sm:$0xff]  ;;  %v11681_v56 = vld [vmem:[#allocation190_spill] sm:$0xff] }
 0x270   :  { %v1686_v61 = vadd.f32 %v1666_v57, %v11663_v60  ;;  %v11682_v57 = vld [vmem:[#allocation191_spill] sm:$0xff]  ;;  %v11683_v60 = vld [vmem:[#allocation192_spill] sm:$0xff] }
 0x272   :  { %v4648_v62 = vmul.f32 -1.442695, %v1686_v61  ;;  %v11684_v61 = vld [vmem:[#allocation193_spill] sm:$0xff] }
 0x274   :  { %4712 = vpow2.f32 %v4648_v62  ;;  %v11685_v62 = vld [vmem:[#allocation194_spill] sm:$0xff] }
 0x281   :  { %v4713_v63 = vpop.eup %4712 }
 0x282   :  { %v1691_v0 = vadd.f32 1.0, %v4713_v63  ;;  %v11686_v63 = vld [vmem:[#allocation195_spill] sm:$0xff] }
 0x284   :  { %4714 = vrcp.f32 %v1691_v0  ;;  %v11689_v0 = vld [vmem:[#allocation198_spill] sm:$0xff] }
 0x291   :  { %v4715_v34 = vpop.eup %4714 }
 0x292   :  { %v1705_v17 = vrot.slane %v4715_v34, 4 }
 0x294   :  { %v1707_v1 = vmul.f32 0.0, %v1705_v17  ;;  %v11702_v17 = vld [vmem:[#allocation211_spill] sm:$0xff] }
 0x2a9   :  { %v1566_v32 = vpop.f32.mrf.mxu0  ;;  %v1637_v44 = vpop.f32.mrf.mxu1 }
 0x2ab   :  { %v1568_v20 = vpop.f32.mrf.mxu0  ;;  %v1639_v43 = vpop.f32.mrf.mxu1 }
 0x2ac   :  { %v1667_v36 = vcombine.low %v1566_v32, %v1568_v20  ;;  %v1668_v7 = vcombine.low %v1637_v44, %v1639_v43  ;;  %v11687_v32 = vld [vmem:[#allocation196_spill] sm:$0xff]  ;;  %v11688_v44 = vld [vmem:[#allocation197_spill] sm:$0xff]  ;;  %v11690_v20 = vld [vmem:[#allocation199_spill] sm:$0xff] }
 0x2ad   :  { %v11691_v43 = vld [vmem:[#allocation200_spill] sm:$0xff] }
 0x2ae   :  { %v1675_v47 = vrot.slane %v1667_v36, %v11660_v54  ;;  %v1682_v3 = vrot.slane %v1668_v7, %v11660_v54  ;;  %v11692_v36 = vld [vmem:[#allocation201_spill] sm:$0xff]  ;;  %v11693_v7 = vld [vmem:[#allocation202_spill] sm:$0xff] }
 0x2b0   :  { %v1683_v45 = vcombine.low %v1675_v47, %v1682_v3  ;;  %v11694_v47 = vld [vmem:[#allocation203_spill] sm:$0xff]  ;;  %v11695_v3 = vld [vmem:[#allocation204_spill] sm:$0xff] }
 0x2b2   :  { %v1687_v4 = vadd.f32 %v1683_v45, %v11666_v6  ;;  %v11696_v45 = vld [vmem:[#allocation205_spill] sm:$0xff]  ;;  %v11697_v6 = vld [vmem:[#allocation206_spill] sm:$0xff] }
 0x2b4   :  { %4716 = vtanh.f32 %v1687_v4  ;;  %v1696_v2 = vrot.slane %v1687_v4, 4  ;;  %v11698_v4 = vld [vmem:[#allocation207_spill] sm:$0xff] }
 0x2b6   :  { %v4649_v37 = vmul.f32 -1.442695, %v1696_v2  ;;  %v11699_v2 = vld [vmem:[#allocation208_spill] sm:$0xff] }
 0x2b8   :  { %4718 = vpow2.f32 %v4649_v37  ;;  %v11700_v37 = vld [vmem:[#allocation209_spill] sm:$0xff] }
 0x2c1   :  { %v4717_v21 = vpop.eup %4716 }
 0x2c2   :  { %v1708_v38 = vmul.f32 %v4717_v21, %v4715_v34  ;;  %v11701_v34 = vld [vmem:[#allocation210_spill] sm:$0xff]  ;;  %v11703_v21 = vld [vmem:[#allocation212_spill] sm:$0xff] }
 0x2c4   :  { %v7094_v41 = vadd.f32 %v1708_v38, %v1707_v1  ;;  %v11704_v1 = vld [vmem:[#allocation213_spill] sm:$0xff]  ;;  %v11705_v38 = vld [vmem:[#allocation214_spill] sm:$0xff] }
 0x2c5   :  { %v4719_v8 = vpop.eup %4718 }
 0x2c6   :  { %v1701_v9 = vadd.f32 1.0, %v4719_v8  ;;  %4720 = vtanh.f32 %v7094_v41  ;;  %v11706_v8 = vld [vmem:[#allocation215_spill] sm:$0xff] }
 0x2c8   :  { %4722 = vrcp.f32 %v1701_v9  ;;  %v11707_v9 = vld [vmem:[#allocation216_spill] sm:$0xff] }
 0x2d3   :  { %v4721_v10 = vpop.eup %4720 }
 0x2d5   :  { %v4723_v11 = vpop.eup %4722 }
 0x2d6   :  { %v1711_v12 = vmul.f32 %v4723_v11, %v4721_v10  ;;  %v11708_v10 = vld [vmem:[#allocation217_spill] sm:$0xff]  ;;  %v11709_v11 = vld [vmem:[#allocation218_spill] sm:$0xff] }
 0x2d8   :  { %v7098_v13 = vrot.slane %v1711_v12, %v11660_v54  ;;  %v11710_v12 = vld [vmem:[#allocation219_spill] sm:$0xff] }
 0x2da   :  { %v1722_v14 = vcombine.high %v7098_v13, %v7098_v13 }
 0x2dc   :  { %1789 = vmatprep.mubr.f32.mxu0 %v1722_v14  ;;  %1860 = vmatprep.mubr.f32.mxu1 %v1722_v14 }
 0x2dd   :  { %1790 = vmatmul.mubr.f32.vlgmr.msra.gmra.mxu0 %v7098_v13  ;;  %1861 = vmatmul.mubr.f32.vlgmr.msra.gmra.mxu1 %v7098_v13 }
 0x2de   :  { %1868 = vmatpush1.msra.mxu0 %v11667_v15  ;;  %1939 = vmatpush1.msra.mxu1 %v11668_v24  ;;  %v11712_v15 = vld [vmem:[#allocation221_spill] sm:$0xff]  ;;  %v11713_v24 = vld [vmem:[#allocation222_spill] sm:$0xff] }
 0x2df   :  { %1869 = vmatprep.subr.mxu0 %v11669_v25  ;;  %1931 = vmatprep.mubr.f32.mxu0 %v1722_v14  ;;  %v11714_v25 = vld [vmem:[#allocation223_spill] sm:$0xff] }
 0x2e0   :  { %1940 = vmatprep.subr.mxu1 %v11670_v26  ;;  %2002 = vmatprep.mubr.f32.mxu1 %v1722_v14  ;;  %v11711_v14 = vld [vmem:[#allocation220_spill] sm:$0xff] }
 0x2e1   :  { %1870 = vmatpush1.msra.mxu0 %v11671_v27  ;;  %1941 = vmatpush1.msra.mxu1 %v11672_v28  ;;  %v11715_v26 = vld [vmem:[#allocation224_spill] sm:$0xff]  ;;  %v11716_v27 = vld [vmem:[#allocation225_spill] sm:$0xff]  ;;  %v11717_v28 = vld [vmem:[#allocation226_spill] sm:$0xff] }
 0x2e2   :  { %1871 = vmatprep.subr.mxu0 %v11673_v29  ;;  %1942 = vmatprep.subr.mxu1 %v11674_v30  ;;  %v11718_v29 = vld [vmem:[#allocation227_spill] sm:$0xff]  ;;  %v11719_v30 = vld [vmem:[#allocation228_spill] sm:$0xff] }
 0x2e3   :  { %1872 = vmatpush1.msra.mxu0 %v11675_v31  ;;  %1943 = vmatpush1.msra.mxu1 %v11676_v50  ;;  %v11720_v31 = vld [vmem:[#allocation229_spill] sm:$0xff]  ;;  %v11721_v50 = vld [vmem:[#allocation230_spill] sm:$0xff] }
 0x2e4   :  { %1873 = vmatprep.subr.mxu0 %v11677_v51  ;;  %1944 = vmatprep.subr.mxu1 %v11678_v52  ;;  %v11722_v51 = vld [vmem:[#allocation231_spill] sm:$0xff]  ;;  %v11723_v52 = vld [vmem:[#allocation232_spill] sm:$0xff] }
 0x2e5   :  { %1874 = vmatpush1.msra.mxu0 %v11679_v53  ;;  %1945 = vmatpush1.msra.mxu1 %v11680_v55  ;;  %v11724_v53 = vld [vmem:[#allocation233_spill] sm:$0xff]  ;;  %v11725_v55 = vld [vmem:[#allocation234_spill] sm:$0xff] }
 0x2e6   :  { %1875 = vmatprep.subr.mxu0 %v11681_v56  ;;  %1946 = vmatprep.subr.mxu1 %v11682_v57  ;;  %v11726_v56 = vld [vmem:[#allocation235_spill] sm:$0xff]  ;;  %v11727_v57 = vld [vmem:[#allocation236_spill] sm:$0xff] }
 0x2e7   :  { %1876 = vmatpush1.msra.mxu0 %v11683_v60  ;;  %1947 = vmatpush1.msra.mxu1 %v11684_v61  ;;  %v11728_v60 = vld [vmem:[#allocation237_spill] sm:$0xff]  ;;  %v11729_v61 = vld [vmem:[#allocation238_spill] sm:$0xff] }
 0x2e8   :  { %1877 = vmatprep.subr.mxu0 %v11685_v62  ;;  %1948 = vmatprep.subr.mxu1 %v11686_v63  ;;  %v11730_v62 = vld [vmem:[#allocation239_spill] sm:$0xff]  ;;  %v11731_v63 = vld [vmem:[#allocation240_spill] sm:$0xff] }
 0x2e9   :  { %1878 = vmatpush1.msra.mxu0 %v11687_v32  ;;  %1949 = vmatpush1.msra.mxu1 %v11688_v44  ;;  %v11732_v32 = vld [vmem:[#allocation241_spill] sm:$0xff]  ;;  %v11733_v44 = vld [vmem:[#allocation242_spill] sm:$0xff] }
 0x2ea   :  { %1879 = vmatprep.subr.mxu0 %v11689_v0  ;;  %1950 = vmatprep.subr.mxu1 %v11690_v20  ;;  %v11734_v0 = vld [vmem:[#allocation243_spill] sm:$0xff]  ;;  %v11735_v20 = vld [vmem:[#allocation244_spill] sm:$0xff] }
 0x2eb   :  { %1880 = vmatpush1.msra.mxu0 %v11691_v43  ;;  %1951 = vmatpush1.msra.mxu1 %v11692_v36  ;;  %v11736_v43 = vld [vmem:[#allocation245_spill] sm:$0xff]  ;;  %v11737_v36 = vld [vmem:[#allocation246_spill] sm:$0xff] }
 0x2ec   :  { %1881 = vmatprep.subr.mxu0 %v11693_v7  ;;  %1952 = vmatprep.subr.mxu1 %v11694_v47  ;;  %v11738_v7 = vld [vmem:[#allocation247_spill] sm:$0xff]  ;;  %v11739_v47 = vld [vmem:[#allocation248_spill] sm:$0xff] }
 0x2ed   :  { %1882 = vmatpush1.msra.mxu0 %v11695_v3  ;;  %1953 = vmatpush1.msra.mxu1 %v11696_v45  ;;  %v11740_v3 = vld [vmem:[#allocation249_spill] sm:$0xff]  ;;  %v11741_v45 = vld [vmem:[#allocation250_spill] sm:$0xff] }
 0x2ee   :  { %1883 = vmatprep.subr.mxu0 %v11697_v6  ;;  %1954 = vmatprep.subr.mxu1 %v11698_v4  ;;  %v11742_v6 = vld [vmem:[#allocation251_spill] sm:$0xff]  ;;  %v11743_v4 = vld [vmem:[#allocation252_spill] sm:$0xff] }
 0x2ef   :  { %1884 = vmatpush1.msra.mxu0 %v11699_v2  ;;  %1955 = vmatpush1.msra.mxu1 %v11700_v37  ;;  %v11744_v2 = vld [vmem:[#allocation253_spill] sm:$0xff]  ;;  %v11745_v37 = vld [vmem:[#allocation254_spill] sm:$0xff] }
 0x2f0   :  { %1885 = vmatprep.subr.mxu0 %v11701_v34  ;;  %1956 = vmatprep.subr.mxu1 %v11702_v17  ;;  %v11746_v34 = vld [vmem:[#allocation255_spill] sm:$0xff]  ;;  %v11747_v17 = vld [vmem:[#allocation256_spill] sm:$0xff] }
 0x2f1   :  { %1886 = vmatpush1.msra.mxu0 %v11703_v21  ;;  %1957 = vmatpush1.msra.mxu1 %v11704_v1  ;;  %v11748_v21 = vld [vmem:[#allocation257_spill] sm:$0xff]  ;;  %v11749_v1 = vld [vmem:[#allocation258_spill] sm:$0xff] }
 0x2f2   :  { %1887 = vmatprep.subr.mxu0 %v11705_v38  ;;  %1958 = vmatprep.subr.mxu1 %v11706_v8  ;;  %v11750_v38 = vld [vmem:[#allocation259_spill] sm:$0xff]  ;;  %v11751_v8 = vld [vmem:[#allocation260_spill] sm:$0xff] }
 0x2f3   :  { %1888 = vmatpush1.msra.mxu0 %v11707_v9  ;;  %1959 = vmatpush1.msra.mxu1 %v11708_v10  ;;  %v11752_v9 = vld [vmem:[#allocation261_spill] sm:$0xff]  ;;  %v11753_v10 = vld [vmem:[#allocation262_spill] sm:$0xff] }
 0x2f4   :  { %1889 = vmatprep.subr.mxu0 %v11709_v11  ;;  %1960 = vmatprep.subr.mxu1 %v11710_v12  ;;  %v11754_v11 = vld [vmem:[#allocation263_spill] sm:$0xff]  ;;  %v11755_v12 = vld [vmem:[#allocation264_spill] sm:$0xff] }
 0x2f5   :  { %1890 = vmatpush1.msra.mxu0 %v11711_v14  ;;  %1961 = vmatpush1.msra.mxu1 %v11712_v15  ;;  %v11756_v14 = vld [vmem:[#allocation265_spill] sm:$0xff]  ;;  %v11757_v15 = vld [vmem:[#allocation266_spill] sm:$0xff] }
 0x2f6   :  { %1891 = vmatprep.subr.mxu0 %v11713_v24  ;;  %1962 = vmatprep.subr.mxu1 %v11714_v25  ;;  %v11758_v24 = vld [vmem:[#allocation267_spill] sm:$0xff]  ;;  %v11759_v25 = vld [vmem:[#allocation268_spill] sm:$0xff] }
 0x2f7   :  { %1892 = vmatpush1.msra.mxu0 %v11715_v26  ;;  %1963 = vmatpush1.msra.mxu1 %v11716_v27  ;;  %v11760_v26 = vld [vmem:[#allocation269_spill] sm:$0xff]  ;;  %v11761_v27 = vld [vmem:[#allocation270_spill] sm:$0xff] }
 0x2f8   :  { %1893 = vmatprep.subr.mxu0 %v11717_v28  ;;  %1964 = vmatprep.subr.mxu1 %v11718_v29  ;;  %v11762_v28 = vld [vmem:[#allocation271_spill] sm:$0xff]  ;;  %v11763_v29 = vld [vmem:[#allocation272_spill] sm:$0xff] }
 0x2f9   :  { %1894 = vmatpush1.msra.mxu0 %v11719_v30  ;;  %1965 = vmatpush1.msra.mxu1 %v11720_v31  ;;  %v11764_v30 = vld [vmem:[#allocation273_spill] sm:$0xff]  ;;  %v11765_v31 = vld [vmem:[#allocation274_spill] sm:$0xff] }
 0x2fa   :  { %1895 = vmatprep.subr.mxu0 %v11721_v50  ;;  %1966 = vmatprep.subr.mxu1 %v11722_v51  ;;  %v11766_v50 = vld [vmem:[#allocation275_spill] sm:$0xff]  ;;  %v11767_v51 = vld [vmem:[#allocation276_spill] sm:$0xff] }
 0x2fb   :  { %1896 = vmatpush1.msra.mxu0 %v11723_v52  ;;  %1967 = vmatpush1.msra.mxu1 %v11724_v53  ;;  %v11768_v52 = vld [vmem:[#allocation277_spill] sm:$0xff]  ;;  %v11769_v53 = vld [vmem:[#allocation278_spill] sm:$0xff] }
 0x2fc   :  { %1897 = vmatprep.subr.mxu0 %v11725_v55  ;;  %1968 = vmatprep.subr.mxu1 %v11726_v56  ;;  %v11770_v55 = vld [vmem:[#allocation279_spill] sm:$0xff]  ;;  %v11771_v56 = vld [vmem:[#allocation280_spill] sm:$0xff] }
 0x2fd   :  { %1898 = vmatpush1.msra.mxu0 %v11727_v57  ;;  %1969 = vmatpush1.msra.mxu1 %v11728_v60  ;;  %v11772_v57 = vld [vmem:[#allocation281_spill] sm:$0xff]  ;;  %v11773_v60 = vld [vmem:[#allocation282_spill] sm:$0xff] }
 0x2fe   :  { %1899 = vmatprep.subr.mxu0 %v11729_v61  ;;  %1970 = vmatprep.subr.mxu1 %v11730_v62  ;;  %v11774_v61 = vld [vmem:[#allocation283_spill] sm:$0xff]  ;;  %v11775_v62 = vld [vmem:[#allocation284_spill] sm:$0xff] }
 0x2ff   :  { %1900 = vmatpush2.msra.mxu0 %v11731_v63  ;;  %1971 = vmatpush2.msra.mxu1 %v11732_v32  ;;  %v11776_v63 = vld [vmem:[#allocation285_spill] sm:$0xff]  ;;  %v11777_v32 = vld [vmem:[#allocation286_spill] sm:$0xff] }
 0x300   :  { %1901 = vmatprep.subr.mxu0 %v11733_v44  ;;  %1972 = vmatprep.subr.mxu1 %v11734_v0  ;;  %v11778_v44 = vld [vmem:[#allocation287_spill] sm:$0xff]  ;;  %v11779_v0 = vld [vmem:[#allocation288_spill] sm:$0xff] }
 0x301   :  { %1902 = vmatpush2.msra.mxu0 %v11735_v20  ;;  %1973 = vmatpush2.msra.mxu1 %v11736_v43  ;;  %v11780_v20 = vld [vmem:[#allocation289_spill] sm:$0xff]  ;;  %v11781_v43 = vld [vmem:[#allocation290_spill] sm:$0xff] }
 0x302   :  { %1903 = vmatprep.subr.mxu0 %v11737_v36  ;;  %1974 = vmatprep.subr.mxu1 %v11738_v7  ;;  %v11782_v36 = vld [vmem:[#allocation291_spill] sm:$0xff]  ;;  %v11783_v7 = vld [vmem:[#allocation292_spill] sm:$0xff] }
 0x303   :  { %1904 = vmatpush2.msra.mxu0 %v11739_v47  ;;  %1975 = vmatpush2.msra.mxu1 %v11740_v3  ;;  %v11784_v47 = vld [vmem:[#allocation293_spill] sm:$0xff]  ;;  %v11785_v3 = vld [vmem:[#allocation294_spill] sm:$0xff] }
 0x304   :  { %1905 = vmatprep.subr.mxu0 %v11741_v45  ;;  %1976 = vmatprep.subr.mxu1 %v11742_v6  ;;  %v11791_v45 = vld [vmem:[#allocation300_spill] sm:$0xff]  ;;  %v7247_v6 = vld [vmem:[#allocation3 + $0x318] sm:$0xff] }
 0x305   :  { %1906 = vmatpush2.msra.mxu0 %v11743_v4  ;;  %1977 = vmatpush2.msra.mxu1 %v11744_v2  ;;  %v7250_v4 = vld [vmem:[#allocation3 + $0x300] sm:$0xff]  ;;  %v7271_v2 = vld [vmem:[#allocation3 + $0x298] sm:$0xff] }
 0x306   :  { %1907 = vmatprep.subr.mxu0 %v11745_v37  ;;  %1978 = vmatprep.subr.mxu1 %v11746_v34  ;;  %v7274_v37 = vld [vmem:[#allocation3 + $0x280] sm:$0xff]  ;;  %v7277_v34 = vld [vmem:[#allocation3 + $0x290] sm:$0xff] }
 0x307   :  { %1908 = vmatpush2.msra.mxu0 %v11747_v17  ;;  %1979 = vmatpush2.msra.mxu1 %v11748_v21  ;;  %v7280_v17 = vld [vmem:[#allocation3 + $0x248] sm:$0xff]  ;;  %v7283_v21 = vld [vmem:[#allocation3 + $0x258] sm:$0xff] }
 0x308   :  { %1909 = vmatprep.subr.mxu0 %v11749_v1  ;;  %1980 = vmatprep.subr.mxu1 %v11750_v38  ;;  %v7286_v1 = vld [vmem:[#allocation3 + $0x240] sm:$0xff]  ;;  %v7289_v38 = vld [vmem:[#allocation3 + $0x250] sm:$0xff] }
 0x309   :  { %1910 = vmatpush2.msra.mxu0 %v11751_v8  ;;  %1981 = vmatpush2.msra.mxu1 %v11752_v9  ;;  %v7292_v8 = vld [vmem:[#allocation3 + $0x208] sm:$0xff]  ;;  %v7295_v9 = vld [vmem:[#allocation3 + $0x218] sm:$0xff] }
 0x30a   :  { %1911 = vmatprep.subr.mxu0 %v11753_v10  ;;  %1982 = vmatprep.subr.mxu1 %v11754_v11  ;;  %v7298_v10 = vld [vmem:[#allocation3 + $0x200] sm:$0xff]  ;;  %v7301_v11 = vld [vmem:[#allocation3 + $0x210] sm:$0xff] }
 0x30b   :  { %1912 = vmatpush2.msra.mxu0 %v11755_v12  ;;  %1983 = vmatpush2.msra.mxu1 %v11756_v14  ;;  %v7304_v12 = vld [vmem:[#allocation3 + $0x1c8] sm:$0xff]  ;;  %v7307_v14 = vld [vmem:[#allocation3 + $0x1d8] sm:$0xff] }
 0x30c   :  { %1913 = vmatprep.subr.mxu0 %v11757_v15  ;;  %1984 = vmatprep.subr.mxu1 %v11758_v24  ;;  %v7310_v15 = vld [vmem:[#allocation3 + $0x1c0] sm:$0xff]  ;;  %v7313_v24 = vld [vmem:[#allocation3 + $0x1d0] sm:$0xff] }
 0x30d   :  { %1914 = vmatpush2.msra.mxu0 %v11759_v25  ;;  %1985 = vmatpush2.msra.mxu1 %v11760_v26  ;;  %v7316_v25 = vld [vmem:[#allocation3 + $0x188] sm:$0xff]  ;;  %v7319_v26 = vld [vmem:[#allocation3 + $0x198] sm:$0xff] }
 0x30e   :  { %1915 = vmatprep.subr.mxu0 %v11761_v27  ;;  %1986 = vmatprep.subr.mxu1 %v11762_v28  ;;  %v7322_v27 = vld [vmem:[#allocation3 + $0x180] sm:$0xff]  ;;  %v7325_v28 = vld [vmem:[#allocation3 + $0x190] sm:$0xff] }
 0x30f   :  { %1916 = vmatpush2.msra.mxu0 %v11763_v29  ;;  %1987 = vmatpush2.msra.mxu1 %v11764_v30  ;;  %v7328_v29 = vld [vmem:[#allocation3 + $0x148] sm:$0xff]  ;;  %v7331_v30 = vld [vmem:[#allocation3 + $0x158] sm:$0xff] }
 0x310   :  { %1917 = vmatprep.subr.mxu0 %v11765_v31  ;;  %1988 = vmatprep.subr.mxu1 %v11766_v50  ;;  %v7334_v31 = vld [vmem:[#allocation3 + $0x140] sm:$0xff]  ;;  %v7337_v50 = vld [vmem:[#allocation3 + $0x150] sm:$0xff] }
 0x311   :  { %1918 = vmatpush2.msra.mxu0 %v11767_v51  ;;  %1989 = vmatpush2.msra.mxu1 %v11768_v52  ;;  %v7340_v51 = vld [vmem:[#allocation3 + $0x108] sm:$0xff]  ;;  %v7343_v52 = vld [vmem:[#allocation3 + $0x118] sm:$0xff] }
 0x312   :  { %1919 = vmatprep.subr.mxu0 %v11769_v53  ;;  %1990 = vmatprep.subr.mxu1 %v11770_v55  ;;  %v7346_v53 = vld [vmem:[#allocation3 + $0x100] sm:$0xff]  ;;  %v7349_v55 = vld [vmem:[#allocation3 + $0x110] sm:$0xff] }
 0x313   :  { %1920 = vmatpush2.msra.mxu0 %v11771_v56  ;;  %1991 = vmatpush2.msra.mxu1 %v11772_v57  ;;  %v7352_v56 = vld [vmem:[#allocation3 + $0xc8] sm:$0xff]  ;;  %v7355_v57 = vld [vmem:[#allocation3 + $0xd8] sm:$0xff] }
 0x314   :  { %1921 = vmatprep.subr.mxu0 %v11773_v60  ;;  %1992 = vmatprep.subr.mxu1 %v11774_v61  ;;  %v7358_v60 = vld [vmem:[#allocation3 + $0xc0] sm:$0xff]  ;;  %v7361_v61 = vld [vmem:[#allocation3 + $0xd0] sm:$0xff] }
 0x315   :  { %1922 = vmatpush2.msra.mxu0 %v11775_v62  ;;  %1993 = vmatpush2.msra.mxu1 %v11776_v63  ;;  %11793 = vst [vmem:[#allocation110_spill] sm:$0xff] %v7361_v61  ;;  %v7364_v62 = vld [vmem:[#allocation3 + $0x88] sm:$0xff]  ;;  %v7367_v63 = vld [vmem:[#allocation3 + $0x98] sm:$0xff] }
 0x316   :  { %1923 = vmatprep.subr.mxu0 %v11777_v32  ;;  %1994 = vmatprep.subr.mxu1 %v11778_v44  ;;  %11794 = vst [vmem:[#allocation111_spill] sm:$0xff] %v7364_v62  ;;  %11795 = vst [vmem:[#allocation112_spill] sm:$0xff] %v7367_v63  ;;  %v7370_v32 = vld [vmem:[#allocation3 + $0x80] sm:$0xff]  ;;  %v7373_v44 = vld [vmem:[#allocation3 + $0x90] sm:$0xff] }
 0x317   :  { %1924 = vmatpush2.msra.mxu0 %v11779_v0  ;;  %1995 = vmatpush2.msra.mxu1 %v11780_v20  ;;  %11796 = vst [vmem:[#allocation113_spill] sm:$0xff] %v7370_v32  ;;  %11797 = vst [vmem:[#allocation114_spill] sm:$0xff] %v7373_v44  ;;  %v7376_v0 = vld [vmem:[#allocation3 + $0x48] sm:$0xff]  ;;  %v7379_v20 = vld [vmem:[#allocation3 + $0x58] sm:$0xff] }
 0x318   :  { %1925 = vmatprep.subr.mxu0 %v6886_v18  ;;  %1996 = vmatprep.subr.mxu1 %v11781_v43  ;;  %v11786_v18 = vld [vmem:[#allocation295_spill] sm:$0xff]  ;;  %11798 = vst [vmem:[#allocation115_spill] sm:$0xff] %v7376_v0  ;;  %11799 = vst [vmem:[#allocation116_spill] sm:$0xff] %v7379_v20 }
 0x319   :  { %1926 = vmatpush2.msra.mxu0 %v6892_v49  ;;  %1997 = vmatpush2.msra.mxu1 %v6894_v16  ;;  %v11787_v49 = vld [vmem:[#allocation296_spill] sm:$0xff]  ;;  %v11788_v16 = vld [vmem:[#allocation297_spill] sm:$0xff] }
 0x31a   :  { %1927 = vmatprep.subr.mxu0 %v6898_v22  ;;  %1998 = vmatprep.subr.mxu1 %v6900_v39  ;;  %v11789_v39 = vld [vmem:[#allocation298_spill] sm:$0xff]  ;;  %v11790_v22 = vld [vmem:[#allocation299_spill] sm:$0xff] }
 0x31b   :  { %1928 = vmatpush2.msra.mxu0 %v11782_v36  ;;  %1999 = vmatpush2.msra.mxu1 %v11783_v7  ;;  %v7382_v43 = vld [vmem:[#allocation3 + $0x40] sm:$0xff]  ;;  %v7385_v36 = vld [vmem:[#allocation3 + $0x50] sm:$0xff]  ;;  %v7388_v7 = vld [vmem:[#allocation3 + $0x8] sm:$0xff] }
 0x31c   :  { %1929 = vmatprep.subr.mxu0 %v6910_v48  ;;  %2000 = vmatprep.subr.mxu1 %v11784_v47  ;;  %v11792_v48 = vld [vmem:[#allocation301_spill] sm:$0xff]  ;;  %11800 = vst [vmem:[#allocation117_spill] sm:$0xff] %v7382_v43  ;;  %11801 = vst [vmem:[#allocation118_spill] sm:$0xff] %v7385_v36  ;;  %v7391_v47 = vld [vmem:[#allocation3 + $0x18] sm:$0xff] }
 0x31d   :  { %1930 = vmatpush2.msra.mxu0 %v11785_v3  ;;  %2001 = vmatpush2.msra.mxu1 %v11786_v18  ;;  %11802 = vst [vmem:[#allocation119_spill] sm:$0xff] %v7388_v7  ;;  %11803 = vst [vmem:[#allocation120_spill] sm:$0xff] %v7391_v47  ;;  %v7394_v3 = vld [vmem:[#allocation3] sm:$0xff]  ;;  %v7397_v18 = vld [vmem:[#allocation3 + $0x10] sm:$0xff] }
 0x31e   :  { %1932 = vmatmul.mubr.f32.vlgmr.msra.gmra.mxu0 %v7098_v13  ;;  %2003 = vmatmul.mubr.f32.vlgmr.msra.gmra.mxu1 %v7098_v13  ;;  %v7244_v13 = vld [vmem:[#allocation3 + $0x308] sm:$0xff]  ;;  %11804 = vst [vmem:[#allocation121_spill] sm:$0xff] %v7394_v3  ;;  %11805 = vst [vmem:[#allocation122_spill] sm:$0xff] %v7397_v18 }
 0x31f   :  { %2092 = vmatprep.subr.mxu0 %v11787_v49  ;;  %2163 = vmatprep.subr.mxu1 %v11788_v16  ;;  %v7400_v49 = vld [vmem:[#allocation3 + $0x7c8] sm:$0xff]  ;;  %v7403_v16 = vld [vmem:[#allocation3 + $0x7d8] sm:$0xff] }
 0x320   :  { %2093 = vmatpush1.msra.mxu0 %v11789_v39  ;;  %2164 = vmatpush1.msra.mxu1 %v11790_v22  ;;  %11806 = vst [vmem:[#allocation123_spill] sm:$0xff] %v7400_v49  ;;  %11807 = vst [vmem:[#allocation124_spill] sm:$0xff] %v7403_v16  ;;  %v7406_v39 = vld [vmem:[#allocation3 + $0x7c0] sm:$0xff]  ;;  %v7409_v22 = vld [vmem:[#allocation3 + $0x7d0] sm:$0xff] }
 0x321   :  { %2094 = vmatprep.subr.mxu0 %v11791_v45  ;;  %2165 = vmatprep.subr.mxu1 %v11792_v48  ;;  %11808 = vst [vmem:[#allocation125_spill] sm:$0xff] %v7406_v39  ;;  %11809 = vst [vmem:[#allocation126_spill] sm:$0xff] %v7409_v22  ;;  %v7412_v45 = vld [vmem:[#allocation3 + $0x788] sm:$0xff]  ;;  %v7415_v48 = vld [vmem:[#allocation3 + $0x798] sm:$0xff] }
 0x322   :  { %2095 = vmatpush1.msra.mxu0 %v6948_v33  ;;  %2166 = vmatpush1.msra.mxu1 %v6951_v5  ;;  %v7253_v33 = vld [vmem:[#allocation3 + $0x310] sm:$0xff]  ;;  %v7262_v5 = vld [vmem:[#allocation3 + $0x2c0] sm:$0xff]  ;;  %11810 = vst [vmem:[#allocation127_spill] sm:$0xff] %v7412_v45  ;;  %11811 = vst [vmem:[#allocation128_spill] sm:$0xff] %v7415_v48 }
 0x323   :  { %2096 = vmatprep.subr.mxu0 %v6954_v35  ;;  %2167 = vmatprep.subr.mxu1 %v6957_v42  ;;  %v7256_v42 = vld [vmem:[#allocation3 + $0x2c8] sm:$0xff]  ;;  %v7265_v35 = vld [vmem:[#allocation3 + $0x2d0] sm:$0xff] }
 0x324   :  { %2097 = vmatpush1.msra.mxu0 %v6960_v46  ;;  %2168 = vmatpush1.msra.mxu1 %v6963_v19  ;;  %v7259_v19 = vld [vmem:[#allocation3 + $0x2d8] sm:$0xff]  ;;  %v7268_v46 = vld [vmem:[#allocation3 + $0x288] sm:$0xff] }
 0x325   :  { %2098 = vmatprep.subr.mxu0 %v7244_v13  ;;  %2169 = vmatprep.subr.mxu1 %v7247_v6 }
 0x326   :  { %2099 = vmatpush1.msra.mxu0 %v7250_v4  ;;  %2170 = vmatpush1.msra.mxu1 %v7253_v33 }
 0x327   :  { %2100 = vmatprep.subr.mxu0 %v7256_v42  ;;  %2171 = vmatprep.subr.mxu1 %v7259_v19 }
 0x328   :  { %2101 = vmatpush1.msra.mxu0 %v7262_v5  ;;  %2172 = vmatpush1.msra.mxu1 %v7265_v35 }
 0x329   :  { %2102 = vmatprep.subr.mxu0 %v7268_v46  ;;  %2173 = vmatprep.subr.mxu1 %v7271_v2 }
 0x32a   :  { %2103 = vmatpush1.msra.mxu0 %v7274_v37  ;;  %2174 = vmatpush1.msra.mxu1 %v7277_v34 }
 0x32b   :  { %2104 = vmatprep.subr.mxu0 %v7280_v17  ;;  %2175 = vmatprep.subr.mxu1 %v7283_v21 }
 0x32c   :  { %2105 = vmatpush1.msra.mxu0 %v7286_v1  ;;  %2176 = vmatpush1.msra.mxu1 %v7289_v38 }
 0x32d   :  { %2106 = vmatprep.subr.mxu0 %v7292_v8  ;;  %2177 = vmatprep.subr.mxu1 %v7295_v9 }
 0x32e   :  { %2107 = vmatpush1.msra.mxu0 %v7298_v10  ;;  %2178 = vmatpush1.msra.mxu1 %v7301_v11 }
 0x32f   :  { %2108 = vmatprep.subr.mxu0 %v7304_v12  ;;  %2179 = vmatprep.subr.mxu1 %v7307_v14 }
 0x330   :  { %2109 = vmatpush1.msra.mxu0 %v7310_v15  ;;  %2180 = vmatpush1.msra.mxu1 %v7313_v24 }
 0x331   :  { %2110 = vmatprep.subr.mxu0 %v7316_v25  ;;  %2181 = vmatprep.subr.mxu1 %v7319_v26 }
 0x332   :  { %2111 = vmatpush1.msra.mxu0 %v7322_v27  ;;  %2182 = vmatpush1.msra.mxu1 %v7325_v28 }
 0x333   :  { %2112 = vmatprep.subr.mxu0 %v7328_v29  ;;  %2183 = vmatprep.subr.mxu1 %v7331_v30 }
 0x334   :  { %2113 = vmatpush1.msra.mxu0 %v7334_v31  ;;  %2184 = vmatpush1.msra.mxu1 %v7337_v50 }
 0x335   :  { %2114 = vmatprep.subr.mxu0 %v7340_v51  ;;  %2185 = vmatprep.subr.mxu1 %v7343_v52 }
 0x336   :  { %2115 = vmatpush1.msra.mxu0 %v7346_v53  ;;  %2186 = vmatpush1.msra.mxu1 %v7349_v55 }
 0x337   :  { %2116 = vmatprep.subr.mxu0 %v7352_v56  ;;  %2187 = vmatprep.subr.mxu1 %v7355_v57 }
 0x338   :  { %2117 = vmatpush1.msra.mxu0 %v7358_v60  ;;  %2188 = vmatpush1.msra.mxu1 %v7361_v61 }
 0x339   :  { %2118 = vmatprep.subr.mxu0 %v7364_v62  ;;  %2189 = vmatprep.subr.mxu1 %v7367_v63 }
 0x33a   :  { %2119 = vmatpush1.msra.mxu0 %v7370_v32  ;;  %2190 = vmatpush1.msra.mxu1 %v7373_v44 }
 0x33b   :  { %2120 = vmatprep.subr.mxu0 %v7376_v0  ;;  %2191 = vmatprep.subr.mxu1 %v7379_v20 }
 0x33c   :  { %2121 = vmatpush1.msra.mxu0 %v7382_v43  ;;  %2192 = vmatpush1.msra.mxu1 %v7385_v36 }
 0x33d   :  { %2122 = vmatprep.subr.mxu0 %v7388_v7  ;;  %2193 = vmatprep.subr.mxu1 %v7391_v47 }
 0x33e   :  { %2123 = vmatpush1.msra.mxu0 %v7394_v3  ;;  %2194 = vmatpush1.msra.mxu1 %v7397_v18 }
 0x33f   :  { %2124 = vmatprep.subr.mxu0 %v7400_v49  ;;  %2195 = vmatprep.subr.mxu1 %v7403_v16  ;;  %v7418_v49 = vld [vmem:[#allocation3 + $0x780] sm:$0xff]  ;;  %v7421_v16 = vld [vmem:[#allocation3 + $0x790] sm:$0xff] }
 0x340   :  { %2125 = vmatpush2.msra.mxu0 %v7406_v39  ;;  %2196 = vmatpush2.msra.mxu1 %v7409_v22  ;;  %11812 = vst [vmem:[#allocation129_spill] sm:$0xff] %v7418_v49  ;;  %11813 = vst [vmem:[#allocation130_spill] sm:$0xff] %v7421_v16  ;;  %v7424_v39 = vld [vmem:[#allocation3 + $0x748] sm:$0xff]  ;;  %v7427_v22 = vld [vmem:[#allocation3 + $0x758] sm:$0xff] }
 0x341   :  { %2126 = vmatprep.subr.mxu0 %v7412_v45  ;;  %2197 = vmatprep.subr.mxu1 %v7415_v48  ;;  %11814 = vst [vmem:[#allocation131_spill] sm:$0xff] %v7424_v39  ;;  %11815 = vst [vmem:[#allocation132_spill] sm:$0xff] %v7427_v22  ;;  %v7430_v45 = vld [vmem:[#allocation3 + $0x740] sm:$0xff]  ;;  %v7433_v48 = vld [vmem:[#allocation3 + $0x750] sm:$0xff] }
 0x342   :  { %2127 = vmatpush2.msra.mxu0 %v7418_v49  ;;  %2198 = vmatpush2.msra.mxu1 %v7421_v16  ;;  %11816 = vst [vmem:[#allocation133_spill] sm:$0xff] %v7430_v45  ;;  %11817 = vst [vmem:[#allocation134_spill] sm:$0xff] %v7433_v48  ;;  %v7436_v49 = vld [vmem:[#allocation3 + $0x708] sm:$0xff]  ;;  %v7439_v16 = vld [vmem:[#allocation3 + $0x718] sm:$0xff] }
 0x343   :  { %2128 = vmatprep.subr.mxu0 %v7424_v39  ;;  %2199 = vmatprep.subr.mxu1 %v7427_v22  ;;  %11818 = vst [vmem:[#allocation135_spill] sm:$0xff] %v7436_v49  ;;  %11819 = vst [vmem:[#allocation136_spill] sm:$0xff] %v7439_v16  ;;  %v7442_v39 = vld [vmem:[#allocation3 + $0x700] sm:$0xff]  ;;  %v7445_v22 = vld [vmem:[#allocation3 + $0x710] sm:$0xff] }
 0x344   :  { %2129 = vmatpush2.msra.mxu0 %v7430_v45  ;;  %2200 = vmatpush2.msra.mxu1 %v7433_v48  ;;  %11820 = vst [vmem:[#allocation137_spill] sm:$0xff] %v7442_v39  ;;  %11821 = vst [vmem:[#allocation138_spill] sm:$0xff] %v7445_v22  ;;  %v7448_v45 = vld [vmem:[#allocation3 + $0x6c8] sm:$0xff]  ;;  %v7451_v48 = vld [vmem:[#allocation3 + $0x6d8] sm:$0xff] }
 0x345   :  { %2130 = vmatprep.subr.mxu0 %v7436_v49  ;;  %2201 = vmatprep.subr.mxu1 %v7439_v16  ;;  %11822 = vst [vmem:[#allocation139_spill] sm:$0xff] %v7448_v45  ;;  %11823 = vst [vmem:[#allocation140_spill] sm:$0xff] %v7451_v48  ;;  %v7454_v49 = vld [vmem:[#allocation3 + $0x6c0] sm:$0xff]  ;;  %v7457_v16 = vld [vmem:[#allocation3 + $0x6d0] sm:$0xff] }
 0x346   :  { %2131 = vmatpush2.msra.mxu0 %v7442_v39  ;;  %2202 = vmatpush2.msra.mxu1 %v7445_v22  ;;  %11824 = vst [vmem:[#allocation141_spill] sm:$0xff] %v7454_v49  ;;  %11825 = vst [vmem:[#allocation142_spill] sm:$0xff] %v7457_v16  ;;  %v7460_v39 = vld [vmem:[#allocation3 + $0x688] sm:$0xff]  ;;  %v7463_v22 = vld [vmem:[#allocation3 + $0x698] sm:$0xff] }
 0x347   :  { %2132 = vmatprep.subr.mxu0 %v7448_v45  ;;  %2203 = vmatprep.subr.mxu1 %v7451_v48  ;;  %11826 = vst [vmem:[#allocation143_spill] sm:$0xff] %v7460_v39  ;;  %11827 = vst [vmem:[#allocation144_spill] sm:$0xff] %v7463_v22  ;;  %v7466_v45 = vld [vmem:[#allocation3 + $0x680] sm:$0xff]  ;;  %v7469_v48 = vld [vmem:[#allocation3 + $0x690] sm:$0xff] }
 0x348   :  { %2133 = vmatpush2.msra.mxu0 %v7454_v49  ;;  %2204 = vmatpush2.msra.mxu1 %v7457_v16  ;;  %11828 = vst [vmem:[#allocation145_spill] sm:$0xff] %v7466_v45  ;;  %11829 = vst [vmem:[#allocation146_spill] sm:$0xff] %v7469_v48  ;;  %v7472_v49 = vld [vmem:[#allocation3 + $0x648] sm:$0xff]  ;;  %v7475_v16 = vld [vmem:[#allocation3 + $0x658] sm:$0xff] }
 0x349   :  { %2134 = vmatprep.subr.mxu0 %v7460_v39  ;;  %2205 = vmatprep.subr.mxu1 %v7463_v22  ;;  %11830 = vst [vmem:[#allocation147_spill] sm:$0xff] %v7472_v49  ;;  %11831 = vst [vmem:[#allocation148_spill] sm:$0xff] %v7475_v16  ;;  %v7478_v39 = vld [vmem:[#allocation3 + $0x640] sm:$0xff]  ;;  %v7481_v22 = vld [vmem:[#allocation3 + $0x650] sm:$0xff] }
 0x34a   :  { %2135 = vmatpush2.msra.mxu0 %v7466_v45  ;;  %2206 = vmatpush2.msra.mxu1 %v7469_v48  ;;  %11832 = vst [vmem:[#allocation149_spill] sm:$0xff] %v7478_v39  ;;  %11833 = vst [vmem:[#allocation150_spill] sm:$0xff] %v7481_v22  ;;  %v7484_v45 = vld [vmem:[#allocation3 + $0x608] sm:$0xff]  ;;  %v7487_v48 = vld [vmem:[#allocation3 + $0x618] sm:$0xff] }
 0x34b   :  { %2136 = vmatprep.subr.mxu0 %v7472_v49  ;;  %2207 = vmatprep.subr.mxu1 %v7475_v16  ;;  %11834 = vst [vmem:[#allocation151_spill] sm:$0xff] %v7484_v45  ;;  %11835 = vst [vmem:[#allocation152_spill] sm:$0xff] %v7487_v48  ;;  %v7490_v49 = vld [vmem:[#allocation3 + $0x600] sm:$0xff]  ;;  %v7493_v16 = vld [vmem:[#allocation3 + $0x610] sm:$0xff] }
 0x34c   :  { %2137 = vmatpush2.msra.mxu0 %v7478_v39  ;;  %2208 = vmatpush2.msra.mxu1 %v7481_v22  ;;  %11836 = vst [vmem:[#allocation153_spill] sm:$0xff] %v7490_v49  ;;  %11837 = vst [vmem:[#allocation154_spill] sm:$0xff] %v7493_v16  ;;  %v7496_v39 = vld [vmem:[#allocation3 + $0x5c8] sm:$0xff]  ;;  %v7499_v22 = vld [vmem:[#allocation3 + $0x5d8] sm:$0xff] }
 0x34d   :  { %2138 = vmatprep.subr.mxu0 %v7484_v45  ;;  %2209 = vmatprep.subr.mxu1 %v7487_v48  ;;  %11838 = vst [vmem:[#allocation155_spill] sm:$0xff] %v7496_v39  ;;  %11839 = vst [vmem:[#allocation156_spill] sm:$0xff] %v7499_v22  ;;  %v7502_v45 = vld [vmem:[#allocation3 + $0x5c0] sm:$0xff]  ;;  %v7505_v48 = vld [vmem:[#allocation3 + $0x5d0] sm:$0xff] }
 0x34e   :  { %2139 = vmatpush2.msra.mxu0 %v7490_v49  ;;  %2210 = vmatpush2.msra.mxu1 %v7493_v16  ;;  %11840 = vst [vmem:[#allocation157_spill] sm:$0xff] %v7502_v45  ;;  %11841 = vst [vmem:[#allocation158_spill] sm:$0xff] %v7505_v48  ;;  %v7508_v49 = vld [vmem:[#allocation3 + $0x588] sm:$0xff]  ;;  %v7511_v16 = vld [vmem:[#allocation3 + $0x598] sm:$0xff] }
 0x34f   :  { %2140 = vmatprep.subr.mxu0 %v7496_v39  ;;  %2211 = vmatprep.subr.mxu1 %v7499_v22  ;;  %11842 = vst [vmem:[#allocation159_spill] sm:$0xff] %v7508_v49  ;;  %11843 = vst [vmem:[#allocation160_spill] sm:$0xff] %v7511_v16  ;;  %v7514_v39 = vld [vmem:[#allocation3 + $0x580] sm:$0xff]  ;;  %v7517_v22 = vld [vmem:[#allocation3 + $0x590] sm:$0xff] }
 0x350   :  { %2141 = vmatpush2.msra.mxu0 %v7502_v45  ;;  %2212 = vmatpush2.msra.mxu1 %v7505_v48  ;;  %11844 = vst [vmem:[#allocation161_spill] sm:$0xff] %v7514_v39  ;;  %11845 = vst [vmem:[#allocation162_spill] sm:$0xff] %v7517_v22  ;;  %v7520_v45 = vld [vmem:[#allocation3 + $0x548] sm:$0xff]  ;;  %v7523_v48 = vld [vmem:[#allocation3 + $0x558] sm:$0xff] }
 0x351   :  { %2142 = vmatprep.subr.mxu0 %v7508_v49  ;;  %2213 = vmatprep.subr.mxu1 %v7511_v16  ;;  %11846 = vst [vmem:[#allocation163_spill] sm:$0xff] %v7520_v45  ;;  %11847 = vst [vmem:[#allocation164_spill] sm:$0xff] %v7523_v48  ;;  %v7526_v49 = vld [vmem:[#allocation3 + $0x540] sm:$0xff]  ;;  %v7529_v16 = vld [vmem:[#allocation3 + $0x550] sm:$0xff] }
 0x352   :  { %2143 = vmatpush2.msra.mxu0 %v7514_v39  ;;  %2214 = vmatpush2.msra.mxu1 %v7517_v22  ;;  %11848 = vst [vmem:[#allocation165_spill] sm:$0xff] %v7526_v49  ;;  %11849 = vst [vmem:[#allocation166_spill] sm:$0xff] %v7529_v16  ;;  %v7532_v39 = vld [vmem:[#allocation3 + $0x508] sm:$0xff]  ;;  %v7535_v22 = vld [vmem:[#allocation3 + $0x518] sm:$0xff] }
 0x353   :  { %2144 = vmatprep.subr.mxu0 %v7520_v45  ;;  %2215 = vmatprep.subr.mxu1 %v7523_v48  ;;  %11850 = vst [vmem:[#allocation167_spill] sm:$0xff] %v7532_v39  ;;  %11851 = vst [vmem:[#allocation168_spill] sm:$0xff] %v7535_v22  ;;  %v7538_v45 = vld [vmem:[#allocation3 + $0x500] sm:$0xff]  ;;  %v7541_v48 = vld [vmem:[#allocation3 + $0x510] sm:$0xff] }
 0x354   :  { %2145 = vmatpush2.msra.mxu0 %v7526_v49  ;;  %2216 = vmatpush2.msra.mxu1 %v7529_v16  ;;  %11852 = vst [vmem:[#allocation169_spill] sm:$0xff] %v7538_v45  ;;  %11853 = vst [vmem:[#allocation170_spill] sm:$0xff] %v7541_v48  ;;  %v7544_v49 = vld [vmem:[#allocation3 + $0x4c8] sm:$0xff]  ;;  %v7547_v16 = vld [vmem:[#allocation3 + $0x4d8] sm:$0xff] }
 0x355   :  { %2146 = vmatprep.subr.mxu0 %v7532_v39  ;;  %2217 = vmatprep.subr.mxu1 %v7535_v22  ;;  %11854 = vst [vmem:[#allocation171_spill] sm:$0xff] %v7544_v49  ;;  %11855 = vst [vmem:[#allocation172_spill] sm:$0xff] %v7547_v16  ;;  %v7550_v39 = vld [vmem:[#allocation3 + $0x4c0] sm:$0xff]  ;;  %v7553_v22 = vld [vmem:[#allocation3 + $0x4d0] sm:$0xff] }
 0x356   :  { %2147 = vmatpush2.msra.mxu0 %v7538_v45  ;;  %2218 = vmatpush2.msra.mxu1 %v7541_v48  ;;  %11856 = vst [vmem:[#allocation173_spill] sm:$0xff] %v7550_v39  ;;  %11857 = vst [vmem:[#allocation174_spill] sm:$0xff] %v7553_v22  ;;  %v7556_v45 = vld [vmem:[#allocation3 + $0x488] sm:$0xff]  ;;  %v7559_v48 = vld [vmem:[#allocation3 + $0x498] sm:$0xff] }
 0x357   :  { %2148 = vmatprep.subr.mxu0 %v7544_v49  ;;  %2219 = vmatprep.subr.mxu1 %v7547_v16  ;;  %11858 = vst [vmem:[#allocation175_spill] sm:$0xff] %v7556_v45  ;;  %11859 = vst [vmem:[#allocation93_spill] sm:$0xff] %v7559_v48  ;;  %v7562_v49 = vld [vmem:[#allocation3 + $0x480] sm:$0xff]  ;;  %v7565_v16 = vld [vmem:[#allocation3 + $0x490] sm:$0xff] }
 0x358   :  { %2149 = vmatpush2.msra.mxu0 %v7550_v39  ;;  %2220 = vmatpush2.msra.mxu1 %v7553_v22  ;;  %11860 = vst [vmem:[#allocation94_spill] sm:$0xff] %v7562_v49  ;;  %11861 = vst [vmem:[#allocation96_spill] sm:$0xff] %v7565_v16  ;;  %v7568_v39 = vld [vmem:[#allocation3 + $0x448] sm:$0xff]  ;;  %v7571_v22 = vld [vmem:[#allocation3 + $0x458] sm:$0xff] }
 0x359   :  { %2150 = vmatprep.subr.mxu0 %v7556_v45  ;;  %2221 = vmatprep.subr.mxu1 %v7559_v48  ;;  %11862 = vst [vmem:[#allocation102_spill] sm:$0xff] %v7568_v39  ;;  %11863 = vst [vmem:[#allocation104_spill] sm:$0xff] %v7571_v22  ;;  %v7574_v45 = vld [vmem:[#allocation3 + $0x440] sm:$0xff]  ;;  %v7577_v48 = vld [vmem:[#allocation3 + $0x450] sm:$0xff] }
 0x35a   :  { %2151 = vmatpush2.msra.mxu0 %v7562_v49  ;;  %2222 = vmatpush2.msra.mxu1 %v7565_v16  ;;  %11864 = vst [vmem:[#allocation176_spill] sm:$0xff] %v7574_v45  ;;  %11865 = vst [vmem:[#allocation177_spill] sm:$0xff] %v7577_v48  ;;  %v7580_v49 = vld [vmem:[#allocation3 + $0x408] sm:$0xff]  ;;  %v7583_v16 = vld [vmem:[#allocation3 + $0x418] sm:$0xff] }
 0x35b   :  { %2152 = vmatprep.subr.mxu0 %v7568_v39  ;;  %2223 = vmatprep.subr.mxu1 %v7571_v22  ;;  %11866 = vst [vmem:[#allocation178_spill] sm:$0xff] %v7580_v49  ;;  %11867 = vst [vmem:[#allocation179_spill] sm:$0xff] %v7583_v16  ;;  %v7586_v39 = vld [vmem:[#allocation3 + $0x400] sm:$0xff]  ;;  %v7589_v22 = vld [vmem:[#allocation3 + $0x410] sm:$0xff] }
 0x35c   :  { %2153 = vmatpush2.msra.mxu0 %v7574_v45  ;;  %2224 = vmatpush2.msra.mxu1 %v7577_v48  ;;  %11868 = vst [vmem:[#allocation180_spill] sm:$0xff] %v7586_v39  ;;  %11869 = vst [vmem:[#allocation181_spill] sm:$0xff] %v7589_v22  ;;  %v7592_v45 = vld [vmem:[#allocation3 + $0x3e8] sm:$0xff]  ;;  %v7595_v48 = vld [vmem:[#allocation3 + $0x3f8] sm:$0xff] }
 0x35d   :  { %2154 = vmatprep.subr.mxu0 %v7580_v49  ;;  %2225 = vmatprep.subr.mxu1 %v7583_v16  ;;  %11870 = vst [vmem:[#allocation182_spill] sm:$0xff] %v7592_v45  ;;  %11871 = vst [vmem:[#allocation183_spill] sm:$0xff] %v7595_v48 }
 0x35e   :  { %2155 = vmatpush2.msra.mxu0 %v7586_v39  ;;  %2226 = vmatpush2.msra.mxu1 %v7589_v22  ;;  %v11872_v22 = vcombine.high %v11661_v58, %v11662_v59  ;;  %v11873_v58 = vcombine.high %v11664_v23, %v11665_v40 }
 0x35f   :  { %2234 = vmatprep.subr.mxu0 %v7592_v45  ;;  %2305 = vmatprep.subr.mxu1 %v7595_v48 }
 0x39d   :  { %v1791_v49 = vpop.f32.mrf.mxu0  ;;  %v1862_v18 = vpop.f32.mrf.mxu1 }
 0x39f   :  { %v1793_v3 = vpop.f32.mrf.mxu0  ;;  %v1864_v16 = vpop.f32.mrf.mxu1 }
 0x3a0   :  { %v2017_v47 = vcombine.low %v1791_v49, %v1793_v3  ;;  %v2018_v7 = vcombine.low %v1862_v18, %v1864_v16 }
 0x3a2   :  { %v2025_v39 = vrot.slane %v2017_v47, %v11660_v54  ;;  %v2032_v36 = vrot.slane %v2018_v7, %v11660_v54 }
 0x3a4   :  { %v2033_v43 = vcombine.low %v2025_v39, %v2032_v36 }
 0x3a6   :  { %v2053_v20 = vadd.f32 %v2033_v43, %v11872_v22 }
 0x3a8   :  { %v4650_v45 = vmul.f32 -1.442695, %v2053_v20 }
 0x3aa   :  { %4724 = vpow2.f32 %v4650_v45  ;;  %v7622_v45 = vld [vmem:[#allocation3 + $0x3f0] sm:$0xff] }
 0x3b7   :  { %v4725_v0 = vpop.eup %4724 }
 0x3b8   :  { %v2058_v32 = vadd.f32 1.0, %v4725_v0 }
 0x3ba   :  { %4726 = vrcp.f32 %v2058_v32 }
 0x3c7   :  { %v4727_v18 = vpop.eup %4726 }
 0x3c8   :  { %v2072_v0 = vrot.slane %v4727_v18, 4 }
 0x3de   :  { %v1933_v44 = vpop.f32.mrf.mxu0  ;;  %v2004_v48 = vpop.f32.mrf.mxu1 }
 0x3e0   :  { %v1935_v63 = vpop.f32.mrf.mxu0  ;;  %v2006_v62 = vpop.f32.mrf.mxu1 }
 0x3e1   :  { %v2034_v61 = vcombine.low %v1933_v44, %v1935_v63  ;;  %v2035_v3 = vcombine.low %v2004_v48, %v2006_v62  ;;  %v2074_v63 = vmul.f32 %v2072_v0, %v7094_v41  ;;  %v7619_v41 = vld [vmem:[#allocation3 + $0x3e0] sm:$0xff]  ;;  %v7625_v48 = vld [vmem:[#allocation3 + $0x3a8] sm:$0xff] }
 0x3e2   :  { %v7655_v0 = vld [vmem:[#allocation3 + $0x320] sm:$0xff] }
 0x3e3   :  { %v2042_v47 = vrot.slane %v2034_v61, %v11660_v54  ;;  %v2049_v7 = vrot.slane %v2035_v3, %v11660_v54  ;;  %v7628_v3 = vld [vmem:[#allocation3 + $0x3b8] sm:$0xff] }
 0x3e5   :  { %v2050_v36 = vcombine.low %v2042_v47, %v2049_v7  ;;  %v7631_v47 = vld [vmem:[#allocation3 + $0x3a0] sm:$0xff]  ;;  %v7634_v7 = vld [vmem:[#allocation3 + $0x3b0] sm:$0xff] }
 0x3e7   :  { %v2054_v59 = vadd.f32 %v2050_v36, %v11873_v58  ;;  %v7637_v36 = vld [vmem:[#allocation3 + $0x368] sm:$0xff]  ;;  %v7640_v58 = vld [vmem:[#allocation3 + $0x378] sm:$0xff] }
 0x3e9   :  { %4728 = vtanh.f32 %v2054_v59  ;;  %v2063_v20 = vrot.slane %v2054_v59, 4  ;;  %v7643_v59 = vld [vmem:[#allocation3 + $0x360] sm:$0xff] }
 0x3eb   :  { %v4651_v43 = vmul.f32 -1.442695, %v2063_v20  ;;  %v7646_v20 = vld [vmem:[#allocation3 + $0x370] sm:$0xff] }
 0x3ed   :  { %4730 = vpow2.f32 %v4651_v43  ;;  %v7649_v43 = vld [vmem:[#allocation3 + $0x328] sm:$0xff] }
 0x3f6   :  { %v4729_v49 = vpop.eup %4728 }
 0x3f7   :  { %v2075_v62 = vmul.f32 %v4729_v49, %v4727_v18  ;;  %v7652_v18 = vld [vmem:[#allocation3 + $0x338] sm:$0xff]  ;;  %v7658_v49 = vld [vmem:[#allocation3 + $0x330] sm:$0xff] }
 0x3f9   :  { %v7609_v32 = vadd.f32 %v2075_v62, %v2074_v63  ;;  %v7661_v63 = vld [vmem:[#allocation3 + $0x2e8] sm:$0xff]  ;;  %v7664_v62 = vld [vmem:[#allocation3 + $0x2f8] sm:$0xff] }
 0x3fa   :  { %v4731_v61 = vpop.eup %4730 }
 0x3fb   :  { %v2068_v44 = vadd.f32 1.0, %v4731_v61  ;;  %4732 = vtanh.f32 %v7609_v32  ;;  %v7667_v61 = vld [vmem:[#allocation3 + $0x2e0] sm:$0xff] }
 0x3fc   :  { %11874 = vst [vmem:[#allocation184_spill] sm:$0xff] %v7667_v61 }
 0x3fd   :  { %4734 = vrcp.f32 %v2068_v44  ;;  %v7670_v44 = vld [vmem:[#allocation3 + $0x2f0] sm:$0xff] }
 0x3fe   :  { %11875 = vst [vmem:[#allocation185_spill] sm:$0xff] %v7670_v44 }
 0x408   :  { %v4733_v16 = vpop.eup %4732 }
 0x40a   :  { %v4735_v23 = vpop.eup %4734 }
 0x40b   :  { %v2078_v40 = vmul.f32 %v4735_v23, %v4733_v16  ;;  %v7673_v16 = vld [vmem:[#allocation3 + $0x2a8] sm:$0xff]  ;;  %v7676_v23 = vld [vmem:[#allocation3 + $0x2b8] sm:$0xff] }
 0x40c   :  { %11876 = vst [vmem:[#allocation186_spill] sm:$0xff] %v7673_v16  ;;  %11877 = vst [vmem:[#allocation187_spill] sm:$0xff] %v7676_v23 }
 0x40d   :  { %v7613_v39 = vrot.slane %v2078_v40, %v11660_v54  ;;  %v7679_v40 = vld [vmem:[#allocation3 + $0x2a0] sm:$0xff] }
 0x40e   :  { %11878 = vst [vmem:[#allocation188_spill] sm:$0xff] %v7679_v40 }
 0x40f   :  { %v2089_v22 = vcombine.high %v7613_v39, %v7613_v39 }
 0x411   :  { %2156 = vmatprep.mubr.f32.mxu0 %v2089_v22  ;;  %2227 = vmatprep.mubr.f32.mxu1 %v2089_v22 }
 0x412   :  { %2157 = vmatmul.mubr.f32.vlgmr.msra.gmra.mxu0 %v7613_v39  ;;  %2228 = vmatmul.mubr.f32.vlgmr.msra.gmra.mxu1 %v7613_v39 }
 0x413   :  { %2235 = vmatpush1.msra.mxu0 %v7619_v41  ;;  %2306 = vmatpush1.msra.mxu1 %v7622_v45 }
 0x414   :  { %2236 = vmatprep.subr.mxu0 %v7625_v48  ;;  %2298 = vmatprep.mubr.f32.mxu0 %v2089_v22 }
 0x415   :  { %2307 = vmatprep.subr.mxu1 %v7628_v3  ;;  %2369 = vmatprep.mubr.f32.mxu1 %v2089_v22  ;;  %v7682_v22 = vld [vmem:[#allocation3 + $0x2b0] sm:$0xff] }
 0x416   :  { %2237 = vmatpush1.msra.mxu0 %v7631_v47  ;;  %2308 = vmatpush1.msra.mxu1 %v7634_v7  ;;  %11879 = vst [vmem:[#allocation189_spill] sm:$0xff] %v7682_v22 }
 0x417   :  { %2238 = vmatprep.subr.mxu0 %v7637_v36  ;;  %2309 = vmatprep.subr.mxu1 %v7640_v58 }
 0x418   :  { %2239 = vmatpush1.msra.mxu0 %v7643_v59  ;;  %2310 = vmatpush1.msra.mxu1 %v7646_v20 }
 0x419   :  { %2240 = vmatprep.subr.mxu0 %v7649_v43  ;;  %2311 = vmatprep.subr.mxu1 %v7652_v18 }
 0x41a   :  { %2241 = vmatpush1.msra.mxu0 %v7655_v0  ;;  %2312 = vmatpush1.msra.mxu1 %v7658_v49 }
 0x41b   :  { %2242 = vmatprep.subr.mxu0 %v7661_v63  ;;  %2313 = vmatprep.subr.mxu1 %v7664_v62 }
 0x41c   :  { %2243 = vmatpush1.msra.mxu0 %v7667_v61  ;;  %2314 = vmatpush1.msra.mxu1 %v7670_v44  ;;  %v7685_v61 = vld [vmem:[#allocation3 + $0x268] sm:$0xff]  ;;  %v7688_v44 = vld [vmem:[#allocation3 + $0x278] sm:$0xff] }
 0x41d   :  { %2244 = vmatprep.subr.mxu0 %v7673_v16  ;;  %2315 = vmatprep.subr.mxu1 %v7676_v23  ;;  %11880 = vst [vmem:[#allocation190_spill] sm:$0xff] %v7685_v61  ;;  %11881 = vst [vmem:[#allocation191_spill] sm:$0xff] %v7688_v44  ;;  %v7691_v16 = vld [vmem:[#allocation3 + $0x260] sm:$0xff]  ;;  %v7694_v23 = vld [vmem:[#allocation3 + $0x270] sm:$0xff] }
 0x41e   :  { %2245 = vmatpush1.msra.mxu0 %v7679_v40  ;;  %2316 = vmatpush1.msra.mxu1 %v7682_v22  ;;  %11882 = vst [vmem:[#allocation192_spill] sm:$0xff] %v7691_v16  ;;  %11883 = vst [vmem:[#allocation193_spill] sm:$0xff] %v7694_v23  ;;  %v7697_v40 = vld [vmem:[#allocation3 + $0x228] sm:$0xff]  ;;  %v7700_v22 = vld [vmem:[#allocation3 + $0x238] sm:$0xff] }
 0x41f   :  { %2246 = vmatprep.subr.mxu0 %v7685_v61  ;;  %2317 = vmatprep.subr.mxu1 %v7688_v44  ;;  %11884 = vst [vmem:[#allocation194_spill] sm:$0xff] %v7697_v40  ;;  %11885 = vst [vmem:[#allocation195_spill] sm:$0xff] %v7700_v22  ;;  %v7703_v61 = vld [vmem:[#allocation3 + $0x220] sm:$0xff]  ;;  %v7706_v44 = vld [vmem:[#allocation3 + $0x230] sm:$0xff] }
 0x420   :  { %2247 = vmatpush1.msra.mxu0 %v7691_v16  ;;  %2318 = vmatpush1.msra.mxu1 %v7694_v23  ;;  %11886 = vst [vmem:[#allocation196_spill] sm:$0xff] %v7703_v61  ;;  %11887 = vst [vmem:[#allocation197_spill] sm:$0xff] %v7706_v44  ;;  %v7709_v16 = vld [vmem:[#allocation3 + $0x1e8] sm:$0xff]  ;;  %v7712_v23 = vld [vmem:[#allocation3 + $0x1f8] sm:$0xff] }
 0x421   :  { %2248 = vmatprep.subr.mxu0 %v7697_v40  ;;  %2319 = vmatprep.subr.mxu1 %v7700_v22  ;;  %11888 = vst [vmem:[#allocation198_spill] sm:$0xff] %v7709_v16  ;;  %11889 = vst [vmem:[#allocation199_spill] sm:$0xff] %v7712_v23  ;;  %v7715_v40 = vld [vmem:[#allocation3 + $0x1e0] sm:$0xff]  ;;  %v7718_v22 = vld [vmem:[#allocation3 + $0x1f0] sm:$0xff] }
 0x422   :  { %2249 = vmatpush1.msra.mxu0 %v7703_v61  ;;  %2320 = vmatpush1.msra.mxu1 %v7706_v44  ;;  %11890 = vst [vmem:[#allocation200_spill] sm:$0xff] %v7715_v40  ;;  %11891 = vst [vmem:[#allocation201_spill] sm:$0xff] %v7718_v22  ;;  %v7721_v61 = vld [vmem:[#allocation3 + $0x1a8] sm:$0xff]  ;;  %v7724_v44 = vld [vmem:[#allocation3 + $0x1b8] sm:$0xff] }
 0x423   :  { %2250 = vmatprep.subr.mxu0 %v7709_v16  ;;  %2321 = vmatprep.subr.mxu1 %v7712_v23  ;;  %11892 = vst [vmem:[#allocation202_spill] sm:$0xff] %v7721_v61  ;;  %11893 = vst [vmem:[#allocation203_spill] sm:$0xff] %v7724_v44  ;;  %v7727_v16 = vld [vmem:[#allocation3 + $0x1a0] sm:$0xff]  ;;  %v7730_v23 = vld [vmem:[#allocation3 + $0x1b0] sm:$0xff] }
 0x424   :  { %2251 = vmatpush1.msra.mxu0 %v7715_v40  ;;  %2322 = vmatpush1.msra.mxu1 %v7718_v22  ;;  %11894 = vst [vmem:[#allocation204_spill] sm:$0xff] %v7727_v16  ;;  %11895 = vst [vmem:[#allocation205_spill] sm:$0xff] %v7730_v23  ;;  %v7733_v40 = vld [vmem:[#allocation3 + $0x168] sm:$0xff]  ;;  %v7736_v22 = vld [vmem:[#allocation3 + $0x178] sm:$0xff] }
 0x425   :  { %2252 = vmatprep.subr.mxu0 %v7721_v61  ;;  %2323 = vmatprep.subr.mxu1 %v7724_v44  ;;  %11896 = vst [vmem:[#allocation206_spill] sm:$0xff] %v7733_v40  ;;  %11897 = vst [vmem:[#allocation207_spill] sm:$0xff] %v7736_v22  ;;  %v7739_v61 = vld [vmem:[#allocation3 + $0x160] sm:$0xff]  ;;  %v7742_v44 = vld [vmem:[#allocation3 + $0x170] sm:$0xff] }
 0x426   :  { %2253 = vmatpush1.msra.mxu0 %v7727_v16  ;;  %2324 = vmatpush1.msra.mxu1 %v7730_v23  ;;  %11898 = vst [vmem:[#allocation208_spill] sm:$0xff] %v7739_v61  ;;  %11899 = vst [vmem:[#allocation209_spill] sm:$0xff] %v7742_v44  ;;  %v7745_v16 = vld [vmem:[#allocation3 + $0x128] sm:$0xff]  ;;  %v7748_v23 = vld [vmem:[#allocation3 + $0x138] sm:$0xff] }
 0x427   :  { %2254 = vmatprep.subr.mxu0 %v7733_v40  ;;  %2325 = vmatprep.subr.mxu1 %v7736_v22  ;;  %11900 = vst [vmem:[#allocation210_spill] sm:$0xff] %v7745_v16  ;;  %11901 = vst [vmem:[#allocation211_spill] sm:$0xff] %v7748_v23  ;;  %v7751_v40 = vld [vmem:[#allocation3 + $0x120] sm:$0xff]  ;;  %v7754_v22 = vld [vmem:[#allocation3 + $0x130] sm:$0xff] }
 0x428   :  { %2255 = vmatpush1.msra.mxu0 %v7739_v61  ;;  %2326 = vmatpush1.msra.mxu1 %v7742_v44  ;;  %11902 = vst [vmem:[#allocation212_spill] sm:$0xff] %v7751_v40  ;;  %11903 = vst [vmem:[#allocation213_spill] sm:$0xff] %v7754_v22  ;;  %v7757_v61 = vld [vmem:[#allocation3 + $0xe8] sm:$0xff]  ;;  %v7760_v44 = vld [vmem:[#allocation3 + $0xf8] sm:$0xff] }
 0x429   :  { %2256 = vmatprep.subr.mxu0 %v7745_v16  ;;  %2327 = vmatprep.subr.mxu1 %v7748_v23  ;;  %11904 = vst [vmem:[#allocation214_spill] sm:$0xff] %v7757_v61  ;;  %11905 = vst [vmem:[#allocation215_spill] sm:$0xff] %v7760_v44  ;;  %v7763_v16 = vld [vmem:[#allocation3 + $0xe0] sm:$0xff]  ;;  %v7766_v23 = vld [vmem:[#allocation3 + $0xf0] sm:$0xff] }
 0x42a   :  { %2257 = vmatpush1.msra.mxu0 %v7751_v40  ;;  %2328 = vmatpush1.msra.mxu1 %v7754_v22  ;;  %11906 = vst [vmem:[#allocation216_spill] sm:$0xff] %v7763_v16  ;;  %11907 = vst [vmem:[#allocation217_spill] sm:$0xff] %v7766_v23  ;;  %v7769_v40 = vld [vmem:[#allocation3 + $0xa8] sm:$0xff]  ;;  %v7772_v22 = vld [vmem:[#allocation3 + $0xb8] sm:$0xff] }
 0x42b   :  { %2258 = vmatprep.subr.mxu0 %v7757_v61  ;;  %2329 = vmatprep.subr.mxu1 %v7760_v44  ;;  %11908 = vst [vmem:[#allocation218_spill] sm:$0xff] %v7769_v40  ;;  %11909 = vst [vmem:[#allocation219_spill] sm:$0xff] %v7772_v22  ;;  %v7775_v61 = vld [vmem:[#allocation3 + $0xa0] sm:$0xff]  ;;  %v7778_v44 = vld [vmem:[#allocation3 + $0xb0] sm:$0xff] }
 0x42c   :  { %2259 = vmatpush1.msra.mxu0 %v7763_v16  ;;  %2330 = vmatpush1.msra.mxu1 %v7766_v23  ;;  %11910 = vst [vmem:[#allocation220_spill] sm:$0xff] %v7775_v61  ;;  %11911 = vst [vmem:[#allocation221_spill] sm:$0xff] %v7778_v44  ;;  %v7781_v16 = vld [vmem:[#allocation3 + $0x68] sm:$0xff]  ;;  %v7784_v23 = vld [vmem:[#allocation3 + $0x78] sm:$0xff] }
 0x42d   :  { %2260 = vmatprep.subr.mxu0 %v7769_v40  ;;  %2331 = vmatprep.subr.mxu1 %v7772_v22  ;;  %11912 = vst [vmem:[#allocation222_spill] sm:$0xff] %v7781_v16  ;;  %11913 = vst [vmem:[#allocation223_spill] sm:$0xff] %v7784_v23  ;;  %v7787_v40 = vld [vmem:[#allocation3 + $0x60] sm:$0xff]  ;;  %v7790_v22 = vld [vmem:[#allocation3 + $0x70] sm:$0xff] }
 0x42e   :  { %2261 = vmatpush1.msra.mxu0 %v7775_v61  ;;  %2332 = vmatpush1.msra.mxu1 %v7778_v44  ;;  %11914 = vst [vmem:[#allocation224_spill] sm:$0xff] %v7787_v40  ;;  %11915 = vst [vmem:[#allocation225_spill] sm:$0xff] %v7790_v22  ;;  %v7793_v61 = vld [vmem:[#allocation3 + $0x28] sm:$0xff]  ;;  %v7796_v44 = vld [vmem:[#allocation3 + $0x38] sm:$0xff] }
 0x42f   :  { %2262 = vmatprep.subr.mxu0 %v7781_v16  ;;  %2333 = vmatprep.subr.mxu1 %v7784_v23  ;;  %11916 = vst [vmem:[#allocation226_spill] sm:$0xff] %v7793_v61  ;;  %11917 = vst [vmem:[#allocation227_spill] sm:$0xff] %v7796_v44  ;;  %v7799_v16 = vld [vmem:[#allocation3 + $0x20] sm:$0xff]  ;;  %v7802_v23 = vld [vmem:[#allocation3 + $0x30] sm:$0xff] }
 0x430   :  { %2263 = vmatpush1.msra.mxu0 %v7787_v40  ;;  %2334 = vmatpush1.msra.mxu1 %v7790_v22  ;;  %11918 = vst [vmem:[#allocation228_spill] sm:$0xff] %v7799_v16  ;;  %11919 = vst [vmem:[#allocation229_spill] sm:$0xff] %v7802_v23  ;;  %v7805_v40 = vld [vmem:[#allocation3 + $0x7e8] sm:$0xff]  ;;  %v7808_v22 = vld [vmem:[#allocation3 + $0x7f8] sm:$0xff] }
 0x431   :  { %2264 = vmatprep.subr.mxu0 %v7793_v61  ;;  %2335 = vmatprep.subr.mxu1 %v7796_v44  ;;  %11920 = vst [vmem:[#allocation230_spill] sm:$0xff] %v7805_v40  ;;  %11921 = vst [vmem:[#allocation231_spill] sm:$0xff] %v7808_v22  ;;  %v7811_v61 = vld [vmem:[#allocation3 + $0x7e0] sm:$0xff]  ;;  %v7814_v44 = vld [vmem:[#allocation3 + $0x7f0] sm:$0xff] }
 0x432   :  { %2265 = vmatpush1.msra.mxu0 %v7799_v16  ;;  %2336 = vmatpush1.msra.mxu1 %v7802_v23  ;;  %11922 = vst [vmem:[#allocation232_spill] sm:$0xff] %v7811_v61  ;;  %11923 = vst [vmem:[#allocation233_spill] sm:$0xff] %v7814_v44  ;;  %v7817_v16 = vld [vmem:[#allocation3 + $0x7a8] sm:$0xff]  ;;  %v7820_v23 = vld [vmem:[#allocation3 + $0x7b8] sm:$0xff] }
 0x433   :  { %2266 = vmatprep.subr.mxu0 %v7805_v40  ;;  %2337 = vmatprep.subr.mxu1 %v7808_v22  ;;  %11924 = vst [vmem:[#allocation234_spill] sm:$0xff] %v7817_v16  ;;  %11925 = vst [vmem:[#allocation235_spill] sm:$0xff] %v7820_v23  ;;  %v7823_v40 = vld [vmem:[#allocation3 + $0x7a0] sm:$0xff]  ;;  %v7826_v22 = vld [vmem:[#allocation3 + $0x7b0] sm:$0xff] }
 0x434   :  { %2267 = vmatpush2.msra.mxu0 %v7811_v61  ;;  %2338 = vmatpush2.msra.mxu1 %v7814_v44  ;;  %11926 = vst [vmem:[#allocation236_spill] sm:$0xff] %v7823_v40  ;;  %11927 = vst [vmem:[#allocation237_spill] sm:$0xff] %v7826_v22  ;;  %v7829_v61 = vld [vmem:[#allocation3 + $0x768] sm:$0xff]  ;;  %v7832_v44 = vld [vmem:[#allocation3 + $0x778] sm:$0xff] }
 0x435   :  { %2268 = vmatprep.subr.mxu0 %v7817_v16  ;;  %2339 = vmatprep.subr.mxu1 %v7820_v23  ;;  %11928 = vst [vmem:[#allocation238_spill] sm:$0xff] %v7829_v61  ;;  %11929 = vst [vmem:[#allocation239_spill] sm:$0xff] %v7832_v44  ;;  %v7835_v16 = vld [vmem:[#allocation3 + $0x760] sm:$0xff]  ;;  %v7838_v23 = vld [vmem:[#allocation3 + $0x770] sm:$0xff] }
 0x436   :  { %2269 = vmatpush2.msra.mxu0 %v7823_v40  ;;  %2340 = vmatpush2.msra.mxu1 %v7826_v22  ;;  %11930 = vst [vmem:[#allocation240_spill] sm:$0xff] %v7835_v16  ;;  %11931 = vst [vmem:[#allocation241_spill] sm:$0xff] %v7838_v23  ;;  %v7841_v40 = vld [vmem:[#allocation3 + $0x728] sm:$0xff]  ;;  %v7844_v22 = vld [vmem:[#allocation3 + $0x738] sm:$0xff] }
 0x437   :  { %2270 = vmatprep.subr.mxu0 %v7829_v61  ;;  %2341 = vmatprep.subr.mxu1 %v7832_v44  ;;  %11932 = vst [vmem:[#allocation242_spill] sm:$0xff] %v7841_v40  ;;  %11933 = vst [vmem:[#allocation243_spill] sm:$0xff] %v7844_v22  ;;  %v7847_v61 = vld [vmem:[#allocation3 + $0x720] sm:$0xff]  ;;  %v7850_v44 = vld [vmem:[#allocation3 + $0x730] sm:$0xff] }
 0x438   :  { %2271 = vmatpush2.msra.mxu0 %v7835_v16  ;;  %2342 = vmatpush2.msra.mxu1 %v7838_v23  ;;  %11934 = vst [vmem:[#allocation244_spill] sm:$0xff] %v7847_v61  ;;  %11935 = vst [vmem:[#allocation245_spill] sm:$0xff] %v7850_v44  ;;  %v7853_v16 = vld [vmem:[#allocation3 + $0x6e8] sm:$0xff]  ;;  %v7856_v23 = vld [vmem:[#allocation3 + $0x6f8] sm:$0xff] }
 0x439   :  { %2272 = vmatprep.subr.mxu0 %v7841_v40  ;;  %2343 = vmatprep.subr.mxu1 %v7844_v22  ;;  %11936 = vst [vmem:[#allocation246_spill] sm:$0xff] %v7853_v16  ;;  %11937 = vst [vmem:[#allocation247_spill] sm:$0xff] %v7856_v23  ;;  %v7859_v40 = vld [vmem:[#allocation3 + $0x6e0] sm:$0xff]  ;;  %v7862_v22 = vld [vmem:[#allocation3 + $0x6f0] sm:$0xff] }
 0x43a   :  { %2273 = vmatpush2.msra.mxu0 %v7847_v61  ;;  %2344 = vmatpush2.msra.mxu1 %v7850_v44  ;;  %11938 = vst [vmem:[#allocation248_spill] sm:$0xff] %v7859_v40  ;;  %11939 = vst [vmem:[#allocation249_spill] sm:$0xff] %v7862_v22  ;;  %v7865_v61 = vld [vmem:[#allocation3 + $0x6a8] sm:$0xff]  ;;  %v7868_v44 = vld [vmem:[#allocation3 + $0x6b8] sm:$0xff] }
 0x43b   :  { %2274 = vmatprep.subr.mxu0 %v7853_v16  ;;  %2345 = vmatprep.subr.mxu1 %v7856_v23  ;;  %11940 = vst [vmem:[#allocation250_spill] sm:$0xff] %v7865_v61  ;;  %11941 = vst [vmem:[#allocation251_spill] sm:$0xff] %v7868_v44  ;;  %v7871_v16 = vld [vmem:[#allocation3 + $0x6a0] sm:$0xff]  ;;  %v7874_v23 = vld [vmem:[#allocation3 + $0x6b0] sm:$0xff] }
 0x43c   :  { %2275 = vmatpush2.msra.mxu0 %v7859_v40  ;;  %2346 = vmatpush2.msra.mxu1 %v7862_v22  ;;  %11942 = vst [vmem:[#allocation252_spill] sm:$0xff] %v7871_v16  ;;  %11943 = vst [vmem:[#allocation253_spill] sm:$0xff] %v7874_v23  ;;  %v7877_v40 = vld [vmem:[#allocation3 + $0x668] sm:$0xff]  ;;  %v7880_v22 = vld [vmem:[#allocation3 + $0x678] sm:$0xff] }
 0x43d   :  { %2276 = vmatprep.subr.mxu0 %v7865_v61  ;;  %2347 = vmatprep.subr.mxu1 %v7868_v44  ;;  %11944 = vst [vmem:[#allocation254_spill] sm:$0xff] %v7877_v40  ;;  %11945 = vst [vmem:[#allocation255_spill] sm:$0xff] %v7880_v22  ;;  %v7883_v61 = vld [vmem:[#allocation3 + $0x660] sm:$0xff]  ;;  %v7886_v44 = vld [vmem:[#allocation3 + $0x670] sm:$0xff] }
 0x43e   :  { %2277 = vmatpush2.msra.mxu0 %v7871_v16  ;;  %2348 = vmatpush2.msra.mxu1 %v7874_v23  ;;  %11946 = vst [vmem:[#allocation256_spill] sm:$0xff] %v7883_v61  ;;  %11947 = vst [vmem:[#allocation257_spill] sm:$0xff] %v7886_v44  ;;  %v7889_v16 = vld [vmem:[#allocation3 + $0x628] sm:$0xff]  ;;  %v7892_v23 = vld [vmem:[#allocation3 + $0x638] sm:$0xff] }
 0x43f   :  { %2278 = vmatprep.subr.mxu0 %v7877_v40  ;;  %2349 = vmatprep.subr.mxu1 %v7880_v22  ;;  %11948 = vst [vmem:[#allocation258_spill] sm:$0xff] %v7889_v16  ;;  %11949 = vst [vmem:[#allocation259_spill] sm:$0xff] %v7892_v23  ;;  %v7895_v40 = vld [vmem:[#allocation3 + $0x620] sm:$0xff]  ;;  %v7898_v22 = vld [vmem:[#allocation3 + $0x630] sm:$0xff] }
 0x440   :  { %2279 = vmatpush2.msra.mxu0 %v7883_v61  ;;  %2350 = vmatpush2.msra.mxu1 %v7886_v44  ;;  %11950 = vst [vmem:[#allocation260_spill] sm:$0xff] %v7895_v40  ;;  %11951 = vst [vmem:[#allocation261_spill] sm:$0xff] %v7898_v22  ;;  %v7901_v61 = vld [vmem:[#allocation3 + $0x5e8] sm:$0xff]  ;;  %v7904_v44 = vld [vmem:[#allocation3 + $0x5f8] sm:$0xff] }
 0x441   :  { %2280 = vmatprep.subr.mxu0 %v7889_v16  ;;  %2351 = vmatprep.subr.mxu1 %v7892_v23  ;;  %11952 = vst [vmem:[#allocation262_spill] sm:$0xff] %v7901_v61  ;;  %11953 = vst [vmem:[#allocation263_spill] sm:$0xff] %v7904_v44  ;;  %v7907_v16 = vld [vmem:[#allocation3 + $0x5e0] sm:$0xff]  ;;  %v7910_v23 = vld [vmem:[#allocation3 + $0x5f0] sm:$0xff] }
 0x442   :  { %2281 = vmatpush2.msra.mxu0 %v7895_v40  ;;  %2352 = vmatpush2.msra.mxu1 %v7898_v22  ;;  %11954 = vst [vmem:[#allocation264_spill] sm:$0xff] %v7907_v16  ;;  %11955 = vst [vmem:[#allocation265_spill] sm:$0xff] %v7910_v23  ;;  %v7913_v40 = vld [vmem:[#allocation3 + $0x5a8] sm:$0xff]  ;;  %v7916_v22 = vld [vmem:[#allocation3 + $0x5b8] sm:$0xff] }
 0x443   :  { %2282 = vmatprep.subr.mxu0 %v7901_v61  ;;  %2353 = vmatprep.subr.mxu1 %v7904_v44  ;;  %11956 = vst [vmem:[#allocation266_spill] sm:$0xff] %v7913_v40  ;;  %11957 = vst [vmem:[#allocation267_spill] sm:$0xff] %v7916_v22  ;;  %v7919_v61 = vld [vmem:[#allocation3 + $0x5a0] sm:$0xff]  ;;  %v7922_v44 = vld [vmem:[#allocation3 + $0x5b0] sm:$0xff] }
 0x444   :  { %2283 = vmatpush2.msra.mxu0 %v7907_v16  ;;  %2354 = vmatpush2.msra.mxu1 %v7910_v23  ;;  %11958 = vst [vmem:[#allocation268_spill] sm:$0xff] %v7919_v61  ;;  %11959 = vst [vmem:[#allocation269_spill] sm:$0xff] %v7922_v44  ;;  %v7925_v16 = vld [vmem:[#allocation3 + $0x568] sm:$0xff]  ;;  %v7928_v23 = vld [vmem:[#allocation3 + $0x578] sm:$0xff] }
 0x445   :  { %2284 = vmatprep.subr.mxu0 %v7913_v40  ;;  %2355 = vmatprep.subr.mxu1 %v7916_v22  ;;  %11960 = vst [vmem:[#allocation270_spill] sm:$0xff] %v7925_v16  ;;  %11961 = vst [vmem:[#allocation271_spill] sm:$0xff] %v7928_v23  ;;  %v7931_v40 = vld [vmem:[#allocation3 + $0x560] sm:$0xff]  ;;  %v7934_v22 = vld [vmem:[#allocation3 + $0x570] sm:$0xff] }
 0x446   :  { %2285 = vmatpush2.msra.mxu0 %v7919_v61  ;;  %2356 = vmatpush2.msra.mxu1 %v7922_v44  ;;  %11962 = vst [vmem:[#allocation272_spill] sm:$0xff] %v7931_v40  ;;  %11963 = vst [vmem:[#allocation273_spill] sm:$0xff] %v7934_v22  ;;  %v7937_v61 = vld [vmem:[#allocation3 + $0x528] sm:$0xff]  ;;  %v7940_v44 = vld [vmem:[#allocation3 + $0x538] sm:$0xff] }
 0x447   :  { %2286 = vmatprep.subr.mxu0 %v7925_v16  ;;  %2357 = vmatprep.subr.mxu1 %v7928_v23  ;;  %11964 = vst [vmem:[#allocation274_spill] sm:$0xff] %v7937_v61  ;;  %11965 = vst [vmem:[#allocation275_spill] sm:$0xff] %v7940_v44  ;;  %v7943_v16 = vld [vmem:[#allocation3 + $0x520] sm:$0xff]  ;;  %v7946_v23 = vld [vmem:[#allocation3 + $0x530] sm:$0xff] }
 0x448   :  { %2287 = vmatpush2.msra.mxu0 %v7931_v40  ;;  %2358 = vmatpush2.msra.mxu1 %v7934_v22  ;;  %11966 = vst [vmem:[#allocation276_spill] sm:$0xff] %v7943_v16  ;;  %11967 = vst [vmem:[#allocation277_spill] sm:$0xff] %v7946_v23  ;;  %v7949_v40 = vld [vmem:[#allocation3 + $0x4e8] sm:$0xff]  ;;  %v7952_v22 = vld [vmem:[#allocation3 + $0x4f8] sm:$0xff] }
 0x449   :  { %2288 = vmatprep.subr.mxu0 %v7937_v61  ;;  %2359 = vmatprep.subr.mxu1 %v7940_v44  ;;  %11968 = vst [vmem:[#allocation278_spill] sm:$0xff] %v7949_v40  ;;  %11969 = vst [vmem:[#allocation279_spill] sm:$0xff] %v7952_v22  ;;  %v7955_v61 = vld [vmem:[#allocation3 + $0x4e0] sm:$0xff]  ;;  %v7958_v44 = vld [vmem:[#allocation3 + $0x4f0] sm:$0xff] }
 0x44a   :  { %2289 = vmatpush2.msra.mxu0 %v7943_v16  ;;  %2360 = vmatpush2.msra.mxu1 %v7946_v23  ;;  %11970 = vst [vmem:[#allocation280_spill] sm:$0xff] %v7955_v61  ;;  %11971 = vst [vmem:[#allocation281_spill] sm:$0xff] %v7958_v44  ;;  %v7961_v16 = vld [vmem:[#allocation3 + $0x4a8] sm:$0xff]  ;;  %v7964_v23 = vld [vmem:[#allocation3 + $0x4b8] sm:$0xff] }
 0x44b   :  { %2290 = vmatprep.subr.mxu0 %v7949_v40  ;;  %2361 = vmatprep.subr.mxu1 %v7952_v22  ;;  %11972 = vst [vmem:[#allocation282_spill] sm:$0xff] %v7961_v16  ;;  %11973 = vst [vmem:[#allocation283_spill] sm:$0xff] %v7964_v23  ;;  %v7967_v40 = vld [vmem:[#allocation3 + $0x4a0] sm:$0xff]  ;;  %v7970_v22 = vld [vmem:[#allocation3 + $0x4b0] sm:$0xff] }
 0x44c   :  { %2291 = vmatpush2.msra.mxu0 %v7955_v61  ;;  %2362 = vmatpush2.msra.mxu1 %v7958_v44  ;;  %11974 = vst [vmem:[#allocation284_spill] sm:$0xff] %v7967_v40  ;;  %11975 = vst [vmem:[#allocation285_spill] sm:$0xff] %v7970_v22  ;;  %v7973_v61 = vld [vmem:[#allocation3 + $0x468] sm:$0xff]  ;;  %v7976_v44 = vld [vmem:[#allocation3 + $0x478] sm:$0xff] }
 0x44d   :  { %2292 = vmatprep.subr.mxu0 %v7961_v16  ;;  %2363 = vmatprep.subr.mxu1 %v7964_v23  ;;  %11976 = vst [vmem:[#allocation286_spill] sm:$0xff] %v7973_v61  ;;  %11977 = vst [vmem:[#allocation287_spill] sm:$0xff] %v7976_v44  ;;  %v7979_v16 = vld [vmem:[#allocation3 + $0x460] sm:$0xff]  ;;  %v7982_v23 = vld [vmem:[#allocation3 + $0x470] sm:$0xff] }
 0x44e   :  { %2293 = vmatpush2.msra.mxu0 %v7967_v40  ;;  %2364 = vmatpush2.msra.mxu1 %v7970_v22  ;;  %11978 = vst [vmem:[#allocation288_spill] sm:$0xff] %v7982_v23  ;;  %v7985_v40 = vld [vmem:[#allocation3 + $0x428] sm:$0xff]  ;;  %v7988_v22 = vld [vmem:[#allocation3 + $0x438] sm:$0xff] }
 0x44f   :  { %2294 = vmatprep.subr.mxu0 %v7973_v61  ;;  %2365 = vmatprep.subr.mxu1 %v7976_v44  ;;  %11979 = vst [vmem:[#allocation289_spill] sm:$0xff] %v7985_v40  ;;  %11980 = vst [vmem:[#allocation290_spill] sm:$0xff] %v7988_v22  ;;  %v7991_v61 = vld [vmem:[#allocation3 + $0x420] sm:$0xff]  ;;  %v7994_v44 = vld [vmem:[#allocation3 + $0x430] sm:$0xff] }
 0x450   :  { %2295 = vmatpush2.msra.mxu0 %v7979_v16  ;;  %2366 = vmatpush2.msra.mxu1 %v7982_v23  ;;  %11981 = vst [vmem:[#allocation291_spill] sm:$0xff] %v7991_v61  ;;  %11982 = vst [vmem:[#allocation292_spill] sm:$0xff] %v7994_v44  ;;  %v7999_v23 = vld [vmem:[#allocation3 + $0x3c8] sm:$0xff] }
 0x451   :  { %2296 = vmatprep.subr.mxu0 %v7985_v40  ;;  %2367 = vmatprep.subr.mxu1 %v7988_v22  ;;  %11983 = vst [vmem:[#allocation293_spill] sm:$0xff] %v7999_v23  ;;  %v8002_v40 = vld [vmem:[#allocation3 + $0x3d8] sm:$0xff]  ;;  %v8005_v22 = vld [vmem:[#allocation3 + $0x3c0] sm:$0xff] }
 0x452   :  { %2297 = vmatpush2.msra.mxu0 %v7991_v61  ;;  %2368 = vmatpush2.msra.mxu1 %v7994_v44  ;;  %11984 = vst [vmem:[#allocation294_spill] sm:$0xff] %v8002_v40  ;;  %11985 = vst [vmem:[#allocation295_spill] sm:$0xff] %v8005_v22  ;;  %v8008_v61 = vld [vmem:[#allocation3 + $0x3d0] sm:$0xff]  ;;  %v8011_v44 = vld [vmem:[#allocation3 + $0x388] sm:$0xff] }
 0x453   :  { %2299 = vmatmul.mubr.f32.vlgmr.msra.gmra.mxu0 %v7613_v39  ;;  %2370 = vmatmul.mubr.f32.vlgmr.msra.gmra.mxu1 %v7613_v39  ;;  %11986 = vst [vmem:[#allocation296_spill] sm:$0xff] %v8008_v61  ;;  %11987 = vst [vmem:[#allocation297_spill] sm:$0xff] %v8011_v44  ;;  %v8014_v39 = vld [vmem:[#allocation3 + $0x398] sm:$0xff] }
 0x454   :  { %2459 = vmatprep.subr.mxu0 %v7999_v23  ;;  %2530 = vmatprep.subr.mxu1 %v8002_v40  ;;  %11988 = vst [vmem:[#allocation298_spill] sm:$0xff] %v8014_v39  ;;  %v8017_v23 = vld [vmem:[#allocation3 + $0x380] sm:$0xff]  ;;  %v8020_v40 = vld [vmem:[#allocation3 + $0x390] sm:$0xff] }
 0x455   :  { %2460 = vmatpush1.msra.mxu0 %v8005_v22  ;;  %2531 = vmatpush1.msra.mxu1 %v8008_v61  ;;  %v8023_v22 = vld [vmem:[#allocation3 + $0x348] sm:$0xff]  ;;  %v8026_v61 = vld [vmem:[#allocation3 + $0x358] sm:$0xff] }
 0x456   :  { %2461 = vmatprep.subr.mxu0 %v8011_v44  ;;  %2532 = vmatprep.subr.mxu1 %v8014_v39  ;;  %v8029_v44 = vld [vmem:[#allocation3 + $0x340] sm:$0xff]  ;;  %v8032_v39 = vld [vmem:[#allocation3 + $0x350] sm:$0xff] }
 0x457   :  { %2462 = vmatpush1.msra.mxu0 %v8017_v23  ;;  %2533 = vmatpush1.msra.mxu1 %v8020_v40 }
 0x458   :  { %2463 = vmatprep.subr.mxu0 %v8023_v22  ;;  %2534 = vmatprep.subr.mxu1 %v8026_v61 }
 0x459   :  { %2464 = vmatpush1.msra.mxu0 %v8029_v44  ;;  %2535 = vmatpush1.msra.mxu1 %v8032_v39 }
 0x45a   :  { %2465 = vmatprep.subr.mxu0 %v7244_v13  ;;  %2536 = vmatprep.subr.mxu1 %v7247_v6  ;;  %v11989_v13 = vld [vmem:[#allocation110_spill] sm:$0xff]  ;;  %v11990_v6 = vld [vmem:[#allocation111_spill] sm:$0xff] }
 0x45b   :  { %2466 = vmatpush1.msra.mxu0 %v7250_v4  ;;  %2537 = vmatpush1.msra.mxu1 %v7253_v33  ;;  %v11991_v4 = vld [vmem:[#allocation112_spill] sm:$0xff]  ;;  %v11992_v33 = vld [vmem:[#allocation113_spill] sm:$0xff] }
 0x45c   :  { %2467 = vmatprep.subr.mxu0 %v7256_v42  ;;  %2538 = vmatprep.subr.mxu1 %v7259_v19  ;;  %v11993_v42 = vld [vmem:[#allocation114_spill] sm:$0xff]  ;;  %v11994_v19 = vld [vmem:[#allocation115_spill] sm:$0xff] }
 0x45d   :  { %2468 = vmatpush1.msra.mxu0 %v7262_v5  ;;  %2539 = vmatpush1.msra.mxu1 %v7265_v35  ;;  %v11995_v5 = vld [vmem:[#allocation116_spill] sm:$0xff]  ;;  %v11996_v35 = vld [vmem:[#allocation117_spill] sm:$0xff] }
 0x45e   :  { %2469 = vmatprep.subr.mxu0 %v7268_v46  ;;  %2540 = vmatprep.subr.mxu1 %v7271_v2  ;;  %v11997_v46 = vld [vmem:[#allocation118_spill] sm:$0xff]  ;;  %v11998_v2 = vld [vmem:[#allocation119_spill] sm:$0xff] }
 0x45f   :  { %2470 = vmatpush1.msra.mxu0 %v7274_v37  ;;  %2541 = vmatpush1.msra.mxu1 %v7277_v34  ;;  %v11999_v37 = vld [vmem:[#allocation120_spill] sm:$0xff]  ;;  %v12000_v34 = vld [vmem:[#allocation121_spill] sm:$0xff] }
 0x460   :  { %2471 = vmatprep.subr.mxu0 %v7280_v17  ;;  %2542 = vmatprep.subr.mxu1 %v7283_v21  ;;  %v12001_v17 = vld [vmem:[#allocation122_spill] sm:$0xff]  ;;  %v12002_v21 = vld [vmem:[#allocation123_spill] sm:$0xff] }
 0x461   :  { %2472 = vmatpush1.msra.mxu0 %v7286_v1  ;;  %2543 = vmatpush1.msra.mxu1 %v7289_v38  ;;  %v12003_v1 = vld [vmem:[#allocation124_spill] sm:$0xff]  ;;  %v12004_v38 = vld [vmem:[#allocation125_spill] sm:$0xff] }
 0x462   :  { %2473 = vmatprep.subr.mxu0 %v7292_v8  ;;  %2544 = vmatprep.subr.mxu1 %v7295_v9  ;;  %v12005_v8 = vld [vmem:[#allocation126_spill] sm:$0xff]  ;;  %v12006_v9 = vld [vmem:[#allocation127_spill] sm:$0xff] }
 0x463   :  { %2474 = vmatpush1.msra.mxu0 %v7298_v10  ;;  %2545 = vmatpush1.msra.mxu1 %v7301_v11  ;;  %v12007_v10 = vld [vmem:[#allocation128_spill] sm:$0xff]  ;;  %v12008_v11 = vld [vmem:[#allocation129_spill] sm:$0xff] }
 0x464   :  { %2475 = vmatprep.subr.mxu0 %v7304_v12  ;;  %2546 = vmatprep.subr.mxu1 %v7307_v14  ;;  %v12009_v12 = vld [vmem:[#allocation130_spill] sm:$0xff]  ;;  %v12010_v14 = vld [vmem:[#allocation131_spill] sm:$0xff] }
 0x465   :  { %2476 = vmatpush1.msra.mxu0 %v7310_v15  ;;  %2547 = vmatpush1.msra.mxu1 %v7313_v24  ;;  %v12011_v15 = vld [vmem:[#allocation132_spill] sm:$0xff]  ;;  %v12012_v24 = vld [vmem:[#allocation133_spill] sm:$0xff] }
 0x466   :  { %2477 = vmatprep.subr.mxu0 %v7316_v25  ;;  %2548 = vmatprep.subr.mxu1 %v7319_v26  ;;  %v12013_v25 = vld [vmem:[#allocation134_spill] sm:$0xff]  ;;  %v12014_v26 = vld [vmem:[#allocation135_spill] sm:$0xff] }
 0x467   :  { %2478 = vmatpush1.msra.mxu0 %v7322_v27  ;;  %2549 = vmatpush1.msra.mxu1 %v7325_v28  ;;  %v12015_v27 = vld [vmem:[#allocation136_spill] sm:$0xff]  ;;  %v12016_v28 = vld [vmem:[#allocation137_spill] sm:$0xff] }
 0x468   :  { %2479 = vmatprep.subr.mxu0 %v7328_v29  ;;  %2550 = vmatprep.subr.mxu1 %v7331_v30  ;;  %v12017_v29 = vld [vmem:[#allocation138_spill] sm:$0xff]  ;;  %v12018_v30 = vld [vmem:[#allocation139_spill] sm:$0xff] }
 0x469   :  { %2480 = vmatpush1.msra.mxu0 %v7334_v31  ;;  %2551 = vmatpush1.msra.mxu1 %v7337_v50  ;;  %v12019_v31 = vld [vmem:[#allocation140_spill] sm:$0xff]  ;;  %v12020_v50 = vld [vmem:[#allocation141_spill] sm:$0xff] }
 0x46a   :  { %2481 = vmatprep.subr.mxu0 %v7340_v51  ;;  %2552 = vmatprep.subr.mxu1 %v7343_v52  ;;  %v12021_v51 = vld [vmem:[#allocation142_spill] sm:$0xff]  ;;  %v12022_v52 = vld [vmem:[#allocation143_spill] sm:$0xff] }
 0x46b   :  { %2482 = vmatpush1.msra.mxu0 %v7346_v53  ;;  %2553 = vmatpush1.msra.mxu1 %v7349_v55  ;;  %v12023_v53 = vld [vmem:[#allocation144_spill] sm:$0xff]  ;;  %v12024_v55 = vld [vmem:[#allocation145_spill] sm:$0xff] }
 0x46c   :  { %2483 = vmatprep.subr.mxu0 %v7352_v56  ;;  %2554 = vmatprep.subr.mxu1 %v7355_v57  ;;  %v12025_v56 = vld [vmem:[#allocation146_spill] sm:$0xff]  ;;  %v12026_v57 = vld [vmem:[#allocation147_spill] sm:$0xff] }
 0x46d   :  { %2484 = vmatpush1.msra.mxu0 %v7358_v60  ;;  %2555 = vmatpush1.msra.mxu1 %v11989_v13  ;;  %v12027_v60 = vld [vmem:[#allocation148_spill] sm:$0xff]  ;;  %v12028_v13 = vld [vmem:[#allocation149_spill] sm:$0xff] }
 0x46e   :  { %2485 = vmatprep.subr.mxu0 %v11990_v6  ;;  %2556 = vmatprep.subr.mxu1 %v11991_v4  ;;  %v12029_v6 = vld [vmem:[#allocation150_spill] sm:$0xff]  ;;  %v12030_v4 = vld [vmem:[#allocation151_spill] sm:$0xff] }
 0x46f   :  { %2486 = vmatpush1.msra.mxu0 %v11992_v33  ;;  %2557 = vmatpush1.msra.mxu1 %v11993_v42  ;;  %v12031_v33 = vld [vmem:[#allocation152_spill] sm:$0xff]  ;;  %v12032_v42 = vld [vmem:[#allocation153_spill] sm:$0xff] }
 0x470   :  { %2487 = vmatprep.subr.mxu0 %v11994_v19  ;;  %2558 = vmatprep.subr.mxu1 %v11995_v5  ;;  %v12033_v19 = vld [vmem:[#allocation154_spill] sm:$0xff]  ;;  %v12034_v5 = vld [vmem:[#allocation155_spill] sm:$0xff] }
 0x471   :  { %2488 = vmatpush1.msra.mxu0 %v11996_v35  ;;  %2559 = vmatpush1.msra.mxu1 %v11997_v46  ;;  %v12035_v35 = vld [vmem:[#allocation156_spill] sm:$0xff]  ;;  %v12036_v46 = vld [vmem:[#allocation157_spill] sm:$0xff] }
 0x472   :  { %2489 = vmatprep.subr.mxu0 %v11998_v2  ;;  %2560 = vmatprep.subr.mxu1 %v11999_v37  ;;  %v12037_v2 = vld [vmem:[#allocation158_spill] sm:$0xff]  ;;  %v12038_v37 = vld [vmem:[#allocation159_spill] sm:$0xff] }
 0x473   :  { %2490 = vmatpush1.msra.mxu0 %v12000_v34  ;;  %2561 = vmatpush1.msra.mxu1 %v12001_v17  ;;  %v12039_v34 = vld [vmem:[#allocation160_spill] sm:$0xff]  ;;  %v12040_v17 = vld [vmem:[#allocation161_spill] sm:$0xff] }
 0x474   :  { %2491 = vmatprep.subr.mxu0 %v12002_v21  ;;  %2562 = vmatprep.subr.mxu1 %v12003_v1  ;;  %v12041_v21 = vld [vmem:[#allocation162_spill] sm:$0xff]  ;;  %v12042_v1 = vld [vmem:[#allocation163_spill] sm:$0xff] }
 0x475   :  { %2492 = vmatpush2.msra.mxu0 %v12004_v38  ;;  %2563 = vmatpush2.msra.mxu1 %v12005_v8  ;;  %v12043_v38 = vld [vmem:[#allocation164_spill] sm:$0xff]  ;;  %v12044_v8 = vld [vmem:[#allocation165_spill] sm:$0xff] }
 0x476   :  { %2493 = vmatprep.subr.mxu0 %v12006_v9  ;;  %2564 = vmatprep.subr.mxu1 %v12007_v10  ;;  %v12045_v9 = vld [vmem:[#allocation166_spill] sm:$0xff]  ;;  %v12046_v10 = vld [vmem:[#allocation167_spill] sm:$0xff] }
 0x477   :  { %2494 = vmatpush2.msra.mxu0 %v12008_v11  ;;  %2565 = vmatpush2.msra.mxu1 %v12009_v12  ;;  %v12047_v11 = vld [vmem:[#allocation168_spill] sm:$0xff]  ;;  %v12048_v12 = vld [vmem:[#allocation169_spill] sm:$0xff] }
 0x478   :  { %2495 = vmatprep.subr.mxu0 %v12010_v14  ;;  %2566 = vmatprep.subr.mxu1 %v12011_v15  ;;  %v12049_v14 = vld [vmem:[#allocation170_spill] sm:$0xff]  ;;  %v12050_v15 = vld [vmem:[#allocation171_spill] sm:$0xff] }
 0x479   :  { %2496 = vmatpush2.msra.mxu0 %v12012_v24  ;;  %2567 = vmatpush2.msra.mxu1 %v12013_v25  ;;  %v12051_v24 = vld [vmem:[#allocation172_spill] sm:$0xff]  ;;  %v12052_v25 = vld [vmem:[#allocation173_spill] sm:$0xff] }
 0x47a   :  { %2497 = vmatprep.subr.mxu0 %v12014_v26  ;;  %2568 = vmatprep.subr.mxu1 %v12015_v27  ;;  %v12053_v26 = vld [vmem:[#allocation174_spill] sm:$0xff]  ;;  %v12054_v27 = vld [vmem:[#allocation175_spill] sm:$0xff] }
 0x47b   :  { %2498 = vmatpush2.msra.mxu0 %v12016_v28  ;;  %2569 = vmatpush2.msra.mxu1 %v12017_v29  ;;  %v12055_v28 = vld [vmem:[#allocation93_spill] sm:$0xff]  ;;  %v12056_v29 = vld [vmem:[#allocation94_spill] sm:$0xff] }
 0x47c   :  { %2499 = vmatprep.subr.mxu0 %v12018_v30  ;;  %2570 = vmatprep.subr.mxu1 %v12019_v31  ;;  %v12057_v30 = vld [vmem:[#allocation96_spill] sm:$0xff]  ;;  %v12058_v31 = vld [vmem:[#allocation102_spill] sm:$0xff] }
 0x47d   :  { %2500 = vmatpush2.msra.mxu0 %v12020_v50  ;;  %2571 = vmatpush2.msra.mxu1 %v12021_v51  ;;  %v12059_v50 = vld [vmem:[#allocation104_spill] sm:$0xff] }
 0x47e   :  { %2501 = vmatprep.subr.mxu0 %v12022_v52  ;;  %2572 = vmatprep.subr.mxu1 %v12023_v53  ;;  %v12060_v51 = vld [vmem:[#allocation176_spill] sm:$0xff]  ;;  %v12061_v52 = vld [vmem:[#allocation177_spill] sm:$0xff]  ;;  %v12062_v53 = vld [vmem:[#allocation178_spill] sm:$0xff] }
 0x47f   :  { %2502 = vmatpush2.msra.mxu0 %v12024_v55  ;;  %2573 = vmatpush2.msra.mxu1 %v12025_v56  ;;  %v12063_v55 = vld [vmem:[#allocation179_spill] sm:$0xff]  ;;  %v12064_v56 = vld [vmem:[#allocation180_spill] sm:$0xff] }
 0x480   :  { %2503 = vmatprep.subr.mxu0 %v12026_v57  ;;  %2574 = vmatprep.subr.mxu1 %v12027_v60  ;;  %v12065_v57 = vld [vmem:[#allocation181_spill] sm:$0xff]  ;;  %v12066_v60 = vld [vmem:[#allocation182_spill] sm:$0xff] }
 0x481   :  { %2504 = vmatpush2.msra.mxu0 %v12028_v13  ;;  %2575 = vmatpush2.msra.mxu1 %v12029_v6  ;;  %v12067_v13 = vld [vmem:[#allocation183_spill] sm:$0xff] }
 0x482   :  { %2505 = vmatprep.subr.mxu0 %v12030_v4  ;;  %2576 = vmatprep.subr.mxu1 %v12031_v33 }
 0x483   :  { %2506 = vmatpush2.msra.mxu0 %v12032_v42  ;;  %2577 = vmatpush2.msra.mxu1 %v12033_v19 }
 0x484   :  { %2507 = vmatprep.subr.mxu0 %v12034_v5  ;;  %2578 = vmatprep.subr.mxu1 %v12035_v35 }
 0x485   :  { %2508 = vmatpush2.msra.mxu0 %v12036_v46  ;;  %2579 = vmatpush2.msra.mxu1 %v12037_v2 }
 0x486   :  { %2509 = vmatprep.subr.mxu0 %v12038_v37  ;;  %2580 = vmatprep.subr.mxu1 %v12039_v34  ;;  %v12068_v37 = vld [vmem:[#allocation95_spill] sm:$0xff]  ;;  %v12069_v34 = vld [vmem:[#allocation97_spill] sm:$0xff] }
 0x487   :  { %2510 = vmatpush2.msra.mxu0 %v12040_v17  ;;  %2581 = vmatpush2.msra.mxu1 %v12041_v21  ;;  %v12070_v17 = vcombine.low %v12068_v37, %v12069_v34 }
 0x488   :  { %2511 = vmatprep.subr.mxu0 %v12042_v1  ;;  %2582 = vmatprep.subr.mxu1 %v12043_v38 }
 0x489   :  { %2512 = vmatpush2.msra.mxu0 %v12044_v8  ;;  %2583 = vmatpush2.msra.mxu1 %v12045_v9 }
 0x48a   :  { %2513 = vmatprep.subr.mxu0 %v12046_v10  ;;  %2584 = vmatprep.subr.mxu1 %v12047_v11 }
 0x48b   :  { %2514 = vmatpush2.msra.mxu0 %v12048_v12  ;;  %2585 = vmatpush2.msra.mxu1 %v12049_v14 }
 0x48c   :  { %2515 = vmatprep.subr.mxu0 %v12050_v15  ;;  %2586 = vmatprep.subr.mxu1 %v12051_v24 }
 0x48d   :  { %2516 = vmatpush2.msra.mxu0 %v12052_v25  ;;  %2587 = vmatpush2.msra.mxu1 %v12053_v26 }
 0x48e   :  { %2517 = vmatprep.subr.mxu0 %v12054_v27  ;;  %2588 = vmatprep.subr.mxu1 %v12055_v28  ;;  %v12071_v27 = vld [vmem:[#allocation103_spill] sm:$0xff]  ;;  %v12072_v28 = vld [vmem:[#allocation105_spill] sm:$0xff] }
 0x48f   :  { %2518 = vmatpush2.msra.mxu0 %v12056_v29  ;;  %2589 = vmatpush2.msra.mxu1 %v12057_v30  ;;  %v12073_v29 = vcombine.low %v12071_v27, %v12072_v28 }
 0x490   :  { %2519 = vmatprep.subr.mxu0 %v12058_v31  ;;  %2590 = vmatprep.subr.mxu1 %v12059_v50 }
 0x491   :  { %2520 = vmatpush2.msra.mxu0 %v12060_v51  ;;  %2591 = vmatpush2.msra.mxu1 %v12061_v52 }
 0x492   :  { %2521 = vmatprep.subr.mxu0 %v12062_v53  ;;  %2592 = vmatprep.subr.mxu1 %v12063_v55 }
 0x493   :  { %2522 = vmatpush2.msra.mxu0 %v12064_v56  ;;  %2593 = vmatpush2.msra.mxu1 %v12065_v57 }
 0x494   :  { %2601 = vmatprep.subr.mxu0 %v12066_v60  ;;  %2672 = vmatprep.subr.mxu1 %v12067_v13 }
 0x4d2   :  { %v2158_v6 = vpop.f32.mrf.mxu0  ;;  %v2229_v4 = vpop.f32.mrf.mxu1 }
 0x4d4   :  { %v2160_v33 = vpop.f32.mrf.mxu0  ;;  %v2231_v42 = vpop.f32.mrf.mxu1 }
 0x4d5   :  { %v2384_v19 = vcombine.low %v2158_v6, %v2160_v33  ;;  %v2385_v5 = vcombine.low %v2229_v4, %v2231_v42 }
 0x4d7   :  { %v2392_v35 = vrot.slane %v2384_v19, %v11660_v54  ;;  %v2399_v46 = vrot.slane %v2385_v5, %v11660_v54  ;;  %v12091_v5 = vld [vmem:[#allocation201_spill] sm:$0xff] }
 0x4d9   :  { %v2400_v2 = vcombine.low %v2392_v35, %v2399_v46  ;;  %v12092_v35 = vld [vmem:[#allocation202_spill] sm:$0xff]  ;;  %v12093_v46 = vld [vmem:[#allocation203_spill] sm:$0xff] }
 0x4db   :  { %v2420_v21 = vadd.f32 %v2400_v2, %v12070_v17  ;;  %v12094_v2 = vld [vmem:[#allocation204_spill] sm:$0xff]  ;;  %v12095_v17 = vld [vmem:[#allocation205_spill] sm:$0xff] }
 0x4dd   :  { %v4652_v1 = vmul.f32 -1.442695, %v2420_v21  ;;  %v12096_v21 = vld [vmem:[#allocation206_spill] sm:$0xff] }
 0x4df   :  { %4736 = vpow2.f32 %v4652_v1  ;;  %v12097_v1 = vld [vmem:[#allocation207_spill] sm:$0xff] }
 0x4ec   :  { %v4737_v38 = vpop.eup %4736 }
 0x4ed   :  { %v2425_v10 = vadd.f32 1.0, %v4737_v38  ;;  %v12098_v38 = vld [vmem:[#allocation208_spill] sm:$0xff] }
 0x4ef   :  { %4738 = vrcp.f32 %v2425_v10  ;;  %v12101_v10 = vld [vmem:[#allocation211_spill] sm:$0xff] }
 0x4fc   :  { %v4739_v51 = vpop.eup %4738 }
 0x4fd   :  { %v2439_v52 = vrot.slane %v4739_v51, 4 }
 0x4ff   :  { %v2441_v55 = vmul.f32 %v2439_v52, %v7609_v32  ;;  %v12074_v32 = vld [vmem:[#allocation184_spill] sm:$0xff] }
 0x500   :  { %v12114_v52 = vld [vmem:[#allocation224_spill] sm:$0xff] }
 0x513   :  { %v2300_v8 = vpop.f32.mrf.mxu0  ;;  %v2371_v9 = vpop.f32.mrf.mxu1 }
 0x515   :  { %v2302_v11 = vpop.f32.mrf.mxu0  ;;  %v2373_v12 = vpop.f32.mrf.mxu1 }
 0x516   :  { %v2401_v14 = vcombine.low %v2300_v8, %v2302_v11  ;;  %v2402_v15 = vcombine.low %v2371_v9, %v2373_v12  ;;  %v12099_v8 = vld [vmem:[#allocation209_spill] sm:$0xff]  ;;  %v12100_v9 = vld [vmem:[#allocation210_spill] sm:$0xff]  ;;  %v12102_v11 = vld [vmem:[#allocation212_spill] sm:$0xff] }
 0x517   :  { %v12103_v12 = vld [vmem:[#allocation213_spill] sm:$0xff] }
 0x518   :  { %v2409_v24 = vrot.slane %v2401_v14, %v11660_v54  ;;  %v2416_v25 = vrot.slane %v2402_v15, %v11660_v54  ;;  %v12104_v14 = vld [vmem:[#allocation214_spill] sm:$0xff]  ;;  %v12105_v15 = vld [vmem:[#allocation215_spill] sm:$0xff] }
 0x51a   :  { %v2417_v26 = vcombine.low %v2409_v24, %v2416_v25  ;;  %v12106_v24 = vld [vmem:[#allocation216_spill] sm:$0xff]  ;;  %v12107_v25 = vld [vmem:[#allocation217_spill] sm:$0xff] }
 0x51c   :  { %v2421_v30 = vadd.f32 %v2417_v26, %v12073_v29  ;;  %v12108_v26 = vld [vmem:[#allocation218_spill] sm:$0xff]  ;;  %v12109_v29 = vld [vmem:[#allocation219_spill] sm:$0xff] }
 0x51e   :  { %4740 = vtanh.f32 %v2421_v30  ;;  %v2430_v31 = vrot.slane %v2421_v30, 4  ;;  %v12110_v30 = vld [vmem:[#allocation220_spill] sm:$0xff] }
 0x520   :  { %v4653_v50 = vmul.f32 -1.442695, %v2430_v31  ;;  %v12111_v31 = vld [vmem:[#allocation221_spill] sm:$0xff] }
 0x522   :  { %4742 = vpow2.f32 %v4653_v50  ;;  %v12112_v50 = vld [vmem:[#allocation222_spill] sm:$0xff] }
 0x52b   :  { %v4741_v53 = vpop.eup %4740 }
 0x52c   :  { %v2442_v56 = vmul.f32 %v4741_v53, %v4739_v51  ;;  %v12113_v51 = vld [vmem:[#allocation223_spill] sm:$0xff]  ;;  %v12115_v53 = vld [vmem:[#allocation225_spill] sm:$0xff] }
 0x52e   :  { %v8164_v57 = vadd.f32 %v2442_v56, %v2441_v55  ;;  %v12116_v55 = vld [vmem:[#allocation226_spill] sm:$0xff]  ;;  %v12117_v56 = vld [vmem:[#allocation227_spill] sm:$0xff] }
 0x52f   :  { %v4743_v60 = vpop.eup %4742 }
 0x530   :  { %v2435_v13 = vadd.f32 1.0, %v4743_v60  ;;  %4744 = vtanh.f32 %v8164_v57  ;;  %v12118_v60 = vld [vmem:[#allocation228_spill] sm:$0xff] }
 0x532   :  { %4746 = vrcp.f32 %v2435_v13  ;;  %v12119_v13 = vld [vmem:[#allocation229_spill] sm:$0xff] }
 0x53d   :  { %v4745_v6 = vpop.eup %4744 }
 0x53f   :  { %v4747_v4 = vpop.eup %4746 }
 0x540   :  { %v2445_v33 = vmul.f32 %v4747_v4, %v4745_v6  ;;  %v12120_v6 = vld [vmem:[#allocation230_spill] sm:$0xff]  ;;  %v12121_v4 = vld [vmem:[#allocation231_spill] sm:$0xff] }
 0x542   :  { %v8168_v42 = vrot.slane %v2445_v33, %v11660_v54  ;;  %v12122_v33 = vld [vmem:[#allocation232_spill] sm:$0xff] }
 0x544   :  { %v2456_v19 = vcombine.high %v8168_v42, %v8168_v42 }
 0x546   :  { %2523 = vmatprep.mubr.f32.mxu0 %v2456_v19  ;;  %2594 = vmatprep.mubr.f32.mxu1 %v2456_v19 }
 0x547   :  { %2524 = vmatmul.mubr.f32.vlgmr.msra.gmra.mxu0 %v8168_v42  ;;  %2595 = vmatmul.mubr.f32.vlgmr.msra.gmra.mxu1 %v8168_v42 }
 0x548   :  { %2602 = vmatpush1.msra.mxu0 %v7619_v41  ;;  %2673 = vmatpush1.msra.mxu1 %v7622_v45  ;;  %v12075_v41 = vld [vmem:[#allocation185_spill] sm:$0xff]  ;;  %v12076_v45 = vld [vmem:[#allocation186_spill] sm:$0xff] }
 0x549   :  { %2603 = vmatprep.subr.mxu0 %v7625_v48  ;;  %2665 = vmatprep.mubr.f32.mxu0 %v2456_v19  ;;  %v12077_v48 = vld [vmem:[#allocation187_spill] sm:$0xff] }
 0x54a   :  { %2674 = vmatprep.subr.mxu1 %v7628_v3  ;;  %2736 = vmatprep.mubr.f32.mxu1 %v2456_v19  ;;  %v12078_v3 = vld [vmem:[#allocation188_spill] sm:$0xff]  ;;  %v12123_v19 = vld [vmem:[#allocation233_spill] sm:$0xff] }
 0x54b   :  { %2604 = vmatpush1.msra.mxu0 %v7631_v47  ;;  %2675 = vmatpush1.msra.mxu1 %v7634_v7  ;;  %v12079_v47 = vld [vmem:[#allocation189_spill] sm:$0xff]  ;;  %v12080_v7 = vld [vmem:[#allocation190_spill] sm:$0xff] }
 0x54c   :  { %2605 = vmatprep.subr.mxu0 %v7637_v36  ;;  %2676 = vmatprep.subr.mxu1 %v7640_v58  ;;  %v12081_v36 = vld [vmem:[#allocation191_spill] sm:$0xff]  ;;  %v12082_v58 = vld [vmem:[#allocation192_spill] sm:$0xff] }
 0x54d   :  { %2606 = vmatpush1.msra.mxu0 %v7643_v59  ;;  %2677 = vmatpush1.msra.mxu1 %v7646_v20  ;;  %v12083_v59 = vld [vmem:[#allocation193_spill] sm:$0xff]  ;;  %v12084_v20 = vld [vmem:[#allocation194_spill] sm:$0xff] }
 0x54e   :  { %2607 = vmatprep.subr.mxu0 %v7649_v43  ;;  %2678 = vmatprep.subr.mxu1 %v7652_v18  ;;  %v12085_v43 = vld [vmem:[#allocation195_spill] sm:$0xff]  ;;  %v12086_v18 = vld [vmem:[#allocation196_spill] sm:$0xff] }
 0x54f   :  { %2608 = vmatpush1.msra.mxu0 %v7655_v0  ;;  %2679 = vmatpush1.msra.mxu1 %v7658_v49  ;;  %v12087_v0 = vld [vmem:[#allocation197_spill] sm:$0xff]  ;;  %v12088_v49 = vld [vmem:[#allocation198_spill] sm:$0xff] }
 0x550   :  { %2609 = vmatprep.subr.mxu0 %v7661_v63  ;;  %2680 = vmatprep.subr.mxu1 %v7664_v62  ;;  %v12089_v63 = vld [vmem:[#allocation199_spill] sm:$0xff]  ;;  %v12090_v62 = vld [vmem:[#allocation200_spill] sm:$0xff] }
 0x551   :  { %2610 = vmatpush1.msra.mxu0 %v12074_v32  ;;  %2681 = vmatpush1.msra.mxu1 %v12075_v41  ;;  %v12124_v32 = vld [vmem:[#allocation234_spill] sm:$0xff]  ;;  %v12125_v41 = vld [vmem:[#allocation235_spill] sm:$0xff] }
 0x552   :  { %2611 = vmatprep.subr.mxu0 %v12076_v45  ;;  %2682 = vmatprep.subr.mxu1 %v12077_v48  ;;  %v12126_v45 = vld [vmem:[#allocation236_spill] sm:$0xff]  ;;  %v12127_v48 = vld [vmem:[#allocation237_spill] sm:$0xff] }
 0x553   :  { %2612 = vmatpush1.msra.mxu0 %v12078_v3  ;;  %2683 = vmatpush1.msra.mxu1 %v12079_v47  ;;  %v12128_v3 = vld [vmem:[#allocation238_spill] sm:$0xff]  ;;  %v12129_v47 = vld [vmem:[#allocation239_spill] sm:$0xff] }
 0x554   :  { %2613 = vmatprep.subr.mxu0 %v12080_v7  ;;  %2684 = vmatprep.subr.mxu1 %v12081_v36  ;;  %v12130_v7 = vld [vmem:[#allocation240_spill] sm:$0xff]  ;;  %v12131_v36 = vld [vmem:[#allocation241_spill] sm:$0xff] }
 0x555   :  { %2614 = vmatpush1.msra.mxu0 %v12082_v58  ;;  %2685 = vmatpush1.msra.mxu1 %v12083_v59  ;;  %v12132_v58 = vld [vmem:[#allocation242_spill] sm:$0xff]  ;;  %v12133_v59 = vld [vmem:[#allocation243_spill] sm:$0xff] }
 0x556   :  { %2615 = vmatprep.subr.mxu0 %v12084_v20  ;;  %2686 = vmatprep.subr.mxu1 %v12085_v43  ;;  %v12134_v20 = vld [vmem:[#allocation244_spill] sm:$0xff]  ;;  %v12135_v43 = vld [vmem:[#allocation245_spill] sm:$0xff] }
 0x557   :  { %2616 = vmatpush1.msra.mxu0 %v12086_v18  ;;  %2687 = vmatpush1.msra.mxu1 %v12087_v0  ;;  %v12136_v18 = vld [vmem:[#allocation246_spill] sm:$0xff]  ;;  %v12137_v0 = vld [vmem:[#allocation247_spill] sm:$0xff] }
 0x558   :  { %2617 = vmatprep.subr.mxu0 %v12088_v49  ;;  %2688 = vmatprep.subr.mxu1 %v12089_v63  ;;  %v12138_v49 = vld [vmem:[#allocation248_spill] sm:$0xff]  ;;  %v12139_v63 = vld [vmem:[#allocation249_spill] sm:$0xff] }
 0x559   :  { %2618 = vmatpush1.msra.mxu0 %v12090_v62  ;;  %2689 = vmatpush1.msra.mxu1 %v12091_v5  ;;  %v12140_v62 = vld [vmem:[#allocation250_spill] sm:$0xff]  ;;  %v12141_v5 = vld [vmem:[#allocation251_spill] sm:$0xff] }
 0x55a   :  { %2619 = vmatprep.subr.mxu0 %v12092_v35  ;;  %2690 = vmatprep.subr.mxu1 %v12093_v46  ;;  %v12142_v35 = vld [vmem:[#allocation252_spill] sm:$0xff]  ;;  %v12143_v46 = vld [vmem:[#allocation253_spill] sm:$0xff] }
 0x55b   :  { %2620 = vmatpush1.msra.mxu0 %v12094_v2  ;;  %2691 = vmatpush1.msra.mxu1 %v12095_v17  ;;  %v12144_v2 = vld [vmem:[#allocation254_spill] sm:$0xff]  ;;  %v12145_v17 = vld [vmem:[#allocation255_spill] sm:$0xff] }
 0x55c   :  { %2621 = vmatprep.subr.mxu0 %v12096_v21  ;;  %2692 = vmatprep.subr.mxu1 %v12097_v1  ;;  %v12146_v21 = vld [vmem:[#allocation256_spill] sm:$0xff]  ;;  %v12147_v1 = vld [vmem:[#allocation257_spill] sm:$0xff] }
 0x55d   :  { %2622 = vmatpush1.msra.mxu0 %v12098_v38  ;;  %2693 = vmatpush1.msra.mxu1 %v12099_v8  ;;  %v12148_v38 = vld [vmem:[#allocation258_spill] sm:$0xff]  ;;  %v12149_v8 = vld [vmem:[#allocation259_spill] sm:$0xff] }
 0x55e   :  { %2623 = vmatprep.subr.mxu0 %v12100_v9  ;;  %2694 = vmatprep.subr.mxu1 %v12101_v10  ;;  %v12150_v9 = vld [vmem:[#allocation260_spill] sm:$0xff]  ;;  %v12151_v10 = vld [vmem:[#allocation261_spill] sm:$0xff] }
 0x55f   :  { %2624 = vmatpush1.msra.mxu0 %v12102_v11  ;;  %2695 = vmatpush1.msra.mxu1 %v12103_v12  ;;  %v12152_v11 = vld [vmem:[#allocation262_spill] sm:$0xff]  ;;  %v12153_v12 = vld [vmem:[#allocation263_spill] sm:$0xff] }
 0x560   :  { %2625 = vmatprep.subr.mxu0 %v12104_v14  ;;  %2696 = vmatprep.subr.mxu1 %v12105_v15  ;;  %v12154_v14 = vld [vmem:[#allocation264_spill] sm:$0xff]  ;;  %v12155_v15 = vld [vmem:[#allocation265_spill] sm:$0xff] }
 0x561   :  { %2626 = vmatpush1.msra.mxu0 %v12106_v24  ;;  %2697 = vmatpush1.msra.mxu1 %v12107_v25  ;;  %v12156_v24 = vld [vmem:[#allocation266_spill] sm:$0xff]  ;;  %v12157_v25 = vld [vmem:[#allocation267_spill] sm:$0xff] }
 0x562   :  { %2627 = vmatprep.subr.mxu0 %v12108_v26  ;;  %2698 = vmatprep.subr.mxu1 %v12109_v29  ;;  %v12158_v26 = vld [vmem:[#allocation268_spill] sm:$0xff]  ;;  %v12159_v29 = vld [vmem:[#allocation269_spill] sm:$0xff] }
 0x563   :  { %2628 = vmatpush1.msra.mxu0 %v12110_v30  ;;  %2699 = vmatpush1.msra.mxu1 %v12111_v31  ;;  %v12160_v30 = vld [vmem:[#allocation270_spill] sm:$0xff]  ;;  %v12161_v31 = vld [vmem:[#allocation271_spill] sm:$0xff] }
 0x564   :  { %2629 = vmatprep.subr.mxu0 %v12112_v50  ;;  %2700 = vmatprep.subr.mxu1 %v12113_v51  ;;  %v12162_v50 = vld [vmem:[#allocation272_spill] sm:$0xff]  ;;  %v12163_v51 = vld [vmem:[#allocation273_spill] sm:$0xff] }
 0x565   :  { %2630 = vmatpush1.msra.mxu0 %v12114_v52  ;;  %2701 = vmatpush1.msra.mxu1 %v12115_v53  ;;  %v12164_v52 = vld [vmem:[#allocation274_spill] sm:$0xff]  ;;  %v12165_v53 = vld [vmem:[#allocation275_spill] sm:$0xff] }
 0x566   :  { %2631 = vmatprep.subr.mxu0 %v12116_v55  ;;  %2702 = vmatprep.subr.mxu1 %v12117_v56  ;;  %v12166_v55 = vld [vmem:[#allocation276_spill] sm:$0xff]  ;;  %v12167_v56 = vld [vmem:[#allocation277_spill] sm:$0xff] }
 0x567   :  { %2632 = vmatpush1.msra.mxu0 %v12118_v60  ;;  %2703 = vmatpush1.msra.mxu1 %v12119_v13  ;;  %v12168_v60 = vld [vmem:[#allocation278_spill] sm:$0xff]  ;;  %v12169_v13 = vld [vmem:[#allocation279_spill] sm:$0xff] }
 0x568   :  { %2633 = vmatprep.subr.mxu0 %v12120_v6  ;;  %2704 = vmatprep.subr.mxu1 %v12121_v4  ;;  %v12170_v6 = vld [vmem:[#allocation280_spill] sm:$0xff]  ;;  %v12171_v4 = vld [vmem:[#allocation281_spill] sm:$0xff] }
 0x569   :  { %2634 = vmatpush2.msra.mxu0 %v12122_v33  ;;  %2705 = vmatpush2.msra.mxu1 %v12123_v19  ;;  %v12172_v33 = vld [vmem:[#allocation282_spill] sm:$0xff]  ;;  %v12173_v19 = vld [vmem:[#allocation283_spill] sm:$0xff] }
 0x56a   :  { %2635 = vmatprep.subr.mxu0 %v12124_v32  ;;  %2706 = vmatprep.subr.mxu1 %v12125_v41  ;;  %v12174_v32 = vld [vmem:[#allocation284_spill] sm:$0xff]  ;;  %v12175_v41 = vld [vmem:[#allocation285_spill] sm:$0xff] }
 0x56b   :  { %2636 = vmatpush2.msra.mxu0 %v12126_v45  ;;  %2707 = vmatpush2.msra.mxu1 %v12127_v48  ;;  %v12176_v45 = vld [vmem:[#allocation286_spill] sm:$0xff]  ;;  %v12177_v48 = vld [vmem:[#allocation287_spill] sm:$0xff] }
 0x56c   :  { %2637 = vmatprep.subr.mxu0 %v12128_v3  ;;  %2708 = vmatprep.subr.mxu1 %v12129_v47  ;;  %v12178_v3 = vld [vmem:[#allocation288_spill] sm:$0xff]  ;;  %v12179_v47 = vld [vmem:[#allocation289_spill] sm:$0xff] }
 0x56d   :  { %2638 = vmatpush2.msra.mxu0 %v12130_v7  ;;  %2709 = vmatpush2.msra.mxu1 %v12131_v36  ;;  %v12180_v7 = vld [vmem:[#allocation290_spill] sm:$0xff]  ;;  %v12181_v36 = vld [vmem:[#allocation291_spill] sm:$0xff] }
 0x56e   :  { %2639 = vmatprep.subr.mxu0 %v12132_v58  ;;  %2710 = vmatprep.subr.mxu1 %v12133_v59  ;;  %v12182_v58 = vld [vmem:[#allocation292_spill] sm:$0xff]  ;;  %v12183_v59 = vld [vmem:[#allocation293_spill] sm:$0xff] }
 0x56f   :  { %2640 = vmatpush2.msra.mxu0 %v12134_v20  ;;  %2711 = vmatpush2.msra.mxu1 %v12135_v43  ;;  %v12184_v20 = vld [vmem:[#allocation294_spill] sm:$0xff]  ;;  %v12185_v43 = vld [vmem:[#allocation295_spill] sm:$0xff] }
 0x570   :  { %2641 = vmatprep.subr.mxu0 %v12136_v18  ;;  %2712 = vmatprep.subr.mxu1 %v12137_v0  ;;  %v12187_v18 = vld [vmem:[#allocation297_spill] sm:$0xff]  ;;  %v12188_v0 = vld [vmem:[#allocation298_spill] sm:$0xff] }
 0x571   :  { %2642 = vmatpush2.msra.mxu0 %v12138_v49  ;;  %2713 = vmatpush2.msra.mxu1 %v12139_v63  ;;  %v8317_v49 = vld [vmem:[#allocation3 + $0x318] sm:$0xff]  ;;  %v8320_v63 = vld [vmem:[#allocation3 + $0x300] sm:$0xff] }
 0x572   :  { %2643 = vmatprep.subr.mxu0 %v12140_v62  ;;  %2714 = vmatprep.subr.mxu1 %v12141_v5  ;;  %v8341_v62 = vld [vmem:[#allocation3 + $0x298] sm:$0xff]  ;;  %v8344_v5 = vld [vmem:[#allocation3 + $0x280] sm:$0xff] }
 0x573   :  { %2644 = vmatpush2.msra.mxu0 %v12142_v35  ;;  %2715 = vmatpush2.msra.mxu1 %v12143_v46  ;;  %v8347_v35 = vld [vmem:[#allocation3 + $0x290] sm:$0xff]  ;;  %v8350_v46 = vld [vmem:[#allocation3 + $0x248] sm:$0xff] }
 0x574   :  { %2645 = vmatprep.subr.mxu0 %v12144_v2  ;;  %2716 = vmatprep.subr.mxu1 %v12145_v17  ;;  %v8353_v2 = vld [vmem:[#allocation3 + $0x258] sm:$0xff]  ;;  %v8356_v17 = vld [vmem:[#allocation3 + $0x240] sm:$0xff] }
 0x575   :  { %2646 = vmatpush2.msra.mxu0 %v12146_v21  ;;  %2717 = vmatpush2.msra.mxu1 %v12147_v1  ;;  %v8359_v21 = vld [vmem:[#allocation3 + $0x250] sm:$0xff]  ;;  %v8362_v1 = vld [vmem:[#allocation3 + $0x208] sm:$0xff] }
 0x576   :  { %2647 = vmatprep.subr.mxu0 %v12148_v38  ;;  %2718 = vmatprep.subr.mxu1 %v12149_v8  ;;  %v8365_v38 = vld [vmem:[#allocation3 + $0x218] sm:$0xff]  ;;  %v8368_v8 = vld [vmem:[#allocation3 + $0x200] sm:$0xff] }
 0x577   :  { %2648 = vmatpush2.msra.mxu0 %v12150_v9  ;;  %2719 = vmatpush2.msra.mxu1 %v12151_v10  ;;  %v8371_v9 = vld [vmem:[#allocation3 + $0x210] sm:$0xff]  ;;  %v8374_v10 = vld [vmem:[#allocation3 + $0x1c8] sm:$0xff] }
 0x578   :  { %2649 = vmatprep.subr.mxu0 %v12152_v11  ;;  %2720 = vmatprep.subr.mxu1 %v12153_v12  ;;  %v8377_v11 = vld [vmem:[#allocation3 + $0x1d8] sm:$0xff]  ;;  %v8380_v12 = vld [vmem:[#allocation3 + $0x1c0] sm:$0xff] }
 0x579   :  { %2650 = vmatpush2.msra.mxu0 %v12154_v14  ;;  %2721 = vmatpush2.msra.mxu1 %v12155_v15  ;;  %v8383_v14 = vld [vmem:[#allocation3 + $0x1d0] sm:$0xff]  ;;  %v8386_v15 = vld [vmem:[#allocation3 + $0x188] sm:$0xff] }
 0x57a   :  { %2651 = vmatprep.subr.mxu0 %v12156_v24  ;;  %2722 = vmatprep.subr.mxu1 %v12157_v25  ;;  %v8389_v24 = vld [vmem:[#allocation3 + $0x198] sm:$0xff]  ;;  %v8392_v25 = vld [vmem:[#allocation3 + $0x180] sm:$0xff] }
 0x57b   :  { %2652 = vmatpush2.msra.mxu0 %v12158_v26  ;;  %2723 = vmatpush2.msra.mxu1 %v12159_v29  ;;  %v8395_v26 = vld [vmem:[#allocation3 + $0x190] sm:$0xff]  ;;  %v8398_v29 = vld [vmem:[#allocation3 + $0x148] sm:$0xff] }
 0x57c   :  { %2653 = vmatprep.subr.mxu0 %v12160_v30  ;;  %2724 = vmatprep.subr.mxu1 %v12161_v31  ;;  %v8401_v30 = vld [vmem:[#allocation3 + $0x158] sm:$0xff]  ;;  %v8404_v31 = vld [vmem:[#allocation3 + $0x140] sm:$0xff] }
 0x57d   :  { %2654 = vmatpush2.msra.mxu0 %v12162_v50  ;;  %2725 = vmatpush2.msra.mxu1 %v12163_v51  ;;  %v8407_v50 = vld [vmem:[#allocation3 + $0x150] sm:$0xff]  ;;  %v8410_v51 = vld [vmem:[#allocation3 + $0x108] sm:$0xff] }
 0x57e   :  { %2655 = vmatprep.subr.mxu0 %v12164_v52  ;;  %2726 = vmatprep.subr.mxu1 %v12165_v53  ;;  %v8413_v52 = vld [vmem:[#allocation3 + $0x118] sm:$0xff]  ;;  %v8416_v53 = vld [vmem:[#allocation3 + $0x100] sm:$0xff] }
 0x57f   :  { %2656 = vmatpush2.msra.mxu0 %v12166_v55  ;;  %2727 = vmatpush2.msra.mxu1 %v12167_v56  ;;  %v8419_v55 = vld [vmem:[#allocation3 + $0x110] sm:$0xff]  ;;  %v8422_v56 = vld [vmem:[#allocation3 + $0xc8] sm:$0xff] }
 0x580   :  { %2657 = vmatprep.subr.mxu0 %v12168_v60  ;;  %2728 = vmatprep.subr.mxu1 %v12169_v13  ;;  %v8425_v60 = vld [vmem:[#allocation3 + $0xd8] sm:$0xff]  ;;  %v8428_v13 = vld [vmem:[#allocation3 + $0xc0] sm:$0xff] }
 0x581   :  { %2658 = vmatpush2.msra.mxu0 %v12170_v6  ;;  %2729 = vmatpush2.msra.mxu1 %v12171_v4  ;;  %v8431_v6 = vld [vmem:[#allocation3 + $0xd0] sm:$0xff]  ;;  %v8434_v4 = vld [vmem:[#allocation3 + $0x88] sm:$0xff] }
 0x582   :  { %2659 = vmatprep.subr.mxu0 %v12172_v33  ;;  %2730 = vmatprep.subr.mxu1 %v12173_v19  ;;  %12189 = vst [vmem:[#allocation299_spill] sm:$0xff] %v8431_v6  ;;  %12190 = vst [vmem:[#allocation300_spill] sm:$0xff] %v8434_v4  ;;  %v8437_v33 = vld [vmem:[#allocation3 + $0x98] sm:$0xff]  ;;  %v8440_v19 = vld [vmem:[#allocation3 + $0x80] sm:$0xff] }
 0x583   :  { %2660 = vmatpush2.msra.mxu0 %v12174_v32  ;;  %2731 = vmatpush2.msra.mxu1 %v12175_v41  ;;  %12191 = vst [vmem:[#allocation301_spill] sm:$0xff] %v8437_v33  ;;  %12192 = vst [vmem:[#allocation110_spill] sm:$0xff] %v8440_v19  ;;  %v8443_v32 = vld [vmem:[#allocation3 + $0x90] sm:$0xff]  ;;  %v8446_v41 = vld [vmem:[#allocation3 + $0x48] sm:$0xff] }
 0x584   :  { %2661 = vmatprep.subr.mxu0 %v12176_v45  ;;  %2732 = vmatprep.subr.mxu1 %v12177_v48  ;;  %12193 = vst [vmem:[#allocation111_spill] sm:$0xff] %v8443_v32  ;;  %12194 = vst [vmem:[#allocation112_spill] sm:$0xff] %v8446_v41  ;;  %v8449_v45 = vld [vmem:[#allocation3 + $0x58] sm:$0xff]  ;;  %v8452_v48 = vld [vmem:[#allocation3 + $0x40] sm:$0xff] }
 0x585   :  { %2662 = vmatpush2.msra.mxu0 %v7979_v16  ;;  %2733 = vmatpush2.msra.mxu1 %v12178_v3  ;;  %v12186_v16 = vld [vmem:[#allocation296_spill] sm:$0xff]  ;;  %12195 = vst [vmem:[#allocation113_spill] sm:$0xff] %v8449_v45  ;;  %12196 = vst [vmem:[#allocation114_spill] sm:$0xff] %v8452_v48  ;;  %v8455_v3 = vld [vmem:[#allocation3 + $0x50] sm:$0xff] }
 0x586   :  { %2663 = vmatprep.subr.mxu0 %v12179_v47  ;;  %2734 = vmatprep.subr.mxu1 %v12180_v7  ;;  %12197 = vst [vmem:[#allocation115_spill] sm:$0xff] %v8455_v3  ;;  %v8458_v47 = vld [vmem:[#allocation3 + $0x8] sm:$0xff]  ;;  %v8461_v7 = vld [vmem:[#allocation3 + $0x18] sm:$0xff] }
 0x587   :  { %2664 = vmatpush2.msra.mxu0 %v12181_v36  ;;  %2735 = vmatpush2.msra.mxu1 %v12182_v58  ;;  %12198 = vst [vmem:[#allocation116_spill] sm:$0xff] %v8458_v47  ;;  %12199 = vst [vmem:[#allocation117_spill] sm:$0xff] %v8461_v7  ;;  %v8464_v36 = vld [vmem:[#allocation3] sm:$0xff]  ;;  %v8467_v58 = vld [vmem:[#allocation3 + $0x10] sm:$0xff] }
 0x588   :  { %2666 = vmatmul.mubr.f32.vlgmr.msra.gmra.mxu0 %v8168_v42  ;;  %2737 = vmatmul.mubr.f32.vlgmr.msra.gmra.mxu1 %v8168_v42  ;;  %v8314_v42 = vld [vmem:[#allocation3 + $0x308] sm:$0xff]  ;;  %12200 = vst [vmem:[#allocation118_spill] sm:$0xff] %v8464_v36  ;;  %12201 = vst [vmem:[#allocation119_spill] sm:$0xff] %v8467_v58 }
 0x589   :  { %2826 = vmatprep.subr.mxu0 %v12183_v59  ;;  %2897 = vmatprep.subr.mxu1 %v12184_v20  ;;  %v8470_v59 = vld [vmem:[#allocation3 + $0x7c8] sm:$0xff]  ;;  %v8473_v20 = vld [vmem:[#allocation3 + $0x7d8] sm:$0xff] }
 0x58a   :  { %2827 = vmatpush1.msra.mxu0 %v12185_v43  ;;  %2898 = vmatpush1.msra.mxu1 %v12186_v16  ;;  %12202 = vst [vmem:[#allocation120_spill] sm:$0xff] %v8470_v59  ;;  %12203 = vst [vmem:[#allocation121_spill] sm:$0xff] %v8473_v20  ;;  %v8476_v43 = vld [vmem:[#allocation3 + $0x7c0] sm:$0xff]  ;;  %v8479_v16 = vld [vmem:[#allocation3 + $0x7d0] sm:$0xff] }
 0x58b   :  { %2828 = vmatprep.subr.mxu0 %v12187_v18  ;;  %2899 = vmatprep.subr.mxu1 %v12188_v0  ;;  %12204 = vst [vmem:[#allocation122_spill] sm:$0xff] %v8476_v43  ;;  %12205 = vst [vmem:[#allocation123_spill] sm:$0xff] %v8479_v16  ;;  %v8482_v18 = vld [vmem:[#allocation3 + $0x788] sm:$0xff]  ;;  %v8485_v0 = vld [vmem:[#allocation3 + $0x798] sm:$0xff] }
 0x58c   :  { %2829 = vmatpush1.msra.mxu0 %v8017_v23  ;;  %2900 = vmatpush1.msra.mxu1 %v8020_v40  ;;  %v8323_v23 = vld [vmem:[#allocation3 + $0x310] sm:$0xff]  ;;  %v8332_v40 = vld [vmem:[#allocation3 + $0x2c0] sm:$0xff]  ;;  %12206 = vst [vmem:[#allocation124_spill] sm:$0xff] %v8482_v18  ;;  %12207 = vst [vmem:[#allocation125_spill] sm:$0xff] %v8485_v0 }
 0x58d   :  { %2830 = vmatprep.subr.mxu0 %v8023_v22  ;;  %2901 = vmatprep.subr.mxu1 %v8026_v61  ;;  %v8326_v61 = vld [vmem:[#allocation3 + $0x2c8] sm:$0xff]  ;;  %v8335_v22 = vld [vmem:[#allocation3 + $0x2d0] sm:$0xff] }
 0x58e   :  { %2831 = vmatpush1.msra.mxu0 %v8029_v44  ;;  %2902 = vmatpush1.msra.mxu1 %v8032_v39  ;;  %v8329_v44 = vld [vmem:[#allocation3 + $0x2d8] sm:$0xff]  ;;  %v8338_v39 = vld [vmem:[#allocation3 + $0x288] sm:$0xff] }
 0x58f   :  { %2832 = vmatprep.subr.mxu0 %v8314_v42  ;;  %2903 = vmatprep.subr.mxu1 %v8317_v49 }
 0x590   :  { %2833 = vmatpush1.msra.mxu0 %v8320_v63  ;;  %2904 = vmatpush1.msra.mxu1 %v8323_v23 }
 0x591   :  { %2834 = vmatprep.subr.mxu0 %v8326_v61  ;;  %2905 = vmatprep.subr.mxu1 %v8329_v44 }
 0x592   :  { %2835 = vmatpush1.msra.mxu0 %v8332_v40  ;;  %2906 = vmatpush1.msra.mxu1 %v8335_v22 }
 0x593   :  { %2836 = vmatprep.subr.mxu0 %v8338_v39  ;;  %2907 = vmatprep.subr.mxu1 %v8341_v62 }
 0x594   :  { %2837 = vmatpush1.msra.mxu0 %v8344_v5  ;;  %2908 = vmatpush1.msra.mxu1 %v8347_v35 }
 0x595   :  { %2838 = vmatprep.subr.mxu0 %v8350_v46  ;;  %2909 = vmatprep.subr.mxu1 %v8353_v2 }
 0x596   :  { %2839 = vmatpush1.msra.mxu0 %v8356_v17  ;;  %2910 = vmatpush1.msra.mxu1 %v8359_v21 }
 0x597   :  { %2840 = vmatprep.subr.mxu0 %v8362_v1  ;;  %2911 = vmatprep.subr.mxu1 %v8365_v38 }
 0x598   :  { %2841 = vmatpush1.msra.mxu0 %v8368_v8  ;;  %2912 = vmatpush1.msra.mxu1 %v8371_v9 }
 0x599   :  { %2842 = vmatprep.subr.mxu0 %v8374_v10  ;;  %2913 = vmatprep.subr.mxu1 %v8377_v11 }
 0x59a   :  { %2843 = vmatpush1.msra.mxu0 %v8380_v12  ;;  %2914 = vmatpush1.msra.mxu1 %v8383_v14 }
 0x59b   :  { %2844 = vmatprep.subr.mxu0 %v8386_v15  ;;  %2915 = vmatprep.subr.mxu1 %v8389_v24 }
 0x59c   :  { %2845 = vmatpush1.msra.mxu0 %v8392_v25  ;;  %2916 = vmatpush1.msra.mxu1 %v8395_v26 }
 0x59d   :  { %2846 = vmatprep.subr.mxu0 %v8398_v29  ;;  %2917 = vmatprep.subr.mxu1 %v8401_v30 }
 0x59e   :  { %2847 = vmatpush1.msra.mxu0 %v8404_v31  ;;  %2918 = vmatpush1.msra.mxu1 %v8407_v50 }
 0x59f   :  { %2848 = vmatprep.subr.mxu0 %v8410_v51  ;;  %2919 = vmatprep.subr.mxu1 %v8413_v52 }
 0x5a0   :  { %2849 = vmatpush1.msra.mxu0 %v8416_v53  ;;  %2920 = vmatpush1.msra.mxu1 %v8419_v55 }
 0x5a1   :  { %2850 = vmatprep.subr.mxu0 %v8422_v56  ;;  %2921 = vmatprep.subr.mxu1 %v8425_v60 }
 0x5a2   :  { %2851 = vmatpush1.msra.mxu0 %v8428_v13  ;;  %2922 = vmatpush1.msra.mxu1 %v8431_v6 }
 0x5a3   :  { %2852 = vmatprep.subr.mxu0 %v8434_v4  ;;  %2923 = vmatprep.subr.mxu1 %v8437_v33 }
 0x5a4   :  { %2853 = vmatpush1.msra.mxu0 %v8440_v19  ;;  %2924 = vmatpush1.msra.mxu1 %v8443_v32 }
 0x5a5   :  { %2854 = vmatprep.subr.mxu0 %v8446_v41  ;;  %2925 = vmatprep.subr.mxu1 %v8449_v45 }
 0x5a6   :  { %2855 = vmatpush1.msra.mxu0 %v8452_v48  ;;  %2926 = vmatpush1.msra.mxu1 %v8455_v3 }
 0x5a7   :  { %2856 = vmatprep.subr.mxu0 %v8458_v47  ;;  %2927 = vmatprep.subr.mxu1 %v8461_v7 }
 0x5a8   :  { %2857 = vmatpush1.msra.mxu0 %v8464_v36  ;;  %2928 = vmatpush1.msra.mxu1 %v8467_v58 }
 0x5a9   :  { %2858 = vmatprep.subr.mxu0 %v8470_v59  ;;  %2929 = vmatprep.subr.mxu1 %v8473_v20  ;;  %v8488_v59 = vld [vmem:[#allocation3 + $0x780] sm:$0xff]  ;;  %v8491_v20 = vld [vmem:[#allocation3 + $0x790] sm:$0xff] }
 0x5aa   :  { %2859 = vmatpush2.msra.mxu0 %v8476_v43  ;;  %2930 = vmatpush2.msra.mxu1 %v8479_v16  ;;  %12208 = vst [vmem:[#allocation126_spill] sm:$0xff] %v8488_v59  ;;  %12209 = vst [vmem:[#allocation127_spill] sm:$0xff] %v8491_v20  ;;  %v8494_v43 = vld [vmem:[#allocation3 + $0x748] sm:$0xff]  ;;  %v8497_v16 = vld [vmem:[#allocation3 + $0x758] sm:$0xff] }
 0x5ab   :  { %2860 = vmatprep.subr.mxu0 %v8482_v18  ;;  %2931 = vmatprep.subr.mxu1 %v8485_v0  ;;  %12210 = vst [vmem:[#allocation128_spill] sm:$0xff] %v8494_v43  ;;  %12211 = vst [vmem:[#allocation129_spill] sm:$0xff] %v8497_v16  ;;  %v8500_v18 = vld [vmem:[#allocation3 + $0x740] sm:$0xff]  ;;  %v8503_v0 = vld [vmem:[#allocation3 + $0x750] sm:$0xff] }
 0x5ac   :  { %2861 = vmatpush2.msra.mxu0 %v8488_v59  ;;  %2932 = vmatpush2.msra.mxu1 %v8491_v20  ;;  %12212 = vst [vmem:[#allocation130_spill] sm:$0xff] %v8500_v18  ;;  %12213 = vst [vmem:[#allocation131_spill] sm:$0xff] %v8503_v0  ;;  %v8506_v59 = vld [vmem:[#allocation3 + $0x708] sm:$0xff]  ;;  %v8509_v20 = vld [vmem:[#allocation3 + $0x718] sm:$0xff] }
 0x5ad   :  { %2862 = vmatprep.subr.mxu0 %v8494_v43  ;;  %2933 = vmatprep.subr.mxu1 %v8497_v16  ;;  %12214 = vst [vmem:[#allocation132_spill] sm:$0xff] %v8506_v59  ;;  %12215 = vst [vmem:[#allocation133_spill] sm:$0xff] %v8509_v20  ;;  %v8512_v43 = vld [vmem:[#allocation3 + $0x700] sm:$0xff]  ;;  %v8515_v16 = vld [vmem:[#allocation3 + $0x710] sm:$0xff] }
 0x5ae   :  { %2863 = vmatpush2.msra.mxu0 %v8500_v18  ;;  %2934 = vmatpush2.msra.mxu1 %v8503_v0  ;;  %12216 = vst [vmem:[#allocation134_spill] sm:$0xff] %v8512_v43  ;;  %12217 = vst [vmem:[#allocation135_spill] sm:$0xff] %v8515_v16  ;;  %v8518_v18 = vld [vmem:[#allocation3 + $0x6c8] sm:$0xff]  ;;  %v8521_v0 = vld [vmem:[#allocation3 + $0x6d8] sm:$0xff] }
 0x5af   :  { %2864 = vmatprep.subr.mxu0 %v8506_v59  ;;  %2935 = vmatprep.subr.mxu1 %v8509_v20  ;;  %12218 = vst [vmem:[#allocation136_spill] sm:$0xff] %v8518_v18  ;;  %12219 = vst [vmem:[#allocation137_spill] sm:$0xff] %v8521_v0  ;;  %v8524_v59 = vld [vmem:[#allocation3 + $0x6c0] sm:$0xff]  ;;  %v8527_v20 = vld [vmem:[#allocation3 + $0x6d0] sm:$0xff] }
 0x5b0   :  { %2865 = vmatpush2.msra.mxu0 %v8512_v43  ;;  %2936 = vmatpush2.msra.mxu1 %v8515_v16  ;;  %12220 = vst [vmem:[#allocation138_spill] sm:$0xff] %v8524_v59  ;;  %12221 = vst [vmem:[#allocation139_spill] sm:$0xff] %v8527_v20  ;;  %v8530_v43 = vld [vmem:[#allocation3 + $0x688] sm:$0xff]  ;;  %v8533_v16 = vld [vmem:[#allocation3 + $0x698] sm:$0xff] }
 0x5b1   :  { %2866 = vmatprep.subr.mxu0 %v8518_v18  ;;  %2937 = vmatprep.subr.mxu1 %v8521_v0  ;;  %12222 = vst [vmem:[#allocation140_spill] sm:$0xff] %v8530_v43  ;;  %12223 = vst [vmem:[#allocation141_spill] sm:$0xff] %v8533_v16  ;;  %v8536_v18 = vld [vmem:[#allocation3 + $0x680] sm:$0xff]  ;;  %v8539_v0 = vld [vmem:[#allocation3 + $0x690] sm:$0xff] }
 0x5b2   :  { %2867 = vmatpush2.msra.mxu0 %v8524_v59  ;;  %2938 = vmatpush2.msra.mxu1 %v8527_v20  ;;  %12224 = vst [vmem:[#allocation142_spill] sm:$0xff] %v8536_v18  ;;  %12225 = vst [vmem:[#allocation143_spill] sm:$0xff] %v8539_v0  ;;  %v8542_v59 = vld [vmem:[#allocation3 + $0x648] sm:$0xff]  ;;  %v8545_v20 = vld [vmem:[#allocation3 + $0x658] sm:$0xff] }
 0x5b3   :  { %2868 = vmatprep.subr.mxu0 %v8530_v43  ;;  %2939 = vmatprep.subr.mxu1 %v8533_v16  ;;  %12226 = vst [vmem:[#allocation144_spill] sm:$0xff] %v8542_v59  ;;  %12227 = vst [vmem:[#allocation145_spill] sm:$0xff] %v8545_v20  ;;  %v8548_v43 = vld [vmem:[#allocation3 + $0x640] sm:$0xff]  ;;  %v8551_v16 = vld [vmem:[#allocation3 + $0x650] sm:$0xff] }
 0x5b4   :  { %2869 = vmatpush2.msra.mxu0 %v8536_v18  ;;  %2940 = vmatpush2.msra.mxu1 %v8539_v0  ;;  %12228 = vst [vmem:[#allocation146_spill] sm:$0xff] %v8548_v43  ;;  %12229 = vst [vmem:[#allocation147_spill] sm:$0xff] %v8551_v16  ;;  %v8554_v18 = vld [vmem:[#allocation3 + $0x608] sm:$0xff]  ;;  %v8557_v0 = vld [vmem:[#allocation3 + $0x618] sm:$0xff] }
 0x5b5   :  { %2870 = vmatprep.subr.mxu0 %v8542_v59  ;;  %2941 = vmatprep.subr.mxu1 %v8545_v20  ;;  %12230 = vst [vmem:[#allocation148_spill] sm:$0xff] %v8554_v18  ;;  %12231 = vst [vmem:[#allocation149_spill] sm:$0xff] %v8557_v0  ;;  %v8560_v59 = vld [vmem:[#allocation3 + $0x600] sm:$0xff]  ;;  %v8563_v20 = vld [vmem:[#allocation3 + $0x610] sm:$0xff] }
 0x5b6   :  { %2871 = vmatpush2.msra.mxu0 %v8548_v43  ;;  %2942 = vmatpush2.msra.mxu1 %v8551_v16  ;;  %12232 = vst [vmem:[#allocation150_spill] sm:$0xff] %v8560_v59  ;;  %12233 = vst [vmem:[#allocation151_spill] sm:$0xff] %v8563_v20  ;;  %v8566_v43 = vld [vmem:[#allocation3 + $0x5c8] sm:$0xff]  ;;  %v8569_v16 = vld [vmem:[#allocation3 + $0x5d8] sm:$0xff] }
 0x5b7   :  { %2872 = vmatprep.subr.mxu0 %v8554_v18  ;;  %2943 = vmatprep.subr.mxu1 %v8557_v0  ;;  %12234 = vst [vmem:[#allocation152_spill] sm:$0xff] %v8566_v43  ;;  %12235 = vst [vmem:[#allocation153_spill] sm:$0xff] %v8569_v16  ;;  %v8572_v18 = vld [vmem:[#allocation3 + $0x5c0] sm:$0xff]  ;;  %v8575_v0 = vld [vmem:[#allocation3 + $0x5d0] sm:$0xff] }
 0x5b8   :  { %2873 = vmatpush2.msra.mxu0 %v8560_v59  ;;  %2944 = vmatpush2.msra.mxu1 %v8563_v20  ;;  %12236 = vst [vmem:[#allocation154_spill] sm:$0xff] %v8572_v18  ;;  %12237 = vst [vmem:[#allocation155_spill] sm:$0xff] %v8575_v0  ;;  %v8578_v59 = vld [vmem:[#allocation3 + $0x588] sm:$0xff]  ;;  %v8581_v20 = vld [vmem:[#allocation3 + $0x598] sm:$0xff] }
 0x5b9   :  { %2874 = vmatprep.subr.mxu0 %v8566_v43  ;;  %2945 = vmatprep.subr.mxu1 %v8569_v16  ;;  %12238 = vst [vmem:[#allocation156_spill] sm:$0xff] %v8578_v59  ;;  %12239 = vst [vmem:[#allocation157_spill] sm:$0xff] %v8581_v20  ;;  %v8584_v43 = vld [vmem:[#allocation3 + $0x580] sm:$0xff]  ;;  %v8587_v16 = vld [vmem:[#allocation3 + $0x590] sm:$0xff] }
 0x5ba   :  { %2875 = vmatpush2.msra.mxu0 %v8572_v18  ;;  %2946 = vmatpush2.msra.mxu1 %v8575_v0  ;;  %12240 = vst [vmem:[#allocation158_spill] sm:$0xff] %v8584_v43  ;;  %12241 = vst [vmem:[#allocation159_spill] sm:$0xff] %v8587_v16  ;;  %v8590_v18 = vld [vmem:[#allocation3 + $0x548] sm:$0xff]  ;;  %v8593_v0 = vld [vmem:[#allocation3 + $0x558] sm:$0xff] }
 0x5bb   :  { %2876 = vmatprep.subr.mxu0 %v8578_v59  ;;  %2947 = vmatprep.subr.mxu1 %v8581_v20  ;;  %12242 = vst [vmem:[#allocation160_spill] sm:$0xff] %v8590_v18  ;;  %12243 = vst [vmem:[#allocation161_spill] sm:$0xff] %v8593_v0  ;;  %v8596_v59 = vld [vmem:[#allocation3 + $0x540] sm:$0xff]  ;;  %v8599_v20 = vld [vmem:[#allocation3 + $0x550] sm:$0xff] }
 0x5bc   :  { %2877 = vmatpush2.msra.mxu0 %v8584_v43  ;;  %2948 = vmatpush2.msra.mxu1 %v8587_v16  ;;  %12244 = vst [vmem:[#allocation162_spill] sm:$0xff] %v8596_v59  ;;  %12245 = vst [vmem:[#allocation163_spill] sm:$0xff] %v8599_v20  ;;  %v8602_v43 = vld [vmem:[#allocation3 + $0x508] sm:$0xff]  ;;  %v8605_v16 = vld [vmem:[#allocation3 + $0x518] sm:$0xff] }
 0x5bd   :  { %2878 = vmatprep.subr.mxu0 %v8590_v18  ;;  %2949 = vmatprep.subr.mxu1 %v8593_v0  ;;  %12246 = vst [vmem:[#allocation164_spill] sm:$0xff] %v8602_v43  ;;  %12247 = vst [vmem:[#allocation165_spill] sm:$0xff] %v8605_v16  ;;  %v8608_v18 = vld [vmem:[#allocation3 + $0x500] sm:$0xff]  ;;  %v8611_v0 = vld [vmem:[#allocation3 + $0x510] sm:$0xff] }
 0x5be   :  { %2879 = vmatpush2.msra.mxu0 %v8596_v59  ;;  %2950 = vmatpush2.msra.mxu1 %v8599_v20  ;;  %12248 = vst [vmem:[#allocation166_spill] sm:$0xff] %v8608_v18  ;;  %12249 = vst [vmem:[#allocation167_spill] sm:$0xff] %v8611_v0  ;;  %v8614_v59 = vld [vmem:[#allocation3 + $0x4c8] sm:$0xff]  ;;  %v8617_v20 = vld [vmem:[#allocation3 + $0x4d8] sm:$0xff] }
 0x5bf   :  { %2880 = vmatprep.subr.mxu0 %v8602_v43  ;;  %2951 = vmatprep.subr.mxu1 %v8605_v16  ;;  %12250 = vst [vmem:[#allocation168_spill] sm:$0xff] %v8614_v59  ;;  %12251 = vst [vmem:[#allocation169_spill] sm:$0xff] %v8617_v20  ;;  %v8620_v43 = vld [vmem:[#allocation3 + $0x4c0] sm:$0xff]  ;;  %v8623_v16 = vld [vmem:[#allocation3 + $0x4d0] sm:$0xff] }
 0x5c0   :  { %2881 = vmatpush2.msra.mxu0 %v8608_v18  ;;  %2952 = vmatpush2.msra.mxu1 %v8611_v0  ;;  %12252 = vst [vmem:[#allocation170_spill] sm:$0xff] %v8620_v43  ;;  %12253 = vst [vmem:[#allocation171_spill] sm:$0xff] %v8623_v16  ;;  %v8626_v18 = vld [vmem:[#allocation3 + $0x488] sm:$0xff]  ;;  %v8629_v0 = vld [vmem:[#allocation3 + $0x498] sm:$0xff] }
 0x5c1   :  { %2882 = vmatprep.subr.mxu0 %v8614_v59  ;;  %2953 = vmatprep.subr.mxu1 %v8617_v20  ;;  %12254 = vst [vmem:[#allocation172_spill] sm:$0xff] %v8626_v18  ;;  %12255 = vst [vmem:[#allocation173_spill] sm:$0xff] %v8629_v0  ;;  %v8632_v59 = vld [vmem:[#allocation3 + $0x480] sm:$0xff]  ;;  %v8635_v20 = vld [vmem:[#allocation3 + $0x490] sm:$0xff] }
 0x5c2   :  { %2883 = vmatpush2.msra.mxu0 %v8620_v43  ;;  %2954 = vmatpush2.msra.mxu1 %v8623_v16  ;;  %12256 = vst [vmem:[#allocation174_spill] sm:$0xff] %v8632_v59  ;;  %12257 = vst [vmem:[#allocation175_spill] sm:$0xff] %v8635_v20  ;;  %v8638_v43 = vld [vmem:[#allocation3 + $0x448] sm:$0xff]  ;;  %v8641_v16 = vld [vmem:[#allocation3 + $0x458] sm:$0xff] }
 0x5c3   :  { %2884 = vmatprep.subr.mxu0 %v8626_v18  ;;  %2955 = vmatprep.subr.mxu1 %v8629_v0  ;;  %12258 = vst [vmem:[#allocation93_spill] sm:$0xff] %v8638_v43  ;;  %12259 = vst [vmem:[#allocation94_spill] sm:$0xff] %v8641_v16  ;;  %v8644_v18 = vld [vmem:[#allocation3 + $0x440] sm:$0xff]  ;;  %v8647_v0 = vld [vmem:[#allocation3 + $0x450] sm:$0xff] }
 0x5c4   :  { %2885 = vmatpush2.msra.mxu0 %v8632_v59  ;;  %2956 = vmatpush2.msra.mxu1 %v8635_v20  ;;  %12260 = vst [vmem:[#allocation96_spill] sm:$0xff] %v8644_v18  ;;  %12261 = vst [vmem:[#allocation102_spill] sm:$0xff] %v8647_v0  ;;  %v8650_v59 = vld [vmem:[#allocation3 + $0x408] sm:$0xff]  ;;  %v8653_v20 = vld [vmem:[#allocation3 + $0x418] sm:$0xff] }
 0x5c5   :  { %2886 = vmatprep.subr.mxu0 %v8638_v43  ;;  %2957 = vmatprep.subr.mxu1 %v8641_v16  ;;  %12262 = vst [vmem:[#allocation104_spill] sm:$0xff] %v8650_v59  ;;  %12263 = vst [vmem:[#allocation176_spill] sm:$0xff] %v8653_v20  ;;  %v8656_v43 = vld [vmem:[#allocation3 + $0x400] sm:$0xff]  ;;  %v8659_v16 = vld [vmem:[#allocation3 + $0x410] sm:$0xff] }
 0x5c6   :  { %2887 = vmatpush2.msra.mxu0 %v8644_v18  ;;  %2958 = vmatpush2.msra.mxu1 %v8647_v0  ;;  %12264 = vst [vmem:[#allocation177_spill] sm:$0xff] %v8656_v43  ;;  %12265 = vst [vmem:[#allocation178_spill] sm:$0xff] %v8659_v16  ;;  %v8662_v18 = vld [vmem:[#allocation3 + $0x3e8] sm:$0xff]  ;;  %v8665_v0 = vld [vmem:[#allocation3 + $0x3f8] sm:$0xff] }
 0x5c7   :  { %2888 = vmatprep.subr.mxu0 %v8650_v59  ;;  %2959 = vmatprep.subr.mxu1 %v8653_v20  ;;  %12266 = vst [vmem:[#allocation179_spill] sm:$0xff] %v8662_v18  ;;  %12267 = vst [vmem:[#allocation180_spill] sm:$0xff] %v8665_v0 }
 0x5c8   :  { %2889 = vmatpush2.msra.mxu0 %v8656_v43  ;;  %2960 = vmatpush2.msra.mxu1 %v8659_v16  ;;  %v12268_v16 = vcombine.high %v12068_v37, %v12069_v34  ;;  %v12269_v37 = vcombine.high %v12071_v27, %v12072_v28 }
 0x5c9   :  { %2968 = vmatprep.subr.mxu0 %v8662_v18  ;;  %3039 = vmatprep.subr.mxu1 %v8665_v0 }
 0x607   :  { %v2525_v59 = vpop.f32.mrf.mxu0  ;;  %v2596_v58 = vpop.f32.mrf.mxu1 }
 0x609   :  { %v2527_v36 = vpop.f32.mrf.mxu0  ;;  %v2598_v20 = vpop.f32.mrf.mxu1 }
 0x60a   :  { %v2751_v7 = vcombine.low %v2525_v59, %v2527_v36  ;;  %v2752_v47 = vcombine.low %v2596_v58, %v2598_v20 }
 0x60c   :  { %v2759_v43 = vrot.slane %v2751_v7, %v11660_v54  ;;  %v2766_v3 = vrot.slane %v2752_v47, %v11660_v54 }
 0x60e   :  { %v2767_v48 = vcombine.low %v2759_v43, %v2766_v3 }
 0x610   :  { %v2787_v45 = vadd.f32 %v2767_v48, %v12268_v16 }
 0x612   :  { %v4654_v18 = vmul.f32 -1.442695, %v2787_v45 }
 0x614   :  { %4748 = vpow2.f32 %v4654_v18  ;;  %v8692_v18 = vld [vmem:[#allocation3 + $0x3f0] sm:$0xff] }
 0x621   :  { %v4749_v41 = vpop.eup %4748 }
 0x622   :  { %v2792_v19 = vadd.f32 1.0, %v4749_v41 }
 0x624   :  { %4750 = vrcp.f32 %v2792_v19 }
 0x631   :  { %v4751_v58 = vpop.eup %4750 }
 0x632   :  { %v2806_v41 = vrot.slane %v4751_v58, 4 }
 0x648   :  { %v2667_v32 = vpop.f32.mrf.mxu0  ;;  %v2738_v0 = vpop.f32.mrf.mxu1 }
 0x64a   :  { %v2669_v33 = vpop.f32.mrf.mxu0  ;;  %v2740_v4 = vpop.f32.mrf.mxu1 }
 0x64b   :  { %v2768_v6 = vcombine.low %v2667_v32, %v2669_v33  ;;  %v2769_v36 = vcombine.low %v2738_v0, %v2740_v4  ;;  %v2808_v33 = vmul.f32 %v2806_v41, %v8164_v57  ;;  %v8689_v57 = vld [vmem:[#allocation3 + $0x3e0] sm:$0xff]  ;;  %v8695_v0 = vld [vmem:[#allocation3 + $0x3a8] sm:$0xff] }
 0x64c   :  { %v8725_v41 = vld [vmem:[#allocation3 + $0x320] sm:$0xff] }
 0x64d   :  { %v2776_v7 = vrot.slane %v2768_v6, %v11660_v54  ;;  %v2783_v47 = vrot.slane %v2769_v36, %v11660_v54  ;;  %v8698_v36 = vld [vmem:[#allocation3 + $0x3b8] sm:$0xff] }
 0x64f   :  { %v2784_v3 = vcombine.low %v2776_v7, %v2783_v47  ;;  %v8701_v7 = vld [vmem:[#allocation3 + $0x3a0] sm:$0xff]  ;;  %v8704_v47 = vld [vmem:[#allocation3 + $0x3b0] sm:$0xff] }
 0x651   :  { %v2788_v34 = vadd.f32 %v2784_v3, %v12269_v37  ;;  %v8707_v3 = vld [vmem:[#allocation3 + $0x368] sm:$0xff]  ;;  %v8710_v37 = vld [vmem:[#allocation3 + $0x378] sm:$0xff] }
 0x653   :  { %4752 = vtanh.f32 %v2788_v34  ;;  %v2797_v45 = vrot.slane %v2788_v34, 4  ;;  %v8713_v34 = vld [vmem:[#allocation3 + $0x360] sm:$0xff] }
 0x655   :  { %v4655_v48 = vmul.f32 -1.442695, %v2797_v45  ;;  %v8716_v45 = vld [vmem:[#allocation3 + $0x370] sm:$0xff] }
 0x657   :  { %4754 = vpow2.f32 %v4655_v48  ;;  %v8719_v48 = vld [vmem:[#allocation3 + $0x328] sm:$0xff] }
 0x660   :  { %v4753_v59 = vpop.eup %4752 }
 0x661   :  { %v2809_v4 = vmul.f32 %v4753_v59, %v4751_v58  ;;  %v8722_v58 = vld [vmem:[#allocation3 + $0x338] sm:$0xff]  ;;  %v8728_v59 = vld [vmem:[#allocation3 + $0x330] sm:$0xff] }
 0x663   :  { %v8679_v19 = vadd.f32 %v2809_v4, %v2808_v33  ;;  %v8731_v33 = vld [vmem:[#allocation3 + $0x2e8] sm:$0xff]  ;;  %v8734_v4 = vld [vmem:[#allocation3 + $0x2f8] sm:$0xff] }
 0x664   :  { %v4755_v6 = vpop.eup %4754 }
 0x665   :  { %v2802_v32 = vadd.f32 1.0, %v4755_v6  ;;  %4756 = vtanh.f32 %v8679_v19  ;;  %v8737_v6 = vld [vmem:[#allocation3 + $0x2e0] sm:$0xff] }
 0x666   :  { %12270 = vst [vmem:[#allocation181_spill] sm:$0xff] %v8737_v6 }
 0x667   :  { %4758 = vrcp.f32 %v2802_v32  ;;  %v8740_v32 = vld [vmem:[#allocation3 + $0x2f0] sm:$0xff] }
 0x668   :  { %12271 = vst [vmem:[#allocation182_spill] sm:$0xff] %v8740_v32 }
 0x672   :  { %v4757_v20 = vpop.eup %4756 }
 0x674   :  { %v4759_v27 = vpop.eup %4758 }
 0x675   :  { %v2812_v28 = vmul.f32 %v4759_v27, %v4757_v20  ;;  %v8743_v20 = vld [vmem:[#allocation3 + $0x2a8] sm:$0xff]  ;;  %v8746_v27 = vld [vmem:[#allocation3 + $0x2b8] sm:$0xff] }
 0x676   :  { %12272 = vst [vmem:[#allocation183_spill] sm:$0xff] %v8743_v20  ;;  %12273 = vst [vmem:[#allocation95_spill] sm:$0xff] %v8746_v27 }
 0x677   :  { %v8683_v43 = vrot.slane %v2812_v28, %v11660_v54  ;;  %v8749_v28 = vld [vmem:[#allocation3 + $0x2a0] sm:$0xff] }
 0x678   :  { %12274 = vst [vmem:[#allocation97_spill] sm:$0xff] %v8749_v28 }
 0x679   :  { %v2823_v16 = vcombine.high %v8683_v43, %v8683_v43 }
 0x67b   :  { %2890 = vmatprep.mubr.f32.mxu0 %v2823_v16  ;;  %2961 = vmatprep.mubr.f32.mxu1 %v2823_v16 }
 0x67c   :  { %2891 = vmatmul.mubr.f32.vlgmr.msra.gmra.mxu0 %v8683_v43  ;;  %2962 = vmatmul.mubr.f32.vlgmr.msra.gmra.mxu1 %v8683_v43 }
 0x67d   :  { %2969 = vmatpush1.msra.mxu0 %v8689_v57  ;;  %3040 = vmatpush1.msra.mxu1 %v8692_v18 }
 0x67e   :  { %2970 = vmatprep.subr.mxu0 %v8695_v0  ;;  %3032 = vmatprep.mubr.f32.mxu0 %v2823_v16 }
 0x67f   :  { %3041 = vmatprep.subr.mxu1 %v8698_v36  ;;  %3103 = vmatprep.mubr.f32.mxu1 %v2823_v16  ;;  %v8752_v16 = vld [vmem:[#allocation3 + $0x2b0] sm:$0xff] }
 0x680   :  { %2971 = vmatpush1.msra.mxu0 %v8701_v7  ;;  %3042 = vmatpush1.msra.mxu1 %v8704_v47  ;;  %12275 = vst [vmem:[#allocation103_spill] sm:$0xff] %v8752_v16 }
 0x681   :  { %2972 = vmatprep.subr.mxu0 %v8707_v3  ;;  %3043 = vmatprep.subr.mxu1 %v8710_v37 }
 0x682   :  { %2973 = vmatpush1.msra.mxu0 %v8713_v34  ;;  %3044 = vmatpush1.msra.mxu1 %v8716_v45 }
 0x683   :  { %2974 = vmatprep.subr.mxu0 %v8719_v48  ;;  %3045 = vmatprep.subr.mxu1 %v8722_v58 }
 0x684   :  { %2975 = vmatpush1.msra.mxu0 %v8725_v41  ;;  %3046 = vmatpush1.msra.mxu1 %v8728_v59 }
 0x685   :  { %2976 = vmatprep.subr.mxu0 %v8731_v33  ;;  %3047 = vmatprep.subr.mxu1 %v8734_v4 }
 0x686   :  { %2977 = vmatpush1.msra.mxu0 %v8737_v6  ;;  %3048 = vmatpush1.msra.mxu1 %v8740_v32  ;;  %v8755_v6 = vld [vmem:[#allocation3 + $0x268] sm:$0xff]  ;;  %v8758_v32 = vld [vmem:[#allocation3 + $0x278] sm:$0xff] }
 0x687   :  { %2978 = vmatprep.subr.mxu0 %v8743_v20  ;;  %3049 = vmatprep.subr.mxu1 %v8746_v27  ;;  %12276 = vst [vmem:[#allocation105_spill] sm:$0xff] %v8755_v6  ;;  %12277 = vst [vmem:[#allocation184_spill] sm:$0xff] %v8758_v32  ;;  %v8761_v20 = vld [vmem:[#allocation3 + $0x260] sm:$0xff]  ;;  %v8764_v27 = vld [vmem:[#allocation3 + $0x270] sm:$0xff] }
 0x688   :  { %2979 = vmatpush1.msra.mxu0 %v8749_v28  ;;  %3050 = vmatpush1.msra.mxu1 %v8752_v16  ;;  %12278 = vst [vmem:[#allocation185_spill] sm:$0xff] %v8761_v20  ;;  %12279 = vst [vmem:[#allocation186_spill] sm:$0xff] %v8764_v27  ;;  %v8767_v28 = vld [vmem:[#allocation3 + $0x228] sm:$0xff]  ;;  %v8770_v16 = vld [vmem:[#allocation3 + $0x238] sm:$0xff] }
 0x689   :  { %2980 = vmatprep.subr.mxu0 %v8755_v6  ;;  %3051 = vmatprep.subr.mxu1 %v8758_v32  ;;  %12280 = vst [vmem:[#allocation187_spill] sm:$0xff] %v8767_v28  ;;  %12281 = vst [vmem:[#allocation188_spill] sm:$0xff] %v8770_v16  ;;  %v8773_v6 = vld [vmem:[#allocation3 + $0x220] sm:$0xff]  ;;  %v8776_v32 = vld [vmem:[#allocation3 + $0x230] sm:$0xff] }
 0x68a   :  { %2981 = vmatpush1.msra.mxu0 %v8761_v20  ;;  %3052 = vmatpush1.msra.mxu1 %v8764_v27  ;;  %12282 = vst [vmem:[#allocation189_spill] sm:$0xff] %v8773_v6  ;;  %12283 = vst [vmem:[#allocation190_spill] sm:$0xff] %v8776_v32  ;;  %v8779_v20 = vld [vmem:[#allocation3 + $0x1e8] sm:$0xff]  ;;  %v8782_v27 = vld [vmem:[#allocation3 + $0x1f8] sm:$0xff] }
 0x68b   :  { %2982 = vmatprep.subr.mxu0 %v8767_v28  ;;  %3053 = vmatprep.subr.mxu1 %v8770_v16  ;;  %12284 = vst [vmem:[#allocation191_spill] sm:$0xff] %v8779_v20  ;;  %12285 = vst [vmem:[#allocation192_spill] sm:$0xff] %v8782_v27  ;;  %v8785_v28 = vld [vmem:[#allocation3 + $0x1e0] sm:$0xff]  ;;  %v8788_v16 = vld [vmem:[#allocation3 + $0x1f0] sm:$0xff] }
 0x68c   :  { %2983 = vmatpush1.msra.mxu0 %v8773_v6  ;;  %3054 = vmatpush1.msra.mxu1 %v8776_v32  ;;  %12286 = vst [vmem:[#allocation193_spill] sm:$0xff] %v8785_v28  ;;  %12287 = vst [vmem:[#allocation194_spill] sm:$0xff] %v8788_v16  ;;  %v8791_v6 = vld [vmem:[#allocation3 + $0x1a8] sm:$0xff]  ;;  %v8794_v32 = vld [vmem:[#allocation3 + $0x1b8] sm:$0xff] }
 0x68d   :  { %2984 = vmatprep.subr.mxu0 %v8779_v20  ;;  %3055 = vmatprep.subr.mxu1 %v8782_v27  ;;  %12288 = vst [vmem:[#allocation195_spill] sm:$0xff] %v8791_v6  ;;  %12289 = vst [vmem:[#allocation196_spill] sm:$0xff] %v8794_v32  ;;  %v8797_v20 = vld [vmem:[#allocation3 + $0x1a0] sm:$0xff]  ;;  %v8800_v27 = vld [vmem:[#allocation3 + $0x1b0] sm:$0xff] }
 0x68e   :  { %2985 = vmatpush1.msra.mxu0 %v8785_v28  ;;  %3056 = vmatpush1.msra.mxu1 %v8788_v16  ;;  %12290 = vst [vmem:[#allocation197_spill] sm:$0xff] %v8797_v20  ;;  %12291 = vst [vmem:[#allocation198_spill] sm:$0xff] %v8800_v27  ;;  %v8803_v28 = vld [vmem:[#allocation3 + $0x168] sm:$0xff]  ;;  %v8806_v16 = vld [vmem:[#allocation3 + $0x178] sm:$0xff] }
 0x68f   :  { %2986 = vmatprep.subr.mxu0 %v8791_v6  ;;  %3057 = vmatprep.subr.mxu1 %v8794_v32  ;;  %12292 = vst [vmem:[#allocation199_spill] sm:$0xff] %v8803_v28  ;;  %12293 = vst [vmem:[#allocation200_spill] sm:$0xff] %v8806_v16  ;;  %v8809_v6 = vld [vmem:[#allocation3 + $0x160] sm:$0xff]  ;;  %v8812_v32 = vld [vmem:[#allocation3 + $0x170] sm:$0xff] }
 0x690   :  { %2987 = vmatpush1.msra.mxu0 %v8797_v20  ;;  %3058 = vmatpush1.msra.mxu1 %v8800_v27  ;;  %12294 = vst [vmem:[#allocation201_spill] sm:$0xff] %v8809_v6  ;;  %12295 = vst [vmem:[#allocation202_spill] sm:$0xff] %v8812_v32  ;;  %v8815_v20 = vld [vmem:[#allocation3 + $0x128] sm:$0xff]  ;;  %v8818_v27 = vld [vmem:[#allocation3 + $0x138] sm:$0xff] }
 0x691   :  { %2988 = vmatprep.subr.mxu0 %v8803_v28  ;;  %3059 = vmatprep.subr.mxu1 %v8806_v16  ;;  %12296 = vst [vmem:[#allocation203_spill] sm:$0xff] %v8815_v20  ;;  %12297 = vst [vmem:[#allocation204_spill] sm:$0xff] %v8818_v27  ;;  %v8821_v28 = vld [vmem:[#allocation3 + $0x120] sm:$0xff]  ;;  %v8824_v16 = vld [vmem:[#allocation3 + $0x130] sm:$0xff] }
 0x692   :  { %2989 = vmatpush1.msra.mxu0 %v8809_v6  ;;  %3060 = vmatpush1.msra.mxu1 %v8812_v32  ;;  %12298 = vst [vmem:[#allocation205_spill] sm:$0xff] %v8821_v28  ;;  %12299 = vst [vmem:[#allocation206_spill] sm:$0xff] %v8824_v16  ;;  %v8827_v6 = vld [vmem:[#allocation3 + $0xe8] sm:$0xff]  ;;  %v8830_v32 = vld [vmem:[#allocation3 + $0xf8] sm:$0xff] }
 0x693   :  { %2990 = vmatprep.subr.mxu0 %v8815_v20  ;;  %3061 = vmatprep.subr.mxu1 %v8818_v27  ;;  %12300 = vst [vmem:[#allocation207_spill] sm:$0xff] %v8827_v6  ;;  %12301 = vst [vmem:[#allocation208_spill] sm:$0xff] %v8830_v32  ;;  %v8833_v20 = vld [vmem:[#allocation3 + $0xe0] sm:$0xff]  ;;  %v8836_v27 = vld [vmem:[#allocation3 + $0xf0] sm:$0xff] }
 0x694   :  { %2991 = vmatpush1.msra.mxu0 %v8821_v28  ;;  %3062 = vmatpush1.msra.mxu1 %v8824_v16  ;;  %12302 = vst [vmem:[#allocation209_spill] sm:$0xff] %v8833_v20  ;;  %12303 = vst [vmem:[#allocation210_spill] sm:$0xff] %v8836_v27  ;;  %v8839_v28 = vld [vmem:[#allocation3 + $0xa8] sm:$0xff]  ;;  %v8842_v16 = vld [vmem:[#allocation3 + $0xb8] sm:$0xff] }
 0x695   :  { %2992 = vmatprep.subr.mxu0 %v8827_v6  ;;  %3063 = vmatprep.subr.mxu1 %v8830_v32  ;;  %12304 = vst [vmem:[#allocation211_spill] sm:$0xff] %v8839_v28  ;;  %12305 = vst [vmem:[#allocation212_spill] sm:$0xff] %v8842_v16  ;;  %v8845_v6 = vld [vmem:[#allocation3 + $0xa0] sm:$0xff]  ;;  %v8848_v32 = vld [vmem:[#allocation3 + $0xb0] sm:$0xff] }
 0x696   :  { %2993 = vmatpush1.msra.mxu0 %v8833_v20  ;;  %3064 = vmatpush1.msra.mxu1 %v8836_v27  ;;  %12306 = vst [vmem:[#allocation213_spill] sm:$0xff] %v8845_v6  ;;  %12307 = vst [vmem:[#allocation214_spill] sm:$0xff] %v8848_v32  ;;  %v8851_v20 = vld [vmem:[#allocation3 + $0x68] sm:$0xff]  ;;  %v8854_v27 = vld [vmem:[#allocation3 + $0x78] sm:$0xff] }
 0x697   :  { %2994 = vmatprep.subr.mxu0 %v8839_v28  ;;  %3065 = vmatprep.subr.mxu1 %v8842_v16  ;;  %12308 = vst [vmem:[#allocation215_spill] sm:$0xff] %v8851_v20  ;;  %12309 = vst [vmem:[#allocation216_spill] sm:$0xff] %v8854_v27  ;;  %v8857_v28 = vld [vmem:[#allocation3 + $0x60] sm:$0xff]  ;;  %v8860_v16 = vld [vmem:[#allocation3 + $0x70] sm:$0xff] }
 0x698   :  { %2995 = vmatpush1.msra.mxu0 %v8845_v6  ;;  %3066 = vmatpush1.msra.mxu1 %v8848_v32  ;;  %12310 = vst [vmem:[#allocation217_spill] sm:$0xff] %v8857_v28  ;;  %12311 = vst [vmem:[#allocation218_spill] sm:$0xff] %v8860_v16  ;;  %v8863_v6 = vld [vmem:[#allocation3 + $0x28] sm:$0xff]  ;;  %v8866_v32 = vld [vmem:[#allocation3 + $0x38] sm:$0xff] }
 0x699   :  { %2996 = vmatprep.subr.mxu0 %v8851_v20  ;;  %3067 = vmatprep.subr.mxu1 %v8854_v27  ;;  %12312 = vst [vmem:[#allocation219_spill] sm:$0xff] %v8863_v6  ;;  %12313 = vst [vmem:[#allocation220_spill] sm:$0xff] %v8866_v32  ;;  %v8869_v20 = vld [vmem:[#allocation3 + $0x20] sm:$0xff]  ;;  %v8872_v27 = vld [vmem:[#allocation3 + $0x30] sm:$0xff] }
 0x69a   :  { %2997 = vmatpush1.msra.mxu0 %v8857_v28  ;;  %3068 = vmatpush1.msra.mxu1 %v8860_v16  ;;  %12314 = vst [vmem:[#allocation221_spill] sm:$0xff] %v8869_v20  ;;  %12315 = vst [vmem:[#allocation222_spill] sm:$0xff] %v8872_v27  ;;  %v8875_v28 = vld [vmem:[#allocation3 + $0x7e8] sm:$0xff]  ;;  %v8878_v16 = vld [vmem:[#allocation3 + $0x7f8] sm:$0xff] }
 0x69b   :  { %2998 = vmatprep.subr.mxu0 %v8863_v6  ;;  %3069 = vmatprep.subr.mxu1 %v8866_v32  ;;  %12316 = vst [vmem:[#allocation223_spill] sm:$0xff] %v8875_v28  ;;  %12317 = vst [vmem:[#allocation224_spill] sm:$0xff] %v8878_v16  ;;  %v8881_v6 = vld [vmem:[#allocation3 + $0x7e0] sm:$0xff]  ;;  %v8884_v32 = vld [vmem:[#allocation3 + $0x7f0] sm:$0xff] }
 0x69c   :  { %2999 = vmatpush1.msra.mxu0 %v8869_v20  ;;  %3070 = vmatpush1.msra.mxu1 %v8872_v27  ;;  %12318 = vst [vmem:[#allocation225_spill] sm:$0xff] %v8881_v6  ;;  %12319 = vst [vmem:[#allocation226_spill] sm:$0xff] %v8884_v32  ;;  %v8887_v20 = vld [vmem:[#allocation3 + $0x7a8] sm:$0xff]  ;;  %v8890_v27 = vld [vmem:[#allocation3 + $0x7b8] sm:$0xff] }
 0x69d   :  { %3000 = vmatprep.subr.mxu0 %v8875_v28  ;;  %3071 = vmatprep.subr.mxu1 %v8878_v16  ;;  %12320 = vst [vmem:[#allocation227_spill] sm:$0xff] %v8887_v20  ;;  %12321 = vst [vmem:[#allocation228_spill] sm:$0xff] %v8890_v27  ;;  %v8893_v28 = vld [vmem:[#allocation3 + $0x7a0] sm:$0xff]  ;;  %v8896_v16 = vld [vmem:[#allocation3 + $0x7b0] sm:$0xff] }
 0x69e   :  { %3001 = vmatpush2.msra.mxu0 %v8881_v6  ;;  %3072 = vmatpush2.msra.mxu1 %v8884_v32  ;;  %12322 = vst [vmem:[#allocation229_spill] sm:$0xff] %v8893_v28  ;;  %12323 = vst [vmem:[#allocation230_spill] sm:$0xff] %v8896_v16  ;;  %v8899_v6 = vld [vmem:[#allocation3 + $0x768] sm:$0xff]  ;;  %v8902_v32 = vld [vmem:[#allocation3 + $0x778] sm:$0xff] }
 0x69f   :  { %3002 = vmatprep.subr.mxu0 %v8887_v20  ;;  %3073 = vmatprep.subr.mxu1 %v8890_v27  ;;  %12324 = vst [vmem:[#allocation231_spill] sm:$0xff] %v8899_v6  ;;  %12325 = vst [vmem:[#allocation232_spill] sm:$0xff] %v8902_v32  ;;  %v8905_v20 = vld [vmem:[#allocation3 + $0x760] sm:$0xff]  ;;  %v8908_v27 = vld [vmem:[#allocation3 + $0x770] sm:$0xff] }
 0x6a0   :  { %3003 = vmatpush2.msra.mxu0 %v8893_v28  ;;  %3074 = vmatpush2.msra.mxu1 %v8896_v16  ;;  %12326 = vst [vmem:[#allocation233_spill] sm:$0xff] %v8905_v20  ;;  %12327 = vst [vmem:[#allocation234_spill] sm:$0xff] %v8908_v27  ;;  %v8911_v28 = vld [vmem:[#allocation3 + $0x728] sm:$0xff]  ;;  %v8914_v16 = vld [vmem:[#allocation3 + $0x738] sm:$0xff] }
 0x6a1   :  { %3004 = vmatprep.subr.mxu0 %v8899_v6  ;;  %3075 = vmatprep.subr.mxu1 %v8902_v32  ;;  %12328 = vst [vmem:[#allocation235_spill] sm:$0xff] %v8911_v28  ;;  %12329 = vst [vmem:[#allocation236_spill] sm:$0xff] %v8914_v16  ;;  %v8917_v6 = vld [vmem:[#allocation3 + $0x720] sm:$0xff]  ;;  %v8920_v32 = vld [vmem:[#allocation3 + $0x730] sm:$0xff] }
 0x6a2   :  { %3005 = vmatpush2.msra.mxu0 %v8905_v20  ;;  %3076 = vmatpush2.msra.mxu1 %v8908_v27  ;;  %12330 = vst [vmem:[#allocation237_spill] sm:$0xff] %v8917_v6  ;;  %12331 = vst [vmem:[#allocation238_spill] sm:$0xff] %v8920_v32  ;;  %v8923_v20 = vld [vmem:[#allocation3 + $0x6e8] sm:$0xff]  ;;  %v8926_v27 = vld [vmem:[#allocation3 + $0x6f8] sm:$0xff] }
 0x6a3   :  { %3006 = vmatprep.subr.mxu0 %v8911_v28  ;;  %3077 = vmatprep.subr.mxu1 %v8914_v16  ;;  %12332 = vst [vmem:[#allocation239_spill] sm:$0xff] %v8923_v20  ;;  %12333 = vst [vmem:[#allocation240_spill] sm:$0xff] %v8926_v27  ;;  %v8929_v28 = vld [vmem:[#allocation3 + $0x6e0] sm:$0xff]  ;;  %v8932_v16 = vld [vmem:[#allocation3 + $0x6f0] sm:$0xff] }
 0x6a4   :  { %3007 = vmatpush2.msra.mxu0 %v8917_v6  ;;  %3078 = vmatpush2.msra.mxu1 %v8920_v32  ;;  %12334 = vst [vmem:[#allocation241_spill] sm:$0xff] %v8929_v28  ;;  %12335 = vst [vmem:[#allocation242_spill] sm:$0xff] %v8932_v16  ;;  %v8935_v6 = vld [vmem:[#allocation3 + $0x6a8] sm:$0xff]  ;;  %v8938_v32 = vld [vmem:[#allocation3 + $0x6b8] sm:$0xff] }
 0x6a5   :  { %3008 = vmatprep.subr.mxu0 %v8923_v20  ;;  %3079 = vmatprep.subr.mxu1 %v8926_v27  ;;  %12336 = vst [vmem:[#allocation243_spill] sm:$0xff] %v8935_v6  ;;  %12337 = vst [vmem:[#allocation244_spill] sm:$0xff] %v8938_v32  ;;  %v8941_v20 = vld [vmem:[#allocation3 + $0x6a0] sm:$0xff]  ;;  %v8944_v27 = vld [vmem:[#allocation3 + $0x6b0] sm:$0xff] }
 0x6a6   :  { %3009 = vmatpush2.msra.mxu0 %v8929_v28  ;;  %3080 = vmatpush2.msra.mxu1 %v8932_v16  ;;  %12338 = vst [vmem:[#allocation245_spill] sm:$0xff] %v8941_v20  ;;  %12339 = vst [vmem:[#allocation246_spill] sm:$0xff] %v8944_v27  ;;  %v8947_v28 = vld [vmem:[#allocation3 + $0x668] sm:$0xff]  ;;  %v8950_v16 = vld [vmem:[#allocation3 + $0x678] sm:$0xff] }
 0x6a7   :  { %3010 = vmatprep.subr.mxu0 %v8935_v6  ;;  %3081 = vmatprep.subr.mxu1 %v8938_v32  ;;  %12340 = vst [vmem:[#allocation247_spill] sm:$0xff] %v8947_v28  ;;  %12341 = vst [vmem:[#allocation248_spill] sm:$0xff] %v8950_v16  ;;  %v8953_v6 = vld [vmem:[#allocation3 + $0x660] sm:$0xff]  ;;  %v8956_v32 = vld [vmem:[#allocation3 + $0x670] sm:$0xff] }
 0x6a8   :  { %3011 = vmatpush2.msra.mxu0 %v8941_v20  ;;  %3082 = vmatpush2.msra.mxu1 %v8944_v27  ;;  %12342 = vst [vmem:[#allocation249_spill] sm:$0xff] %v8953_v6  ;;  %12343 = vst [vmem:[#allocation250_spill] sm:$0xff] %v8956_v32  ;;  %v8959_v20 = vld [vmem:[#allocation3 + $0x628] sm:$0xff]  ;;  %v8962_v27 = vld [vmem:[#allocation3 + $0x638] sm:$0xff] }
 0x6a9   :  { %3012 = vmatprep.subr.mxu0 %v8947_v28  ;;  %3083 = vmatprep.subr.mxu1 %v8950_v16  ;;  %12344 = vst [vmem:[#allocation251_spill] sm:$0xff] %v8959_v20  ;;  %12345 = vst [vmem:[#allocation252_spill] sm:$0xff] %v8962_v27  ;;  %v8965_v28 = vld [vmem:[#allocation3 + $0x620] sm:$0xff]  ;;  %v8968_v16 = vld [vmem:[#allocation3 + $0x630] sm:$0xff] }
 0x6aa   :  { %3013 = vmatpush2.msra.mxu0 %v8953_v6  ;;  %3084 = vmatpush2.msra.mxu1 %v8956_v32  ;;  %12346 = vst [vmem:[#allocation253_spill] sm:$0xff] %v8965_v28  ;;  %12347 = vst [vmem:[#allocation254_spill] sm:$0xff] %v8968_v16  ;;  %v8971_v6 = vld [vmem:[#allocation3 + $0x5e8] sm:$0xff]  ;;  %v8974_v32 = vld [vmem:[#allocation3 + $0x5f8] sm:$0xff] }
 0x6ab   :  { %3014 = vmatprep.subr.mxu0 %v8959_v20  ;;  %3085 = vmatprep.subr.mxu1 %v8962_v27  ;;  %12348 = vst [vmem:[#allocation255_spill] sm:$0xff] %v8971_v6  ;;  %12349 = vst [vmem:[#allocation256_spill] sm:$0xff] %v8974_v32  ;;  %v8977_v20 = vld [vmem:[#allocation3 + $0x5e0] sm:$0xff]  ;;  %v8980_v27 = vld [vmem:[#allocation3 + $0x5f0] sm:$0xff] }
 0x6ac   :  { %3015 = vmatpush2.msra.mxu0 %v8965_v28  ;;  %3086 = vmatpush2.msra.mxu1 %v8968_v16  ;;  %12350 = vst [vmem:[#allocation257_spill] sm:$0xff] %v8977_v20  ;;  %12351 = vst [vmem:[#allocation258_spill] sm:$0xff] %v8980_v27  ;;  %v8983_v28 = vld [vmem:[#allocation3 + $0x5a8] sm:$0xff]  ;;  %v8986_v16 = vld [vmem:[#allocation3 + $0x5b8] sm:$0xff] }
 0x6ad   :  { %3016 = vmatprep.subr.mxu0 %v8971_v6  ;;  %3087 = vmatprep.subr.mxu1 %v8974_v32  ;;  %12352 = vst [vmem:[#allocation259_spill] sm:$0xff] %v8983_v28  ;;  %12353 = vst [vmem:[#allocation260_spill] sm:$0xff] %v8986_v16  ;;  %v8989_v6 = vld [vmem:[#allocation3 + $0x5a0] sm:$0xff]  ;;  %v8992_v32 = vld [vmem:[#allocation3 + $0x5b0] sm:$0xff] }
 0x6ae   :  { %3017 = vmatpush2.msra.mxu0 %v8977_v20  ;;  %3088 = vmatpush2.msra.mxu1 %v8980_v27  ;;  %12354 = vst [vmem:[#allocation261_spill] sm:$0xff] %v8989_v6  ;;  %12355 = vst [vmem:[#allocation262_spill] sm:$0xff] %v8992_v32  ;;  %v8995_v20 = vld [vmem:[#allocation3 + $0x568] sm:$0xff]  ;;  %v8998_v27 = vld [vmem:[#allocation3 + $0x578] sm:$0xff] }
 0x6af   :  { %3018 = vmatprep.subr.mxu0 %v8983_v28  ;;  %3089 = vmatprep.subr.mxu1 %v8986_v16  ;;  %12356 = vst [vmem:[#allocation263_spill] sm:$0xff] %v8995_v20  ;;  %12357 = vst [vmem:[#allocation264_spill] sm:$0xff] %v8998_v27  ;;  %v9001_v28 = vld [vmem:[#allocation3 + $0x560] sm:$0xff]  ;;  %v9004_v16 = vld [vmem:[#allocation3 + $0x570] sm:$0xff] }
 0x6b0   :  { %3019 = vmatpush2.msra.mxu0 %v8989_v6  ;;  %3090 = vmatpush2.msra.mxu1 %v8992_v32  ;;  %12358 = vst [vmem:[#allocation265_spill] sm:$0xff] %v9001_v28  ;;  %12359 = vst [vmem:[#allocation266_spill] sm:$0xff] %v9004_v16  ;;  %v9007_v6 = vld [vmem:[#allocation3 + $0x528] sm:$0xff]  ;;  %v9010_v32 = vld [vmem:[#allocation3 + $0x538] sm:$0xff] }
 0x6b1   :  { %3020 = vmatprep.subr.mxu0 %v8995_v20  ;;  %3091 = vmatprep.subr.mxu1 %v8998_v27  ;;  %12360 = vst [vmem:[#allocation267_spill] sm:$0xff] %v9007_v6  ;;  %12361 = vst [vmem:[#allocation268_spill] sm:$0xff] %v9010_v32  ;;  %v9013_v20 = vld [vmem:[#allocation3 + $0x520] sm:$0xff]  ;;  %v9016_v27 = vld [vmem:[#allocation3 + $0x530] sm:$0xff] }
 0x6b2   :  { %3021 = vmatpush2.msra.mxu0 %v9001_v28  ;;  %3092 = vmatpush2.msra.mxu1 %v9004_v16  ;;  %12362 = vst [vmem:[#allocation269_spill] sm:$0xff] %v9013_v20  ;;  %12363 = vst [vmem:[#allocation270_spill] sm:$0xff] %v9016_v27  ;;  %v9019_v28 = vld [vmem:[#allocation3 + $0x4e8] sm:$0xff]  ;;  %v9022_v16 = vld [vmem:[#allocation3 + $0x4f8] sm:$0xff] }
 0x6b3   :  { %3022 = vmatprep.subr.mxu0 %v9007_v6  ;;  %3093 = vmatprep.subr.mxu1 %v9010_v32  ;;  %12364 = vst [vmem:[#allocation271_spill] sm:$0xff] %v9019_v28  ;;  %12365 = vst [vmem:[#allocation272_spill] sm:$0xff] %v9022_v16  ;;  %v9025_v6 = vld [vmem:[#allocation3 + $0x4e0] sm:$0xff]  ;;  %v9028_v32 = vld [vmem:[#allocation3 + $0x4f0] sm:$0xff] }
 0x6b4   :  { %3023 = vmatpush2.msra.mxu0 %v9013_v20  ;;  %3094 = vmatpush2.msra.mxu1 %v9016_v27  ;;  %12366 = vst [vmem:[#allocation273_spill] sm:$0xff] %v9025_v6  ;;  %12367 = vst [vmem:[#allocation274_spill] sm:$0xff] %v9028_v32  ;;  %v9031_v20 = vld [vmem:[#allocation3 + $0x4a8] sm:$0xff]  ;;  %v9034_v27 = vld [vmem:[#allocation3 + $0x4b8] sm:$0xff] }
 0x6b5   :  { %3024 = vmatprep.subr.mxu0 %v9019_v28  ;;  %3095 = vmatprep.subr.mxu1 %v9022_v16  ;;  %12368 = vst [vmem:[#allocation275_spill] sm:$0xff] %v9031_v20  ;;  %12369 = vst [vmem:[#allocation276_spill] sm:$0xff] %v9034_v27  ;;  %v9037_v28 = vld [vmem:[#allocation3 + $0x4a0] sm:$0xff]  ;;  %v9040_v16 = vld [vmem:[#allocation3 + $0x4b0] sm:$0xff] }
 0x6b6   :  { %3025 = vmatpush2.msra.mxu0 %v9025_v6  ;;  %3096 = vmatpush2.msra.mxu1 %v9028_v32  ;;  %12370 = vst [vmem:[#allocation277_spill] sm:$0xff] %v9037_v28  ;;  %12371 = vst [vmem:[#allocation278_spill] sm:$0xff] %v9040_v16  ;;  %v9043_v6 = vld [vmem:[#allocation3 + $0x468] sm:$0xff]  ;;  %v9046_v32 = vld [vmem:[#allocation3 + $0x478] sm:$0xff] }
 0x6b7   :  { %3026 = vmatprep.subr.mxu0 %v9031_v20  ;;  %3097 = vmatprep.subr.mxu1 %v9034_v27  ;;  %12372 = vst [vmem:[#allocation279_spill] sm:$0xff] %v9043_v6  ;;  %12373 = vst [vmem:[#allocation280_spill] sm:$0xff] %v9046_v32  ;;  %v9049_v20 = vld [vmem:[#allocation3 + $0x460] sm:$0xff]  ;;  %v9052_v27 = vld [vmem:[#allocation3 + $0x470] sm:$0xff] }
 0x6b8   :  { %3027 = vmatpush2.msra.mxu0 %v9037_v28  ;;  %3098 = vmatpush2.msra.mxu1 %v9040_v16  ;;  %12374 = vst [vmem:[#allocation281_spill] sm:$0xff] %v9052_v27  ;;  %v9055_v28 = vld [vmem:[#allocation3 + $0x428] sm:$0xff]  ;;  %v9058_v16 = vld [vmem:[#allocation3 + $0x438] sm:$0xff] }
 0x6b9   :  { %3028 = vmatprep.subr.mxu0 %v9043_v6  ;;  %3099 = vmatprep.subr.mxu1 %v9046_v32  ;;  %12375 = vst [vmem:[#allocation282_spill] sm:$0xff] %v9055_v28  ;;  %12376 = vst [vmem:[#allocation283_spill] sm:$0xff] %v9058_v16  ;;  %v9061_v6 = vld [vmem:[#allocation3 + $0x420] sm:$0xff]  ;;  %v9064_v32 = vld [vmem:[#allocation3 + $0x430] sm:$0xff] }
 0x6ba   :  { %3029 = vmatpush2.msra.mxu0 %v9049_v20  ;;  %3100 = vmatpush2.msra.mxu1 %v9052_v27  ;;  %12377 = vst [vmem:[#allocation284_spill] sm:$0xff] %v9061_v6  ;;  %12378 = vst [vmem:[#allocation285_spill] sm:$0xff] %v9064_v32  ;;  %v9069_v27 = vld [vmem:[#allocation3 + $0x3c8] sm:$0xff] }
 0x6bb   :  { %3030 = vmatprep.subr.mxu0 %v9055_v28  ;;  %3101 = vmatprep.subr.mxu1 %v9058_v16  ;;  %12379 = vst [vmem:[#allocation286_spill] sm:$0xff] %v9069_v27  ;;  %v9072_v28 = vld [vmem:[#allocation3 + $0x3d8] sm:$0xff]  ;;  %v9075_v16 = vld [vmem:[#allocation3 + $0x3c0] sm:$0xff] }
 0x6bc   :  { %3031 = vmatpush2.msra.mxu0 %v9061_v6  ;;  %3102 = vmatpush2.msra.mxu1 %v9064_v32  ;;  %12380 = vst [vmem:[#allocation287_spill] sm:$0xff] %v9072_v28  ;;  %12381 = vst [vmem:[#allocation288_spill] sm:$0xff] %v9075_v16  ;;  %v9078_v6 = vld [vmem:[#allocation3 + $0x3d0] sm:$0xff]  ;;  %v9081_v32 = vld [vmem:[#allocation3 + $0x388] sm:$0xff] }
 0x6bd   :  { %3033 = vmatmul.mubr.f32.vlgmr.msra.gmra.mxu0 %v8683_v43  ;;  %3104 = vmatmul.mubr.f32.vlgmr.msra.gmra.mxu1 %v8683_v43  ;;  %12382 = vst [vmem:[#allocation289_spill] sm:$0xff] %v9078_v6  ;;  %12383 = vst [vmem:[#allocation290_spill] sm:$0xff] %v9081_v32  ;;  %v9084_v43 = vld [vmem:[#allocation3 + $0x398] sm:$0xff] }
 0x6be   :  { %3193 = vmatprep.subr.mxu0 %v9069_v27  ;;  %3264 = vmatprep.subr.mxu1 %v9072_v28  ;;  %12384 = vst [vmem:[#allocation291_spill] sm:$0xff] %v9084_v43  ;;  %v9087_v27 = vld [vmem:[#allocation3 + $0x380] sm:$0xff]  ;;  %v9090_v28 = vld [vmem:[#allocation3 + $0x390] sm:$0xff] }
 0x6bf   :  { %3194 = vmatpush1.msra.mxu0 %v9075_v16  ;;  %3265 = vmatpush1.msra.mxu1 %v9078_v6  ;;  %v9093_v16 = vld [vmem:[#allocation3 + $0x348] sm:$0xff]  ;;  %v9096_v6 = vld [vmem:[#allocation3 + $0x358] sm:$0xff] }
 0x6c0   :  { %3195 = vmatprep.subr.mxu0 %v9081_v32  ;;  %3266 = vmatprep.subr.mxu1 %v9084_v43  ;;  %v9099_v32 = vld [vmem:[#allocation3 + $0x340] sm:$0xff]  ;;  %v9102_v43 = vld [vmem:[#allocation3 + $0x350] sm:$0xff] }
 0x6c1   :  { %3196 = vmatpush1.msra.mxu0 %v9087_v27  ;;  %3267 = vmatpush1.msra.mxu1 %v9090_v28 }
 0x6c2   :  { %3197 = vmatprep.subr.mxu0 %v9093_v16  ;;  %3268 = vmatprep.subr.mxu1 %v9096_v6 }
 0x6c3   :  { %3198 = vmatpush1.msra.mxu0 %v9099_v32  ;;  %3269 = vmatpush1.msra.mxu1 %v9102_v43 }
 0x6c4   :  { %3199 = vmatprep.subr.mxu0 %v8314_v42  ;;  %3270 = vmatprep.subr.mxu1 %v8317_v49  ;;  %v12385_v42 = vld [vmem:[#allocation299_spill] sm:$0xff]  ;;  %v12386_v49 = vld [vmem:[#allocation300_spill] sm:$0xff] }
 0x6c5   :  { %3200 = vmatpush1.msra.mxu0 %v8320_v63  ;;  %3271 = vmatpush1.msra.mxu1 %v8323_v23  ;;  %v12387_v63 = vld [vmem:[#allocation301_spill] sm:$0xff]  ;;  %v12388_v23 = vld [vmem:[#allocation110_spill] sm:$0xff] }
 0x6c6   :  { %3201 = vmatprep.subr.mxu0 %v8326_v61  ;;  %3272 = vmatprep.subr.mxu1 %v8329_v44  ;;  %v12389_v61 = vld [vmem:[#allocation111_spill] sm:$0xff]  ;;  %v12390_v44 = vld [vmem:[#allocation112_spill] sm:$0xff] }
 0x6c7   :  { %3202 = vmatpush1.msra.mxu0 %v8332_v40  ;;  %3273 = vmatpush1.msra.mxu1 %v8335_v22  ;;  %v12391_v40 = vld [vmem:[#allocation113_spill] sm:$0xff]  ;;  %v12392_v22 = vld [vmem:[#allocation114_spill] sm:$0xff] }
 0x6c8   :  { %3203 = vmatprep.subr.mxu0 %v8338_v39  ;;  %3274 = vmatprep.subr.mxu1 %v8341_v62  ;;  %v12393_v39 = vld [vmem:[#allocation115_spill] sm:$0xff]  ;;  %v12394_v62 = vld [vmem:[#allocation116_spill] sm:$0xff] }
 0x6c9   :  { %3204 = vmatpush1.msra.mxu0 %v8344_v5  ;;  %3275 = vmatpush1.msra.mxu1 %v8347_v35  ;;  %v12395_v5 = vld [vmem:[#allocation117_spill] sm:$0xff]  ;;  %v12396_v35 = vld [vmem:[#allocation118_spill] sm:$0xff] }
 0x6ca   :  { %3205 = vmatprep.subr.mxu0 %v8350_v46  ;;  %3276 = vmatprep.subr.mxu1 %v8353_v2  ;;  %v12397_v46 = vld [vmem:[#allocation119_spill] sm:$0xff]  ;;  %v12398_v2 = vld [vmem:[#allocation120_spill] sm:$0xff] }
 0x6cb   :  { %3206 = vmatpush1.msra.mxu0 %v8356_v17  ;;  %3277 = vmatpush1.msra.mxu1 %v8359_v21  ;;  %v12399_v17 = vld [vmem:[#allocation121_spill] sm:$0xff]  ;;  %v12400_v21 = vld [vmem:[#allocation122_spill] sm:$0xff] }
 0x6cc   :  { %3207 = vmatprep.subr.mxu0 %v8362_v1  ;;  %3278 = vmatprep.subr.mxu1 %v8365_v38  ;;  %v12401_v1 = vld [vmem:[#allocation123_spill] sm:$0xff]  ;;  %v12402_v38 = vld [vmem:[#allocation124_spill] sm:$0xff] }
 0x6cd   :  { %3208 = vmatpush1.msra.mxu0 %v8368_v8  ;;  %3279 = vmatpush1.msra.mxu1 %v8371_v9  ;;  %v12403_v8 = vld [vmem:[#allocation125_spill] sm:$0xff]  ;;  %v12404_v9 = vld [vmem:[#allocation126_spill] sm:$0xff] }
 0x6ce   :  { %3209 = vmatprep.subr.mxu0 %v8374_v10  ;;  %3280 = vmatprep.subr.mxu1 %v8377_v11  ;;  %v12405_v10 = vld [vmem:[#allocation127_spill] sm:$0xff]  ;;  %v12406_v11 = vld [vmem:[#allocation128_spill] sm:$0xff] }
 0x6cf   :  { %3210 = vmatpush1.msra.mxu0 %v8380_v12  ;;  %3281 = vmatpush1.msra.mxu1 %v8383_v14  ;;  %v12407_v12 = vld [vmem:[#allocation129_spill] sm:$0xff]  ;;  %v12408_v14 = vld [vmem:[#allocation130_spill] sm:$0xff] }
 0x6d0   :  { %3211 = vmatprep.subr.mxu0 %v8386_v15  ;;  %3282 = vmatprep.subr.mxu1 %v8389_v24  ;;  %v12409_v15 = vld [vmem:[#allocation131_spill] sm:$0xff]  ;;  %v12410_v24 = vld [vmem:[#allocation132_spill] sm:$0xff] }
 0x6d1   :  { %3212 = vmatpush1.msra.mxu0 %v8392_v25  ;;  %3283 = vmatpush1.msra.mxu1 %v8395_v26  ;;  %v12411_v25 = vld [vmem:[#allocation133_spill] sm:$0xff]  ;;  %v12412_v26 = vld [vmem:[#allocation134_spill] sm:$0xff] }
 0x6d2   :  { %3213 = vmatprep.subr.mxu0 %v8398_v29  ;;  %3284 = vmatprep.subr.mxu1 %v8401_v30  ;;  %v12413_v29 = vld [vmem:[#allocation135_spill] sm:$0xff]  ;;  %v12414_v30 = vld [vmem:[#allocation136_spill] sm:$0xff] }
 0x6d3   :  { %3214 = vmatpush1.msra.mxu0 %v8404_v31  ;;  %3285 = vmatpush1.msra.mxu1 %v8407_v50  ;;  %v12415_v31 = vld [vmem:[#allocation137_spill] sm:$0xff]  ;;  %v12416_v50 = vld [vmem:[#allocation138_spill] sm:$0xff] }
 0x6d4   :  { %3215 = vmatprep.subr.mxu0 %v8410_v51  ;;  %3286 = vmatprep.subr.mxu1 %v8413_v52  ;;  %v12417_v51 = vld [vmem:[#allocation139_spill] sm:$0xff]  ;;  %v12418_v52 = vld [vmem:[#allocation140_spill] sm:$0xff] }
 0x6d5   :  { %3216 = vmatpush1.msra.mxu0 %v8416_v53  ;;  %3287 = vmatpush1.msra.mxu1 %v8419_v55  ;;  %v12419_v53 = vld [vmem:[#allocation141_spill] sm:$0xff]  ;;  %v12420_v55 = vld [vmem:[#allocation142_spill] sm:$0xff] }
 0x6d6   :  { %3217 = vmatprep.subr.mxu0 %v8422_v56  ;;  %3288 = vmatprep.subr.mxu1 %v8425_v60  ;;  %v12421_v56 = vld [vmem:[#allocation143_spill] sm:$0xff]  ;;  %v12422_v60 = vld [vmem:[#allocation144_spill] sm:$0xff] }
 0x6d7   :  { %3218 = vmatpush1.msra.mxu0 %v8428_v13  ;;  %3289 = vmatpush1.msra.mxu1 %v12385_v42  ;;  %v12423_v13 = vld [vmem:[#allocation145_spill] sm:$0xff]  ;;  %v12424_v42 = vld [vmem:[#allocation146_spill] sm:$0xff] }
 0x6d8   :  { %3219 = vmatprep.subr.mxu0 %v12386_v49  ;;  %3290 = vmatprep.subr.mxu1 %v12387_v63  ;;  %v12425_v49 = vld [vmem:[#allocation147_spill] sm:$0xff]  ;;  %v12426_v63 = vld [vmem:[#allocation148_spill] sm:$0xff] }
 0x6d9   :  { %3220 = vmatpush1.msra.mxu0 %v12388_v23  ;;  %3291 = vmatpush1.msra.mxu1 %v12389_v61  ;;  %v12427_v23 = vld [vmem:[#allocation149_spill] sm:$0xff]  ;;  %v12428_v61 = vld [vmem:[#allocation150_spill] sm:$0xff] }
 0x6da   :  { %3221 = vmatprep.subr.mxu0 %v12390_v44  ;;  %3292 = vmatprep.subr.mxu1 %v12391_v40  ;;  %v12429_v44 = vld [vmem:[#allocation151_spill] sm:$0xff]  ;;  %v12430_v40 = vld [vmem:[#allocation152_spill] sm:$0xff] }
 0x6db   :  { %3222 = vmatpush1.msra.mxu0 %v12392_v22  ;;  %3293 = vmatpush1.msra.mxu1 %v12393_v39  ;;  %v12431_v22 = vld [vmem:[#allocation153_spill] sm:$0xff]  ;;  %v12432_v39 = vld [vmem:[#allocation154_spill] sm:$0xff] }
 0x6dc   :  { %3223 = vmatprep.subr.mxu0 %v12394_v62  ;;  %3294 = vmatprep.subr.mxu1 %v12395_v5  ;;  %v12433_v62 = vld [vmem:[#allocation155_spill] sm:$0xff]  ;;  %v12434_v5 = vld [vmem:[#allocation156_spill] sm:$0xff] }
 0x6dd   :  { %3224 = vmatpush1.msra.mxu0 %v12396_v35  ;;  %3295 = vmatpush1.msra.mxu1 %v12397_v46  ;;  %v12435_v35 = vld [vmem:[#allocation157_spill] sm:$0xff]  ;;  %v12436_v46 = vld [vmem:[#allocation158_spill] sm:$0xff] }
 0x6de   :  { %3225 = vmatprep.subr.mxu0 %v12398_v2  ;;  %3296 = vmatprep.subr.mxu1 %v12399_v17  ;;  %v12437_v2 = vld [vmem:[#allocation159_spill] sm:$0xff]  ;;  %v12438_v17 = vld [vmem:[#allocation160_spill] sm:$0xff] }
 0x6df   :  { %3226 = vmatpush2.msra.mxu0 %v12400_v21  ;;  %3297 = vmatpush2.msra.mxu1 %v12401_v1  ;;  %v12439_v21 = vld [vmem:[#allocation161_spill] sm:$0xff]  ;;  %v12440_v1 = vld [vmem:[#allocation162_spill] sm:$0xff] }
 0x6e0   :  { %3227 = vmatprep.subr.mxu0 %v12402_v38  ;;  %3298 = vmatprep.subr.mxu1 %v12403_v8  ;;  %v12441_v38 = vld [vmem:[#allocation163_spill] sm:$0xff]  ;;  %v12442_v8 = vld [vmem:[#allocation164_spill] sm:$0xff] }
 0x6e1   :  { %3228 = vmatpush2.msra.mxu0 %v12404_v9  ;;  %3299 = vmatpush2.msra.mxu1 %v12405_v10  ;;  %v12443_v9 = vld [vmem:[#allocation165_spill] sm:$0xff]  ;;  %v12444_v10 = vld [vmem:[#allocation166_spill] sm:$0xff] }
 0x6e2   :  { %3229 = vmatprep.subr.mxu0 %v12406_v11  ;;  %3300 = vmatprep.subr.mxu1 %v12407_v12  ;;  %v12445_v11 = vld [vmem:[#allocation167_spill] sm:$0xff]  ;;  %v12446_v12 = vld [vmem:[#allocation168_spill] sm:$0xff] }
 0x6e3   :  { %3230 = vmatpush2.msra.mxu0 %v12408_v14  ;;  %3301 = vmatpush2.msra.mxu1 %v12409_v15  ;;  %v12447_v14 = vld [vmem:[#allocation169_spill] sm:$0xff]  ;;  %v12448_v15 = vld [vmem:[#allocation170_spill] sm:$0xff] }
 0x6e4   :  { %3231 = vmatprep.subr.mxu0 %v12410_v24  ;;  %3302 = vmatprep.subr.mxu1 %v12411_v25  ;;  %v12449_v24 = vld [vmem:[#allocation171_spill] sm:$0xff]  ;;  %v12450_v25 = vld [vmem:[#allocation172_spill] sm:$0xff] }
 0x6e5   :  { %3232 = vmatpush2.msra.mxu0 %v12412_v26  ;;  %3303 = vmatpush2.msra.mxu1 %v12413_v29  ;;  %v12451_v26 = vld [vmem:[#allocation173_spill] sm:$0xff]  ;;  %v12452_v29 = vld [vmem:[#allocation174_spill] sm:$0xff] }
 0x6e6   :  { %3233 = vmatprep.subr.mxu0 %v12414_v30  ;;  %3304 = vmatprep.subr.mxu1 %v12415_v31  ;;  %v12453_v30 = vld [vmem:[#allocation175_spill] sm:$0xff]  ;;  %v12454_v31 = vld [vmem:[#allocation93_spill] sm:$0xff] }
 0x6e7   :  { %3234 = vmatpush2.msra.mxu0 %v12416_v50  ;;  %3305 = vmatpush2.msra.mxu1 %v12417_v51  ;;  %v12455_v50 = vld [vmem:[#allocation94_spill] sm:$0xff]  ;;  %v12456_v51 = vld [vmem:[#allocation96_spill] sm:$0xff] }
 0x6e8   :  { %3235 = vmatprep.subr.mxu0 %v12418_v52  ;;  %3306 = vmatprep.subr.mxu1 %v12419_v53  ;;  %v12457_v52 = vld [vmem:[#allocation102_spill] sm:$0xff]  ;;  %v12458_v53 = vld [vmem:[#allocation104_spill] sm:$0xff] }
 0x6e9   :  { %3236 = vmatpush2.msra.mxu0 %v12420_v55  ;;  %3307 = vmatpush2.msra.mxu1 %v12421_v56  ;;  %v12459_v55 = vld [vmem:[#allocation176_spill] sm:$0xff]  ;;  %v12460_v56 = vld [vmem:[#allocation177_spill] sm:$0xff] }
 0x6ea   :  { %3237 = vmatprep.subr.mxu0 %v12422_v60  ;;  %3308 = vmatprep.subr.mxu1 %v12423_v13  ;;  %v12461_v60 = vld [vmem:[#allocation178_spill] sm:$0xff]  ;;  %v12462_v13 = vld [vmem:[#allocation179_spill] sm:$0xff] }
 0x6eb   :  { %3238 = vmatpush2.msra.mxu0 %v12424_v42  ;;  %3309 = vmatpush2.msra.mxu1 %v12425_v49  ;;  %v12463_v42 = vld [vmem:[#allocation180_spill] sm:$0xff] }
 0x6ec   :  { %3239 = vmatprep.subr.mxu0 %v12426_v63  ;;  %3310 = vmatprep.subr.mxu1 %v12427_v23 }
 0x6ed   :  { %3240 = vmatpush2.msra.mxu0 %v12428_v61  ;;  %3311 = vmatpush2.msra.mxu1 %v12429_v44 }
 0x6ee   :  { %3241 = vmatprep.subr.mxu0 %v12430_v40  ;;  %3312 = vmatprep.subr.mxu1 %v12431_v22 }
 0x6ef   :  { %3242 = vmatpush2.msra.mxu0 %v12432_v39  ;;  %3313 = vmatpush2.msra.mxu1 %v12433_v62 }
 0x6f0   :  { %3243 = vmatprep.subr.mxu0 %v12434_v5  ;;  %3314 = vmatprep.subr.mxu1 %v12435_v35  ;;  %v12464_v5 = vld [vmem:[#allocation98_spill] sm:$0xff]  ;;  %v12465_v35 = vld [vmem:[#allocation100_spill] sm:$0xff] }
 0x6f1   :  { %3244 = vmatpush2.msra.mxu0 %v12436_v46  ;;  %3315 = vmatpush2.msra.mxu1 %v12437_v2  ;;  %v12466_v46 = vcombine.low %v12464_v5, %v12465_v35 }
 0x6f2   :  { %3245 = vmatprep.subr.mxu0 %v12438_v17  ;;  %3316 = vmatprep.subr.mxu1 %v12439_v21 }
 0x6f3   :  { %3246 = vmatpush2.msra.mxu0 %v12440_v1  ;;  %3317 = vmatpush2.msra.mxu1 %v12441_v38 }
 0x6f4   :  { %3247 = vmatprep.subr.mxu0 %v12442_v8  ;;  %3318 = vmatprep.subr.mxu1 %v12443_v9 }
 0x6f5   :  { %3248 = vmatpush2.msra.mxu0 %v12444_v10  ;;  %3319 = vmatpush2.msra.mxu1 %v12445_v11 }
 0x6f6   :  { %3249 = vmatprep.subr.mxu0 %v12446_v12  ;;  %3320 = vmatprep.subr.mxu1 %v12447_v14 }
 0x6f7   :  { %3250 = vmatpush2.msra.mxu0 %v12448_v15  ;;  %3321 = vmatpush2.msra.mxu1 %v12449_v24 }
 0x6f8   :  { %3251 = vmatprep.subr.mxu0 %v12450_v25  ;;  %3322 = vmatprep.subr.mxu1 %v12451_v26  ;;  %v12467_v25 = vld [vmem:[#allocation106_spill] sm:$0xff]  ;;  %v12468_v26 = vld [vmem:[#allocation108_spill] sm:$0xff] }
 0x6f9   :  { %3252 = vmatpush2.msra.mxu0 %v12452_v29  ;;  %3323 = vmatpush2.msra.mxu1 %v12453_v30  ;;  %v12469_v29 = vcombine.low %v12467_v25, %v12468_v26 }
 0x6fa   :  { %3253 = vmatprep.subr.mxu0 %v12454_v31  ;;  %3324 = vmatprep.subr.mxu1 %v12455_v50 }
 0x6fb   :  { %3254 = vmatpush2.msra.mxu0 %v12456_v51  ;;  %3325 = vmatpush2.msra.mxu1 %v12457_v52 }
 0x6fc   :  { %3255 = vmatprep.subr.mxu0 %v12458_v53  ;;  %3326 = vmatprep.subr.mxu1 %v12459_v55 }
 0x6fd   :  { %3256 = vmatpush2.msra.mxu0 %v12460_v56  ;;  %3327 = vmatpush2.msra.mxu1 %v12461_v60 }
 0x6fe   :  { %3335 = vmatprep.subr.mxu0 %v12462_v13  ;;  %3406 = vmatprep.subr.mxu1 %v12463_v42 }
 0x73c   :  { %v2892_v49 = vpop.f32.mrf.mxu0  ;;  %v2963_v63 = vpop.f32.mrf.mxu1 }
 0x73e   :  { %v2894_v23 = vpop.f32.mrf.mxu0  ;;  %v2965_v61 = vpop.f32.mrf.mxu1 }
 0x73f   :  { %v3118_v44 = vcombine.low %v2892_v49, %v2894_v23  ;;  %v3119_v40 = vcombine.low %v2963_v63, %v2965_v61 }
 0x741   :  { %v3126_v22 = vrot.slane %v3118_v44, %v11660_v54  ;;  %v3133_v39 = vrot.slane %v3119_v40, %v11660_v54  ;;  %v12487_v40 = vld [vmem:[#allocation194_spill] sm:$0xff] }
 0x743   :  { %v3134_v62 = vcombine.low %v3126_v22, %v3133_v39  ;;  %v12488_v22 = vld [vmem:[#allocation195_spill] sm:$0xff]  ;;  %v12489_v39 = vld [vmem:[#allocation196_spill] sm:$0xff] }
 0x745   :  { %v3154_v2 = vadd.f32 %v3134_v62, %v12466_v46  ;;  %v12490_v62 = vld [vmem:[#allocation197_spill] sm:$0xff]  ;;  %v12491_v46 = vld [vmem:[#allocation198_spill] sm:$0xff] }
 0x747   :  { %v4656_v17 = vmul.f32 -1.442695, %v3154_v2  ;;  %v12492_v2 = vld [vmem:[#allocation199_spill] sm:$0xff] }
 0x749   :  { %4760 = vpow2.f32 %v4656_v17  ;;  %v12493_v17 = vld [vmem:[#allocation200_spill] sm:$0xff] }
 0x756   :  { %v4761_v21 = vpop.eup %4760 }
 0x757   :  { %v3159_v8 = vadd.f32 1.0, %v4761_v21  ;;  %v12494_v21 = vld [vmem:[#allocation201_spill] sm:$0xff] }
 0x759   :  { %4762 = vrcp.f32 %v3159_v8  ;;  %v12497_v8 = vld [vmem:[#allocation204_spill] sm:$0xff] }
 0x766   :  { %v4763_v51 = vpop.eup %4762 }
 0x767   :  { %v3173_v52 = vrot.slane %v4763_v51, 4 }
 0x769   :  { %v3175_v55 = vmul.f32 %v3173_v52, %v8679_v19  ;;  %v12470_v19 = vld [vmem:[#allocation181_spill] sm:$0xff] }
 0x76a   :  { %v12510_v52 = vld [vmem:[#allocation217_spill] sm:$0xff] }
 0x77d   :  { %v3034_v1 = vpop.f32.mrf.mxu0  ;;  %v3105_v38 = vpop.f32.mrf.mxu1 }
 0x77f   :  { %v3036_v9 = vpop.f32.mrf.mxu0  ;;  %v3107_v10 = vpop.f32.mrf.mxu1 }
 0x780   :  { %v3135_v11 = vcombine.low %v3034_v1, %v3036_v9  ;;  %v3136_v12 = vcombine.low %v3105_v38, %v3107_v10  ;;  %v12495_v1 = vld [vmem:[#allocation202_spill] sm:$0xff]  ;;  %v12496_v38 = vld [vmem:[#allocation203_spill] sm:$0xff]  ;;  %v12498_v9 = vld [vmem:[#allocation205_spill] sm:$0xff] }
 0x781   :  { %v12499_v10 = vld [vmem:[#allocation206_spill] sm:$0xff] }
 0x782   :  { %v3143_v14 = vrot.slane %v3135_v11, %v11660_v54  ;;  %v3150_v15 = vrot.slane %v3136_v12, %v11660_v54  ;;  %v12500_v11 = vld [vmem:[#allocation207_spill] sm:$0xff]  ;;  %v12501_v12 = vld [vmem:[#allocation208_spill] sm:$0xff] }
 0x784   :  { %v3151_v24 = vcombine.low %v3143_v14, %v3150_v15  ;;  %v12502_v14 = vld [vmem:[#allocation209_spill] sm:$0xff]  ;;  %v12503_v15 = vld [vmem:[#allocation210_spill] sm:$0xff] }
 0x786   :  { %v3155_v30 = vadd.f32 %v3151_v24, %v12469_v29  ;;  %v12504_v24 = vld [vmem:[#allocation211_spill] sm:$0xff]  ;;  %v12505_v29 = vld [vmem:[#allocation212_spill] sm:$0xff] }
 0x788   :  { %4764 = vtanh.f32 %v3155_v30  ;;  %v3164_v31 = vrot.slane %v3155_v30, 4  ;;  %v12506_v30 = vld [vmem:[#allocation213_spill] sm:$0xff] }
 0x78a   :  { %v4657_v50 = vmul.f32 -1.442695, %v3164_v31  ;;  %v12507_v31 = vld [vmem:[#allocation214_spill] sm:$0xff] }
 0x78c   :  { %4766 = vpow2.f32 %v4657_v50  ;;  %v12508_v50 = vld [vmem:[#allocation215_spill] sm:$0xff] }
 0x795   :  { %v4765_v53 = vpop.eup %4764 }
 0x796   :  { %v3176_v56 = vmul.f32 %v4765_v53, %v4763_v51  ;;  %v12509_v51 = vld [vmem:[#allocation216_spill] sm:$0xff]  ;;  %v12511_v53 = vld [vmem:[#allocation218_spill] sm:$0xff] }
 0x798   :  { %v9234_v60 = vadd.f32 %v3176_v56, %v3175_v55  ;;  %v12512_v55 = vld [vmem:[#allocation219_spill] sm:$0xff]  ;;  %v12513_v56 = vld [vmem:[#allocation220_spill] sm:$0xff] }
 0x799   :  { %v4767_v13 = vpop.eup %4766 }
 0x79a   :  { %v3169_v42 = vadd.f32 1.0, %v4767_v13  ;;  %4768 = vtanh.f32 %v9234_v60  ;;  %v12514_v13 = vld [vmem:[#allocation221_spill] sm:$0xff] }
 0x79c   :  { %4770 = vrcp.f32 %v3169_v42  ;;  %v12515_v42 = vld [vmem:[#allocation222_spill] sm:$0xff] }
 0x7a7   :  { %v4769_v49 = vpop.eup %4768 }
 0x7a9   :  { %v4771_v63 = vpop.eup %4770 }
 0x7aa   :  { %v3179_v23 = vmul.f32 %v4771_v63, %v4769_v49  ;;  %v12516_v49 = vld [vmem:[#allocation223_spill] sm:$0xff]  ;;  %v12517_v63 = vld [vmem:[#allocation224_spill] sm:$0xff] }
 0x7ac   :  { %v9238_v61 = vrot.slane %v3179_v23, %v11660_v54  ;;  %v12518_v23 = vld [vmem:[#allocation225_spill] sm:$0xff] }
 0x7ae   :  { %v3190_v44 = vcombine.high %v9238_v61, %v9238_v61 }
 0x7b0   :  { %3257 = vmatprep.mubr.f32.mxu0 %v3190_v44  ;;  %3328 = vmatprep.mubr.f32.mxu1 %v3190_v44 }
 0x7b1   :  { %3258 = vmatmul.mubr.f32.vlgmr.msra.gmra.mxu0 %v9238_v61  ;;  %3329 = vmatmul.mubr.f32.vlgmr.msra.gmra.mxu1 %v9238_v61 }
 0x7b2   :  { %3336 = vmatpush1.msra.mxu0 %v8689_v57  ;;  %3407 = vmatpush1.msra.mxu1 %v8692_v18  ;;  %v12471_v57 = vld [vmem:[#allocation182_spill] sm:$0xff]  ;;  %v12472_v18 = vld [vmem:[#allocation183_spill] sm:$0xff] }
 0x7b3   :  { %3337 = vmatprep.subr.mxu0 %v8695_v0  ;;  %3399 = vmatprep.mubr.f32.mxu0 %v3190_v44  ;;  %v12473_v0 = vld [vmem:[#allocation95_spill] sm:$0xff] }
 0x7b4   :  { %3408 = vmatprep.subr.mxu1 %v8698_v36  ;;  %3470 = vmatprep.mubr.f32.mxu1 %v3190_v44  ;;  %v12474_v36 = vld [vmem:[#allocation97_spill] sm:$0xff]  ;;  %v12519_v44 = vld [vmem:[#allocation226_spill] sm:$0xff] }
 0x7b5   :  { %3338 = vmatpush1.msra.mxu0 %v8701_v7  ;;  %3409 = vmatpush1.msra.mxu1 %v8704_v47  ;;  %v12475_v7 = vld [vmem:[#allocation103_spill] sm:$0xff]  ;;  %v12476_v47 = vld [vmem:[#allocation105_spill] sm:$0xff] }
 0x7b6   :  { %3339 = vmatprep.subr.mxu0 %v8707_v3  ;;  %3410 = vmatprep.subr.mxu1 %v8710_v37  ;;  %v12477_v3 = vld [vmem:[#allocation184_spill] sm:$0xff]  ;;  %v12478_v37 = vld [vmem:[#allocation185_spill] sm:$0xff] }
 0x7b7   :  { %3340 = vmatpush1.msra.mxu0 %v8713_v34  ;;  %3411 = vmatpush1.msra.mxu1 %v8716_v45  ;;  %v12479_v34 = vld [vmem:[#allocation186_spill] sm:$0xff]  ;;  %v12480_v45 = vld [vmem:[#allocation187_spill] sm:$0xff] }
 0x7b8   :  { %3341 = vmatprep.subr.mxu0 %v8719_v48  ;;  %3412 = vmatprep.subr.mxu1 %v8722_v58  ;;  %v12481_v48 = vld [vmem:[#allocation188_spill] sm:$0xff]  ;;  %v12482_v58 = vld [vmem:[#allocation189_spill] sm:$0xff] }
 0x7b9   :  { %3342 = vmatpush1.msra.mxu0 %v8725_v41  ;;  %3413 = vmatpush1.msra.mxu1 %v8728_v59  ;;  %v12483_v41 = vld [vmem:[#allocation190_spill] sm:$0xff]  ;;  %v12484_v59 = vld [vmem:[#allocation191_spill] sm:$0xff] }
 0x7ba   :  { %3343 = vmatprep.subr.mxu0 %v8731_v33  ;;  %3414 = vmatprep.subr.mxu1 %v8734_v4  ;;  %v12485_v33 = vld [vmem:[#allocation192_spill] sm:$0xff]  ;;  %v12486_v4 = vld [vmem:[#allocation193_spill] sm:$0xff] }
 0x7bb   :  { %3344 = vmatpush1.msra.mxu0 %v12470_v19  ;;  %3415 = vmatpush1.msra.mxu1 %v12471_v57  ;;  %v12520_v19 = vld [vmem:[#allocation227_spill] sm:$0xff]  ;;  %v12521_v57 = vld [vmem:[#allocation228_spill] sm:$0xff] }
 0x7bc   :  { %3345 = vmatprep.subr.mxu0 %v12472_v18  ;;  %3416 = vmatprep.subr.mxu1 %v12473_v0  ;;  %v12522_v18 = vld [vmem:[#allocation229_spill] sm:$0xff]  ;;  %v12523_v0 = vld [vmem:[#allocation230_spill] sm:$0xff] }
 0x7bd   :  { %3346 = vmatpush1.msra.mxu0 %v12474_v36  ;;  %3417 = vmatpush1.msra.mxu1 %v12475_v7  ;;  %v12524_v36 = vld [vmem:[#allocation231_spill] sm:$0xff]  ;;  %v12525_v7 = vld [vmem:[#allocation232_spill] sm:$0xff] }
 0x7be   :  { %3347 = vmatprep.subr.mxu0 %v12476_v47  ;;  %3418 = vmatprep.subr.mxu1 %v12477_v3  ;;  %v12526_v47 = vld [vmem:[#allocation233_spill] sm:$0xff]  ;;  %v12527_v3 = vld [vmem:[#allocation234_spill] sm:$0xff] }
 0x7bf   :  { %3348 = vmatpush1.msra.mxu0 %v12478_v37  ;;  %3419 = vmatpush1.msra.mxu1 %v12479_v34  ;;  %v12528_v37 = vld [vmem:[#allocation235_spill] sm:$0xff]  ;;  %v12529_v34 = vld [vmem:[#allocation236_spill] sm:$0xff] }
 0x7c0   :  { %3349 = vmatprep.subr.mxu0 %v12480_v45  ;;  %3420 = vmatprep.subr.mxu1 %v12481_v48  ;;  %v12530_v45 = vld [vmem:[#allocation237_spill] sm:$0xff]  ;;  %v12531_v48 = vld [vmem:[#allocation238_spill] sm:$0xff] }
 0x7c1   :  { %3350 = vmatpush1.msra.mxu0 %v12482_v58  ;;  %3421 = vmatpush1.msra.mxu1 %v12483_v41  ;;  %v12532_v58 = vld [vmem:[#allocation239_spill] sm:$0xff]  ;;  %v12533_v41 = vld [vmem:[#allocation240_spill] sm:$0xff] }
 0x7c2   :  { %3351 = vmatprep.subr.mxu0 %v12484_v59  ;;  %3422 = vmatprep.subr.mxu1 %v12485_v33  ;;  %v12534_v59 = vld [vmem:[#allocation241_spill] sm:$0xff]  ;;  %v12535_v33 = vld [vmem:[#allocation242_spill] sm:$0xff] }
 0x7c3   :  { %3352 = vmatpush1.msra.mxu0 %v12486_v4  ;;  %3423 = vmatpush1.msra.mxu1 %v12487_v40  ;;  %v12536_v4 = vld [vmem:[#allocation243_spill] sm:$0xff]  ;;  %v12537_v40 = vld [vmem:[#allocation244_spill] sm:$0xff] }
 0x7c4   :  { %3353 = vmatprep.subr.mxu0 %v12488_v22  ;;  %3424 = vmatprep.subr.mxu1 %v12489_v39  ;;  %v12538_v22 = vld [vmem:[#allocation245_spill] sm:$0xff]  ;;  %v12539_v39 = vld [vmem:[#allocation246_spill] sm:$0xff] }
 0x7c5   :  { %3354 = vmatpush1.msra.mxu0 %v12490_v62  ;;  %3425 = vmatpush1.msra.mxu1 %v12491_v46  ;;  %v12540_v62 = vld [vmem:[#allocation247_spill] sm:$0xff]  ;;  %v12541_v46 = vld [vmem:[#allocation248_spill] sm:$0xff] }
 0x7c6   :  { %3355 = vmatprep.subr.mxu0 %v12492_v2  ;;  %3426 = vmatprep.subr.mxu1 %v12493_v17  ;;  %v12542_v2 = vld [vmem:[#allocation249_spill] sm:$0xff]  ;;  %v12543_v17 = vld [vmem:[#allocation250_spill] sm:$0xff] }
 0x7c7   :  { %3356 = vmatpush1.msra.mxu0 %v12494_v21  ;;  %3427 = vmatpush1.msra.mxu1 %v12495_v1  ;;  %v12544_v21 = vld [vmem:[#allocation251_spill] sm:$0xff]  ;;  %v12545_v1 = vld [vmem:[#allocation252_spill] sm:$0xff] }
 0x7c8   :  { %3357 = vmatprep.subr.mxu0 %v12496_v38  ;;  %3428 = vmatprep.subr.mxu1 %v12497_v8  ;;  %v12546_v38 = vld [vmem:[#allocation253_spill] sm:$0xff]  ;;  %v12547_v8 = vld [vmem:[#allocation254_spill] sm:$0xff] }
 0x7c9   :  { %3358 = vmatpush1.msra.mxu0 %v12498_v9  ;;  %3429 = vmatpush1.msra.mxu1 %v12499_v10  ;;  %v12548_v9 = vld [vmem:[#allocation255_spill] sm:$0xff]  ;;  %v12549_v10 = vld [vmem:[#allocation256_spill] sm:$0xff] }
 0x7ca   :  { %3359 = vmatprep.subr.mxu0 %v12500_v11  ;;  %3430 = vmatprep.subr.mxu1 %v12501_v12  ;;  %v12550_v11 = vld [vmem:[#allocation257_spill] sm:$0xff]  ;;  %v12551_v12 = vld [vmem:[#allocation258_spill] sm:$0xff] }
 0x7cb   :  { %3360 = vmatpush1.msra.mxu0 %v12502_v14  ;;  %3431 = vmatpush1.msra.mxu1 %v12503_v15  ;;  %v12552_v14 = vld [vmem:[#allocation259_spill] sm:$0xff]  ;;  %v12553_v15 = vld [vmem:[#allocation260_spill] sm:$0xff] }
 0x7cc   :  { %3361 = vmatprep.subr.mxu0 %v12504_v24  ;;  %3432 = vmatprep.subr.mxu1 %v12505_v29  ;;  %v12554_v24 = vld [vmem:[#allocation261_spill] sm:$0xff]  ;;  %v12555_v29 = vld [vmem:[#allocation262_spill] sm:$0xff] }
 0x7cd   :  { %3362 = vmatpush1.msra.mxu0 %v12506_v30  ;;  %3433 = vmatpush1.msra.mxu1 %v12507_v31  ;;  %v12556_v30 = vld [vmem:[#allocation263_spill] sm:$0xff]  ;;  %v12557_v31 = vld [vmem:[#allocation264_spill] sm:$0xff] }
 0x7ce   :  { %3363 = vmatprep.subr.mxu0 %v12508_v50  ;;  %3434 = vmatprep.subr.mxu1 %v12509_v51  ;;  %v12558_v50 = vld [vmem:[#allocation265_spill] sm:$0xff]  ;;  %v12559_v51 = vld [vmem:[#allocation266_spill] sm:$0xff] }
 0x7cf   :  { %3364 = vmatpush1.msra.mxu0 %v12510_v52  ;;  %3435 = vmatpush1.msra.mxu1 %v12511_v53  ;;  %v12560_v52 = vld [vmem:[#allocation267_spill] sm:$0xff]  ;;  %v12561_v53 = vld [vmem:[#allocation268_spill] sm:$0xff] }
 0x7d0   :  { %3365 = vmatprep.subr.mxu0 %v12512_v55  ;;  %3436 = vmatprep.subr.mxu1 %v12513_v56  ;;  %v12562_v55 = vld [vmem:[#allocation269_spill] sm:$0xff]  ;;  %v12563_v56 = vld [vmem:[#allocation270_spill] sm:$0xff] }
 0x7d1   :  { %3366 = vmatpush1.msra.mxu0 %v12514_v13  ;;  %3437 = vmatpush1.msra.mxu1 %v12515_v42  ;;  %v12564_v13 = vld [vmem:[#allocation271_spill] sm:$0xff]  ;;  %v12565_v42 = vld [vmem:[#allocation272_spill] sm:$0xff] }
 0x7d2   :  { %3367 = vmatprep.subr.mxu0 %v12516_v49  ;;  %3438 = vmatprep.subr.mxu1 %v12517_v63  ;;  %v12566_v49 = vld [vmem:[#allocation273_spill] sm:$0xff]  ;;  %v12567_v63 = vld [vmem:[#allocation274_spill] sm:$0xff] }
 0x7d3   :  { %3368 = vmatpush2.msra.mxu0 %v12518_v23  ;;  %3439 = vmatpush2.msra.mxu1 %v12519_v44  ;;  %v12568_v23 = vld [vmem:[#allocation275_spill] sm:$0xff]  ;;  %v12569_v44 = vld [vmem:[#allocation276_spill] sm:$0xff] }
 0x7d4   :  { %3369 = vmatprep.subr.mxu0 %v12520_v19  ;;  %3440 = vmatprep.subr.mxu1 %v12521_v57  ;;  %v12570_v19 = vld [vmem:[#allocation277_spill] sm:$0xff]  ;;  %v12571_v57 = vld [vmem:[#allocation278_spill] sm:$0xff] }
 0x7d5   :  { %3370 = vmatpush2.msra.mxu0 %v12522_v18  ;;  %3441 = vmatpush2.msra.mxu1 %v12523_v0  ;;  %v12572_v18 = vld [vmem:[#allocation279_spill] sm:$0xff]  ;;  %v12573_v0 = vld [vmem:[#allocation280_spill] sm:$0xff] }
 0x7d6   :  { %3371 = vmatprep.subr.mxu0 %v12524_v36  ;;  %3442 = vmatprep.subr.mxu1 %v12525_v7  ;;  %v12574_v36 = vld [vmem:[#allocation281_spill] sm:$0xff]  ;;  %v12575_v7 = vld [vmem:[#allocation282_spill] sm:$0xff] }
 0x7d7   :  { %3372 = vmatpush2.msra.mxu0 %v12526_v47  ;;  %3443 = vmatpush2.msra.mxu1 %v12527_v3  ;;  %v12576_v47 = vld [vmem:[#allocation283_spill] sm:$0xff]  ;;  %v12577_v3 = vld [vmem:[#allocation284_spill] sm:$0xff] }
 0x7d8   :  { %3373 = vmatprep.subr.mxu0 %v12528_v37  ;;  %3444 = vmatprep.subr.mxu1 %v12529_v34  ;;  %v12578_v37 = vld [vmem:[#allocation285_spill] sm:$0xff]  ;;  %v12579_v34 = vld [vmem:[#allocation286_spill] sm:$0xff] }
 0x7d9   :  { %3374 = vmatpush2.msra.mxu0 %v12530_v45  ;;  %3445 = vmatpush2.msra.mxu1 %v12531_v48  ;;  %v12580_v45 = vld [vmem:[#allocation287_spill] sm:$0xff]  ;;  %v12581_v48 = vld [vmem:[#allocation288_spill] sm:$0xff] }
 0x7da   :  { %3375 = vmatprep.subr.mxu0 %v12532_v58  ;;  %3446 = vmatprep.subr.mxu1 %v12533_v41  ;;  %v12583_v58 = vld [vmem:[#allocation290_spill] sm:$0xff]  ;;  %v12584_v41 = vld [vmem:[#allocation291_spill] sm:$0xff] }
 0x7db   :  { %3376 = vmatpush2.msra.mxu0 %v12534_v59  ;;  %3447 = vmatpush2.msra.mxu1 %v12535_v33  ;;  %v9387_v59 = vld [vmem:[#allocation3 + $0x318] sm:$0xff]  ;;  %v9390_v33 = vld [vmem:[#allocation3 + $0x300] sm:$0xff] }
 0x7dc   :  { %3377 = vmatprep.subr.mxu0 %v12536_v4  ;;  %3448 = vmatprep.subr.mxu1 %v12537_v40  ;;  %v9411_v4 = vld [vmem:[#allocation3 + $0x298] sm:$0xff]  ;;  %v9414_v40 = vld [vmem:[#allocation3 + $0x280] sm:$0xff] }
 0x7dd   :  { %3378 = vmatpush2.msra.mxu0 %v12538_v22  ;;  %3449 = vmatpush2.msra.mxu1 %v12539_v39  ;;  %v9417_v22 = vld [vmem:[#allocation3 + $0x290] sm:$0xff]  ;;  %v9420_v39 = vld [vmem:[#allocation3 + $0x248] sm:$0xff] }
 0x7de   :  { %3379 = vmatprep.subr.mxu0 %v12540_v62  ;;  %3450 = vmatprep.subr.mxu1 %v12541_v46  ;;  %v9423_v62 = vld [vmem:[#allocation3 + $0x258] sm:$0xff]  ;;  %v9426_v46 = vld [vmem:[#allocation3 + $0x240] sm:$0xff] }
 0x7df   :  { %3380 = vmatpush2.msra.mxu0 %v12542_v2  ;;  %3451 = vmatpush2.msra.mxu1 %v12543_v17  ;;  %v9429_v2 = vld [vmem:[#allocation3 + $0x250] sm:$0xff]  ;;  %v9432_v17 = vld [vmem:[#allocation3 + $0x208] sm:$0xff] }
 0x7e0   :  { %3381 = vmatprep.subr.mxu0 %v12544_v21  ;;  %3452 = vmatprep.subr.mxu1 %v12545_v1  ;;  %v9435_v21 = vld [vmem:[#allocation3 + $0x218] sm:$0xff]  ;;  %v9438_v1 = vld [vmem:[#allocation3 + $0x200] sm:$0xff] }
 0x7e1   :  { %3382 = vmatpush2.msra.mxu0 %v12546_v38  ;;  %3453 = vmatpush2.msra.mxu1 %v12547_v8  ;;  %v9441_v38 = vld [vmem:[#allocation3 + $0x210] sm:$0xff]  ;;  %v9444_v8 = vld [vmem:[#allocation3 + $0x1c8] sm:$0xff] }
 0x7e2   :  { %3383 = vmatprep.subr.mxu0 %v12548_v9  ;;  %3454 = vmatprep.subr.mxu1 %v12549_v10  ;;  %v9447_v9 = vld [vmem:[#allocation3 + $0x1d8] sm:$0xff]  ;;  %v9450_v10 = vld [vmem:[#allocation3 + $0x1c0] sm:$0xff] }
 0x7e3   :  { %3384 = vmatpush2.msra.mxu0 %v12550_v11  ;;  %3455 = vmatpush2.msra.mxu1 %v12551_v12  ;;  %v9453_v11 = vld [vmem:[#allocation3 + $0x1d0] sm:$0xff]  ;;  %v9456_v12 = vld [vmem:[#allocation3 + $0x188] sm:$0xff] }
 0x7e4   :  { %3385 = vmatprep.subr.mxu0 %v12552_v14  ;;  %3456 = vmatprep.subr.mxu1 %v12553_v15  ;;  %v9459_v14 = vld [vmem:[#allocation3 + $0x198] sm:$0xff]  ;;  %v9462_v15 = vld [vmem:[#allocation3 + $0x180] sm:$0xff] }
 0x7e5   :  { %3386 = vmatpush2.msra.mxu0 %v12554_v24  ;;  %3457 = vmatpush2.msra.mxu1 %v12555_v29  ;;  %v9465_v24 = vld [vmem:[#allocation3 + $0x190] sm:$0xff]  ;;  %v9468_v29 = vld [vmem:[#allocation3 + $0x148] sm:$0xff] }
 0x7e6   :  { %3387 = vmatprep.subr.mxu0 %v12556_v30  ;;  %3458 = vmatprep.subr.mxu1 %v12557_v31  ;;  %v9471_v30 = vld [vmem:[#allocation3 + $0x158] sm:$0xff]  ;;  %v9474_v31 = vld [vmem:[#allocation3 + $0x140] sm:$0xff] }
 0x7e7   :  { %3388 = vmatpush2.msra.mxu0 %v12558_v50  ;;  %3459 = vmatpush2.msra.mxu1 %v12559_v51  ;;  %v9477_v50 = vld [vmem:[#allocation3 + $0x150] sm:$0xff]  ;;  %v9480_v51 = vld [vmem:[#allocation3 + $0x108] sm:$0xff] }
 0x7e8   :  { %3389 = vmatprep.subr.mxu0 %v12560_v52  ;;  %3460 = vmatprep.subr.mxu1 %v12561_v53  ;;  %v9483_v52 = vld [vmem:[#allocation3 + $0x118] sm:$0xff]  ;;  %v9486_v53 = vld [vmem:[#allocation3 + $0x100] sm:$0xff] }
 0x7e9   :  { %3390 = vmatpush2.msra.mxu0 %v12562_v55  ;;  %3461 = vmatpush2.msra.mxu1 %v12563_v56  ;;  %v9489_v55 = vld [vmem:[#allocation3 + $0x110] sm:$0xff]  ;;  %v9492_v56 = vld [vmem:[#allocation3 + $0xc8] sm:$0xff] }
 0x7ea   :  { %3391 = vmatprep.subr.mxu0 %v12564_v13  ;;  %3462 = vmatprep.subr.mxu1 %v12565_v42  ;;  %v9495_v13 = vld [vmem:[#allocation3 + $0xd8] sm:$0xff]  ;;  %v9498_v42 = vld [vmem:[#allocation3 + $0xc0] sm:$0xff] }
 0x7eb   :  { %3392 = vmatpush2.msra.mxu0 %v12566_v49  ;;  %3463 = vmatpush2.msra.mxu1 %v12567_v63  ;;  %v9501_v49 = vld [vmem:[#allocation3 + $0xd0] sm:$0xff]  ;;  %v9504_v63 = vld [vmem:[#allocation3 + $0x88] sm:$0xff] }
 0x7ec   :  { %3393 = vmatprep.subr.mxu0 %v12568_v23  ;;  %3464 = vmatprep.subr.mxu1 %v12569_v44  ;;  %12585 = vst [vmem:[#allocation292_spill] sm:$0xff] %v9501_v49  ;;  %12586 = vst [vmem:[#allocation293_spill] sm:$0xff] %v9504_v63  ;;  %v9507_v23 = vld [vmem:[#allocation3 + $0x98] sm:$0xff]  ;;  %v9510_v44 = vld [vmem:[#allocation3 + $0x80] sm:$0xff] }
 0x7ed   :  { %3394 = vmatpush2.msra.mxu0 %v12570_v19  ;;  %3465 = vmatpush2.msra.mxu1 %v12571_v57  ;;  %12587 = vst [vmem:[#allocation294_spill] sm:$0xff] %v9507_v23  ;;  %12588 = vst [vmem:[#allocation295_spill] sm:$0xff] %v9510_v44  ;;  %v9513_v19 = vld [vmem:[#allocation3 + $0x90] sm:$0xff]  ;;  %v9516_v57 = vld [vmem:[#allocation3 + $0x48] sm:$0xff] }
 0x7ee   :  { %3395 = vmatprep.subr.mxu0 %v12572_v18  ;;  %3466 = vmatprep.subr.mxu1 %v12573_v0  ;;  %12589 = vst [vmem:[#allocation296_spill] sm:$0xff] %v9513_v19  ;;  %12590 = vst [vmem:[#allocation297_spill] sm:$0xff] %v9516_v57  ;;  %v9519_v18 = vld [vmem:[#allocation3 + $0x58] sm:$0xff]  ;;  %v9522_v0 = vld [vmem:[#allocation3 + $0x40] sm:$0xff] }
 0x7ef   :  { %3396 = vmatpush2.msra.mxu0 %v9049_v20  ;;  %3467 = vmatpush2.msra.mxu1 %v12574_v36  ;;  %v12582_v20 = vld [vmem:[#allocation289_spill] sm:$0xff]  ;;  %12591 = vst [vmem:[#allocation298_spill] sm:$0xff] %v9519_v18  ;;  %12592 = vst [vmem:[#allocation299_spill] sm:$0xff] %v9522_v0 }
 0x7f0   :  { %3397 = vmatprep.subr.mxu0 %v12575_v7  ;;  %3468 = vmatprep.subr.mxu1 %v12576_v47  ;;  %v9525_v36 = vld [vmem:[#allocation3 + $0x50] sm:$0xff]  ;;  %v9528_v7 = vld [vmem:[#allocation3 + $0x8] sm:$0xff]  ;;  %v9531_v47 = vld [vmem:[#allocation3 + $0x18] sm:$0xff] }
 0x7f1   :  { %3398 = vmatpush2.msra.mxu0 %v12577_v3  ;;  %3469 = vmatpush2.msra.mxu1 %v12578_v37  ;;  %12593 = vst [vmem:[#allocation300_spill] sm:$0xff] %v9525_v36  ;;  %12594 = vst [vmem:[#allocation301_spill] sm:$0xff] %v9528_v7  ;;  %v9534_v3 = vld [vmem:[#allocation3] sm:$0xff]  ;;  %v9537_v37 = vld [vmem:[#allocation3 + $0x10] sm:$0xff] }
 0x7f2   :  { %3400 = vmatmul.mubr.f32.vlgmr.msra.gmra.mxu0 %v9238_v61  ;;  %3471 = vmatmul.mubr.f32.vlgmr.msra.gmra.mxu1 %v9238_v61  ;;  %v9384_v61 = vld [vmem:[#allocation3 + $0x308] sm:$0xff]  ;;  %12595 = vst [vmem:[#allocation110_spill] sm:$0xff] %v9531_v47  ;;  %12596 = vst [vmem:[#allocation111_spill] sm:$0xff] %v9534_v3 }
 0x7f3   :  { %3560 = vmatprep.subr.mxu0 %v12579_v34  ;;  %3631 = vmatprep.subr.mxu1 %v12580_v45  ;;  %12597 = vst [vmem:[#allocation112_spill] sm:$0xff] %v9537_v37  ;;  %v9540_v34 = vld [vmem:[#allocation3 + $0x7c8] sm:$0xff]  ;;  %v9543_v45 = vld [vmem:[#allocation3 + $0x7d8] sm:$0xff] }
 0x7f4   :  { %3561 = vmatpush1.msra.mxu0 %v12581_v48  ;;  %3632 = vmatpush1.msra.mxu1 %v12582_v20  ;;  %12598 = vst [vmem:[#allocation113_spill] sm:$0xff] %v9540_v34  ;;  %12599 = vst [vmem:[#allocation114_spill] sm:$0xff] %v9543_v45  ;;  %v9546_v48 = vld [vmem:[#allocation3 + $0x7c0] sm:$0xff]  ;;  %v9549_v20 = vld [vmem:[#allocation3 + $0x7d0] sm:$0xff] }
 0x7f5   :  { %3562 = vmatprep.subr.mxu0 %v12583_v58  ;;  %3633 = vmatprep.subr.mxu1 %v12584_v41  ;;  %12600 = vst [vmem:[#allocation115_spill] sm:$0xff] %v9546_v48  ;;  %12601 = vst [vmem:[#allocation116_spill] sm:$0xff] %v9549_v20  ;;  %v9552_v58 = vld [vmem:[#allocation3 + $0x788] sm:$0xff]  ;;  %v9555_v41 = vld [vmem:[#allocation3 + $0x798] sm:$0xff] }
 0x7f6   :  { %3563 = vmatpush1.msra.mxu0 %v9087_v27  ;;  %3634 = vmatpush1.msra.mxu1 %v9090_v28  ;;  %v9393_v27 = vld [vmem:[#allocation3 + $0x310] sm:$0xff]  ;;  %v9402_v28 = vld [vmem:[#allocation3 + $0x2c0] sm:$0xff]  ;;  %12602 = vst [vmem:[#allocation117_spill] sm:$0xff] %v9552_v58  ;;  %12603 = vst [vmem:[#allocation118_spill] sm:$0xff] %v9555_v41 }
 0x7f7   :  { %3564 = vmatprep.subr.mxu0 %v9093_v16  ;;  %3635 = vmatprep.subr.mxu1 %v9096_v6  ;;  %v9396_v6 = vld [vmem:[#allocation3 + $0x2c8] sm:$0xff]  ;;  %v9405_v16 = vld [vmem:[#allocation3 + $0x2d0] sm:$0xff] }
 0x7f8   :  { %3565 = vmatpush1.msra.mxu0 %v9099_v32  ;;  %3636 = vmatpush1.msra.mxu1 %v9102_v43  ;;  %v9399_v32 = vld [vmem:[#allocation3 + $0x2d8] sm:$0xff]  ;;  %v9408_v43 = vld [vmem:[#allocation3 + $0x288] sm:$0xff] }
 0x7f9   :  { %3566 = vmatprep.subr.mxu0 %v9384_v61  ;;  %3637 = vmatprep.subr.mxu1 %v9387_v59 }
 0x7fa   :  { %3567 = vmatpush1.msra.mxu0 %v9390_v33  ;;  %3638 = vmatpush1.msra.mxu1 %v9393_v27 }
 0x7fb   :  { %3568 = vmatprep.subr.mxu0 %v9396_v6  ;;  %3639 = vmatprep.subr.mxu1 %v9399_v32 }
 0x7fc   :  { %3569 = vmatpush1.msra.mxu0 %v9402_v28  ;;  %3640 = vmatpush1.msra.mxu1 %v9405_v16 }
 0x7fd   :  { %3570 = vmatprep.subr.mxu0 %v9408_v43  ;;  %3641 = vmatprep.subr.mxu1 %v9411_v4 }
 0x7fe   :  { %3571 = vmatpush1.msra.mxu0 %v9414_v40  ;;  %3642 = vmatpush1.msra.mxu1 %v9417_v22 }
 0x7ff   :  { %3572 = vmatprep.subr.mxu0 %v9420_v39  ;;  %3643 = vmatprep.subr.mxu1 %v9423_v62 }
 0x800   :  { %3573 = vmatpush1.msra.mxu0 %v9426_v46  ;;  %3644 = vmatpush1.msra.mxu1 %v9429_v2 }
 0x801   :  { %3574 = vmatprep.subr.mxu0 %v9432_v17  ;;  %3645 = vmatprep.subr.mxu1 %v9435_v21 }
 0x802   :  { %3575 = vmatpush1.msra.mxu0 %v9438_v1  ;;  %3646 = vmatpush1.msra.mxu1 %v9441_v38 }
 0x803   :  { %3576 = vmatprep.subr.mxu0 %v9444_v8  ;;  %3647 = vmatprep.subr.mxu1 %v9447_v9 }
 0x804   :  { %3577 = vmatpush1.msra.mxu0 %v9450_v10  ;;  %3648 = vmatpush1.msra.mxu1 %v9453_v11 }
 0x805   :  { %3578 = vmatprep.subr.mxu0 %v9456_v12  ;;  %3649 = vmatprep.subr.mxu1 %v9459_v14 }
 0x806   :  { %3579 = vmatpush1.msra.mxu0 %v9462_v15  ;;  %3650 = vmatpush1.msra.mxu1 %v9465_v24 }
 0x807   :  { %3580 = vmatprep.subr.mxu0 %v9468_v29  ;;  %3651 = vmatprep.subr.mxu1 %v9471_v30 }
 0x808   :  { %3581 = vmatpush1.msra.mxu0 %v9474_v31  ;;  %3652 = vmatpush1.msra.mxu1 %v9477_v50 }
 0x809   :  { %3582 = vmatprep.subr.mxu0 %v9480_v51  ;;  %3653 = vmatprep.subr.mxu1 %v9483_v52 }
 0x80a   :  { %3583 = vmatpush1.msra.mxu0 %v9486_v53  ;;  %3654 = vmatpush1.msra.mxu1 %v9489_v55 }
 0x80b   :  { %3584 = vmatprep.subr.mxu0 %v9492_v56  ;;  %3655 = vmatprep.subr.mxu1 %v9495_v13 }
 0x80c   :  { %3585 = vmatpush1.msra.mxu0 %v9498_v42  ;;  %3656 = vmatpush1.msra.mxu1 %v9501_v49 }
 0x80d   :  { %3586 = vmatprep.subr.mxu0 %v9504_v63  ;;  %3657 = vmatprep.subr.mxu1 %v9507_v23 }
 0x80e   :  { %3587 = vmatpush1.msra.mxu0 %v9510_v44  ;;  %3658 = vmatpush1.msra.mxu1 %v9513_v19 }
 0x80f   :  { %3588 = vmatprep.subr.mxu0 %v9516_v57  ;;  %3659 = vmatprep.subr.mxu1 %v9519_v18 }
 0x810   :  { %3589 = vmatpush1.msra.mxu0 %v9522_v0  ;;  %3660 = vmatpush1.msra.mxu1 %v9525_v36 }
 0x811   :  { %3590 = vmatprep.subr.mxu0 %v9528_v7  ;;  %3661 = vmatprep.subr.mxu1 %v9531_v47 }
 0x812   :  { %3591 = vmatpush1.msra.mxu0 %v9534_v3  ;;  %3662 = vmatpush1.msra.mxu1 %v9537_v37 }
 0x813   :  { %3592 = vmatprep.subr.mxu0 %v9540_v34  ;;  %3663 = vmatprep.subr.mxu1 %v9543_v45  ;;  %v9558_v34 = vld [vmem:[#allocation3 + $0x780] sm:$0xff]  ;;  %v9561_v45 = vld [vmem:[#allocation3 + $0x790] sm:$0xff] }
 0x814   :  { %3593 = vmatpush2.msra.mxu0 %v9546_v48  ;;  %3664 = vmatpush2.msra.mxu1 %v9549_v20  ;;  %12604 = vst [vmem:[#allocation119_spill] sm:$0xff] %v9558_v34  ;;  %12605 = vst [vmem:[#allocation120_spill] sm:$0xff] %v9561_v45  ;;  %v9564_v48 = vld [vmem:[#allocation3 + $0x748] sm:$0xff]  ;;  %v9567_v20 = vld [vmem:[#allocation3 + $0x758] sm:$0xff] }
 0x815   :  { %3594 = vmatprep.subr.mxu0 %v9552_v58  ;;  %3665 = vmatprep.subr.mxu1 %v9555_v41  ;;  %12606 = vst [vmem:[#allocation121_spill] sm:$0xff] %v9564_v48  ;;  %12607 = vst [vmem:[#allocation122_spill] sm:$0xff] %v9567_v20  ;;  %v9570_v58 = vld [vmem:[#allocation3 + $0x740] sm:$0xff]  ;;  %v9573_v41 = vld [vmem:[#allocation3 + $0x750] sm:$0xff] }
 0x816   :  { %3595 = vmatpush2.msra.mxu0 %v9558_v34  ;;  %3666 = vmatpush2.msra.mxu1 %v9561_v45  ;;  %12608 = vst [vmem:[#allocation123_spill] sm:$0xff] %v9570_v58  ;;  %12609 = vst [vmem:[#allocation124_spill] sm:$0xff] %v9573_v41  ;;  %v9576_v34 = vld [vmem:[#allocation3 + $0x708] sm:$0xff]  ;;  %v9579_v45 = vld [vmem:[#allocation3 + $0x718] sm:$0xff] }
 0x817   :  { %3596 = vmatprep.subr.mxu0 %v9564_v48  ;;  %3667 = vmatprep.subr.mxu1 %v9567_v20  ;;  %12610 = vst [vmem:[#allocation125_spill] sm:$0xff] %v9576_v34  ;;  %12611 = vst [vmem:[#allocation126_spill] sm:$0xff] %v9579_v45  ;;  %v9582_v48 = vld [vmem:[#allocation3 + $0x700] sm:$0xff]  ;;  %v9585_v20 = vld [vmem:[#allocation3 + $0x710] sm:$0xff] }
 0x818   :  { %3597 = vmatpush2.msra.mxu0 %v9570_v58  ;;  %3668 = vmatpush2.msra.mxu1 %v9573_v41  ;;  %12612 = vst [vmem:[#allocation127_spill] sm:$0xff] %v9582_v48  ;;  %12613 = vst [vmem:[#allocation128_spill] sm:$0xff] %v9585_v20  ;;  %v9588_v58 = vld [vmem:[#allocation3 + $0x6c8] sm:$0xff]  ;;  %v9591_v41 = vld [vmem:[#allocation3 + $0x6d8] sm:$0xff] }
 0x819   :  { %3598 = vmatprep.subr.mxu0 %v9576_v34  ;;  %3669 = vmatprep.subr.mxu1 %v9579_v45  ;;  %12614 = vst [vmem:[#allocation129_spill] sm:$0xff] %v9588_v58  ;;  %12615 = vst [vmem:[#allocation130_spill] sm:$0xff] %v9591_v41  ;;  %v9594_v34 = vld [vmem:[#allocation3 + $0x6c0] sm:$0xff]  ;;  %v9597_v45 = vld [vmem:[#allocation3 + $0x6d0] sm:$0xff] }
 0x81a   :  { %3599 = vmatpush2.msra.mxu0 %v9582_v48  ;;  %3670 = vmatpush2.msra.mxu1 %v9585_v20  ;;  %12616 = vst [vmem:[#allocation131_spill] sm:$0xff] %v9594_v34  ;;  %12617 = vst [vmem:[#allocation132_spill] sm:$0xff] %v9597_v45  ;;  %v9600_v48 = vld [vmem:[#allocation3 + $0x688] sm:$0xff]  ;;  %v9603_v20 = vld [vmem:[#allocation3 + $0x698] sm:$0xff] }
 0x81b   :  { %3600 = vmatprep.subr.mxu0 %v9588_v58  ;;  %3671 = vmatprep.subr.mxu1 %v9591_v41  ;;  %12618 = vst [vmem:[#allocation133_spill] sm:$0xff] %v9600_v48  ;;  %12619 = vst [vmem:[#allocation134_spill] sm:$0xff] %v9603_v20  ;;  %v9606_v58 = vld [vmem:[#allocation3 + $0x680] sm:$0xff]  ;;  %v9609_v41 = vld [vmem:[#allocation3 + $0x690] sm:$0xff] }
 0x81c   :  { %3601 = vmatpush2.msra.mxu0 %v9594_v34  ;;  %3672 = vmatpush2.msra.mxu1 %v9597_v45  ;;  %12620 = vst [vmem:[#allocation135_spill] sm:$0xff] %v9606_v58  ;;  %12621 = vst [vmem:[#allocation136_spill] sm:$0xff] %v9609_v41  ;;  %v9612_v34 = vld [vmem:[#allocation3 + $0x648] sm:$0xff]  ;;  %v9615_v45 = vld [vmem:[#allocation3 + $0x658] sm:$0xff] }
 0x81d   :  { %3602 = vmatprep.subr.mxu0 %v9600_v48  ;;  %3673 = vmatprep.subr.mxu1 %v9603_v20  ;;  %12622 = vst [vmem:[#allocation137_spill] sm:$0xff] %v9612_v34  ;;  %12623 = vst [vmem:[#allocation138_spill] sm:$0xff] %v9615_v45  ;;  %v9618_v48 = vld [vmem:[#allocation3 + $0x640] sm:$0xff]  ;;  %v9621_v20 = vld [vmem:[#allocation3 + $0x650] sm:$0xff] }
 0x81e   :  { %3603 = vmatpush2.msra.mxu0 %v9606_v58  ;;  %3674 = vmatpush2.msra.mxu1 %v9609_v41  ;;  %12624 = vst [vmem:[#allocation139_spill] sm:$0xff] %v9618_v48  ;;  %12625 = vst [vmem:[#allocation140_spill] sm:$0xff] %v9621_v20  ;;  %v9624_v58 = vld [vmem:[#allocation3 + $0x608] sm:$0xff]  ;;  %v9627_v41 = vld [vmem:[#allocation3 + $0x618] sm:$0xff] }
 0x81f   :  { %3604 = vmatprep.subr.mxu0 %v9612_v34  ;;  %3675 = vmatprep.subr.mxu1 %v9615_v45  ;;  %12626 = vst [vmem:[#allocation141_spill] sm:$0xff] %v9624_v58  ;;  %12627 = vst [vmem:[#allocation142_spill] sm:$0xff] %v9627_v41  ;;  %v9630_v34 = vld [vmem:[#allocation3 + $0x600] sm:$0xff]  ;;  %v9633_v45 = vld [vmem:[#allocation3 + $0x610] sm:$0xff] }
 0x820   :  { %3605 = vmatpush2.msra.mxu0 %v9618_v48  ;;  %3676 = vmatpush2.msra.mxu1 %v9621_v20  ;;  %12628 = vst [vmem:[#allocation143_spill] sm:$0xff] %v9630_v34  ;;  %12629 = vst [vmem:[#allocation144_spill] sm:$0xff] %v9633_v45  ;;  %v9636_v48 = vld [vmem:[#allocation3 + $0x5c8] sm:$0xff]  ;;  %v9639_v20 = vld [vmem:[#allocation3 + $0x5d8] sm:$0xff] }
 0x821   :  { %3606 = vmatprep.subr.mxu0 %v9624_v58  ;;  %3677 = vmatprep.subr.mxu1 %v9627_v41  ;;  %12630 = vst [vmem:[#allocation145_spill] sm:$0xff] %v9636_v48  ;;  %12631 = vst [vmem:[#allocation146_spill] sm:$0xff] %v9639_v20  ;;  %v9642_v58 = vld [vmem:[#allocation3 + $0x5c0] sm:$0xff]  ;;  %v9645_v41 = vld [vmem:[#allocation3 + $0x5d0] sm:$0xff] }
 0x822   :  { %3607 = vmatpush2.msra.mxu0 %v9630_v34  ;;  %3678 = vmatpush2.msra.mxu1 %v9633_v45  ;;  %12632 = vst [vmem:[#allocation147_spill] sm:$0xff] %v9642_v58  ;;  %12633 = vst [vmem:[#allocation148_spill] sm:$0xff] %v9645_v41  ;;  %v9648_v34 = vld [vmem:[#allocation3 + $0x588] sm:$0xff]  ;;  %v9651_v45 = vld [vmem:[#allocation3 + $0x598] sm:$0xff] }
 0x823   :  { %3608 = vmatprep.subr.mxu0 %v9636_v48  ;;  %3679 = vmatprep.subr.mxu1 %v9639_v20  ;;  %12634 = vst [vmem:[#allocation149_spill] sm:$0xff] %v9648_v34  ;;  %12635 = vst [vmem:[#allocation150_spill] sm:$0xff] %v9651_v45  ;;  %v9654_v48 = vld [vmem:[#allocation3 + $0x580] sm:$0xff]  ;;  %v9657_v20 = vld [vmem:[#allocation3 + $0x590] sm:$0xff] }
 0x824   :  { %3609 = vmatpush2.msra.mxu0 %v9642_v58  ;;  %3680 = vmatpush2.msra.mxu1 %v9645_v41  ;;  %12636 = vst [vmem:[#allocation151_spill] sm:$0xff] %v9654_v48  ;;  %12637 = vst [vmem:[#allocation152_spill] sm:$0xff] %v9657_v20  ;;  %v9660_v58 = vld [vmem:[#allocation3 + $0x548] sm:$0xff]  ;;  %v9663_v41 = vld [vmem:[#allocation3 + $0x558] sm:$0xff] }
 0x825   :  { %3610 = vmatprep.subr.mxu0 %v9648_v34  ;;  %3681 = vmatprep.subr.mxu1 %v9651_v45  ;;  %12638 = vst [vmem:[#allocation153_spill] sm:$0xff] %v9660_v58  ;;  %12639 = vst [vmem:[#allocation154_spill] sm:$0xff] %v9663_v41  ;;  %v9666_v34 = vld [vmem:[#allocation3 + $0x540] sm:$0xff]  ;;  %v9669_v45 = vld [vmem:[#allocation3 + $0x550] sm:$0xff] }
 0x826   :  { %3611 = vmatpush2.msra.mxu0 %v9654_v48  ;;  %3682 = vmatpush2.msra.mxu1 %v9657_v20  ;;  %12640 = vst [vmem:[#allocation155_spill] sm:$0xff] %v9666_v34  ;;  %12641 = vst [vmem:[#allocation156_spill] sm:$0xff] %v9669_v45  ;;  %v9672_v48 = vld [vmem:[#allocation3 + $0x508] sm:$0xff]  ;;  %v9675_v20 = vld [vmem:[#allocation3 + $0x518] sm:$0xff] }
 0x827   :  { %3612 = vmatprep.subr.mxu0 %v9660_v58  ;;  %3683 = vmatprep.subr.mxu1 %v9663_v41  ;;  %12642 = vst [vmem:[#allocation157_spill] sm:$0xff] %v9672_v48  ;;  %12643 = vst [vmem:[#allocation158_spill] sm:$0xff] %v9675_v20  ;;  %v9678_v58 = vld [vmem:[#allocation3 + $0x500] sm:$0xff]  ;;  %v9681_v41 = vld [vmem:[#allocation3 + $0x510] sm:$0xff] }
 0x828   :  { %3613 = vmatpush2.msra.mxu0 %v9666_v34  ;;  %3684 = vmatpush2.msra.mxu1 %v9669_v45  ;;  %12644 = vst [vmem:[#allocation159_spill] sm:$0xff] %v9678_v58  ;;  %12645 = vst [vmem:[#allocation160_spill] sm:$0xff] %v9681_v41  ;;  %v9684_v34 = vld [vmem:[#allocation3 + $0x4c8] sm:$0xff]  ;;  %v9687_v45 = vld [vmem:[#allocation3 + $0x4d8] sm:$0xff] }
 0x829   :  { %3614 = vmatprep.subr.mxu0 %v9672_v48  ;;  %3685 = vmatprep.subr.mxu1 %v9675_v20  ;;  %12646 = vst [vmem:[#allocation161_spill] sm:$0xff] %v9684_v34  ;;  %12647 = vst [vmem:[#allocation162_spill] sm:$0xff] %v9687_v45  ;;  %v9690_v48 = vld [vmem:[#allocation3 + $0x4c0] sm:$0xff]  ;;  %v9693_v20 = vld [vmem:[#allocation3 + $0x4d0] sm:$0xff] }
 0x82a   :  { %3615 = vmatpush2.msra.mxu0 %v9678_v58  ;;  %3686 = vmatpush2.msra.mxu1 %v9681_v41  ;;  %12648 = vst [vmem:[#allocation163_spill] sm:$0xff] %v9690_v48  ;;  %12649 = vst [vmem:[#allocation164_spill] sm:$0xff] %v9693_v20  ;;  %v9696_v58 = vld [vmem:[#allocation3 + $0x488] sm:$0xff]  ;;  %v9699_v41 = vld [vmem:[#allocation3 + $0x498] sm:$0xff] }
 0x82b   :  { %3616 = vmatprep.subr.mxu0 %v9684_v34  ;;  %3687 = vmatprep.subr.mxu1 %v9687_v45  ;;  %12650 = vst [vmem:[#allocation165_spill] sm:$0xff] %v9696_v58  ;;  %12651 = vst [vmem:[#allocation166_spill] sm:$0xff] %v9699_v41  ;;  %v9702_v34 = vld [vmem:[#allocation3 + $0x480] sm:$0xff]  ;;  %v9705_v45 = vld [vmem:[#allocation3 + $0x490] sm:$0xff] }
 0x82c   :  { %3617 = vmatpush2.msra.mxu0 %v9690_v48  ;;  %3688 = vmatpush2.msra.mxu1 %v9693_v20  ;;  %12652 = vst [vmem:[#allocation167_spill] sm:$0xff] %v9702_v34  ;;  %12653 = vst [vmem:[#allocation168_spill] sm:$0xff] %v9705_v45  ;;  %v9708_v48 = vld [vmem:[#allocation3 + $0x448] sm:$0xff]  ;;  %v9711_v20 = vld [vmem:[#allocation3 + $0x458] sm:$0xff] }
 0x82d   :  { %3618 = vmatprep.subr.mxu0 %v9696_v58  ;;  %3689 = vmatprep.subr.mxu1 %v9699_v41  ;;  %12654 = vst [vmem:[#allocation169_spill] sm:$0xff] %v9708_v48  ;;  %12655 = vst [vmem:[#allocation170_spill] sm:$0xff] %v9711_v20  ;;  %v9714_v58 = vld [vmem:[#allocation3 + $0x440] sm:$0xff]  ;;  %v9717_v41 = vld [vmem:[#allocation3 + $0x450] sm:$0xff] }
 0x82e   :  { %3619 = vmatpush2.msra.mxu0 %v9702_v34  ;;  %3690 = vmatpush2.msra.mxu1 %v9705_v45  ;;  %12656 = vst [vmem:[#allocation171_spill] sm:$0xff] %v9714_v58  ;;  %12657 = vst [vmem:[#allocation172_spill] sm:$0xff] %v9717_v41  ;;  %v9720_v34 = vld [vmem:[#allocation3 + $0x408] sm:$0xff]  ;;  %v9723_v45 = vld [vmem:[#allocation3 + $0x418] sm:$0xff] }
 0x82f   :  { %3620 = vmatprep.subr.mxu0 %v9708_v48  ;;  %3691 = vmatprep.subr.mxu1 %v9711_v20  ;;  %12658 = vst [vmem:[#allocation173_spill] sm:$0xff] %v9720_v34  ;;  %12659 = vst [vmem:[#allocation174_spill] sm:$0xff] %v9723_v45  ;;  %v9726_v48 = vld [vmem:[#allocation3 + $0x400] sm:$0xff]  ;;  %v9729_v20 = vld [vmem:[#allocation3 + $0x410] sm:$0xff] }
 0x830   :  { %3621 = vmatpush2.msra.mxu0 %v9714_v58  ;;  %3692 = vmatpush2.msra.mxu1 %v9717_v41  ;;  %12660 = vst [vmem:[#allocation175_spill] sm:$0xff] %v9726_v48  ;;  %12661 = vst [vmem:[#allocation93_spill] sm:$0xff] %v9729_v20  ;;  %v9732_v58 = vld [vmem:[#allocation3 + $0x3e8] sm:$0xff]  ;;  %v9735_v41 = vld [vmem:[#allocation3 + $0x3f8] sm:$0xff] }
 0x831   :  { %3622 = vmatprep.subr.mxu0 %v9720_v34  ;;  %3693 = vmatprep.subr.mxu1 %v9723_v45  ;;  %12662 = vst [vmem:[#allocation94_spill] sm:$0xff] %v9732_v58  ;;  %12663 = vst [vmem:[#allocation96_spill] sm:$0xff] %v9735_v41 }
 0x832   :  { %3623 = vmatpush2.msra.mxu0 %v9726_v48  ;;  %3694 = vmatpush2.msra.mxu1 %v9729_v20  ;;  %v12664_v20 = vcombine.high %v12464_v5, %v12465_v35  ;;  %v12665_v5 = vcombine.high %v12467_v25, %v12468_v26 }
 0x833   :  { %3702 = vmatprep.subr.mxu0 %v9732_v58  ;;  %3773 = vmatprep.subr.mxu1 %v9735_v41 }
 0x871   :  { %v3259_v34 = vpop.f32.mrf.mxu0  ;;  %v3330_v37 = vpop.f32.mrf.mxu1 }
 0x873   :  { %v3261_v3 = vpop.f32.mrf.mxu0  ;;  %v3332_v45 = vpop.f32.mrf.mxu1 }
 0x874   :  { %v3485_v47 = vcombine.low %v3259_v34, %v3261_v3  ;;  %v3486_v7 = vcombine.low %v3330_v37, %v3332_v45 }
 0x876   :  { %v3493_v48 = vrot.slane %v3485_v47, %v11660_v54  ;;  %v3500_v36 = vrot.slane %v3486_v7, %v11660_v54 }
 0x878   :  { %v3501_v0 = vcombine.low %v3493_v48, %v3500_v36 }
 0x87a   :  { %v3521_v18 = vadd.f32 %v3501_v0, %v12664_v20 }
 0x87c   :  { %v4658_v58 = vmul.f32 -1.442695, %v3521_v18 }
 0x87e   :  { %4772 = vpow2.f32 %v4658_v58  ;;  %v9762_v58 = vld [vmem:[#allocation3 + $0x3f0] sm:$0xff] }
 0x88b   :  { %v4773_v57 = vpop.eup %4772 }
 0x88c   :  { %v3526_v44 = vadd.f32 1.0, %v4773_v57 }
 0x88e   :  { %4774 = vrcp.f32 %v3526_v44 }
 0x89b   :  { %v4775_v37 = vpop.eup %4774 }
 0x89c   :  { %v3540_v57 = vrot.slane %v4775_v37, 4 }
 0x8b2   :  { %v3401_v19 = vpop.f32.mrf.mxu0  ;;  %v3472_v41 = vpop.f32.mrf.mxu1 }
 0x8b4   :  { %v3403_v23 = vpop.f32.mrf.mxu0  ;;  %v3474_v63 = vpop.f32.mrf.mxu1 }
 0x8b5   :  { %v3502_v49 = vcombine.low %v3401_v19, %v3403_v23  ;;  %v3503_v3 = vcombine.low %v3472_v41, %v3474_v63  ;;  %v3542_v23 = vmul.f32 %v3540_v57, %v9234_v60  ;;  %v9759_v60 = vld [vmem:[#allocation3 + $0x3e0] sm:$0xff]  ;;  %v9765_v41 = vld [vmem:[#allocation3 + $0x3a8] sm:$0xff] }
 0x8b6   :  { %v9795_v57 = vld [vmem:[#allocation3 + $0x320] sm:$0xff] }
 0x8b7   :  { %v3510_v47 = vrot.slane %v3502_v49, %v11660_v54  ;;  %v3517_v7 = vrot.slane %v3503_v3, %v11660_v54  ;;  %v9768_v3 = vld [vmem:[#allocation3 + $0x3b8] sm:$0xff]  ;;  %12666 = vst [vmem:[#allocation102_spill] sm:$0xff] %v9795_v57 }
 0x8b9   :  { %v3518_v36 = vcombine.low %v3510_v47, %v3517_v7  ;;  %v9771_v47 = vld [vmem:[#allocation3 + $0x3a0] sm:$0xff]  ;;  %v9774_v7 = vld [vmem:[#allocation3 + $0x3b0] sm:$0xff] }
 0x8bb   :  { %v3522_v35 = vadd.f32 %v3518_v36, %v12665_v5  ;;  %v9777_v36 = vld [vmem:[#allocation3 + $0x368] sm:$0xff]  ;;  %v9780_v5 = vld [vmem:[#allocation3 + $0x378] sm:$0xff] }
 0x8bd   :  { %4776 = vtanh.f32 %v3522_v35  ;;  %v3531_v18 = vrot.slane %v3522_v35, 4  ;;  %v9783_v35 = vld [vmem:[#allocation3 + $0x360] sm:$0xff] }
 0x8bf   :  { %v4659_v0 = vmul.f32 -1.442695, %v3531_v18  ;;  %v9786_v18 = vld [vmem:[#allocation3 + $0x370] sm:$0xff] }
 0x8c1   :  { %4778 = vpow2.f32 %v4659_v0  ;;  %v9789_v0 = vld [vmem:[#allocation3 + $0x328] sm:$0xff] }
 0x8ca   :  { %v4777_v34 = vpop.eup %4776 }
 0x8cb   :  { %v3543_v63 = vmul.f32 %v4777_v34, %v4775_v37  ;;  %v9792_v37 = vld [vmem:[#allocation3 + $0x338] sm:$0xff]  ;;  %v9798_v34 = vld [vmem:[#allocation3 + $0x330] sm:$0xff] }
 0x8cc   :  { %12667 = vst [vmem:[#allocation104_spill] sm:$0xff] %v9798_v34 }
 0x8cd   :  { %v9749_v44 = vadd.f32 %v3543_v63, %v3542_v23  ;;  %v9801_v23 = vld [vmem:[#allocation3 + $0x2e8] sm:$0xff]  ;;  %v9804_v63 = vld [vmem:[#allocation3 + $0x2f8] sm:$0xff] }
 0x8ce   :  { %v4779_v49 = vpop.eup %4778  ;;  %12668 = vst [vmem:[#allocation176_spill] sm:$0xff] %v9801_v23  ;;  %12669 = vst [vmem:[#allocation177_spill] sm:$0xff] %v9804_v63 }
 0x8cf   :  { %v3536_v19 = vadd.f32 1.0, %v4779_v49  ;;  %4780 = vtanh.f32 %v9749_v44  ;;  %v9807_v49 = vld [vmem:[#allocation3 + $0x2e0] sm:$0xff] }
 0x8d0   :  { %12670 = vst [vmem:[#allocation178_spill] sm:$0xff] %v9807_v49 }
 0x8d1   :  { %4782 = vrcp.f32 %v3536_v19  ;;  %v9810_v19 = vld [vmem:[#allocation3 + $0x2f0] sm:$0xff] }
 0x8d2   :  { %12671 = vst [vmem:[#allocation179_spill] sm:$0xff] %v9810_v19 }
 0x8dc   :  { %v4781_v45 = vpop.eup %4780 }
 0x8de   :  { %v4783_v25 = vpop.eup %4782 }
 0x8df   :  { %v3546_v26 = vmul.f32 %v4783_v25, %v4781_v45  ;;  %v9813_v45 = vld [vmem:[#allocation3 + $0x2a8] sm:$0xff]  ;;  %v9816_v25 = vld [vmem:[#allocation3 + $0x2b8] sm:$0xff] }
 0x8e0   :  { %12672 = vst [vmem:[#allocation180_spill] sm:$0xff] %v9813_v45  ;;  %12673 = vst [vmem:[#allocation98_spill] sm:$0xff] %v9816_v25 }
 0x8e1   :  { %v9753_v48 = vrot.slane %v3546_v26, %v11660_v54  ;;  %v9819_v26 = vld [vmem:[#allocation3 + $0x2a0] sm:$0xff] }
 0x8e2   :  { %12674 = vst [vmem:[#allocation100_spill] sm:$0xff] %v9819_v26 }
 0x8e3   :  { %v3557_v20 = vcombine.high %v9753_v48, %v9753_v48 }
 0x8e5   :  { %3624 = vmatprep.mubr.f32.mxu0 %v3557_v20  ;;  %3695 = vmatprep.mubr.f32.mxu1 %v3557_v20 }
 0x8e6   :  { %3625 = vmatmul.mubr.f32.vlgmr.msra.gmra.mxu0 %v9753_v48  ;;  %3696 = vmatmul.mubr.f32.vlgmr.msra.gmra.mxu1 %v9753_v48 }
 0x8e7   :  { %3703 = vmatpush1.msra.mxu0 %v9759_v60  ;;  %3774 = vmatpush1.msra.mxu1 %v9762_v58 }
 0x8e8   :  { %3704 = vmatprep.subr.mxu0 %v9765_v41  ;;  %3766 = vmatprep.mubr.f32.mxu0 %v3557_v20 }
 0x8e9   :  { %3775 = vmatprep.subr.mxu1 %v9768_v3  ;;  %3837 = vmatprep.mubr.f32.mxu1 %v3557_v20  ;;  %v9822_v20 = vld [vmem:[#allocation3 + $0x2b0] sm:$0xff] }
 0x8ea   :  { %3705 = vmatpush1.msra.mxu0 %v9771_v47  ;;  %3776 = vmatpush1.msra.mxu1 %v9774_v7  ;;  %12675 = vst [vmem:[#allocation106_spill] sm:$0xff] %v9822_v20 }
 0x8eb   :  { %3706 = vmatprep.subr.mxu0 %v9777_v36  ;;  %3777 = vmatprep.subr.mxu1 %v9780_v5 }
 0x8ec   :  { %3707 = vmatpush1.msra.mxu0 %v9783_v35  ;;  %3778 = vmatpush1.msra.mxu1 %v9786_v18 }
 0x8ed   :  { %3708 = vmatprep.subr.mxu0 %v9789_v0  ;;  %3779 = vmatprep.subr.mxu1 %v9792_v37 }
 0x8ee   :  { %3709 = vmatpush1.msra.mxu0 %v9795_v57  ;;  %3780 = vmatpush1.msra.mxu1 %v9798_v34  ;;  %v5583_v34 = vld [vmem:[#allocation3 + $0x390] sm:$0xff]  ;;  %v5585_v57 = vld [vmem:[#allocation3 + $0x358] sm:$0xff] }
 0x8ef   :  { %3710 = vmatprep.subr.mxu0 %v9801_v23  ;;  %3781 = vmatprep.subr.mxu1 %v9804_v63  ;;  %v5579_v63 = vld [vmem:[#allocation3 + $0x3d0] sm:$0xff]  ;;  %v5581_v23 = vld [vmem:[#allocation3 + $0x398] sm:$0xff] }
 0x8f0   :  { %3711 = vmatpush1.msra.mxu0 %v9807_v49  ;;  %3782 = vmatpush1.msra.mxu1 %v9810_v19  ;;  %v9825_v49 = vld [vmem:[#allocation3 + $0x268] sm:$0xff]  ;;  %v9828_v19 = vld [vmem:[#allocation3 + $0x278] sm:$0xff] }
 0x8f1   :  { %3712 = vmatprep.subr.mxu0 %v9813_v45  ;;  %3783 = vmatprep.subr.mxu1 %v9816_v25  ;;  %12676 = vst [vmem:[#allocation108_spill] sm:$0xff] %v9825_v49  ;;  %12677 = vst [vmem:[#allocation181_spill] sm:$0xff] %v9828_v19  ;;  %v9831_v45 = vld [vmem:[#allocation3 + $0x260] sm:$0xff]  ;;  %v9834_v25 = vld [vmem:[#allocation3 + $0x270] sm:$0xff] }
 0x8f2   :  { %3713 = vmatpush1.msra.mxu0 %v9819_v26  ;;  %3784 = vmatpush1.msra.mxu1 %v9822_v20  ;;  %12678 = vst [vmem:[#allocation182_spill] sm:$0xff] %v9831_v45  ;;  %12679 = vst [vmem:[#allocation183_spill] sm:$0xff] %v9834_v25  ;;  %v9837_v26 = vld [vmem:[#allocation3 + $0x228] sm:$0xff]  ;;  %v9840_v20 = vld [vmem:[#allocation3 + $0x238] sm:$0xff] }
 0x8f3   :  { %3714 = vmatprep.subr.mxu0 %v9825_v49  ;;  %3785 = vmatprep.subr.mxu1 %v9828_v19  ;;  %12680 = vst [vmem:[#allocation95_spill] sm:$0xff] %v9837_v26  ;;  %12681 = vst [vmem:[#allocation97_spill] sm:$0xff] %v9840_v20  ;;  %v9843_v49 = vld [vmem:[#allocation3 + $0x220] sm:$0xff]  ;;  %v9846_v19 = vld [vmem:[#allocation3 + $0x230] sm:$0xff] }
 0x8f4   :  { %3715 = vmatpush1.msra.mxu0 %v9831_v45  ;;  %3786 = vmatpush1.msra.mxu1 %v9834_v25  ;;  %12682 = vst [vmem:[#allocation103_spill] sm:$0xff] %v9843_v49  ;;  %12683 = vst [vmem:[#allocation105_spill] sm:$0xff] %v9846_v19  ;;  %v9849_v45 = vld [vmem:[#allocation3 + $0x1e8] sm:$0xff]  ;;  %v9852_v25 = vld [vmem:[#allocation3 + $0x1f8] sm:$0xff] }
 0x8f5   :  { %3716 = vmatprep.subr.mxu0 %v9837_v26  ;;  %3787 = vmatprep.subr.mxu1 %v9840_v20  ;;  %12684 = vst [vmem:[#allocation184_spill] sm:$0xff] %v9849_v45  ;;  %12685 = vst [vmem:[#allocation185_spill] sm:$0xff] %v9852_v25  ;;  %v9855_v26 = vld [vmem:[#allocation3 + $0x1e0] sm:$0xff]  ;;  %v9858_v20 = vld [vmem:[#allocation3 + $0x1f0] sm:$0xff] }
 0x8f6   :  { %3717 = vmatpush1.msra.mxu0 %v9843_v49  ;;  %3788 = vmatpush1.msra.mxu1 %v9846_v19  ;;  %12686 = vst [vmem:[#allocation186_spill] sm:$0xff] %v9855_v26  ;;  %12687 = vst [vmem:[#allocation187_spill] sm:$0xff] %v9858_v20  ;;  %v9861_v49 = vld [vmem:[#allocation3 + $0x1a8] sm:$0xff]  ;;  %v9864_v19 = vld [vmem:[#allocation3 + $0x1b8] sm:$0xff] }
 0x8f7   :  { %3718 = vmatprep.subr.mxu0 %v9849_v45  ;;  %3789 = vmatprep.subr.mxu1 %v9852_v25  ;;  %12688 = vst [vmem:[#allocation188_spill] sm:$0xff] %v9861_v49  ;;  %12689 = vst [vmem:[#allocation189_spill] sm:$0xff] %v9864_v19  ;;  %v9867_v45 = vld [vmem:[#allocation3 + $0x1a0] sm:$0xff]  ;;  %v9870_v25 = vld [vmem:[#allocation3 + $0x1b0] sm:$0xff] }
 0x8f8   :  { %3719 = vmatpush1.msra.mxu0 %v9855_v26  ;;  %3790 = vmatpush1.msra.mxu1 %v9858_v20  ;;  %12690 = vst [vmem:[#allocation190_spill] sm:$0xff] %v9867_v45  ;;  %12691 = vst [vmem:[#allocation191_spill] sm:$0xff] %v9870_v25  ;;  %v9873_v26 = vld [vmem:[#allocation3 + $0x168] sm:$0xff]  ;;  %v9876_v20 = vld [vmem:[#allocation3 + $0x178] sm:$0xff] }
 0x8f9   :  { %3720 = vmatprep.subr.mxu0 %v9861_v49  ;;  %3791 = vmatprep.subr.mxu1 %v9864_v19  ;;  %12692 = vst [vmem:[#allocation192_spill] sm:$0xff] %v9873_v26  ;;  %12693 = vst [vmem:[#allocation193_spill] sm:$0xff] %v9876_v20  ;;  %v9879_v49 = vld [vmem:[#allocation3 + $0x160] sm:$0xff]  ;;  %v9882_v19 = vld [vmem:[#allocation3 + $0x170] sm:$0xff] }
 0x8fa   :  { %3721 = vmatpush1.msra.mxu0 %v9867_v45  ;;  %3792 = vmatpush1.msra.mxu1 %v9870_v25  ;;  %12694 = vst [vmem:[#allocation194_spill] sm:$0xff] %v9879_v49  ;;  %12695 = vst [vmem:[#allocation195_spill] sm:$0xff] %v9882_v19  ;;  %v9885_v45 = vld [vmem:[#allocation3 + $0x128] sm:$0xff]  ;;  %v9888_v25 = vld [vmem:[#allocation3 + $0x138] sm:$0xff] }
 0x8fb   :  { %3722 = vmatprep.subr.mxu0 %v9873_v26  ;;  %3793 = vmatprep.subr.mxu1 %v9876_v20  ;;  %12696 = vst [vmem:[#allocation196_spill] sm:$0xff] %v9885_v45  ;;  %12697 = vst [vmem:[#allocation197_spill] sm:$0xff] %v9888_v25  ;;  %v9891_v26 = vld [vmem:[#allocation3 + $0x120] sm:$0xff]  ;;  %v9894_v20 = vld [vmem:[#allocation3 + $0x130] sm:$0xff] }
 0x8fc   :  { %3723 = vmatpush1.msra.mxu0 %v9879_v49  ;;  %3794 = vmatpush1.msra.mxu1 %v9882_v19  ;;  %12698 = vst [vmem:[#allocation198_spill] sm:$0xff] %v9891_v26  ;;  %12699 = vst [vmem:[#allocation199_spill] sm:$0xff] %v9894_v20  ;;  %v9897_v49 = vld [vmem:[#allocation3 + $0xe8] sm:$0xff]  ;;  %v9900_v19 = vld [vmem:[#allocation3 + $0xf8] sm:$0xff] }
 0x8fd   :  { %3724 = vmatprep.subr.mxu0 %v9885_v45  ;;  %3795 = vmatprep.subr.mxu1 %v9888_v25  ;;  %12700 = vst [vmem:[#allocation200_spill] sm:$0xff] %v9897_v49  ;;  %12701 = vst [vmem:[#allocation201_spill] sm:$0xff] %v9900_v19  ;;  %v9903_v45 = vld [vmem:[#allocation3 + $0xe0] sm:$0xff]  ;;  %v9906_v25 = vld [vmem:[#allocation3 + $0xf0] sm:$0xff] }
 0x8fe   :  { %3725 = vmatpush1.msra.mxu0 %v9891_v26  ;;  %3796 = vmatpush1.msra.mxu1 %v9894_v20  ;;  %12702 = vst [vmem:[#allocation202_spill] sm:$0xff] %v9903_v45  ;;  %12703 = vst [vmem:[#allocation203_spill] sm:$0xff] %v9906_v25  ;;  %v9909_v26 = vld [vmem:[#allocation3 + $0xa8] sm:$0xff]  ;;  %v9912_v20 = vld [vmem:[#allocation3 + $0xb8] sm:$0xff] }
 0x8ff   :  { %3726 = vmatprep.subr.mxu0 %v9897_v49  ;;  %3797 = vmatprep.subr.mxu1 %v9900_v19  ;;  %12704 = vst [vmem:[#allocation204_spill] sm:$0xff] %v9909_v26  ;;  %12705 = vst [vmem:[#allocation205_spill] sm:$0xff] %v9912_v20  ;;  %v9915_v49 = vld [vmem:[#allocation3 + $0xa0] sm:$0xff]  ;;  %v9918_v19 = vld [vmem:[#allocation3 + $0xb0] sm:$0xff] }
 0x900   :  { %3727 = vmatpush1.msra.mxu0 %v9903_v45  ;;  %3798 = vmatpush1.msra.mxu1 %v9906_v25  ;;  %12706 = vst [vmem:[#allocation206_spill] sm:$0xff] %v9915_v49  ;;  %12707 = vst [vmem:[#allocation207_spill] sm:$0xff] %v9918_v19  ;;  %v9921_v45 = vld [vmem:[#allocation3 + $0x68] sm:$0xff]  ;;  %v9924_v25 = vld [vmem:[#allocation3 + $0x78] sm:$0xff] }
 0x901   :  { %3728 = vmatprep.subr.mxu0 %v9909_v26  ;;  %3799 = vmatprep.subr.mxu1 %v9912_v20  ;;  %12708 = vst [vmem:[#allocation208_spill] sm:$0xff] %v9921_v45  ;;  %12709 = vst [vmem:[#allocation209_spill] sm:$0xff] %v9924_v25  ;;  %v9927_v26 = vld [vmem:[#allocation3 + $0x60] sm:$0xff]  ;;  %v9930_v20 = vld [vmem:[#allocation3 + $0x70] sm:$0xff] }
 0x902   :  { %3729 = vmatpush1.msra.mxu0 %v9915_v49  ;;  %3800 = vmatpush1.msra.mxu1 %v9918_v19  ;;  %12710 = vst [vmem:[#allocation210_spill] sm:$0xff] %v9927_v26  ;;  %12711 = vst [vmem:[#allocation211_spill] sm:$0xff] %v9930_v20  ;;  %v9933_v49 = vld [vmem:[#allocation3 + $0x28] sm:$0xff]  ;;  %v9936_v19 = vld [vmem:[#allocation3 + $0x38] sm:$0xff] }
 0x903   :  { %3730 = vmatprep.subr.mxu0 %v9921_v45  ;;  %3801 = vmatprep.subr.mxu1 %v9924_v25  ;;  %12712 = vst [vmem:[#allocation212_spill] sm:$0xff] %v9933_v49  ;;  %12713 = vst [vmem:[#allocation213_spill] sm:$0xff] %v9936_v19  ;;  %v9939_v45 = vld [vmem:[#allocation3 + $0x20] sm:$0xff]  ;;  %v9942_v25 = vld [vmem:[#allocation3 + $0x30] sm:$0xff] }
 0x904   :  { %3731 = vmatpush1.msra.mxu0 %v9927_v26  ;;  %3802 = vmatpush1.msra.mxu1 %v9930_v20  ;;  %12714 = vst [vmem:[#allocation214_spill] sm:$0xff] %v9939_v45  ;;  %12715 = vst [vmem:[#allocation215_spill] sm:$0xff] %v9942_v25  ;;  %v9945_v26 = vld [vmem:[#allocation3 + $0x7e8] sm:$0xff]  ;;  %v9948_v20 = vld [vmem:[#allocation3 + $0x7f8] sm:$0xff] }
 0x905   :  { %3732 = vmatprep.subr.mxu0 %v9933_v49  ;;  %3803 = vmatprep.subr.mxu1 %v9936_v19  ;;  %12716 = vst [vmem:[#allocation216_spill] sm:$0xff] %v9945_v26  ;;  %12717 = vst [vmem:[#allocation217_spill] sm:$0xff] %v9948_v20  ;;  %v9951_v49 = vld [vmem:[#allocation3 + $0x7e0] sm:$0xff]  ;;  %v9954_v19 = vld [vmem:[#allocation3 + $0x7f0] sm:$0xff] }
 0x906   :  { %3733 = vmatpush1.msra.mxu0 %v9939_v45  ;;  %3804 = vmatpush1.msra.mxu1 %v9942_v25  ;;  %12718 = vst [vmem:[#allocation218_spill] sm:$0xff] %v9951_v49  ;;  %12719 = vst [vmem:[#allocation219_spill] sm:$0xff] %v9954_v19  ;;  %v9957_v45 = vld [vmem:[#allocation3 + $0x7a8] sm:$0xff]  ;;  %v9960_v25 = vld [vmem:[#allocation3 + $0x7b8] sm:$0xff] }
 0x907   :  { %3734 = vmatprep.subr.mxu0 %v9945_v26  ;;  %3805 = vmatprep.subr.mxu1 %v9948_v20  ;;  %12720 = vst [vmem:[#allocation220_spill] sm:$0xff] %v9957_v45  ;;  %12721 = vst [vmem:[#allocation221_spill] sm:$0xff] %v9960_v25  ;;  %v9963_v26 = vld [vmem:[#allocation3 + $0x7a0] sm:$0xff]  ;;  %v9966_v20 = vld [vmem:[#allocation3 + $0x7b0] sm:$0xff] }
 0x908   :  { %3735 = vmatpush2.msra.mxu0 %v9951_v49  ;;  %3806 = vmatpush2.msra.mxu1 %v9954_v19  ;;  %12722 = vst [vmem:[#allocation222_spill] sm:$0xff] %v9963_v26  ;;  %12723 = vst [vmem:[#allocation223_spill] sm:$0xff] %v9966_v20  ;;  %v9969_v49 = vld [vmem:[#allocation3 + $0x768] sm:$0xff]  ;;  %v9972_v19 = vld [vmem:[#allocation3 + $0x778] sm:$0xff] }
 0x909   :  { %3736 = vmatprep.subr.mxu0 %v9957_v45  ;;  %3807 = vmatprep.subr.mxu1 %v9960_v25  ;;  %12724 = vst [vmem:[#allocation224_spill] sm:$0xff] %v9969_v49  ;;  %12725 = vst [vmem:[#allocation225_spill] sm:$0xff] %v9972_v19  ;;  %v9975_v45 = vld [vmem:[#allocation3 + $0x760] sm:$0xff]  ;;  %v9978_v25 = vld [vmem:[#allocation3 + $0x770] sm:$0xff] }
 0x90a   :  { %3737 = vmatpush2.msra.mxu0 %v9963_v26  ;;  %3808 = vmatpush2.msra.mxu1 %v9966_v20  ;;  %12726 = vst [vmem:[#allocation226_spill] sm:$0xff] %v9975_v45  ;;  %12727 = vst [vmem:[#allocation227_spill] sm:$0xff] %v9978_v25  ;;  %v9981_v26 = vld [vmem:[#allocation3 + $0x728] sm:$0xff]  ;;  %v9984_v20 = vld [vmem:[#allocation3 + $0x738] sm:$0xff] }
 0x90b   :  { %3738 = vmatprep.subr.mxu0 %v9969_v49  ;;  %3809 = vmatprep.subr.mxu1 %v9972_v19  ;;  %12728 = vst [vmem:[#allocation228_spill] sm:$0xff] %v9981_v26  ;;  %12729 = vst [vmem:[#allocation229_spill] sm:$0xff] %v9984_v20  ;;  %v9987_v49 = vld [vmem:[#allocation3 + $0x720] sm:$0xff]  ;;  %v9990_v19 = vld [vmem:[#allocation3 + $0x730] sm:$0xff] }
 0x90c   :  { %3739 = vmatpush2.msra.mxu0 %v9975_v45  ;;  %3810 = vmatpush2.msra.mxu1 %v9978_v25  ;;  %12730 = vst [vmem:[#allocation230_spill] sm:$0xff] %v9987_v49  ;;  %12731 = vst [vmem:[#allocation231_spill] sm:$0xff] %v9990_v19  ;;  %v9993_v45 = vld [vmem:[#allocation3 + $0x6e8] sm:$0xff]  ;;  %v9996_v25 = vld [vmem:[#allocation3 + $0x6f8] sm:$0xff] }
 0x90d   :  { %3740 = vmatprep.subr.mxu0 %v9981_v26  ;;  %3811 = vmatprep.subr.mxu1 %v9984_v20  ;;  %12732 = vst [vmem:[#allocation232_spill] sm:$0xff] %v9993_v45  ;;  %12733 = vst [vmem:[#allocation233_spill] sm:$0xff] %v9996_v25  ;;  %v9999_v26 = vld [vmem:[#allocation3 + $0x6e0] sm:$0xff]  ;;  %v10002_v20 = vld [vmem:[#allocation3 + $0x6f0] sm:$0xff] }
 0x90e   :  { %3741 = vmatpush2.msra.mxu0 %v9987_v49  ;;  %3812 = vmatpush2.msra.mxu1 %v9990_v19  ;;  %12734 = vst [vmem:[#allocation234_spill] sm:$0xff] %v9999_v26  ;;  %12735 = vst [vmem:[#allocation235_spill] sm:$0xff] %v10002_v20  ;;  %v10005_v49 = vld [vmem:[#allocation3 + $0x6a8] sm:$0xff]  ;;  %v10008_v19 = vld [vmem:[#allocation3 + $0x6b8] sm:$0xff] }
 0x90f   :  { %3742 = vmatprep.subr.mxu0 %v9993_v45  ;;  %3813 = vmatprep.subr.mxu1 %v9996_v25  ;;  %12736 = vst [vmem:[#allocation236_spill] sm:$0xff] %v10005_v49  ;;  %12737 = vst [vmem:[#allocation237_spill] sm:$0xff] %v10008_v19  ;;  %v10011_v45 = vld [vmem:[#allocation3 + $0x6a0] sm:$0xff]  ;;  %v10014_v25 = vld [vmem:[#allocation3 + $0x6b0] sm:$0xff] }
 0x910   :  { %3743 = vmatpush2.msra.mxu0 %v9999_v26  ;;  %3814 = vmatpush2.msra.mxu1 %v10002_v20  ;;  %12738 = vst [vmem:[#allocation238_spill] sm:$0xff] %v10011_v45  ;;  %12739 = vst [vmem:[#allocation239_spill] sm:$0xff] %v10014_v25  ;;  %v10017_v26 = vld [vmem:[#allocation3 + $0x668] sm:$0xff]  ;;  %v10020_v20 = vld [vmem:[#allocation3 + $0x678] sm:$0xff] }
 0x911   :  { %3744 = vmatprep.subr.mxu0 %v10005_v49  ;;  %3815 = vmatprep.subr.mxu1 %v10008_v19  ;;  %12740 = vst [vmem:[#allocation240_spill] sm:$0xff] %v10017_v26  ;;  %12741 = vst [vmem:[#allocation241_spill] sm:$0xff] %v10020_v20  ;;  %v10023_v49 = vld [vmem:[#allocation3 + $0x660] sm:$0xff]  ;;  %v10026_v19 = vld [vmem:[#allocation3 + $0x670] sm:$0xff] }
 0x912   :  { %3745 = vmatpush2.msra.mxu0 %v10011_v45  ;;  %3816 = vmatpush2.msra.mxu1 %v10014_v25  ;;  %12742 = vst [vmem:[#allocation242_spill] sm:$0xff] %v10023_v49  ;;  %12743 = vst [vmem:[#allocation243_spill] sm:$0xff] %v10026_v19  ;;  %v10029_v45 = vld [vmem:[#allocation3 + $0x628] sm:$0xff]  ;;  %v10032_v25 = vld [vmem:[#allocation3 + $0x638] sm:$0xff] }
 0x913   :  { %3746 = vmatprep.subr.mxu0 %v10017_v26  ;;  %3817 = vmatprep.subr.mxu1 %v10020_v20  ;;  %12744 = vst [vmem:[#allocation244_spill] sm:$0xff] %v10029_v45  ;;  %12745 = vst [vmem:[#allocation245_spill] sm:$0xff] %v10032_v25  ;;  %v10035_v26 = vld [vmem:[#allocation3 + $0x620] sm:$0xff]  ;;  %v10038_v20 = vld [vmem:[#allocation3 + $0x630] sm:$0xff] }
 0x914   :  { %3747 = vmatpush2.msra.mxu0 %v10023_v49  ;;  %3818 = vmatpush2.msra.mxu1 %v10026_v19  ;;  %12746 = vst [vmem:[#allocation246_spill] sm:$0xff] %v10035_v26  ;;  %12747 = vst [vmem:[#allocation247_spill] sm:$0xff] %v10038_v20  ;;  %v10041_v49 = vld [vmem:[#allocation3 + $0x5e8] sm:$0xff]  ;;  %v10044_v19 = vld [vmem:[#allocation3 + $0x5f8] sm:$0xff] }
 0x915   :  { %3748 = vmatprep.subr.mxu0 %v10029_v45  ;;  %3819 = vmatprep.subr.mxu1 %v10032_v25  ;;  %12748 = vst [vmem:[#allocation248_spill] sm:$0xff] %v10041_v49  ;;  %12749 = vst [vmem:[#allocation249_spill] sm:$0xff] %v10044_v19  ;;  %v10047_v45 = vld [vmem:[#allocation3 + $0x5e0] sm:$0xff]  ;;  %v10050_v25 = vld [vmem:[#allocation3 + $0x5f0] sm:$0xff] }
 0x916   :  { %3749 = vmatpush2.msra.mxu0 %v10035_v26  ;;  %3820 = vmatpush2.msra.mxu1 %v10038_v20  ;;  %12750 = vst [vmem:[#allocation250_spill] sm:$0xff] %v10047_v45  ;;  %12751 = vst [vmem:[#allocation251_spill] sm:$0xff] %v10050_v25  ;;  %v10053_v26 = vld [vmem:[#allocation3 + $0x5a8] sm:$0xff]  ;;  %v10056_v20 = vld [vmem:[#allocation3 + $0x5b8] sm:$0xff] }
 0x917   :  { %3750 = vmatprep.subr.mxu0 %v10041_v49  ;;  %3821 = vmatprep.subr.mxu1 %v10044_v19  ;;  %12752 = vst [vmem:[#allocation252_spill] sm:$0xff] %v10053_v26  ;;  %12753 = vst [vmem:[#allocation253_spill] sm:$0xff] %v10056_v20  ;;  %v10059_v49 = vld [vmem:[#allocation3 + $0x5a0] sm:$0xff]  ;;  %v10062_v19 = vld [vmem:[#allocation3 + $0x5b0] sm:$0xff] }
 0x918   :  { %3751 = vmatpush2.msra.mxu0 %v10047_v45  ;;  %3822 = vmatpush2.msra.mxu1 %v10050_v25  ;;  %12754 = vst [vmem:[#allocation254_spill] sm:$0xff] %v10059_v49  ;;  %12755 = vst [vmem:[#allocation255_spill] sm:$0xff] %v10062_v19  ;;  %v10065_v45 = vld [vmem:[#allocation3 + $0x568] sm:$0xff]  ;;  %v10068_v25 = vld [vmem:[#allocation3 + $0x578] sm:$0xff] }
 0x919   :  { %3752 = vmatprep.subr.mxu0 %v10053_v26  ;;  %3823 = vmatprep.subr.mxu1 %v10056_v20  ;;  %12756 = vst [vmem:[#allocation256_spill] sm:$0xff] %v10065_v45  ;;  %12757 = vst [vmem:[#allocation257_spill] sm:$0xff] %v10068_v25  ;;  %v10071_v26 = vld [vmem:[#allocation3 + $0x560] sm:$0xff]  ;;  %v10074_v20 = vld [vmem:[#allocation3 + $0x570] sm:$0xff] }
 0x91a   :  { %3753 = vmatpush2.msra.mxu0 %v10059_v49  ;;  %3824 = vmatpush2.msra.mxu1 %v10062_v19  ;;  %12758 = vst [vmem:[#allocation258_spill] sm:$0xff] %v10071_v26  ;;  %12759 = vst [vmem:[#allocation259_spill] sm:$0xff] %v10074_v20  ;;  %v10077_v49 = vld [vmem:[#allocation3 + $0x528] sm:$0xff]  ;;  %v10080_v19 = vld [vmem:[#allocation3 + $0x538] sm:$0xff] }
 0x91b   :  { %3754 = vmatprep.subr.mxu0 %v10065_v45  ;;  %3825 = vmatprep.subr.mxu1 %v10068_v25  ;;  %12760 = vst [vmem:[#allocation260_spill] sm:$0xff] %v10077_v49  ;;  %12761 = vst [vmem:[#allocation261_spill] sm:$0xff] %v10080_v19  ;;  %v10083_v45 = vld [vmem:[#allocation3 + $0x520] sm:$0xff]  ;;  %v10086_v25 = vld [vmem:[#allocation3 + $0x530] sm:$0xff] }
 0x91c   :  { %3755 = vmatpush2.msra.mxu0 %v10071_v26  ;;  %3826 = vmatpush2.msra.mxu1 %v10074_v20  ;;  %12762 = vst [vmem:[#allocation262_spill] sm:$0xff] %v10083_v45  ;;  %12763 = vst [vmem:[#allocation263_spill] sm:$0xff] %v10086_v25  ;;  %v10089_v26 = vld [vmem:[#allocation3 + $0x4e8] sm:$0xff]  ;;  %v10092_v20 = vld [vmem:[#allocation3 + $0x4f8] sm:$0xff] }
 0x91d   :  { %3756 = vmatprep.subr.mxu0 %v10077_v49  ;;  %3827 = vmatprep.subr.mxu1 %v10080_v19  ;;  %12764 = vst [vmem:[#allocation264_spill] sm:$0xff] %v10089_v26  ;;  %12765 = vst [vmem:[#allocation265_spill] sm:$0xff] %v10092_v20  ;;  %v10095_v49 = vld [vmem:[#allocation3 + $0x4e0] sm:$0xff]  ;;  %v10098_v19 = vld [vmem:[#allocation3 + $0x4f0] sm:$0xff] }
 0x91e   :  { %3757 = vmatpush2.msra.mxu0 %v10083_v45  ;;  %3828 = vmatpush2.msra.mxu1 %v10086_v25  ;;  %12766 = vst [vmem:[#allocation266_spill] sm:$0xff] %v10095_v49  ;;  %12767 = vst [vmem:[#allocation267_spill] sm:$0xff] %v10098_v19  ;;  %v10101_v45 = vld [vmem:[#allocation3 + $0x4a8] sm:$0xff]  ;;  %v10104_v25 = vld [vmem:[#allocation3 + $0x4b8] sm:$0xff] }
 0x91f   :  { %3758 = vmatprep.subr.mxu0 %v10089_v26  ;;  %3829 = vmatprep.subr.mxu1 %v10092_v20  ;;  %12768 = vst [vmem:[#allocation268_spill] sm:$0xff] %v10101_v45  ;;  %12769 = vst [vmem:[#allocation269_spill] sm:$0xff] %v10104_v25  ;;  %v10107_v26 = vld [vmem:[#allocation3 + $0x4a0] sm:$0xff]  ;;  %v10110_v20 = vld [vmem:[#allocation3 + $0x4b0] sm:$0xff] }
 0x920   :  { %3759 = vmatpush2.msra.mxu0 %v10095_v49  ;;  %3830 = vmatpush2.msra.mxu1 %v10098_v19  ;;  %12770 = vst [vmem:[#allocation270_spill] sm:$0xff] %v10107_v26  ;;  %12771 = vst [vmem:[#allocation271_spill] sm:$0xff] %v10110_v20  ;;  %v10113_v49 = vld [vmem:[#allocation3 + $0x468] sm:$0xff]  ;;  %v10116_v19 = vld [vmem:[#allocation3 + $0x478] sm:$0xff] }
 0x921   :  { %3760 = vmatprep.subr.mxu0 %v10101_v45  ;;  %3831 = vmatprep.subr.mxu1 %v10104_v25  ;;  %12772 = vst [vmem:[#allocation272_spill] sm:$0xff] %v10113_v49  ;;  %12773 = vst [vmem:[#allocation273_spill] sm:$0xff] %v10116_v19  ;;  %v10119_v45 = vld [vmem:[#allocation3 + $0x460] sm:$0xff]  ;;  %v10122_v25 = vld [vmem:[#allocation3 + $0x470] sm:$0xff] }
 0x922   :  { %3761 = vmatpush2.msra.mxu0 %v10107_v26  ;;  %3832 = vmatpush2.msra.mxu1 %v10110_v20  ;;  %12774 = vst [vmem:[#allocation274_spill] sm:$0xff] %v10119_v45  ;;  %12775 = vst [vmem:[#allocation275_spill] sm:$0xff] %v10122_v25  ;;  %v10125_v26 = vld [vmem:[#allocation3 + $0x428] sm:$0xff]  ;;  %v10128_v20 = vld [vmem:[#allocation3 + $0x438] sm:$0xff] }
 0x923   :  { %3762 = vmatprep.subr.mxu0 %v10113_v49  ;;  %3833 = vmatprep.subr.mxu1 %v10116_v19  ;;  %12776 = vst [vmem:[#allocation276_spill] sm:$0xff] %v10125_v26  ;;  %12777 = vst [vmem:[#allocation277_spill] sm:$0xff] %v10128_v20  ;;  %v10131_v49 = vld [vmem:[#allocation3 + $0x420] sm:$0xff]  ;;  %v10134_v19 = vld [vmem:[#allocation3 + $0x430] sm:$0xff] }
 0x924   :  { %3763 = vmatpush2.msra.mxu0 %v10119_v45  ;;  %3834 = vmatpush2.msra.mxu1 %v10122_v25  ;;  %12778 = vst [vmem:[#allocation278_spill] sm:$0xff] %v10131_v49  ;;  %12779 = vst [vmem:[#allocation279_spill] sm:$0xff] %v10134_v19  ;;  %v5576_v25 = vld [vmem:[#allocation3 + $0x3c8] sm:$0xff]  ;;  %v5577_v45 = vld [vmem:[#allocation3 + $0x3d8] sm:$0xff] }
 0x925   :  { %3764 = vmatprep.subr.mxu0 %v10125_v26  ;;  %3835 = vmatprep.subr.mxu1 %v10128_v20  ;;  %v5578_v26 = vld [vmem:[#allocation3 + $0x3c0] sm:$0xff]  ;;  %v5580_v20 = vld [vmem:[#allocation3 + $0x388] sm:$0xff] }
 0x926   :  { %3765 = vmatpush2.msra.mxu0 %v10131_v49  ;;  %3836 = vmatpush2.msra.mxu1 %v10134_v19  ;;  %v5582_v49 = vld [vmem:[#allocation3 + $0x380] sm:$0xff]  ;;  %v5584_v19 = vld [vmem:[#allocation3 + $0x348] sm:$0xff] }
 0x927   :  { %3767 = vmatmul.mubr.f32.vlgmr.msra.gmra.mxu0 %v9753_v48  ;;  %3838 = vmatmul.mubr.f32.vlgmr.msra.gmra.mxu1 %v9753_v48  ;;  %v5586_v48 = vld [vmem:[#allocation3 + $0x340] sm:$0xff] }
 0x928   :  { %3927 = vmatprep.subr.mxu0 %v5576_v25  ;;  %3998 = vmatprep.subr.mxu1 %v5577_v45  ;;  %v5587_v25 = vld [vmem:[#allocation3 + $0x350] sm:$0xff] }
 0x929   :  { %3928 = vmatpush1.msra.mxu0 %v5578_v26  ;;  %3999 = vmatpush1.msra.mxu1 %v5579_v63  ;;  %v12822_v63 = vld [vmem:[#allocation142_spill] sm:$0xff]  ;;  %v12825_v45 = vld [vmem:[#allocation145_spill] sm:$0xff] }
 0x92a   :  { %3929 = vmatprep.subr.mxu0 %v5580_v20  ;;  %4000 = vmatprep.subr.mxu1 %v5581_v23  ;;  %v12821_v23 = vld [vmem:[#allocation141_spill] sm:$0xff]  ;;  %v12826_v26 = vld [vmem:[#allocation146_spill] sm:$0xff]  ;;  %v12827_v20 = vld [vmem:[#allocation147_spill] sm:$0xff] }
 0x92b   :  { %3930 = vmatpush1.msra.mxu0 %v5582_v49  ;;  %4001 = vmatpush1.msra.mxu1 %v5583_v34  ;;  %v12820_v34 = vld [vmem:[#allocation140_spill] sm:$0xff]  ;;  %v12823_v49 = vld [vmem:[#allocation143_spill] sm:$0xff] }
 0x92c   :  { %3931 = vmatprep.subr.mxu0 %v5584_v19  ;;  %4002 = vmatprep.subr.mxu1 %v5585_v57  ;;  %v12819_v57 = vld [vmem:[#allocation139_spill] sm:$0xff]  ;;  %v12824_v19 = vld [vmem:[#allocation144_spill] sm:$0xff] }
 0x92d   :  { %3932 = vmatpush1.msra.mxu0 %v5586_v48  ;;  %4003 = vmatpush1.msra.mxu1 %v5587_v25  ;;  %v12828_v48 = vld [vmem:[#allocation148_spill] sm:$0xff]  ;;  %v12829_v25 = vld [vmem:[#allocation149_spill] sm:$0xff] }
 0x92e   :  { %3933 = vmatprep.subr.mxu0 %v9384_v61  ;;  %4004 = vmatprep.subr.mxu1 %v9387_v59  ;;  %v12780_v61 = vld [vmem:[#allocation292_spill] sm:$0xff]  ;;  %v12781_v59 = vld [vmem:[#allocation293_spill] sm:$0xff] }
 0x92f   :  { %3934 = vmatpush1.msra.mxu0 %v9390_v33  ;;  %4005 = vmatpush1.msra.mxu1 %v9393_v27  ;;  %v12782_v33 = vld [vmem:[#allocation294_spill] sm:$0xff]  ;;  %v12783_v27 = vld [vmem:[#allocation295_spill] sm:$0xff] }
 0x930   :  { %3935 = vmatprep.subr.mxu0 %v9396_v6  ;;  %4006 = vmatprep.subr.mxu1 %v9399_v32  ;;  %v12784_v6 = vld [vmem:[#allocation296_spill] sm:$0xff]  ;;  %v12785_v32 = vld [vmem:[#allocation297_spill] sm:$0xff] }
 0x931   :  { %3936 = vmatpush1.msra.mxu0 %v9402_v28  ;;  %4007 = vmatpush1.msra.mxu1 %v9405_v16  ;;  %v12786_v28 = vld [vmem:[#allocation298_spill] sm:$0xff]  ;;  %v12787_v16 = vld [vmem:[#allocation299_spill] sm:$0xff] }
 0x932   :  { %3937 = vmatprep.subr.mxu0 %v9408_v43  ;;  %4008 = vmatprep.subr.mxu1 %v9411_v4  ;;  %v12788_v43 = vld [vmem:[#allocation300_spill] sm:$0xff]  ;;  %v12789_v4 = vld [vmem:[#allocation301_spill] sm:$0xff] }
 0x933   :  { %3938 = vmatpush1.msra.mxu0 %v9414_v40  ;;  %4009 = vmatpush1.msra.mxu1 %v9417_v22  ;;  %v12790_v40 = vld [vmem:[#allocation110_spill] sm:$0xff]  ;;  %v12791_v22 = vld [vmem:[#allocation111_spill] sm:$0xff] }
 0x934   :  { %3939 = vmatprep.subr.mxu0 %v9420_v39  ;;  %4010 = vmatprep.subr.mxu1 %v9423_v62  ;;  %v12792_v39 = vld [vmem:[#allocation112_spill] sm:$0xff]  ;;  %v12793_v62 = vld [vmem:[#allocation113_spill] sm:$0xff] }
 0x935   :  { %3940 = vmatpush1.msra.mxu0 %v9426_v46  ;;  %4011 = vmatpush1.msra.mxu1 %v9429_v2  ;;  %v12794_v46 = vld [vmem:[#allocation114_spill] sm:$0xff]  ;;  %v12795_v2 = vld [vmem:[#allocation115_spill] sm:$0xff] }
 0x936   :  { %3941 = vmatprep.subr.mxu0 %v9432_v17  ;;  %4012 = vmatprep.subr.mxu1 %v9435_v21  ;;  %v12796_v17 = vld [vmem:[#allocation116_spill] sm:$0xff]  ;;  %v12797_v21 = vld [vmem:[#allocation117_spill] sm:$0xff] }
 0x937   :  { %3942 = vmatpush1.msra.mxu0 %v9438_v1  ;;  %4013 = vmatpush1.msra.mxu1 %v9441_v38  ;;  %v12798_v1 = vld [vmem:[#allocation118_spill] sm:$0xff]  ;;  %v12799_v38 = vld [vmem:[#allocation119_spill] sm:$0xff] }
 0x938   :  { %3943 = vmatprep.subr.mxu0 %v9444_v8  ;;  %4014 = vmatprep.subr.mxu1 %v9447_v9  ;;  %v12800_v8 = vld [vmem:[#allocation120_spill] sm:$0xff]  ;;  %v12801_v9 = vld [vmem:[#allocation121_spill] sm:$0xff] }
 0x939   :  { %3944 = vmatpush1.msra.mxu0 %v9450_v10  ;;  %4015 = vmatpush1.msra.mxu1 %v9453_v11  ;;  %v12802_v10 = vld [vmem:[#allocation122_spill] sm:$0xff]  ;;  %v12803_v11 = vld [vmem:[#allocation123_spill] sm:$0xff] }
 0x93a   :  { %3945 = vmatprep.subr.mxu0 %v9456_v12  ;;  %4016 = vmatprep.subr.mxu1 %v9459_v14  ;;  %v12804_v12 = vld [vmem:[#allocation124_spill] sm:$0xff]  ;;  %v12805_v14 = vld [vmem:[#allocation125_spill] sm:$0xff] }
 0x93b   :  { %3946 = vmatpush1.msra.mxu0 %v9462_v15  ;;  %4017 = vmatpush1.msra.mxu1 %v9465_v24  ;;  %v12806_v15 = vld [vmem:[#allocation126_spill] sm:$0xff]  ;;  %v12807_v24 = vld [vmem:[#allocation127_spill] sm:$0xff] }
 0x93c   :  { %3947 = vmatprep.subr.mxu0 %v9468_v29  ;;  %4018 = vmatprep.subr.mxu1 %v9471_v30  ;;  %v12808_v29 = vld [vmem:[#allocation128_spill] sm:$0xff]  ;;  %v12809_v30 = vld [vmem:[#allocation129_spill] sm:$0xff] }
 0x93d   :  { %3948 = vmatpush1.msra.mxu0 %v9474_v31  ;;  %4019 = vmatpush1.msra.mxu1 %v9477_v50  ;;  %v12810_v31 = vld [vmem:[#allocation130_spill] sm:$0xff]  ;;  %v12811_v50 = vld [vmem:[#allocation131_spill] sm:$0xff] }
 0x93e   :  { %3949 = vmatprep.subr.mxu0 %v9480_v51  ;;  %4020 = vmatprep.subr.mxu1 %v9483_v52  ;;  %v12812_v51 = vld [vmem:[#allocation132_spill] sm:$0xff]  ;;  %v12813_v52 = vld [vmem:[#allocation133_spill] sm:$0xff] }
 0x93f   :  { %3950 = vmatpush1.msra.mxu0 %v9486_v53  ;;  %4021 = vmatpush1.msra.mxu1 %v9489_v55  ;;  %v12814_v53 = vld [vmem:[#allocation134_spill] sm:$0xff]  ;;  %v12815_v55 = vld [vmem:[#allocation135_spill] sm:$0xff] }
 0x940   :  { %3951 = vmatprep.subr.mxu0 %v9492_v56  ;;  %4022 = vmatprep.subr.mxu1 %v9495_v13  ;;  %v12816_v56 = vld [vmem:[#allocation136_spill] sm:$0xff]  ;;  %v12817_v13 = vld [vmem:[#allocation137_spill] sm:$0xff] }
 0x941   :  { %3952 = vmatpush1.msra.mxu0 %v9498_v42  ;;  %4023 = vmatpush1.msra.mxu1 %v12780_v61  ;;  %v12818_v42 = vld [vmem:[#allocation138_spill] sm:$0xff] }
 0x942   :  { %3953 = vmatprep.subr.mxu0 %v12781_v59  ;;  %4024 = vmatprep.subr.mxu1 %v12782_v33  ;;  %v12830_v61 = vld [vmem:[#allocation150_spill] sm:$0xff]  ;;  %v12831_v59 = vld [vmem:[#allocation151_spill] sm:$0xff]  ;;  %v12832_v33 = vld [vmem:[#allocation152_spill] sm:$0xff] }
 0x943   :  { %3954 = vmatpush1.msra.mxu0 %v12783_v27  ;;  %4025 = vmatpush1.msra.mxu1 %v12784_v6  ;;  %v12833_v27 = vld [vmem:[#allocation153_spill] sm:$0xff]  ;;  %v12834_v6 = vld [vmem:[#allocation154_spill] sm:$0xff] }
 0x944   :  { %3955 = vmatprep.subr.mxu0 %v12785_v32  ;;  %4026 = vmatprep.subr.mxu1 %v12786_v28  ;;  %v12835_v32 = vld [vmem:[#allocation155_spill] sm:$0xff]  ;;  %v12836_v28 = vld [vmem:[#allocation156_spill] sm:$0xff] }
 0x945   :  { %3956 = vmatpush1.msra.mxu0 %v12787_v16  ;;  %4027 = vmatpush1.msra.mxu1 %v12788_v43  ;;  %v12837_v16 = vld [vmem:[#allocation157_spill] sm:$0xff]  ;;  %v12838_v43 = vld [vmem:[#allocation158_spill] sm:$0xff] }
 0x946   :  { %3957 = vmatprep.subr.mxu0 %v12789_v4  ;;  %4028 = vmatprep.subr.mxu1 %v12790_v40  ;;  %v12839_v4 = vld [vmem:[#allocation159_spill] sm:$0xff]  ;;  %v12840_v40 = vld [vmem:[#allocation160_spill] sm:$0xff] }
 0x947   :  { %3958 = vmatpush1.msra.mxu0 %v12791_v22  ;;  %4029 = vmatpush1.msra.mxu1 %v12792_v39  ;;  %v12841_v22 = vld [vmem:[#allocation161_spill] sm:$0xff]  ;;  %v12842_v39 = vld [vmem:[#allocation162_spill] sm:$0xff] }
 0x948   :  { %3959 = vmatprep.subr.mxu0 %v12793_v62  ;;  %4030 = vmatprep.subr.mxu1 %v12794_v46  ;;  %v12843_v62 = vld [vmem:[#allocation163_spill] sm:$0xff]  ;;  %v12844_v46 = vld [vmem:[#allocation164_spill] sm:$0xff] }
 0x949   :  { %3960 = vmatpush2.msra.mxu0 %v12795_v2  ;;  %4031 = vmatpush2.msra.mxu1 %v12796_v17  ;;  %v12845_v2 = vld [vmem:[#allocation165_spill] sm:$0xff]  ;;  %v12846_v17 = vld [vmem:[#allocation166_spill] sm:$0xff] }
 0x94a   :  { %3961 = vmatprep.subr.mxu0 %v12797_v21  ;;  %4032 = vmatprep.subr.mxu1 %v12798_v1  ;;  %v12847_v21 = vld [vmem:[#allocation167_spill] sm:$0xff]  ;;  %v12848_v1 = vld [vmem:[#allocation168_spill] sm:$0xff] }
 0x94b   :  { %3962 = vmatpush2.msra.mxu0 %v12799_v38  ;;  %4033 = vmatpush2.msra.mxu1 %v12800_v8  ;;  %v12849_v38 = vld [vmem:[#allocation169_spill] sm:$0xff]  ;;  %v12850_v8 = vld [vmem:[#allocation170_spill] sm:$0xff] }
 0x94c   :  { %3963 = vmatprep.subr.mxu0 %v12801_v9  ;;  %4034 = vmatprep.subr.mxu1 %v12802_v10  ;;  %v12851_v9 = vld [vmem:[#allocation171_spill] sm:$0xff]  ;;  %v12852_v10 = vld [vmem:[#allocation172_spill] sm:$0xff] }
 0x94d   :  { %3964 = vmatpush2.msra.mxu0 %v12803_v11  ;;  %4035 = vmatpush2.msra.mxu1 %v12804_v12  ;;  %v12853_v11 = vld [vmem:[#allocation173_spill] sm:$0xff]  ;;  %v12854_v12 = vld [vmem:[#allocation174_spill] sm:$0xff] }
 0x94e   :  { %3965 = vmatprep.subr.mxu0 %v12805_v14  ;;  %4036 = vmatprep.subr.mxu1 %v12806_v15  ;;  %v12855_v14 = vld [vmem:[#allocation175_spill] sm:$0xff]  ;;  %v12856_v15 = vld [vmem:[#allocation93_spill] sm:$0xff] }
 0x94f   :  { %3966 = vmatpush2.msra.mxu0 %v12807_v24  ;;  %4037 = vmatpush2.msra.mxu1 %v12808_v29  ;;  %v12857_v24 = vld [vmem:[#allocation94_spill] sm:$0xff]  ;;  %v12858_v29 = vld [vmem:[#allocation96_spill] sm:$0xff] }
 0x950   :  { %3967 = vmatprep.subr.mxu0 %v12809_v30  ;;  %4038 = vmatprep.subr.mxu1 %v12810_v31 }
 0x951   :  { %3968 = vmatpush2.msra.mxu0 %v12811_v50  ;;  %4039 = vmatpush2.msra.mxu1 %v12812_v51 }
 0x952   :  { %3969 = vmatprep.subr.mxu0 %v12813_v52  ;;  %4040 = vmatprep.subr.mxu1 %v12814_v53 }
 0x953   :  { %3970 = vmatpush2.msra.mxu0 %v12815_v55  ;;  %4041 = vmatpush2.msra.mxu1 %v12816_v56 }
 0x954   :  { %3971 = vmatprep.subr.mxu0 %v12817_v13  ;;  %4042 = vmatprep.subr.mxu1 %v12818_v42  ;;  %v12859_v42 = vld [vmem:[#allocation99_spill] sm:$0xff] }
 0x955   :  { %3972 = vmatpush2.msra.mxu0 %v12819_v57  ;;  %4043 = vmatpush2.msra.mxu1 %v12820_v34  ;;  %v12860_v57 = vld [vmem:[#allocation101_spill] sm:$0xff] }
 0x956   :  { %3973 = vmatprep.subr.mxu0 %v12821_v23  ;;  %4044 = vmatprep.subr.mxu1 %v12822_v63  ;;  %v12861_v34 = vcombine.low %v12859_v42, %v12860_v57 }
 0x957   :  { %3974 = vmatpush2.msra.mxu0 %v12823_v49  ;;  %4045 = vmatpush2.msra.mxu1 %v12824_v19 }
 0x958   :  { %3975 = vmatprep.subr.mxu0 %v12825_v45  ;;  %4046 = vmatprep.subr.mxu1 %v12826_v26 }
 0x959   :  { %3976 = vmatpush2.msra.mxu0 %v12827_v20  ;;  %4047 = vmatpush2.msra.mxu1 %v12828_v48 }
 0x95a   :  { %3977 = vmatprep.subr.mxu0 %v12829_v25  ;;  %4048 = vmatprep.subr.mxu1 %v12830_v61 }
 0x95b   :  { %3978 = vmatpush2.msra.mxu0 %v12831_v59  ;;  %4049 = vmatpush2.msra.mxu1 %v12832_v33 }
 0x95c   :  { %3979 = vmatprep.subr.mxu0 %v12833_v27  ;;  %4050 = vmatprep.subr.mxu1 %v12834_v6  ;;  %v12862_v6 = vld [vmem:[#allocation107_spill] sm:$0xff] }
 0x95d   :  { %3980 = vmatpush2.msra.mxu0 %v12835_v32  ;;  %4051 = vmatpush2.msra.mxu1 %v12836_v28  ;;  %v12863_v32 = vld [vmem:[#allocation109_spill] sm:$0xff] }
 0x95e   :  { %3981 = vmatprep.subr.mxu0 %v12837_v16  ;;  %4052 = vmatprep.subr.mxu1 %v12838_v43  ;;  %v12864_v28 = vcombine.low %v12862_v6, %v12863_v32 }
 0x95f   :  { %3982 = vmatpush2.msra.mxu0 %v12839_v4  ;;  %4053 = vmatpush2.msra.mxu1 %v12840_v40 }
 0x960   :  { %3983 = vmatprep.subr.mxu0 %v12841_v22  ;;  %4054 = vmatprep.subr.mxu1 %v12842_v39 }
 0x961   :  { %3984 = vmatpush2.msra.mxu0 %v12843_v62  ;;  %4055 = vmatpush2.msra.mxu1 %v12844_v46 }
 0x962   :  { %3985 = vmatprep.subr.mxu0 %v12845_v2  ;;  %4056 = vmatprep.subr.mxu1 %v12846_v17 }
 0x963   :  { %3986 = vmatpush2.msra.mxu0 %v12847_v21  ;;  %4057 = vmatpush2.msra.mxu1 %v12848_v1 }
 0x964   :  { %3987 = vmatprep.subr.mxu0 %v12849_v38  ;;  %4058 = vmatprep.subr.mxu1 %v12850_v8 }
 0x965   :  { %3988 = vmatpush2.msra.mxu0 %v12851_v9  ;;  %4059 = vmatpush2.msra.mxu1 %v12852_v10 }
 0x966   :  { %3989 = vmatprep.subr.mxu0 %v12853_v11  ;;  %4060 = vmatprep.subr.mxu1 %v12854_v12  ;;  %v12878_v11 = vld [vmem:[#allocation183_spill] sm:$0xff] }
 0x967   :  { %3990 = vmatpush2.msra.mxu0 %v12855_v14  ;;  %4061 = vmatpush2.msra.mxu1 %v12856_v15  ;;  %v12879_v12 = vld [vmem:[#allocation95_spill] sm:$0xff]  ;;  %v12880_v14 = vld [vmem:[#allocation97_spill] sm:$0xff] }
 0x968   :  { %4069 = vmatprep.subr.mxu0 %v12857_v24  ;;  %4140 = vmatprep.subr.mxu1 %v12858_v29  ;;  %v12881_v15 = vld [vmem:[#allocation103_spill] sm:$0xff]  ;;  %v12882_v24 = vld [vmem:[#allocation105_spill] sm:$0xff]  ;;  %v12883_v29 = vld [vmem:[#allocation184_spill] sm:$0xff] }
 0x9a6   :  { %v3626_v30 = vpop.f32.mrf.mxu0  ;;  %v3697_v31 = vpop.f32.mrf.mxu1 }
 0x9a8   :  { %v3628_v50 = vpop.f32.mrf.mxu0  ;;  %v3699_v51 = vpop.f32.mrf.mxu1 }
 0x9a9   :  { %v3852_v52 = vcombine.low %v3626_v30, %v3628_v50  ;;  %v3853_v53 = vcombine.low %v3697_v31, %v3699_v51  ;;  %v12884_v30 = vld [vmem:[#allocation185_spill] sm:$0xff]  ;;  %v12885_v31 = vld [vmem:[#allocation186_spill] sm:$0xff]  ;;  %v12886_v50 = vld [vmem:[#allocation187_spill] sm:$0xff] }
 0x9aa   :  { %v12887_v51 = vld [vmem:[#allocation188_spill] sm:$0xff] }
 0x9ab   :  { %v3860_v55 = vrot.slane %v3852_v52, %v11660_v54  ;;  %v3867_v56 = vrot.slane %v3853_v53, %v11660_v54  ;;  %v12888_v52 = vld [vmem:[#allocation189_spill] sm:$0xff]  ;;  %v12889_v53 = vld [vmem:[#allocation190_spill] sm:$0xff] }
 0x9ad   :  { %v3868_v13 = vcombine.low %v3860_v55, %v3867_v56  ;;  %v12890_v55 = vld [vmem:[#allocation191_spill] sm:$0xff]  ;;  %v12891_v56 = vld [vmem:[#allocation192_spill] sm:$0xff] }
 0x9af   :  { %v3888_v23 = vadd.f32 %v3868_v13, %v12861_v34  ;;  %v12892_v13 = vld [vmem:[#allocation193_spill] sm:$0xff]  ;;  %v12893_v34 = vld [vmem:[#allocation194_spill] sm:$0xff] }
 0x9b1   :  { %v4660_v63 = vmul.f32 -1.442695, %v3888_v23  ;;  %v12894_v23 = vld [vmem:[#allocation195_spill] sm:$0xff] }
 0x9b3   :  { %4784 = vpow2.f32 %v4660_v63  ;;  %v12895_v63 = vld [vmem:[#allocation196_spill] sm:$0xff] }
 0x9c0   :  { %v4785_v49 = vpop.eup %4784 }
 0x9c1   :  { %v3893_v26 = vadd.f32 1.0, %v4785_v49  ;;  %v12896_v49 = vld [vmem:[#allocation197_spill] sm:$0xff] }
 0x9c3   :  { %4786 = vrcp.f32 %v3893_v26  ;;  %v12899_v26 = vld [vmem:[#allocation200_spill] sm:$0xff] }
 0x9d0   :  { %v4787_v40 = vpop.eup %4786 }
 0x9d1   :  { %v3907_v22 = vrot.slane %v4787_v40, 4 }
 0x9d3   :  { %v3909_v62 = vmul.f32 %v3907_v22, %v9749_v44  ;;  %v12865_v44 = vld [vmem:[#allocation102_spill] sm:$0xff]  ;;  %v12912_v22 = vld [vmem:[#allocation213_spill] sm:$0xff] }
 0x9e7   :  { %v3768_v19 = vpop.f32.mrf.mxu0  ;;  %v3839_v45 = vpop.f32.mrf.mxu1 }
 0x9e9   :  { %v3770_v20 = vpop.f32.mrf.mxu0  ;;  %v3841_v48 = vpop.f32.mrf.mxu1 }
 0x9ea   :  { %v3869_v25 = vcombine.low %v3768_v19, %v3770_v20  ;;  %v3870_v61 = vcombine.low %v3839_v45, %v3841_v48  ;;  %v12897_v19 = vld [vmem:[#allocation198_spill] sm:$0xff]  ;;  %v12898_v45 = vld [vmem:[#allocation199_spill] sm:$0xff]  ;;  %v12900_v20 = vld [vmem:[#allocation201_spill] sm:$0xff] }
 0x9eb   :  { %v12901_v48 = vld [vmem:[#allocation202_spill] sm:$0xff] }
 0x9ec   :  { %v3877_v59 = vrot.slane %v3869_v25, %v11660_v54  ;;  %v3884_v33 = vrot.slane %v3870_v61, %v11660_v54  ;;  %v12902_v25 = vld [vmem:[#allocation203_spill] sm:$0xff]  ;;  %v12903_v61 = vld [vmem:[#allocation204_spill] sm:$0xff] }
 0x9ee   :  { %v3885_v27 = vcombine.low %v3877_v59, %v3884_v33  ;;  %v12904_v59 = vld [vmem:[#allocation205_spill] sm:$0xff]  ;;  %v12905_v33 = vld [vmem:[#allocation206_spill] sm:$0xff] }
 0x9f0   :  { %v3889_v16 = vadd.f32 %v3885_v27, %v12864_v28  ;;  %v12906_v27 = vld [vmem:[#allocation207_spill] sm:$0xff]  ;;  %v12907_v28 = vld [vmem:[#allocation208_spill] sm:$0xff] }
 0x9f2   :  { %4788 = vtanh.f32 %v3889_v16  ;;  %v3898_v43 = vrot.slane %v3889_v16, 4  ;;  %v12908_v16 = vld [vmem:[#allocation209_spill] sm:$0xff] }
 0x9f4   :  { %v4661_v4 = vmul.f32 -1.442695, %v3898_v43  ;;  %v12909_v43 = vld [vmem:[#allocation210_spill] sm:$0xff] }
 0x9f6   :  { %4790 = vpow2.f32 %v4661_v4  ;;  %v12910_v4 = vld [vmem:[#allocation211_spill] sm:$0xff] }
 0x9ff   :  { %v4789_v39 = vpop.eup %4788 }
 0xa00   :  { %v3910_v46 = vmul.f32 %v4789_v39, %v4787_v40  ;;  %v12911_v40 = vld [vmem:[#allocation212_spill] sm:$0xff]  ;;  %v12913_v39 = vld [vmem:[#allocation214_spill] sm:$0xff] }
 0xa02   :  { %v10268_v2 = vadd.f32 %v3910_v46, %v3909_v62  ;;  %v12914_v62 = vld [vmem:[#allocation215_spill] sm:$0xff]  ;;  %v12915_v46 = vld [vmem:[#allocation216_spill] sm:$0xff] }
 0xa03   :  { %v4791_v17 = vpop.eup %4790 }
 0xa04   :  { %v3903_v21 = vadd.f32 1.0, %v4791_v17  ;;  %4792 = vtanh.f32 %v10268_v2  ;;  %v12916_v17 = vld [vmem:[#allocation217_spill] sm:$0xff] }
 0xa06   :  { %4794 = vrcp.f32 %v3903_v21  ;;  %v12917_v21 = vld [vmem:[#allocation218_spill] sm:$0xff] }
 0xa11   :  { %v4793_v1 = vpop.eup %4792 }
 0xa13   :  { %v4795_v38 = vpop.eup %4794 }
 0xa14   :  { %v3913_v8 = vmul.f32 %v4795_v38, %v4793_v1  ;;  %v12918_v1 = vld [vmem:[#allocation219_spill] sm:$0xff]  ;;  %v12919_v38 = vld [vmem:[#allocation220_spill] sm:$0xff] }
 0xa16   :  { %v10272_v9 = vrot.slane %v3913_v8, %v11660_v54  ;;  %v12920_v8 = vld [vmem:[#allocation221_spill] sm:$0xff] }
 0xa18   :  { %v3924_v10 = vcombine.high %v10272_v9, %v10272_v9 }
 0xa1a   :  { %3991 = vmatprep.mubr.f32.mxu0 %v3924_v10  ;;  %4062 = vmatprep.mubr.f32.mxu1 %v3924_v10 }
 0xa1b   :  { %3992 = vmatmul.mubr.f32.vlgmr.msra.gmra.mxu0 %v10272_v9  ;;  %4063 = vmatmul.mubr.f32.vlgmr.msra.gmra.mxu1 %v10272_v9 }
 0xa1c   :  { %4070 = vmatpush1.msra.mxu0 %v9759_v60  ;;  %4141 = vmatpush1.msra.mxu1 %v9762_v58  ;;  %v12866_v60 = vld [vmem:[#allocation104_spill] sm:$0xff] }
 0xa1d   :  { %4071 = vmatprep.subr.mxu0 %v9765_v41  ;;  %4133 = vmatprep.mubr.f32.mxu0 %v3924_v10  ;;  %v12867_v58 = vld [vmem:[#allocation176_spill] sm:$0xff]  ;;  %v12868_v41 = vld [vmem:[#allocation177_spill] sm:$0xff] }
 0xa1e   :  { %4142 = vmatprep.subr.mxu1 %v9768_v3  ;;  %4204 = vmatprep.mubr.f32.mxu1 %v3924_v10  ;;  %v12869_v3 = vld [vmem:[#allocation178_spill] sm:$0xff] }
 0xa1f   :  { %4072 = vmatpush1.msra.mxu0 %v9771_v47  ;;  %4143 = vmatpush1.msra.mxu1 %v9774_v7  ;;  %v12870_v47 = vld [vmem:[#allocation179_spill] sm:$0xff]  ;;  %v12871_v7 = vld [vmem:[#allocation180_spill] sm:$0xff]  ;;  %v12921_v10 = vld [vmem:[#allocation222_spill] sm:$0xff] }
 0xa20   :  { %4073 = vmatprep.subr.mxu0 %v9777_v36  ;;  %4144 = vmatprep.subr.mxu1 %v9780_v5  ;;  %v12872_v36 = vld [vmem:[#allocation98_spill] sm:$0xff]  ;;  %v12873_v5 = vld [vmem:[#allocation100_spill] sm:$0xff] }
 0xa21   :  { %4074 = vmatpush1.msra.mxu0 %v9783_v35  ;;  %4145 = vmatpush1.msra.mxu1 %v9786_v18  ;;  %v12874_v35 = vld [vmem:[#allocation106_spill] sm:$0xff]  ;;  %v12875_v18 = vld [vmem:[#allocation108_spill] sm:$0xff] }
 0xa22   :  { %4075 = vmatprep.subr.mxu0 %v9789_v0  ;;  %4146 = vmatprep.subr.mxu1 %v9792_v37  ;;  %v12876_v0 = vld [vmem:[#allocation181_spill] sm:$0xff]  ;;  %v12877_v37 = vld [vmem:[#allocation182_spill] sm:$0xff] }
 0xa23   :  { %4076 = vmatpush1.msra.mxu0 %v12865_v44  ;;  %4147 = vmatpush1.msra.mxu1 %v12866_v60  ;;  %v12922_v44 = vld [vmem:[#allocation223_spill] sm:$0xff]  ;;  %v12923_v60 = vld [vmem:[#allocation224_spill] sm:$0xff] }
 0xa24   :  { %4077 = vmatprep.subr.mxu0 %v12867_v58  ;;  %4148 = vmatprep.subr.mxu1 %v12868_v41  ;;  %v12924_v58 = vld [vmem:[#allocation225_spill] sm:$0xff]  ;;  %v12925_v41 = vld [vmem:[#allocation226_spill] sm:$0xff] }
 0xa25   :  { %4078 = vmatpush1.msra.mxu0 %v12869_v3  ;;  %4149 = vmatpush1.msra.mxu1 %v12870_v47  ;;  %v12926_v3 = vld [vmem:[#allocation227_spill] sm:$0xff]  ;;  %v12927_v47 = vld [vmem:[#allocation228_spill] sm:$0xff] }
 0xa26   :  { %4079 = vmatprep.subr.mxu0 %v12871_v7  ;;  %4150 = vmatprep.subr.mxu1 %v12872_v36  ;;  %v12928_v7 = vld [vmem:[#allocation229_spill] sm:$0xff]  ;;  %v12929_v36 = vld [vmem:[#allocation230_spill] sm:$0xff] }
 0xa27   :  { %4080 = vmatpush1.msra.mxu0 %v12873_v5  ;;  %4151 = vmatpush1.msra.mxu1 %v12874_v35  ;;  %v12930_v5 = vld [vmem:[#allocation231_spill] sm:$0xff]  ;;  %v12931_v35 = vld [vmem:[#allocation232_spill] sm:$0xff] }
 0xa28   :  { %4081 = vmatprep.subr.mxu0 %v12875_v18  ;;  %4152 = vmatprep.subr.mxu1 %v12876_v0  ;;  %v12932_v18 = vld [vmem:[#allocation233_spill] sm:$0xff]  ;;  %v12933_v0 = vld [vmem:[#allocation234_spill] sm:$0xff] }
 0xa29   :  { %4082 = vmatpush1.msra.mxu0 %v12877_v37  ;;  %4153 = vmatpush1.msra.mxu1 %v12878_v11  ;;  %v12934_v37 = vld [vmem:[#allocation235_spill] sm:$0xff]  ;;  %v12935_v11 = vld [vmem:[#allocation236_spill] sm:$0xff] }
 0xa2a   :  { %4083 = vmatprep.subr.mxu0 %v12879_v12  ;;  %4154 = vmatprep.subr.mxu1 %v12880_v14  ;;  %v12936_v12 = vld [vmem:[#allocation237_spill] sm:$0xff]  ;;  %v12937_v14 = vld [vmem:[#allocation238_spill] sm:$0xff] }
 0xa2b   :  { %4084 = vmatpush1.msra.mxu0 %v12881_v15  ;;  %4155 = vmatpush1.msra.mxu1 %v12882_v24  ;;  %v12938_v15 = vld [vmem:[#allocation239_spill] sm:$0xff]  ;;  %v12939_v24 = vld [vmem:[#allocation240_spill] sm:$0xff] }
 0xa2c   :  { %4085 = vmatprep.subr.mxu0 %v12883_v29  ;;  %4156 = vmatprep.subr.mxu1 %v12884_v30  ;;  %v12940_v29 = vld [vmem:[#allocation241_spill] sm:$0xff]  ;;  %v12941_v30 = vld [vmem:[#allocation242_spill] sm:$0xff] }
 0xa2d   :  { %4086 = vmatpush1.msra.mxu0 %v12885_v31  ;;  %4157 = vmatpush1.msra.mxu1 %v12886_v50  ;;  %v12942_v31 = vld [vmem:[#allocation243_spill] sm:$0xff]  ;;  %v12943_v50 = vld [vmem:[#allocation244_spill] sm:$0xff] }
 0xa2e   :  { %4087 = vmatprep.subr.mxu0 %v12887_v51  ;;  %4158 = vmatprep.subr.mxu1 %v12888_v52  ;;  %v12944_v51 = vld [vmem:[#allocation245_spill] sm:$0xff]  ;;  %v12945_v52 = vld [vmem:[#allocation246_spill] sm:$0xff] }
 0xa2f   :  { %4088 = vmatpush1.msra.mxu0 %v12889_v53  ;;  %4159 = vmatpush1.msra.mxu1 %v12890_v55  ;;  %v12946_v53 = vld [vmem:[#allocation247_spill] sm:$0xff]  ;;  %v12947_v55 = vld [vmem:[#allocation248_spill] sm:$0xff] }
 0xa30   :  { %4089 = vmatprep.subr.mxu0 %v12891_v56  ;;  %4160 = vmatprep.subr.mxu1 %v12892_v13  ;;  %v12948_v56 = vld [vmem:[#allocation249_spill] sm:$0xff]  ;;  %v12949_v13 = vld [vmem:[#allocation250_spill] sm:$0xff] }
 0xa31   :  { %4090 = vmatpush1.msra.mxu0 %v12893_v34  ;;  %4161 = vmatpush1.msra.mxu1 %v12894_v23  ;;  %v12950_v34 = vld [vmem:[#allocation251_spill] sm:$0xff]  ;;  %v12951_v23 = vld [vmem:[#allocation252_spill] sm:$0xff] }
 0xa32   :  { %4091 = vmatprep.subr.mxu0 %v12895_v63  ;;  %4162 = vmatprep.subr.mxu1 %v12896_v49  ;;  %v12952_v63 = vld [vmem:[#allocation253_spill] sm:$0xff]  ;;  %v12953_v49 = vld [vmem:[#allocation254_spill] sm:$0xff] }
 0xa33   :  { %4092 = vmatpush1.msra.mxu0 %v12897_v19  ;;  %4163 = vmatpush1.msra.mxu1 %v12898_v45  ;;  %v12954_v19 = vld [vmem:[#allocation255_spill] sm:$0xff]  ;;  %v12955_v45 = vld [vmem:[#allocation256_spill] sm:$0xff] }
 0xa34   :  { %4093 = vmatprep.subr.mxu0 %v12899_v26  ;;  %4164 = vmatprep.subr.mxu1 %v12900_v20  ;;  %v12956_v26 = vld [vmem:[#allocation257_spill] sm:$0xff]  ;;  %v12957_v20 = vld [vmem:[#allocation258_spill] sm:$0xff] }
 0xa35   :  { %4094 = vmatpush1.msra.mxu0 %v12901_v48  ;;  %4165 = vmatpush1.msra.mxu1 %v12902_v25  ;;  %v12958_v48 = vld [vmem:[#allocation259_spill] sm:$0xff]  ;;  %v12959_v25 = vld [vmem:[#allocation260_spill] sm:$0xff] }
 0xa36   :  { %4095 = vmatprep.subr.mxu0 %v12903_v61  ;;  %4166 = vmatprep.subr.mxu1 %v12904_v59  ;;  %v12960_v61 = vld [vmem:[#allocation261_spill] sm:$0xff]  ;;  %v12961_v59 = vld [vmem:[#allocation262_spill] sm:$0xff] }
 0xa37   :  { %4096 = vmatpush1.msra.mxu0 %v12905_v33  ;;  %4167 = vmatpush1.msra.mxu1 %v12906_v27  ;;  %v12962_v33 = vld [vmem:[#allocation263_spill] sm:$0xff]  ;;  %v12963_v27 = vld [vmem:[#allocation264_spill] sm:$0xff] }
 0xa38   :  { %4097 = vmatprep.subr.mxu0 %v12907_v28  ;;  %4168 = vmatprep.subr.mxu1 %v12908_v16  ;;  %v12964_v28 = vld [vmem:[#allocation265_spill] sm:$0xff]  ;;  %v12965_v16 = vld [vmem:[#allocation266_spill] sm:$0xff] }
 0xa39   :  { %4098 = vmatpush1.msra.mxu0 %v12909_v43  ;;  %4169 = vmatpush1.msra.mxu1 %v12910_v4  ;;  %v12966_v43 = vld [vmem:[#allocation267_spill] sm:$0xff]  ;;  %v12967_v4 = vld [vmem:[#allocation268_spill] sm:$0xff] }
 0xa3a   :  { %4099 = vmatprep.subr.mxu0 %v12911_v40  ;;  %4170 = vmatprep.subr.mxu1 %v12912_v22  ;;  %v12968_v40 = vld [vmem:[#allocation269_spill] sm:$0xff]  ;;  %v12969_v22 = vld [vmem:[#allocation270_spill] sm:$0xff] }
 0xa3b   :  { %4100 = vmatpush1.msra.mxu0 %v12913_v39  ;;  %4171 = vmatpush1.msra.mxu1 %v12914_v62  ;;  %v12970_v39 = vld [vmem:[#allocation271_spill] sm:$0xff]  ;;  %v12971_v62 = vld [vmem:[#allocation272_spill] sm:$0xff] }
 0xa3c   :  { %4101 = vmatprep.subr.mxu0 %v12915_v46  ;;  %4172 = vmatprep.subr.mxu1 %v12916_v17  ;;  %v12972_v46 = vld [vmem:[#allocation273_spill] sm:$0xff]  ;;  %v12973_v17 = vld [vmem:[#allocation274_spill] sm:$0xff] }
 0xa3d   :  { %4102 = vmatpush2.msra.mxu0 %v12917_v21  ;;  %4173 = vmatpush2.msra.mxu1 %v12918_v1  ;;  %v12974_v21 = vld [vmem:[#allocation275_spill] sm:$0xff]  ;;  %v12975_v1 = vld [vmem:[#allocation276_spill] sm:$0xff] }
 0xa3e   :  { %4103 = vmatprep.subr.mxu0 %v12919_v38  ;;  %4174 = vmatprep.subr.mxu1 %v12920_v8  ;;  %v12976_v38 = vld [vmem:[#allocation277_spill] sm:$0xff]  ;;  %v12977_v8 = vld [vmem:[#allocation278_spill] sm:$0xff] }
 0xa3f   :  { %4104 = vmatpush2.msra.mxu0 %v12921_v10  ;;  %4175 = vmatpush2.msra.mxu1 %v12922_v44  ;;  %v12978_v10 = vld [vmem:[#allocation279_spill] sm:$0xff] }
 0xa40   :  { %4105 = vmatprep.subr.mxu0 %v12923_v60  ;;  %4176 = vmatprep.subr.mxu1 %v12924_v58 }
 0xa41   :  { %4106 = vmatpush2.msra.mxu0 %v12925_v41  ;;  %4177 = vmatpush2.msra.mxu1 %v12926_v3 }
 0xa42   :  { %4107 = vmatprep.subr.mxu0 %v12927_v47  ;;  %4178 = vmatprep.subr.mxu1 %v12928_v7 }
 0xa43   :  { %4108 = vmatpush2.msra.mxu0 %v12929_v36  ;;  %4179 = vmatpush2.msra.mxu1 %v12930_v5 }
 0xa44   :  { %4109 = vmatprep.subr.mxu0 %v12931_v35  ;;  %4180 = vmatprep.subr.mxu1 %v12932_v18  ;;  %v12979_v35 = vcombine.high %v12859_v42, %v12860_v57  ;;  %v12980_v42 = vcombine.high %v12862_v6, %v12863_v32 }
 0xa45   :  { %4110 = vmatpush2.msra.mxu0 %v12933_v0  ;;  %4181 = vmatpush2.msra.mxu1 %v12934_v37 }
 0xa46   :  { %4111 = vmatprep.subr.mxu0 %v12935_v11  ;;  %4182 = vmatprep.subr.mxu1 %v12936_v12 }
 0xa47   :  { %4112 = vmatpush2.msra.mxu0 %v12937_v14  ;;  %4183 = vmatpush2.msra.mxu1 %v12938_v15 }
 0xa48   :  { %4113 = vmatprep.subr.mxu0 %v12939_v24  ;;  %4184 = vmatprep.subr.mxu1 %v12940_v29 }
 0xa49   :  { %4114 = vmatpush2.msra.mxu0 %v12941_v30  ;;  %4185 = vmatpush2.msra.mxu1 %v12942_v31 }
 0xa4a   :  { %4115 = vmatprep.subr.mxu0 %v12943_v50  ;;  %4186 = vmatprep.subr.mxu1 %v12944_v51 }
 0xa4b   :  { %4116 = vmatpush2.msra.mxu0 %v12945_v52  ;;  %4187 = vmatpush2.msra.mxu1 %v12946_v53 }
 0xa4c   :  { %4117 = vmatprep.subr.mxu0 %v12947_v55  ;;  %4188 = vmatprep.subr.mxu1 %v12948_v56 }
 0xa4d   :  { %4118 = vmatpush2.msra.mxu0 %v12949_v13  ;;  %4189 = vmatpush2.msra.mxu1 %v12950_v34 }
 0xa4e   :  { %4119 = vmatprep.subr.mxu0 %v12951_v23  ;;  %4190 = vmatprep.subr.mxu1 %v12952_v63 }
 0xa4f   :  { %4120 = vmatpush2.msra.mxu0 %v12953_v49  ;;  %4191 = vmatpush2.msra.mxu1 %v12954_v19 }
 0xa50   :  { %4121 = vmatprep.subr.mxu0 %v12955_v45  ;;  %4192 = vmatprep.subr.mxu1 %v12956_v26 }
 0xa51   :  { %4122 = vmatpush2.msra.mxu0 %v12957_v20  ;;  %4193 = vmatpush2.msra.mxu1 %v12958_v48 }
 0xa52   :  { %4123 = vmatprep.subr.mxu0 %v12959_v25  ;;  %4194 = vmatprep.subr.mxu1 %v12960_v61 }
 0xa53   :  { %4124 = vmatpush2.msra.mxu0 %v12961_v59  ;;  %4195 = vmatpush2.msra.mxu1 %v12962_v33 }
 0xa54   :  { %4125 = vmatprep.subr.mxu0 %v12963_v27  ;;  %4196 = vmatprep.subr.mxu1 %v12964_v28 }
 0xa55   :  { %4126 = vmatpush2.msra.mxu0 %v12965_v16  ;;  %4197 = vmatpush2.msra.mxu1 %v12966_v43 }
 0xa56   :  { %4127 = vmatprep.subr.mxu0 %v12967_v4  ;;  %4198 = vmatprep.subr.mxu1 %v12968_v40 }
 0xa57   :  { %4128 = vmatpush2.msra.mxu0 %v12969_v22  ;;  %4199 = vmatpush2.msra.mxu1 %v12970_v39 }
 0xa58   :  { %4129 = vmatprep.subr.mxu0 %v12971_v62  ;;  %4200 = vmatprep.subr.mxu1 %v12972_v46 }
 0xa59   :  { %4130 = vmatpush2.msra.mxu0 %v12973_v17  ;;  %4201 = vmatpush2.msra.mxu1 %v12974_v21 }
 0xa5a   :  { %4131 = vmatprep.subr.mxu0 %v12975_v1  ;;  %4202 = vmatprep.subr.mxu1 %v12976_v38 }
 0xa5b   :  { %4132 = vmatpush2.msra.mxu0 %v12977_v8  ;;  %4203 = vmatpush2.msra.mxu1 %v12978_v10 }
 0xa5c   :  { %4134 = vmatmul.mubr.f32.vlgmr.msra.gmra.mxu0 %v10272_v9  ;;  %4205 = vmatmul.mubr.f32.vlgmr.msra.gmra.mxu1 %v10272_v9 }
 0xadb   :  { %v3993_v44 = vpop.f32.mrf.mxu0  ;;  %v4064_v60 = vpop.f32.mrf.mxu1 }
 0xadd   :  { %v3995_v58 = vpop.f32.mrf.mxu0  ;;  %v4066_v41 = vpop.f32.mrf.mxu1 }
 0xade   :  { %v4219_v3 = vcombine.low %v3993_v44, %v3995_v58  ;;  %v4220_v47 = vcombine.low %v4064_v60, %v4066_v41 }
 0xae0   :  { %v4227_v7 = vrot.slane %v4219_v3, %v11660_v54  ;;  %v4234_v36 = vrot.slane %v4220_v47, %v11660_v54 }
 0xae2   :  { %v4235_v5 = vcombine.low %v4227_v7, %v4234_v36 }
 0xae4   :  { %v4255_v18 = vadd.f32 %v4235_v5, %v12979_v35 }
 0xae6   :  { %v4662_v0 = vmul.f32 -1.442695, %v4255_v18 }
 0xae8   :  { %4796 = vpow2.f32 %v4662_v0 }
 0xaf5   :  { %v4797_v37 = vpop.eup %4796 }
 0xaf6   :  { %v4260_v12 = vadd.f32 1.0, %v4797_v37 }
 0xaf8   :  { %4798 = vrcp.f32 %v4260_v12 }
 0xb05   :  { %v4799_v53 = vpop.eup %4798 }
 0xb06   :  { %v4274_v55 = vrot.slane %v4799_v53, 4 }
 0xb08   :  { %v4276_v13 = vmul.f32 %v4274_v55, %v10268_v2 }
 0xb1c   :  { %v4135_v11 = vpop.f32.mrf.mxu0  ;;  %v4206_v9 = vpop.f32.mrf.mxu1 }
 0xb1e   :  { %v4137_v14 = vpop.f32.mrf.mxu0  ;;  %v4208_v15 = vpop.f32.mrf.mxu1 }
 0xb1f   :  { %v4236_v24 = vcombine.low %v4135_v11, %v4137_v14  ;;  %v4237_v29 = vcombine.low %v4206_v9, %v4208_v15 }
 0xb21   :  { %v4244_v30 = vrot.slane %v4236_v24, %v11660_v54  ;;  %v4251_v31 = vrot.slane %v4237_v29, %v11660_v54 }
 0xb23   :  { %v4252_v50 = vcombine.low %v4244_v30, %v4251_v31 }
 0xb25   :  { %v4256_v57 = vadd.f32 %v4252_v50, %v12980_v42 }
 0xb27   :  { %4800 = vtanh.f32 %v4256_v57  ;;  %v4265_v51 = vrot.slane %v4256_v57, 4 }
 0xb29   :  { %v4663_v52 = vmul.f32 -1.442695, %v4265_v51 }
 0xb2b   :  { %4802 = vpow2.f32 %v4663_v52 }
 0xb34   :  { %v4801_v56 = vpop.eup %4800 }
 0xb35   :  { %v4277_v34 = vmul.f32 %v4801_v56, %v4799_v53 }
 0xb37   :  { %v4278_v23 = vadd.f32 %v4277_v34, %v4276_v13 }
 0xb38   :  { %v4803_v63 = vpop.eup %4802 }
 0xb39   :  { %v4270_v49 = vadd.f32 1.0, %v4803_v63  ;;  %4804 = vtanh.f32 %v4278_v23 }
 0xb3b   :  { %4806 = vrcp.f32 %v4270_v49 }
 0xb46   :  { %v4805_v19 = vpop.eup %4804 }
 0xb48   :  { %v4807_v45 = vpop.eup %4806 }
 0xb49   :  { %v4280_v26 = vmul.f32 %v4807_v45, %v4805_v19 }
 0xb4a   :  { %5656 = dma.done.wait [#allocation8 + $0x1], 4096 }
 0xb4b   :  { %5657 = vsyncadd [#allocation8 + $0x1], 4294963200 }
 0xb4c   :  { %5658 = dma.done.wait [#allocation8 + $0x2], 16 }
 0xb4d   :  { %5659 = vsyncadd [#allocation8 + $0x2], 4294967280 }
 0xb4e   :  { %5660 = dma.done.wait [#allocation8 + $0x3], 4096 }
 0xb4f   :  { %5661 = vsyncadd [#allocation8 + $0x3], 4294963200  ;;  %v12981_v6 = vld [vmem:[#allocation59_spill] sm:$0xff]  ;;  %v10419_v32 = vrot.slane %v4280_v26, %v11660_v54 }
 0xb50   :  { %4670 = vmatprep.subr.mxu0 %v12981_v6  ;;  %v12982_v2 = vld [vmem:[#allocation91_spill] sm:$0xff] }
 0xb51   :  { %4459 = vmatprep.subr.mxu1 %v12982_v2 }
 0xb52   :  { %5662 = dma.done.wait [#allocation8 + $0x4], 32 }
 0xb53   :  { %5663 = vsyncadd [#allocation8 + $0x4], 4294967264  ;;  %v12983_v20 = vld [vmem:[#allocation43_spill] sm:$0xff]  ;;  %v12984_v48 = vld [vmem:[#allocation90_spill] sm:$0xff]  ;;  %v4341_v61 = vcombine.high %v10419_v32, %v10419_v32  ;;  %vm4543_vm2 = vcmask 1041408   ;;  %vm4544_vm3 = vcmask 224258  }
 0xb54   :  { %4671 = vmatpush3.msra.mxu0 %v12983_v20  ;;  %4460 = vmatpush1.msra.mxu1 %v12984_v48  ;;  %v12985_v25 = vld [vmem:[#allocation58_spill] sm:$0xff]  ;;  %v12986_v59 = vld [vmem:[#allocation89_spill] sm:$0xff]  ;;  %v12988_v27 = vld [vmem:[#allocation88_spill] sm:$0xff]  ;;  %v13045_v48 = vmov 0.0   ;;  %s5672_s2 = smov [#allocation12]  }
 0xb55   :  { %4672 = vmatprep.subr.mxu0 %v12985_v25  ;;  %4461 = vmatprep.subr.mxu1 %v12986_v59  ;;  %v12987_v33 = vld [vmem:[#allocation42_spill] sm:$0xff]  ;;  %v12989_v28 = vld [vmem:[#allocation57_spill] sm:$0xff]  ;;  %v12991_v43 = vld [vmem:[#allocation87_spill] sm:$0xff]  ;;  %s4553_s28 = sshll.u32 %s5672_s2, 4  ;;  %s4554_s28 = int_to_ptr.vmem [resolvable:$true] %s4553_s28 }
 0xb56   :  { %4673 = vmatpush3.msra.mxu0 %v12987_v33  ;;  %4462 = vmatpush1.msra.mxu1 %v12988_v27  ;;  %v12990_v16 = vld [vmem:[#allocation41_spill] sm:$0xff]  ;;  %v12992_v4 = vld [vmem:[#allocation56_spill] sm:$0xff]  ;;  %v12993_v40 = vld [vmem:[#allocation86_spill] sm:$0xff]  ;;  %s5632_s29 = scalar_lea.vmem %s4554_s28, 64  ;;  %p5637_p11 = scmp.lt.s32.totalorder %s4554_s28, %s4554_s28 }
 0xb57   :  { %4674 = vmatprep.subr.mxu0 %v12989_v28  ;;  %4408 = vmatprep.mubr.f32.mxu0 %v4341_v61  ;;  %v12994_v22 = vld [vmem:[#allocation40_spill] sm:$0xff]  ;;  %v12995_v39 = vld [vmem:[#allocation85_spill] sm:$0xff]  ;;  %v12996_v62 = vld [vmem:[#allocation55_spill] sm:$0xff]  ;;  %p5633_p10 = scmp.ne.s32.totalorder %s4554_s28, %s5632_s29  ;;  %p5638_p12 = scmp.lt.s32.totalorder %s5632_s29, %s5632_s29 }
 0xb58   :  { %4675 = vmatpush3.msra.mxu0 %v12990_v16  ;;  %4463 = vmatprep.subr.mxu1 %v12991_v43  ;;  %v12997_v46 = vld [vmem:[#allocation84_spill] sm:$0xff]  ;;  %v12998_v17 = vld [vmem:[#allocation39_spill] sm:$0xff]  ;;  %v13000_v1 = vld [vmem:[#allocation54_spill] sm:$0xff] }
 0xb59   :  { %4676 = vmatprep.subr.mxu0 %v12992_v4  ;;  %4464 = vmatpush1.msra.mxu1 %v12993_v40  ;;  %v12999_v21 = vld [vmem:[#allocation83_spill] sm:$0xff]  ;;  %v13001_v38 = vld [vmem:[#allocation82_spill] sm:$0xff]  ;;  %v13003_v10 = vld [vmem:[#allocation81_spill] sm:$0xff]  ;;  %p5639_p13 = por %p5638_p12, %p5637_p11 }
 0xb5a   :  { %4677 = vmatpush3.msra.mxu0 %v12994_v22  ;;  %4465 = vmatprep.subr.mxu1 %v12995_v39  ;;  %v13002_v8 = vld [vmem:[#allocation38_spill] sm:$0xff]  ;;  %v13004_v44 = vld [vmem:[#allocation53_spill] sm:$0xff]  ;;  %v13005_v60 = vld [vmem:[#allocation80_spill] sm:$0xff] }
 0xb5b   :  { %4678 = vmatprep.subr.mxu0 %v12996_v62  ;;  %4466 = vmatpush1.msra.mxu1 %v12997_v46  ;;  %v13006_v58 = vld [vmem:[#allocation37_spill] sm:$0xff]  ;;  %v13007_v41 = vld [vmem:[#allocation79_spill] sm:$0xff]  ;;  %v13008_v3 = vld [vmem:[#allocation52_spill] sm:$0xff]  ;;  %p5640_p0 = pnand %p5639_p13, %p5633_p10 }
 0xb5c   :  { %4679 = vmatpush3.msra.mxu0 %v12998_v17  ;;  %4467 = vmatprep.subr.mxu1 %v12999_v21  ;;  %v13009_v47 = vld [vmem:[#allocation78_spill] sm:$0xff]  ;;  %v13010_v7 = vld [vmem:[#allocation36_spill] sm:$0xff]  ;;  %v13011_v36 = vld [vmem:[#allocation77_spill] sm:$0xff] }
 0xb5d   :  { %4680 = vmatprep.subr.mxu0 %v13000_v1  ;;  %4468 = vmatpush1.msra.mxu1 %v13001_v38  ;;  %v13012_v5 = vld [vmem:[#allocation51_spill] sm:$0xff]  ;;  %v13013_v35 = vld [vmem:[#allocation76_spill] sm:$0xff]  ;;  %v13016_v37 = vld [vmem:[#allocation50_spill] sm:$0xff] }
 0xb5e   :  { %4681 = vmatpush3.msra.mxu0 %v13002_v8  ;;  %4469 = vmatprep.subr.mxu1 %v13003_v10  ;;  %v13014_v18 = vld [vmem:[#allocation35_spill] sm:$0xff]  ;;  %v13017_v11 = vld [vmem:[#allocation74_spill] sm:$0xff]  ;;  %v13019_v12 = vld [vmem:[#allocation73_spill] sm:$0xff] }
 0xb5f   :  { %4682 = vmatprep.subr.mxu0 %v13004_v44  ;;  %4470 = vmatpush1.msra.mxu1 %v13005_v60  ;;  %v13015_v0 = vld [vmem:[#allocation75_spill] sm:$0xff]  ;;  %v13018_v9 = vld [vmem:[#allocation34_spill] sm:$0xff]  ;;  %v13020_v14 = vld [vmem:[#allocation49_spill] sm:$0xff] }
 0xb60   :  { %4683 = vmatpush3.msra.mxu0 %v13006_v58  ;;  %4471 = vmatprep.subr.mxu1 %v13007_v41  ;;  %v13021_v15 = vld [vmem:[#allocation72_spill] sm:$0xff]  ;;  %v13022_v24 = vld [vmem:[#allocation33_spill] sm:$0xff]  ;;  %v13023_v29 = vld [vmem:[#allocation71_spill] sm:$0xff] }
 0xb61   :  { %4684 = vmatprep.subr.mxu0 %v13008_v3  ;;  %4472 = vmatpush1.msra.mxu1 %v13009_v47  ;;  %v13024_v30 = vld [vmem:[#allocation48_spill] sm:$0xff]  ;;  %v13025_v31 = vld [vmem:[#allocation70_spill] sm:$0xff]  ;;  %v13027_v42 = vld [vmem:[#allocation69_spill] sm:$0xff] }
 0xb62   :  { %4685 = vmatpush3.msra.mxu0 %v13010_v7  ;;  %4473 = vmatprep.subr.mxu1 %v13011_v36  ;;  %v13026_v50 = vld [vmem:[#allocation32_spill] sm:$0xff]  ;;  %v13028_v57 = vld [vmem:[#allocation47_spill] sm:$0xff]  ;;  %v13032_v55 = vld [vmem:[#allocation46_spill] sm:$0xff] }
 0xb63   :  { %4686 = vmatprep.subr.mxu0 %v13012_v5  ;;  %4474 = vmatpush1.msra.mxu1 %v13013_v35  ;;  %v13029_v51 = vld [vmem:[#allocation68_spill] sm:$0xff]  ;;  %v13030_v52 = vld [vmem:[#allocation31_spill] sm:$0xff]  ;;  %v13033_v56 = vld [vmem:[#allocation66_spill] sm:$0xff] }
 0xb64   :  { %4687 = vmatpush3.msra.mxu0 %v13014_v18  ;;  %4475 = vmatprep.subr.mxu1 %v13015_v0  ;;  %v13031_v53 = vld [vmem:[#allocation67_spill] sm:$0xff]  ;;  %v13034_v13 = vld [vmem:[#allocation30_spill] sm:$0xff]  ;;  %v13035_v34 = vld [vmem:[#allocation65_spill] sm:$0xff] }
 0xb65   :  { %4688 = vmatprep.subr.mxu0 %v13016_v37  ;;  %4476 = vmatpush1.msra.mxu1 %v13017_v11  ;;  %v13036_v23 = vld [vmem:[#allocation45_spill] sm:$0xff]  ;;  %v13037_v63 = vld [vmem:[#allocation64_spill] sm:$0xff]  ;;  %v13039_v19 = vld [vmem:[#allocation63_spill] sm:$0xff] }
 0xb66   :  { %4689 = vmatpush3.msra.mxu0 %v13018_v9  ;;  %4477 = vmatprep.subr.mxu1 %v13019_v12  ;;  %v13038_v49 = vld [vmem:[#allocation29_spill] sm:$0xff]  ;;  %v13040_v45 = vld [vmem:[#allocation44_spill] sm:$0xff]  ;;  %v13041_v26 = vld [vmem:[#allocation62_spill] sm:$0xff] }
 0xb67   :  { %4690 = vmatprep.subr.mxu0 %v13020_v14  ;;  %4478 = vmatpush1.msra.mxu1 %v13021_v15  ;;  %v13042_v6 = vld [vmem:[#allocation28_spill] sm:$0xff]  ;;  %v13043_v2 = vld [vmem:[#allocation61_spill] sm:$0xff]  ;;  %v4664_v61 = vld [vmem:[#allocation5] ss:$0 sm:$0xff] }
 0xb68   :  { %4691 = vmatpush3.msra.mxu0 %v13022_v24  ;;  %4479 = vmatprep.subr.mxu1 %v13023_v29  ;;  %v13044_v20 = vld [vmem:[#allocation60_spill] sm:$0xff]  ;;  %v4447_v16 = vld [vmem:[#allocation7] sm:$0x3]  ;;  %vm4545_vm4 = vmor %vm4544_vm3, %vm4543_vm2 }
 0xb69   :  { %4692 = vmatprep.subr.mxu0 %v13024_v30  ;;  %4480 = vmatpush1.msra.mxu1 %v13025_v31  ;;  %v13046_v43 = vld [vmem:[#allocation92_spill] sm:$0xff] }
 0xb6a   :  { %4693 = vmatpush3.msra.mxu0 %v13026_v50  ;;  %4481 = vmatprep.subr.mxu1 %v13027_v42  ;;  %v13047_v4 = vsub.s32 0, %v13046_v43  ;;  %v13048_v22 = vsub.s32 1, %v13046_v43 }
 0xb6b   :  { %4694 = vmatprep.subr.mxu0 %v13028_v57  ;;  %4482 = vmatpush1.msra.mxu1 %v13029_v51 }
 0xb6c   :  { %4695 = vmatpush3.msra.mxu0 %v13030_v52  ;;  %4483 = vmatprep.subr.mxu1 %v13031_v53  ;;  %v4452_v40 = vrot.slane %v4447_v16, %v13047_v4  ;;  %v4456_v39 = vrot.slane %v4447_v16, %v13048_v22 }
 0xb6d   :  { %4696 = vmatprep.subr.mxu0 %v13032_v55  ;;  %4484 = vmatpush1.msra.mxu1 %v13033_v56 }
 0xb6e   :  { %4697 = vmatpush3.msra.mxu0 %v13034_v13  ;;  %4485 = vmatprep.subr.mxu1 %v13035_v34 }
 0xb6f   :  { %4698 = vmatprep.subr.mxu0 %v13036_v23  ;;  %4486 = vmatpush1.msra.mxu1 %v13037_v63 }
 0xb70   :  { %4699 = vmatpush3.msra.mxu0 %v13038_v49  ;;  %4487 = vmatprep.subr.mxu1 %v13039_v19 }
 0xb71   :  { %4700 = vmatprep.subr.mxu0 %v13040_v45  ;;  %4488 = vmatpush1.msra.mxu1 %v13041_v26 }
 0xb72   :  { %4701 = vmatpush3.msra.mxu0 %v13042_v6  ;;  %4489 = vmatprep.subr.mxu1 %v13043_v2 }
 0xb73   :  { %4409 = vmatmul.mubr.f32.vlgmr.msra.gmra.mxu0 %v10419_v32  ;;  %4490 = vmatpush1.msra.mxu1 %v13044_v20 }
 0xb74   :  { %4523 = vmatprep.mubr.f32.mxu1 %v13045_v48 }
 0xc33   :  { %v4702_v25 = vpop.f32.mrf.mxu0 }
 0xc35   :  { %v4703_v59 = vpop.f32.mrf.mxu0 }
 0xc36   :  { %v4704_v33 = vadd.f32 %v4703_v59, %v4702_v25 }
 0xc38   :  { %v4411_v27 = vadd.f32 %v4704_v33, %v4664_v61 }
 0xc3a   :  { %v4414_v28 = vmax.f32 %v4411_v27, 0.0 }
 0xc3c   :  { %4524 = vmatmul.mubr.f32.vlgmr.msra.gmra.mxu1 %v4414_v28 }
 0xcfc   :  { %v4525_v62 = vpop.f32.mrf.mxu1 }
 0xcfd   :  { %v4526_v32 = vadd.f32 %v4525_v62, %v4452_v40 }
 0xcfe   :  { %v4527_v46 = vpop.f32.mrf.mxu1 }
 0xcff   :  { %v4528_v17 = vadd.f32 %v4527_v46, %v4456_v39  ;;  %5588 = vtanh.f32 %v4526_v32 }
 0xd01   :  { %5590 = vtanh.f32 %v4528_v17 }
 0xd0c   :  { %v5589_v21 = vpop.eup %5588 }
 0xd0e   :  { %v5591_v1 = vpop.eup %5590 }
 0xd0f   :  { %v4534_v38 = vcombine.low %v5589_v21, %v5591_v1 }
 0xd11   :  { %v4541_v8 = vrot.slane %v4534_v38, %v11660_v54 }
 0xd13   :  { %4546 = vst.msk [vmem:[#allocation12] sm:$0xf] %vm4545_vm4, %v4541_v8 }
 0xd14   :  { %5643 = shalt.err (!%p5640_p0)
}
 0xd15   :  { %4556 = dma.vmem_to_hbm [thread:$0]  %s4554_s28, 64, %s10504_s8, [#allocation11]  }
 0xd16   :  { %5664 = dma.done.wait [#allocation11], 64  }
 0xd17   :  { %5665 = vsyncadd [#allocation11], 4294967232 }
 0xd18   :  { %4560 = vsyncpa [#allocation10], 1 }
 0xd19   :  { %4561 = vsyncpa [#allocation11], 1 }
 0xd1a   :  { %4562 = vsyncmov [#allocation8] }
 0xd1d   :  { %s4563_s10 = vpop.sfrf %4562 }
 0xd1e   :  { %p4665_p1 = scmp.ne.s32.totalorder %s4563_s10, 0 }
 0xd20   :  { %4567 = shalt.err (%p4665_p1)  }
 0xd21   :  { %4569 = vsyncmov [#allocation8 + $0x1] }
 0xd24   :  { %s4570_s11 = vpop.sfrf %4569 }
 0xd25   :  { %p4666_p2 = scmp.ne.s32.totalorder %s4570_s11, 0 }
 0xd27   :  { %4574 = shalt.err (%p4666_p2)  }
 0xd28   :  { %4576 = vsyncmov [#allocation8 + $0x2] }
 0xd2b   :  { %s4577_s12 = vpop.sfrf %4576 }
 0xd2c   :  { %p4667_p3 = scmp.ne.s32.totalorder %s4577_s12, 0 }
 0xd2e   :  { %4581 = shalt.err (%p4667_p3)  }
 0xd2f   :  { %4583 = vsyncmov [#allocation8 + $0x3] }
 0xd32   :  { %s4584_s13 = vpop.sfrf %4583 }
 0xd33   :  { %p4668_p4 = scmp.ne.s32.totalorder %s4584_s13, 0 }
 0xd35   :  { %4588 = shalt.err (%p4668_p4)  }
 0xd36   :  { %4590 = vsyncmov [#allocation8 + $0x4] }
 0xd39   :  { %s4591_s8 = vpop.sfrf %4590 }
 0xd3a   :  { %p4669_p5 = scmp.ne.s32.totalorder %s4591_s8, 0 }
 0xd3c   :  { %4595 = shalt.err (%p4669_p5)  }

</bundles_post_ra>
